<compile_context>
chip_gen: v7x
topology: tpu7x:2x2x1
jax: 0.10.0
libtpu: 0.0.40
codegen_flags: <defaults>
</compile_context>

<pallas_src>
import math

import numpy as np

import jax
import jax.numpy as jnp
from jax.experimental import pallas as pl
from jax.experimental.pallas import tpu as pltpu

D_IN = 2
W_DIM = 512
HIDDEN = 128
N_BLOCKS = 4
N_HIDDEN_LAYERS = N_BLOCKS - 1          # 3 Style2Layer blocks after fc_in
RGB_OUT = 32                            # final_out_dim = rgb_out_dim * shuffle_factor
L_POS = 10
DIM_EMBED = D_IN * L_POS * 2            # 40
NUM_WS = 1 + (N_BLOCKS - 1) + 1         # 5
LRELU_GAIN = math.sqrt(2.0)             # bias_act def_gain for 'lrelu'


# -----------------------------------------------------------------------------
# Positional-encoding constants: column j of the encoding is
#   sin(scale_x[j]*p_x + scale_y[j]*p_y + phase[j])
# with the 'normal' NeRF ordering  [sin(2^i*pi*p), cos(2^i*pi*p)]  per freq i
# (cos(x) == sin(x + pi/2)).
# -----------------------------------------------------------------------------
def _build_enc_consts():
    scale = np.zeros((D_IN, DIM_EMBED), np.float32)
    phase = np.zeros((1, DIM_EMBED), np.float32)
    for i in range(L_POS):
        f = (2.0 ** i) * math.pi
        base = i * 2 * D_IN
        for d in range(D_IN):
            scale[d, base + d] = f                       # sin(2^i*pi*p_d)
            scale[d, base + D_IN + d] = f                # cos(2^i*pi*p_d)
            phase[0, base + D_IN + d] = math.pi / 2.0
    return np.concatenate([scale, phase], axis=0)        # (D_IN+1, DIM_EMBED)


ENC_CONSTS = _build_enc_consts()


# -----------------------------------------------------------------------------
# Pallas kernel: positional encoding + per-point 5-layer modulated MLP
# -----------------------------------------------------------------------------
def _lrelu(x):
    return jnp.where(x >= 0.0, x, 0.2 * x) * LRELU_GAIN


def nerf_mlp_kernel(p_ref, enc_ref, w_in_ref, b_in_ref, w_h_ref, b_h_ref,
                    w_out_ref, b_out_ref, o_ref):
    # p_ref:     (TN, 2)         raw f32 points for the current (batch, tile)
    # enc_ref:   (3, 40)         rows = [scale_x, scale_y, phase]
    # w_in_ref:  (40, 128)  bf16 per-batch modulated+demodulated fc_in weight
    # w_h_ref:   (3,128,128) bf16 per-batch modulated+demodulated block weights
    # w_out_ref: (128, 32)  bf16 per-batch modulated ToRGB weight (no demod)
    p = p_ref[...]                                        # (TN, 2) f32
    sc = enc_ref[...]                                     # (3, 40) f32
    arg = sc[D_IN:D_IN + 1, :]                            # phase row (1, 40)
    for d in range(D_IN):
        arg = arg + p[:, d:d + 1] * sc[d:d + 1, :]        # (TN, 40) f32
    h = jnp.sin(arg).astype(jnp.bfloat16)                 # encoded points

    # fc_in
    h = jnp.dot(h, w_in_ref[...], preferred_element_type=jnp.float32)
    h = _lrelu(h + b_in_ref[...])
    # hidden blocks
    for l in range(N_HIDDEN_LAYERS):
        h = jnp.dot(h.astype(jnp.bfloat16), w_h_ref[l],
                    preferred_element_type=jnp.float32)
        h = _lrelu(h + b_h_ref[l])
    # ToRGB (linear) + final squash
    out = jnp.dot(h.astype(jnp.bfloat16), w_out_ref[...],
                  preferred_element_type=jnp.float32)
    out = out + b_out_ref[...]
    out = jax.nn.sigmoid(out) * (1.0 + 2.0 * 0.001) - 0.001
    o_ref[...] = out.astype(o_ref.dtype)


def _round_up(x, m):
    return ((x + m - 1) // m) * m


def nerf_block_pallas(p, w_in, b_in, w_h, b_h, w_out, b_out, *, tile_n=2048):
    """p: (B, N, 2) f32 raw points; weights already modulated per batch (bf16)."""
    B, N, D = p.shape
    assert D == D_IN
    # Big tiles amortize the ~0.35us/grid-step fixed cost; keep at least two
    # grid points total so both v7x TensorCores get work when B == 1.
    tn = min(tile_n, _round_up(N, 8))
    if B == 1 and N > 8:
        tn = min(tn, max(8, _round_up((N + 1) // 2, 8)))
    n_pad = _round_up(N, tn)
    if n_pad != N:
        p = jnp.pad(p, ((0, 0), (0, n_pad - N), (0, 0)))
    # b outermost / n innermost: weight index_maps depend only on b, so the
    # per-batch weights stay VMEM-resident across the whole point axis.
    grid = (B, n_pad // tn)

    enc_consts = jnp.asarray(ENC_CONSTS)

    flops = 2 * B * n_pad * (DIM_EMBED * HIDDEN
                             + N_HIDDEN_LAYERS * HIDDEN * HIDDEN
                             + HIDDEN * RGB_OUT)
    transcendentals = B * n_pad * (DIM_EMBED + RGB_OUT)   # sin + sigmoid
    bytes_accessed = (p.size * 4
                      + (w_in.size + w_h.size + w_out.size) * 2
                      + (b_in.size + b_h.size + b_out.size) * 4
                      + B * n_pad * RGB_OUT * 4)

    out = pl.pallas_call(
        nerf_mlp_kernel,
        out_shape=jax.ShapeDtypeStruct((B, n_pad, RGB_OUT), jnp.float32),
        grid_spec=pltpu.PrefetchScalarGridSpec(
            num_scalar_prefetch=0,
            grid=grid,
            in_specs=[
                pl.BlockSpec((None, tn, D_IN), lambda b, n: (b, n, 0)),
                pl.BlockSpec((D_IN + 1, DIM_EMBED), lambda b, n: (0, 0)),
                pl.BlockSpec((None, DIM_EMBED, HIDDEN), lambda b, n: (b, 0, 0)),
                pl.BlockSpec((1, HIDDEN), lambda b, n: (0, 0)),
                pl.BlockSpec((None, N_HIDDEN_LAYERS, HIDDEN, HIDDEN),
                             lambda b, n: (b, 0, 0, 0)),
                pl.BlockSpec((N_HIDDEN_LAYERS, HIDDEN), lambda b, n: (0, 0)),
                pl.BlockSpec((None, HIDDEN, RGB_OUT), lambda b, n: (b, 0, 0)),
                pl.BlockSpec((1, RGB_OUT), lambda b, n: (0, 0)),
            ],
            out_specs=pl.BlockSpec((None, tn, RGB_OUT), lambda b, n: (b, n, 0)),
        ),
        compiler_params=pltpu.CompilerParams(
            dimension_semantics=("parallel", "parallel")),
        cost_estimate=pl.CostEstimate(
            flops=int(flops), transcendentals=int(transcendentals),
            bytes_accessed=int(bytes_accessed)),
    )(p, enc_consts, w_in, b_in, w_h, b_h, w_out, b_out)
    if n_pad != N:
        out = out[:, :N, :]
    return out


# -----------------------------------------------------------------------------
# Parameter setup / style-modulation glue (plain JAX, tiny O(B*C^2) work)
# -----------------------------------------------------------------------------
def init_params(key):
    """Deterministic synthetic parameters with the PyTorch shapes.

    Style2Layer(cin, cout, 512): affine = FullyConnectedLayer(512, cin, bias_init=1)
        -> affine.weight ~ randn(cin, 512), affine.bias = 1
        conv weight ~ randn(cout, cin, 1, 1), conv bias = 0
    ToRGBLayer(128, 32, 512, k=1): same layout, weight_gain = 1/sqrt(128).
    """
    layer_dims = [(DIM_EMBED, HIDDEN)] + [(HIDDEN, HIDDEN)] * N_HIDDEN_LAYERS
    ks = jax.random.split(key, 2 * (len(layer_dims) + 1))
    layers = []
    for i, (cin, cout) in enumerate(layer_dims):
        layers.append(dict(
            affine_w=jax.random.normal(ks[2 * i], (cin, W_DIM), jnp.float32),
            affine_b=jnp.ones((cin,), jnp.float32),
            conv_w=jax.random.normal(ks[2 * i + 1], (cout, cin), jnp.float32),
            conv_b=jnp.zeros((cout,), jnp.float32),
        ))
    j = 2 * len(layer_dims)
    torgb = dict(
        affine_w=jax.random.normal(ks[j], (HIDDEN, W_DIM), jnp.float32),
        affine_b=jnp.ones((HIDDEN,), jnp.float32),
        conv_w=jax.random.normal(ks[j + 1], (RGB_OUT, HIDDEN), jnp.float32),
        conv_b=jnp.zeros((RGB_OUT,), jnp.float32),
    )
    return dict(style_layers=layers, torgb=torgb)


def _affine(w, affine_w, affine_b):
    # FullyConnectedLayer: weight_gain = 1 / sqrt(w_dim), linear activation.
    return jnp.dot(w, affine_w.T) / math.sqrt(W_DIM) + affine_b


def style2_effective_weight(layer, w):
    # modulated_conv2d with demodulate=True, 1x1 kernel, up=1, padding=0.
    styles = _affine(w, layer["affine_w"], layer["affine_b"])       # (B, cin)
    ww = layer["conv_w"][None, :, :] * styles[:, None, :]           # (B, cout, cin)
    dcoef = jax.lax.rsqrt(jnp.sum(jnp.square(ww), axis=-1) + 1e-8)  # (B, cout)
    w_eff = ww * dcoef[:, :, None]
    return jnp.transpose(w_eff, (0, 2, 1))                          # (B, cin, cout)


def torgb_effective_weight(layer, w):
    # ToRGBLayer: styles = affine(w) * 1/sqrt(cin), demodulate=False.
    styles = _affine(w, layer["affine_w"], layer["affine_b"]) / math.sqrt(HIDDEN)
    w_eff = layer["conv_w"][None, :, :] * styles[:, None, :]        # (B, cout, cin)
    return jnp.transpose(w_eff, (0, 2, 1))                          # (B, cin, cout)


def nerf_block_forward(params, p_in, ws, *, tile_n=2048):
    """p_in: (B, hw, 2) with hw a perfect square; ws: (B, 5, 512)."""
    sl = params["style_layers"]
    w_in = style2_effective_weight(sl[0], ws[:, 0]).astype(jnp.bfloat16)
    b_in = sl[0]["conv_b"][None, :]                                  # (1, 128)
    w_h = jnp.stack([style2_effective_weight(sl[i + 1], ws[:, i + 1])
                     for i in range(N_HIDDEN_LAYERS)],
                    axis=1).astype(jnp.bfloat16)                     # (B, 3, 128, 128)
    b_h = jnp.stack([sl[i + 1]["conv_b"]
                     for i in range(N_HIDDEN_LAYERS)], axis=0)       # (3, 128)
    w_out = torgb_effective_weight(params["torgb"],
                                   ws[:, -1]).astype(jnp.bfloat16)   # (B, 128, 32)
    b_out = params["torgb"]["conv_b"][None, :]                       # (1, 32)
    return nerf_block_pallas(p_in, w_in, b_in, w_h, b_h, w_out, b_out,
                             tile_n=tile_n)


# -----------------------------------------------------------------------------
# Pure-JAX reference (same bf16-matmul / f32-accumulate precision as the kernel)
# -----------------------------------------------------------------------------
def positional_encoding(p, L=L_POS):
    # 'normal' NeRF encoding: concat_i [sin(2^i * pi * p), cos(2^i * pi * p)]
    out = []
    for i in range(L):
        arg = (2.0 ** i) * math.pi * p
        out.append(jnp.sin(arg))
        out.append(jnp.cos(arg))
    return jnp.concatenate(out, axis=-1)


def nerf_block_reference(params, p_in, ws):
    h = positional_encoding(p_in)
    for i in range(N_BLOCKS):
        layer = params["style_layers"][i]
        w_eff = style2_effective_weight(layer, ws[:, i]).astype(jnp.bfloat16)
        h = jnp.einsum("bnc,bco->bno", h.astype(jnp.bfloat16), w_eff,
                       preferred_element_type=jnp.float32) + layer["conv_b"]
        h = jnp.where(h >= 0, h, 0.2 * h) * LRELU_GAIN
    w_eff = torgb_effective_weight(params["torgb"],
                                   ws[:, -1]).astype(jnp.bfloat16)
    out = (jnp.einsum("bnc,bco->bno", h.astype(jnp.bfloat16), w_eff,
                      preferred_element_type=jnp.float32)
           + params["torgb"]["conv_b"])
    return jax.nn.sigmoid(out) * (1.0 + 2.0 * 0.001) - 0.001


if __name__ == "__main__":
    key = jax.random.PRNGKey(0)
    k_param, k_p, k_ws = jax.random.split(key, 3)

    B, H_SP, W_SP = 2, 16, 16
    N = H_SP * W_SP                                  # hw must be a perfect square
    params = init_params(k_param)
    p_in = jax.random.uniform(k_p, (B, N, D_IN), jnp.float32, -1.0, 1.0)
    ws = jax.random.normal(k_ws, (B, NUM_WS, W_DIM), jnp.float32)

    out = jax.block_until_ready(nerf_block_forward(params, p_in, ws))
    ref = jax.block_until_ready(nerf_block_reference(params, p_in, ws))

    assert out.shape == (B, N, RGB_OUT), out.shape
    max_err = float(jnp.max(jnp.abs(out - ref)))
    assert jnp.allclose(out, ref, atol=3e-3, rtol=3e-3), max_err
    print("KERNEL_OK")
</pallas_src>

<mosaic_0001>
module attributes {stable_mosaic.version = 11 : i64} {
  func.func @nerf_mlp_kernel(%arg0: i32, %arg1: i32, %arg2: memref<1x256x2xf32, #tpu.memory_space<vmem>>, %arg3: memref<3x40xf32, #tpu.memory_space<vmem>>, %arg4: memref<1x40x128xbf16, #tpu.memory_space<vmem>>, %arg5: memref<1x128xf32, #tpu.memory_space<vmem>>, %arg6: memref<1x3x128x128xbf16, #tpu.memory_space<vmem>>, %arg7: memref<3x128xf32, #tpu.memory_space<vmem>>, %arg8: memref<1x128x32xbf16, #tpu.memory_space<vmem>>, %arg9: memref<1x32xf32, #tpu.memory_space<vmem>>, %arg10: memref<1x256x32xf32, #tpu.memory_space<vmem>>) attributes {dimension_semantics = [#tpu.dimension_semantics<parallel>, #tpu.dimension_semantics<parallel>], iteration_bounds = array<i64: 2, 1>, scalar_prefetch = 0 : i64, scratch_operands = 0 : i64, tpu.core_type = #tpu.core_type<tc>, window_params = [{transform_indices = @transform_0, window_bounds = array<i64: 1, 256, 2>}, {pipeline_mode = #tpu.pipeline_mode<synchronous>, transform_indices = @transform_1, window_bounds = array<i64: 3, 40>}, {transform_indices = @transform_2, window_bounds = array<i64: 1, 40, 128>}, {pipeline_mode = #tpu.pipeline_mode<synchronous>, transform_indices = @transform_3, window_bounds = array<i64: 1, 128>}, {transform_indices = @transform_4, window_bounds = array<i64: 1, 3, 128, 128>}, {pipeline_mode = #tpu.pipeline_mode<synchronous>, transform_indices = @transform_5, window_bounds = array<i64: 3, 128>}, {transform_indices = @transform_6, window_bounds = array<i64: 1, 128, 32>}, {pipeline_mode = #tpu.pipeline_mode<synchronous>, transform_indices = @transform_7, window_bounds = array<i64: 1, 32>}, {transform_indices = @transform_8, window_bounds = array<i64: 1, 256, 32>}]} {
    %c0 = arith.constant 0 : index
    %c0_0 = arith.constant 0 : index
    %c0_1 = arith.constant 0 : index
    %0 = vector.load %arg2[%c0, %c0_0, %c0_1] : memref<1x256x2xf32, #tpu.memory_space<vmem>>, vector<1x256x2xf32>
    %1 = vector.shape_cast %0 : vector<1x256x2xf32> to vector<256x2xf32>
    %c0_2 = arith.constant 0 : index
    %c0_3 = arith.constant 0 : index
    %2 = vector.load %arg3[%c0_2, %c0_3] : memref<3x40xf32, #tpu.memory_space<vmem>>, vector<3x40xf32>
    %3 = vector.extract_strided_slice %2 {offsets = [2, 0], sizes = [1, 40], strides = [1, 1]} : vector<3x40xf32> to vector<1x40xf32>
    %4 = vector.extract_strided_slice %1 {offsets = [0, 0], sizes = [256, 1], strides = [1, 1]} : vector<256x2xf32> to vector<256x1xf32>
    %5 = vector.extract_strided_slice %2 {offsets = [0, 0], sizes = [1, 40], strides = [1, 1]} : vector<3x40xf32> to vector<1x40xf32>
    %6 = vector.broadcast %4 : vector<256x1xf32> to vector<256x40xf32>
    %7 = vector.broadcast %5 : vector<1x40xf32> to vector<256x40xf32>
    %8 = arith.mulf %6, %7 : vector<256x40xf32>
    %9 = vector.broadcast %3 : vector<1x40xf32> to vector<256x40xf32>
    %10 = arith.addf %9, %8 : vector<256x40xf32>
    %11 = vector.extract_strided_slice %1 {offsets = [0, 1], sizes = [256, 1], strides = [1, 1]} : vector<256x2xf32> to vector<256x1xf32>
    %12 = vector.extract_strided_slice %2 {offsets = [1, 0], sizes = [1, 40], strides = [1, 1]} : vector<3x40xf32> to vector<1x40xf32>
    %13 = vector.broadcast %11 : vector<256x1xf32> to vector<256x40xf32>
    %14 = vector.broadcast %12 : vector<1x40xf32> to vector<256x40xf32>
    %15 = arith.mulf %13, %14 : vector<256x40xf32>
    %16 = arith.addf %10, %15 : vector<256x40xf32>
    %17 = math.sin %16 : vector<256x40xf32>
    %18 = arith.truncf %17 : vector<256x40xf32> to vector<256x40xbf16>
    %c0_4 = arith.constant 0 : index
    %c0_5 = arith.constant 0 : index
    %c0_6 = arith.constant 0 : index
    %19 = vector.load %arg4[%c0_4, %c0_5, %c0_6] : memref<1x40x128xbf16, #tpu.memory_space<vmem>>, vector<1x40x128xbf16>
    %20 = vector.shape_cast %19 : vector<1x40x128xbf16> to vector<40x128xbf16>
    %cst = arith.constant dense<0.000000e+00> : vector<256x128xf32>
    %21 = tpu.matmul %18, %20, %cst {dimension_numbers = #tpu.dot_dimension_numbers<[1], [0], [0], [1], [0, 0, 1, 1], [], []>} : vector<256x40xbf16>, vector<40x128xbf16>, vector<256x128xf32> -> vector<256x128xf32>
    %c0_7 = arith.constant 0 : index
    %c0_8 = arith.constant 0 : index
    %22 = vector.load %arg5[%c0_7, %c0_8] : memref<1x128xf32, #tpu.memory_space<vmem>>, vector<1x128xf32>
    %23 = vector.broadcast %22 : vector<1x128xf32> to vector<256x128xf32>
    %24 = arith.addf %21, %23 : vector<256x128xf32>
    %cst_9 = arith.constant 0.000000e+00 : f32
    %25 = vector.broadcast %cst_9 : f32 to vector<256x128xf32>
    %26 = arith.cmpf oge, %24, %25 : vector<256x128xf32>
    %cst_10 = arith.constant 2.000000e-01 : f32
    %27 = vector.broadcast %cst_10 : f32 to vector<256x128xf32>
    %28 = arith.mulf %27, %24 : vector<256x128xf32>
    %29 = arith.select %26, %24, %28 : vector<256x128xi1>, vector<256x128xf32>
    %cst_11 = arith.constant 1.41421354 : f32
    %30 = vector.broadcast %cst_11 : f32 to vector<256x128xf32>
    %31 = arith.mulf %29, %30 : vector<256x128xf32>
    %32 = arith.truncf %31 : vector<256x128xf32> to vector<256x128xbf16>
    %c0_12 = arith.constant 0 : index
    %c0_13 = arith.constant 0 : index
    %c0_14 = arith.constant 0 : index
    %c0_15 = arith.constant 0 : index
    %33 = vector.load %arg6[%c0_12, %c0_13, %c0_14, %c0_15] : memref<1x3x128x128xbf16, #tpu.memory_space<vmem>>, vector<1x1x128x128xbf16>
    %34 = vector.shape_cast %33 : vector<1x1x128x128xbf16> to vector<128x128xbf16>
    %cst_16 = arith.constant dense<0.000000e+00> : vector<256x128xf32>
    %35 = tpu.matmul %32, %34, %cst_16 {dimension_numbers = #tpu.dot_dimension_numbers<[1], [0], [0], [1], [0, 0, 1, 1], [], []>} : vector<256x128xbf16>, vector<128x128xbf16>, vector<256x128xf32> -> vector<256x128xf32>
    %c0_17 = arith.constant 0 : index
    %c0_18 = arith.constant 0 : index
    %36 = vector.load %arg7[%c0_17, %c0_18] : memref<3x128xf32, #tpu.memory_space<vmem>>, vector<1x128xf32>
    %37 = vector.shape_cast %36 : vector<1x128xf32> to vector<128xf32>
    %38 = vector.shape_cast %37 : vector<128xf32> to vector<1x128xf32>
    %39 = vector.broadcast %38 : vector<1x128xf32> to vector<256x128xf32>
    %40 = arith.addf %35, %39 : vector<256x128xf32>
    %cst_19 = arith.constant 0.000000e+00 : f32
    %41 = vector.broadcast %cst_19 : f32 to vector<256x128xf32>
    %42 = arith.cmpf oge, %40, %41 : vector<256x128xf32>
    %cst_20 = arith.constant 2.000000e-01 : f32
    %43 = vector.broadcast %cst_20 : f32 to vector<256x128xf32>
    %44 = arith.mulf %43, %40 : vector<256x128xf32>
    %45 = arith.select %42, %40, %44 : vector<256x128xi1>, vector<256x128xf32>
    %cst_21 = arith.constant 1.41421354 : f32
    %46 = vector.broadcast %cst_21 : f32 to vector<256x128xf32>
    %47 = arith.mulf %45, %46 : vector<256x128xf32>
    %48 = arith.truncf %47 : vector<256x128xf32> to vector<256x128xbf16>
    %c0_22 = arith.constant 0 : index
    %c1 = arith.constant 1 : index
    %c0_23 = arith.constant 0 : index
    %c0_24 = arith.constant 0 : index
    %49 = vector.load %arg6[%c0_22, %c1, %c0_23, %c0_24] : memref<1x3x128x128xbf16, #tpu.memory_space<vmem>>, vector<1x1x128x128xbf16>
    %50 = vector.shape_cast %49 : vector<1x1x128x128xbf16> to vector<128x128xbf16>
    %cst_25 = arith.constant dense<0.000000e+00> : vector<256x128xf32>
    %51 = tpu.matmul %48, %50, %cst_25 {dimension_numbers = #tpu.dot_dimension_numbers<[1], [0], [0], [1], [0, 0, 1, 1], [], []>} : vector<256x128xbf16>, vector<128x128xbf16>, vector<256x128xf32> -> vector<256x128xf32>
    %c1_26 = arith.constant 1 : index
    %c0_27 = arith.constant 0 : index
    %52 = vector.load %arg7[%c1_26, %c0_27] : memref<3x128xf32, #tpu.memory_space<vmem>>, vector<1x128xf32>
    %53 = vector.shape_cast %52 : vector<1x128xf32> to vector<128xf32>
    %54 = vector.shape_cast %53 : vector<128xf32> to vector<1x128xf32>
    %55 = vector.broadcast %54 : vector<1x128xf32> to vector<256x128xf32>
    %56 = arith.addf %51, %55 : vector<256x128xf32>
    %cst_28 = arith.constant 0.000000e+00 : f32
    %57 = vector.broadcast %cst_28 : f32 to vector<256x128xf32>
    %58 = arith.cmpf oge, %56, %57 : vector<256x128xf32>
    %cst_29 = arith.constant 2.000000e-01 : f32
    %59 = vector.broadcast %cst_29 : f32 to vector<256x128xf32>
    %60 = arith.mulf %59, %56 : vector<256x128xf32>
    %61 = arith.select %58, %56, %60 : vector<256x128xi1>, vector<256x128xf32>
    %cst_30 = arith.constant 1.41421354 : f32
    %62 = vector.broadcast %cst_30 : f32 to vector<256x128xf32>
    %63 = arith.mulf %61, %62 : vector<256x128xf32>
    %64 = arith.truncf %63 : vector<256x128xf32> to vector<256x128xbf16>
    %c0_31 = arith.constant 0 : index
    %c2 = arith.constant 2 : index
    %c0_32 = arith.constant 0 : index
    %c0_33 = arith.constant 0 : index
    %65 = vector.load %arg6[%c0_31, %c2, %c0_32, %c0_33] : memref<1x3x128x128xbf16, #tpu.memory_space<vmem>>, vector<1x1x128x128xbf16>
    %66 = vector.shape_cast %65 : vector<1x1x128x128xbf16> to vector<128x128xbf16>
    %cst_34 = arith.constant dense<0.000000e+00> : vector<256x128xf32>
    %67 = tpu.matmul %64, %66, %cst_34 {dimension_numbers = #tpu.dot_dimension_numbers<[1], [0], [0], [1], [0, 0, 1, 1], [], []>} : vector<256x128xbf16>, vector<128x128xbf16>, vector<256x128xf32> -> vector<256x128xf32>
    %c2_35 = arith.constant 2 : index
    %c0_36 = arith.constant 0 : index
    %68 = vector.load %arg7[%c2_35, %c0_36] : memref<3x128xf32, #tpu.memory_space<vmem>>, vector<1x128xf32>
    %69 = vector.shape_cast %68 : vector<1x128xf32> to vector<128xf32>
    %70 = vector.shape_cast %69 : vector<128xf32> to vector<1x128xf32>
    %71 = vector.broadcast %70 : vector<1x128xf32> to vector<256x128xf32>
    %72 = arith.addf %67, %71 : vector<256x128xf32>
    %cst_37 = arith.constant 0.000000e+00 : f32
    %73 = vector.broadcast %cst_37 : f32 to vector<256x128xf32>
    %74 = arith.cmpf oge, %72, %73 : vector<256x128xf32>
    %cst_38 = arith.constant 2.000000e-01 : f32
    %75 = vector.broadcast %cst_38 : f32 to vector<256x128xf32>
    %76 = arith.mulf %75, %72 : vector<256x128xf32>
    %77 = arith.select %74, %72, %76 : vector<256x128xi1>, vector<256x128xf32>
    %cst_39 = arith.constant 1.41421354 : f32
    %78 = vector.broadcast %cst_39 : f32 to vector<256x128xf32>
    %79 = arith.mulf %77, %78 : vector<256x128xf32>
    %80 = arith.truncf %79 : vector<256x128xf32> to vector<256x128xbf16>
    %c0_40 = arith.constant 0 : index
    %c0_41 = arith.constant 0 : index
    %c0_42 = arith.constant 0 : index
    %81 = vector.load %arg8[%c0_40, %c0_41, %c0_42] : memref<1x128x32xbf16, #tpu.memory_space<vmem>>, vector<1x128x32xbf16>
    %82 = vector.shape_cast %81 : vector<1x128x32xbf16> to vector<128x32xbf16>
    %cst_43 = arith.constant dense<0.000000e+00> : vector<256x32xf32>
    %83 = tpu.matmul %80, %82, %cst_43 {dimension_numbers = #tpu.dot_dimension_numbers<[1], [0], [0], [1], [0, 0, 1, 1], [], []>} : vector<256x128xbf16>, vector<128x32xbf16>, vector<256x32xf32> -> vector<256x32xf32>
    %c0_44 = arith.constant 0 : index
    %c0_45 = arith.constant 0 : index
    %84 = vector.load %arg9[%c0_44, %c0_45] : memref<1x32xf32, #tpu.memory_space<vmem>>, vector<1x32xf32>
    %85 = vector.broadcast %84 : vector<1x32xf32> to vector<256x32xf32>
    %86 = arith.addf %83, %85 : vector<256x32xf32>
    %87 = arith.negf %86 : vector<256x32xf32>
    %88 = math.exp %87 : vector<256x32xf32>
    %cst_46 = arith.constant 1.000000e+00 : f32
    %89 = vector.broadcast %cst_46 : f32 to vector<256x32xf32>
    %90 = arith.addf %89, %88 : vector<256x32xf32>
    %91 = arith.divf %89, %90 : vector<256x32xf32>
    %cst_47 = arith.constant 1.002000e+00 : f32
    %92 = vector.broadcast %cst_47 : f32 to vector<256x32xf32>
    %93 = arith.mulf %91, %92 : vector<256x32xf32>
    %cst_48 = arith.constant 1.000000e-03 : f32
    %94 = vector.broadcast %cst_48 : f32 to vector<256x32xf32>
    %95 = arith.subf %93, %94 : vector<256x32xf32>
    %c0_49 = arith.constant 0 : index
    %c0_50 = arith.constant 0 : index
    %c0_51 = arith.constant 0 : index
    %96 = vector.load %arg10[%c0_49, %c0_50, %c0_51] : memref<1x256x32xf32, #tpu.memory_space<vmem>>, vector<1x256x32xf32>
    %97 = vector.shape_cast %96 : vector<1x256x32xf32> to vector<256x32xf32>
    %98 = vector.shape_cast %95 : vector<256x32xf32> to vector<1x256x32xf32>
    tpu.vector_store %arg10[%c0_49, %c0_50, %c0_51], %98 {strides = array<i32>} : memref<1x256x32xf32, #tpu.memory_space<vmem>>, vector<1x256x32xf32>,
    return
  }
  func.func @transform_0(%arg0: i32, %arg1: i32) -> (i32, i32, i32) {
    %c0_i32 = arith.constant 0 : i32
    %c0_i32_0 = arith.constant 0 : i32
    return %arg0, %arg1, %c0_i32 : i32, i32, i32
  }
  func.func @transform_1(%arg0: i32, %arg1: i32) -> (i32, i32) {
    %c0_i32 = arith.constant 0 : i32
    %c0_i32_0 = arith.constant 0 : i32
    %c0_i32_1 = arith.constant 0 : i32
    return %c0_i32, %c0_i32_0 : i32, i32
  }
  func.func @transform_2(%arg0: i32, %arg1: i32) -> (i32, i32, i32) {
    %c0_i32 = arith.constant 0 : i32
    %c0_i32_0 = arith.constant 0 : i32
    %c0_i32_1 = arith.constant 0 : i32
    return %arg0, %c0_i32, %c0_i32_0 : i32, i32, i32
  }
  func.func @transform_3(%arg0: i32, %arg1: i32) -> (i32, i32) {
    %c0_i32 = arith.constant 0 : i32
    %c0_i32_0 = arith.constant 0 : i32
    %c0_i32_1 = arith.constant 0 : i32
    return %c0_i32, %c0_i32_0 : i32, i32
  }
  func.func @transform_4(%arg0: i32, %arg1: i32) -> (i32, i32, i32, i32) {
    %c0_i32 = arith.constant 0 : i32
    %c0_i32_0 = arith.constant 0 : i32
    %c0_i32_1 = arith.constant 0 : i32
    %c0_i32_2 = arith.constant 0 : i32
    return %arg0, %c0_i32, %c0_i32_0, %c0_i32_1 : i32, i32, i32, i32
  }
  func.func @transform_5(%arg0: i32, %arg1: i32) -> (i32, i32) {
    %c0_i32 = arith.constant 0 : i32
    %c0_i32_0 = arith.constant 0 : i32
    %c0_i32_1 = arith.constant 0 : i32
    return %c0_i32, %c0_i32_0 : i32, i32
  }
  func.func @transform_6(%arg0: i32, %arg1: i32) -> (i32, i32, i32) {
    %c0_i32 = arith.constant 0 : i32
    %c0_i32_0 = arith.constant 0 : i32
    %c0_i32_1 = arith.constant 0 : i32
    return %arg0, %c0_i32, %c0_i32_0 : i32, i32, i32
  }
  func.func @transform_7(%arg0: i32, %arg1: i32) -> (i32, i32) {
    %c0_i32 = arith.constant 0 : i32
    %c0_i32_0 = arith.constant 0 : i32
    %c0_i32_1 = arith.constant 0 : i32
    return %c0_i32, %c0_i32_0 : i32, i32
  }
  func.func @transform_8(%arg0: i32, %arg1: i32) -> (i32, i32, i32) {
    %c0_i32 = arith.constant 0 : i32
    %c0_i32_0 = arith.constant 0 : i32
    return %arg0, %arg1, %c0_i32 : i32, i32, i32
  }
}

</mosaic_0001>

<bundles_post_ra>
// kernel: tpu_custom_call.1
= control target key start
LH: loop header
LB: loop body
LE: loop exit
PB: predicated region body
PF: predicated region fallthrough
CT: control target
= control target key end

     0   :  { %s7563_s27 = smov 0   ;;  %s7565_s28 = smov 0   ;;  %s11591_s0 = inlined_call_operand.vmem [shape: f32[2,256,2], index: 0, kind: input, shape index: {}]   ;;  %s11592_s1 = inlined_call_operand.vmem [shape: f32[3,40], index: 1, kind: input, shape index: {}]   ;;  %s11593_s2 = inlined_call_operand.vmem [shape: bf16[2,40,128], index: 2, kind: input, shape index: {}]   ;;  %s11594_s3 = inlined_call_operand.vmem [shape: f32[1,128], index: 3, kind: input, shape index: {}]   ;;  %s11595_s4 = inlined_call_operand.vmem [shape: bf16[2,3,128,128], index: 4, kind: input, shape index: {}]   ;;  %s11596_s5 = inlined_call_operand.vmem [shape: f32[3,128], index: 5, kind: input, shape index: {}]   ;;  %s11597_s6 = inlined_call_operand.vmem [shape: bf16[2,128,32], index: 6, kind: input, shape index: {}]   ;;  %s11598_s7 = inlined_call_operand.vmem [shape: f32[1,32], index: 7, kind: input, shape index: {}]   ;;  %s11599_s8 = inlined_call_operand.vmem [shape: f32[2,256,32], index: 8, kind: output, shape index: {}]  }
   0x1   :  { %s7567_s29 = smov 0  }
   0x2 LB: > { %s30_s30 = sadd.s32 1, %s7504_s28  ;;  %p6368_p0 = scmp.ge.s32.totalorder %s7508_s29, 1  ;;  %s7508_s29 = sphi %s7567_s29, %s18_s29   ;;  %s7504_s28 = sphi %s7565_s28, %s12313_s28   ;;  %s7500_s27 = sphi %s7563_s27, %s12312_s27  }
   0x3   : > { %p32_p1 = scmp.ge.s32.totalorder %s30_s30, 2  ;;  %p313_p2 = scmp.lt.s32.totalorder %s7508_s29, 3 }
   0x5   : > { %s12315_s30 = smov (%p32_p1, %s30_s30), 0  ;;  %p314_p3 = pnand %p6368_p0, %p313_p2 }
   0x7   : > { %317 = sbr.rel (%p314_p3) target bundleno = 2189 (0x88d), region = 52 }
   0xe   : > { %p371_p4 = scmp.lt.s32.totalorder %s7500_s27, 1  ;;  %v7510_v0 = vmov 0   ;;  %v7511_v6 = vmov 1   ;;  %v599_v32 = vlaneseq  ;;  %v438_v37 = vld [vmem:[%s11592_s1] sm:$0x7] }
   0xf   : > { %7178 = vset.pattern.permute.xlu1 %v7510_v0  ;;  %7177 = vset.pattern.permute.xlu0 %v7510_v0 }
  0x10   : > { %s12317_s27 = smov (!%p371_p4, %s7500_s27), 1  ;;  %v600_v33 = vshrl.u32 %v599_v32, 7 }
  0x11   : > { %s6659_s9 = sshll.u32 %s12317_s27, 8  ;;  %s7016_s13 = smul.u32 192, %s12317_s27 }
  0x12   : > { %s7591_s12 = scalar_lea.vmem %s11591_s0, %s6659_s9  ;;  %v601_v35 = vsub.s32 0, %v600_v33  ;;  %v637_v40 = vsub.s32 2, %v600_v33  ;;  %v801_v42 = vsub.s32 1, %v600_v33  ;;  %s7015_s19 = smul.u32 20, %s12317_s27 }
  0x13   : > { %v408_v1 = vld [vmem:[%s7591_s12 + $0x10] sm:$0xff]  ;;  %v406_v2 = vld [vmem:[%s7591_s12] sm:$0xff]  ;;  %v409_v3 = vld [vmem:[%s7591_s12 + $0x18] sm:$0xff]  ;;  %s7603_s16 = scalar_lea.vmem %s11595_s4, %s7016_s13 }
  0x14   : > { %451 = vperm.xlu1 %7178, %v408_v1   ;;  %441 = vperm.xlu0 %7177, %v406_v2   ;;  %v407_v4 = vld [vmem:[%s7591_s12 + $0x8] sm:$0xff]  ;;  %v410_v9 = vld [vmem:[%s7591_s12 + $0x20] sm:$0xff]  ;;  %v412_v11 = vld [vmem:[%s7591_s12 + $0x30] sm:$0xff]  ;;  %v7662_v39 = vrot.slane %v438_v37, %v601_v35  ;;  %v7668_v44 = vrot.slane %v438_v37, %v637_v40  ;;  %v7671_v46 = vrot.slane %v438_v37, %v801_v42  ;;  %s8729_s22 = scalar_lea.vmem %s11593_s2, %s7015_s19 }
  0x15   : > { %v411_v5 = vld [vmem:[%s7591_s12 + $0x28] sm:$0xff]  ;;  %v413_v13 = vld [vmem:[%s7591_s12 + $0x38] sm:$0xff]  ;;  %v414_v16 = vld [vmem:[%s7591_s12 + $0x40] sm:$0xff] }
  0x16   : > { %v415_v7 = vld [vmem:[%s7591_s12 + $0x48] sm:$0xff]  ;;  %v416_v17 = vld [vmem:[%s7591_s12 + $0x50] sm:$0xff]  ;;  %v417_v18 = vld [vmem:[%s7591_s12 + $0x58] sm:$0xff]  ;;  %11828 = vst [vmem:[#allocation2_spill] sm:$0xff] %v7671_v46 }
  0x17   : > { %v419_v8 = vld [vmem:[%s7591_s12 + $0x68] sm:$0xff]  ;;  %v418_v19 = vld [vmem:[%s7591_s12 + $0x60] sm:$0xff]  ;;  %v420_v20 = vld [vmem:[%s7591_s12 + $0x70] sm:$0xff] }
  0x18   : > { %456 = vperm.xlu1 %7178, %v409_v3   ;;  %446 = vperm.xlu0 %7177, %v407_v4   ;;  %v7609_v10 = vld [vmem:[%s7591_s12 + $0x88] sm:$0xff]  ;;  %v421_v21 = vld [vmem:[%s7591_s12 + $0x78] sm:$0xff]  ;;  %v422_v22 = vld [vmem:[%s7591_s12 + $0x80] sm:$0xff] }
  0x19   : > { %v7614_v12 = vld [vmem:[%s7591_s12 + $0xa8] sm:$0xff]  ;;  %v425_v23 = vld [vmem:[%s7591_s12 + $0x98] sm:$0xff]  ;;  %v426_v24 = vld [vmem:[%s7591_s12 + $0xa0] sm:$0xff] }
  0x1a   : > { %v7620_v14 = vld [vmem:[%s7591_s12 + $0xc8] sm:$0xff]  ;;  %v429_v25 = vld [vmem:[%s7591_s12 + $0xb8] sm:$0xff]  ;;  %v430_v26 = vld [vmem:[%s7591_s12 + $0xc0] sm:$0xff] }
  0x1b   : > { %v7624_v15 = vld [vmem:[%s7591_s12 + $0xe8] sm:$0xff]  ;;  %v424_v27 = vld [vmem:[%s7591_s12 + $0x90] sm:$0xff]  ;;  %v433_v28 = vld [vmem:[%s7591_s12 + $0xd8] sm:$0xff] }
  0x1c   : > { %7179 = vset.pattern.permute.xlu1 %v7511_v6  ;;  %466 = vperm.xlu0 %7177, %v411_v5   ;;  %v434_v29 = vld [vmem:[%s7591_s12 + $0xe0] sm:$0xff]  ;;  %v437_v30 = vld [vmem:[%s7591_s12 + $0xf8] sm:$0xff]  ;;  %v428_v31 = vld [vmem:[%s7591_s12 + $0xb0] sm:$0xff] }
  0x1d   : > { %676 = vperm.xlu1 %7179, %v407_v4   ;;  %v432_v36 = vld [vmem:[%s7591_s12 + $0xd0] sm:$0xff] }
  0x1e   : > { %v436_v60 = vld [vmem:[%s7591_s12 + $0xf0] sm:$0xff]  ;;  %s6660_s12 = sshll.u32 %s12317_s27, 6 }
  0x1f   : > { %s394_s15 = scalar_lea.vmem %s11597_s6, %s6660_s12 }
  0x20   : > { %486 = vperm.xlu0 %7177, %v415_v7  }
  0x21   : > { %680 = vperm.xlu1 %7179, %v408_v1  }
  0x24   : > { %506 = vperm.xlu0 %7177, %v419_v8  }
  0x25   : > { %7180 = vset.pattern.permute.xlu1 %v7510_v0 }
  0x26   : > { %461 = vperm.xlu1 %7180, %v410_v9  }
  0x28   : > { %526 = vperm.xlu0 %7177, %v7609_v10  }
  0x2a   : > { %471 = vperm.xlu1 %7180, %v412_v11  }
  0x2c   : > { %546 = vperm.xlu0 %7177, %v7614_v12  }
  0x2e   : > { %476 = vperm.xlu1 %7180, %v413_v13  }
  0x30   : > { %566 = vperm.xlu0 %7177, %v7620_v14  }
  0x32   : > { %7181 = vset.pattern.permute.xlu1 %v7511_v6 }
  0x33   : > { %692 = vperm.xlu1 %7181, %v411_v5  }
  0x34   : > { %586 = vperm.xlu0 %7177, %v7624_v15  }
  0x37   : > { %696 = vperm.xlu1 %7181, %v412_v11   ;;  %v11604_v11 = vmov 2475754826  }
  0x38   : > { %7193 = vset.pattern.permute.xlu0 %v7511_v6 }
  0x39   : > { %672 = vperm.xlu0 %7193, %v406_v2  }
  0x3b   : > { %7182 = vset.pattern.permute.xlu1 %v7510_v0 }
  0x3c   : > { %481 = vperm.xlu1 %7182, %v414_v16  }
  0x3d   : > { %684 = vperm.xlu0 %7193, %v409_v3  }
  0x40   : > { %491 = vperm.xlu1 %7182, %v416_v17  }
  0x41   : > { %688 = vperm.xlu0 %7193, %v410_v9   ;;  %v11606_v9 = vmov 683565275  }
  0x44   : > { %496 = vperm.xlu1 %7182, %v417_v18  }
  0x45   : > { %700 = vperm.xlu0 %7193, %v413_v13  }
  0x48   : > { %7183 = vset.pattern.permute.xlu1 %v7511_v6 }
  0x49   : > { %708 = vperm.xlu1 %7183, %v415_v7   ;;  %704 = vperm.xlu0 %7193, %v414_v16  }
  0x4d   : > { %712 = vperm.xlu1 %7183, %v416_v17   ;;  %716 = vperm.xlu0 %7193, %v417_v18   ;;  %v11608_v17 = vmov 2131351028  }
  0x51   : > { %7184 = vset.pattern.permute.xlu1 %v7510_v0  ;;  %720 = vperm.xlu0 %7193, %v418_v19  }
  0x52   : > { %501 = vperm.xlu1 %7184, %v418_v19  }
  0x55   : > { %732 = vperm.xlu0 %7193, %v421_v21  }
  0x56   : > { %511 = vperm.xlu1 %7184, %v420_v20  }
  0x59   : > { %736 = vperm.xlu0 %7193, %v422_v22  }
  0x5a   : > { %516 = vperm.xlu1 %7184, %v421_v21  }
  0x5d   : > { %748 = vperm.xlu0 %7193, %v425_v23  }
  0x5e   : > { %7185 = vset.pattern.permute.xlu1 %v7511_v6 }
  0x5f   : > { %724 = vperm.xlu1 %7185, %v419_v8  }
  0x61   : > { %752 = vperm.xlu0 %7193, %v426_v24  }
  0x63   : > { %728 = vperm.xlu1 %7185, %v420_v20   ;;  %v11620_v20 = vmov 2102212464  }
  0x65   : > { %764 = vperm.xlu0 %7193, %v429_v25  }
  0x67   : > { %7186 = vset.pattern.permute.xlu1 %v7510_v0 }
  0x68   : > { %521 = vperm.xlu1 %7186, %v422_v22  }
  0x69   : > { %768 = vperm.xlu0 %7193, %v430_v26  }
  0x6c   : > { %531 = vperm.xlu1 %7186, %v424_v27  }
  0x6d   : > { %780 = vperm.xlu0 %7193, %v433_v28  }
  0x70   : > { %536 = vperm.xlu1 %7186, %v425_v23   ;;  %v11612_v23 = vmov 920167782  }
  0x71   : > { %784 = vperm.xlu0 %7193, %v434_v29  }
  0x74   : > { %7187 = vset.pattern.permute.xlu1 %v7511_v6 }
  0x75   : > { %740 = vperm.xlu1 %7187, %v7609_v10   ;;  %796 = vperm.xlu0 %7193, %v437_v30  }
  0x79   : > { %744 = vperm.xlu1 %7187, %v424_v27  }
  0x7d   : > { %7188 = vset.pattern.permute.xlu1 %v7510_v0 }
  0x7e   : > { %541 = vperm.xlu1 %7188, %v426_v24  }
  0x82   : > { %551 = vperm.xlu1 %7188, %v428_v31  }
  0x86   : > { %556 = vperm.xlu1 %7188, %v429_v25  }
  0x8a   : > { %7189 = vset.pattern.permute.xlu1 %v7511_v6 }
  0x8b   : > { %756 = vperm.xlu1 %7189, %v7614_v12  }
  0x8f   : > { %760 = vperm.xlu1 %7189, %v428_v31  }
  0x93   : > { %v452_v34 = vpop.permute.xlu1 %451  ;;  %7190 = vset.pattern.permute.xlu1 %v7510_v0  ;;  %v7664_v41 = vpop.permute.xlu0 %441 }
  0x94   : > { %561 = vperm.xlu1 %7190, %v430_v26   ;;  %v605_v45 = vmul.f32 %v7662_v39, %v452_v34  ;;  %v11610_v26 = vmov 1326507024  }
  0x96   : > { %v641_v48 = vadd.f32 %v7668_v44, %v605_v45 }
  0x97   : > { %v7660_v38 = vpop.permute.xlu1 %456  ;;  %v447_v49 = vpop.permute.xlu0 %446 }
  0x98   : > { %571 = vperm.xlu1 %7190, %v432_v36  }
  0x9b   : > { %v467_v54 = vpop.permute.xlu0 %466 }
  0x9c   : > { %576 = vperm.xlu1 %7190, %v433_v28   ;;  %v7666_v43 = vpop.permute.xlu1 %676  ;;  %v608_v62 = vmul.f32 %v7662_v39, %v467_v54 }
  0x9e   : > { %v644_v4 = vadd.f32 %v7668_v44, %v608_v62 }
  0x9f   : > { %v7685_v61 = vpop.permute.xlu0 %486 }
  0xa0   : > { %7191 = vset.pattern.permute.xlu1 %v7511_v6  ;;  %v681_v47 = vpop.permute.xlu1 %680 }
  0xa1   : > { %v805_v50 = vmul.f32 %v7671_v46, %v681_v47  ;;  %772 = vperm.xlu1 %7191, %v7620_v14  }
  0xa3   : > { %v7677_v51 = vadd.f32 %v805_v50, %v641_v48  ;;  %v7696_v13 = vpop.permute.xlu0 %506 }
  0xa5   : > { %11829 = vst [vmem:[#allocation3_spill] sm:$0xff] %v7677_v51  ;;  %v1078_v52 = vand.u32 2139095040, %v7677_v51  ;;  %776 = vperm.xlu1 %7191, %v432_v36   ;;  %v7680_v53 = vpop.permute.xlu1 %461  ;;  %v11603_v58 = vand.u32 2147483647, %v7677_v51 }
  0xa7   : > { %v1079_v55 = vshrl.u32 %v1078_v52, 23  ;;  %v1082_v63 = vand.u32 8388607, %v11603_v58  ;;  %v7710_v47 = vpop.permute.xlu0 %526 }
  0xa9   : > { %v6385_v56 = vadd.s32 4294967169, %v1079_v55  ;;  %7192 = vset.pattern.permute.xlu1 %v7510_v0  ;;  %v472_v57 = vpop.permute.xlu1 %471  ;;  %v604_v0 = vmul.f32 %v7662_v39, %v447_v49  ;;  %v1083_v5 = vor.u32 8388608, %v1082_v63 }
  0xaa   : > { %581 = vperm.xlu1 %7192, %v434_v29   ;;  %v609_v14 = vmul.f32 %v7662_v39, %v472_v57 }
  0xab   : > { %v1085_v59 = vadd.s32 1, %v6385_v56  ;;  %v1123_v32 = vshll.u32 %v1083_v5, 8 }
  0xac   : > { %v645_v5 = vadd.f32 %v7668_v44, %v609_v14 }
  0xad   : > { %vm1086_vm0 = vcmp.gt.s32.totalorder %v1085_v59, 0  ;;  %v7690_v2 = vpop.permute.xlu1 %476 }
  0xae   : > { %591 = vperm.xlu1 %7192, %v436_v60   ;;  %v1087_v1 = vsel %vm1086_vm0, %v1085_v59, 0 }
  0xaf   : > { %v1089_v3 = vand.u32 31, %v1087_v1  ;;  %v1088_v8 = vshrl.u32 %v1087_v1, 5 }
  0xb1   : > { %v1090_v7 = vsub.s32 32, %v1089_v3  ;;  %v1092_v10 = vshll.u32 %v11606_v9, %v1089_v3  ;;  %v1095_v12 = vshll.u32 %v11604_v11, %v1089_v3  ;;  %v1098_v19 = vshll.u32 %v11608_v17, %v1089_v3 }
  0xb2   : > { %596 = vperm.xlu1 %7192, %v437_v30   ;;  %v1101_v22 = vshll.u32 %v11620_v20, %v1089_v3  ;;  %v1104_v25 = vshll.u32 %v11612_v23, %v1089_v3  ;;  %v693_v28 = vpop.permute.xlu1 %692  ;;  %vm1107_vm1 = vcmp.lt.s32.totalorder %v1088_v8, 1  ;;  %vm1110_vm2 = vcmp.lt.s32.totalorder %v1088_v8, 4 }
  0xb3   : > { %v1093_v16 = vshrl.u32 %v11604_v11, %v1090_v7  ;;  %v1096_v18 = vshrl.u32 %v11608_v17, %v1090_v7  ;;  %v1099_v21 = vshrl.u32 %v11620_v20, %v1090_v7  ;;  %v1102_v24 = vshrl.u32 %v11612_v23, %v1090_v7 }
  0xb4   : > { %v1105_v27 = vshrl.u32 %v11610_v26, %v1090_v7  ;;  %v1091_v35 = vshrl.u32 %v11606_v9, %v1090_v7  ;;  %vm1109_vm3 = vcmp.lt.s32.totalorder %v1088_v8, 3  ;;  %v808_v48 = vmul.f32 %v7671_v46, %v693_v28 }
  0xb5   : > { %v1094_v29 = vor.u32 %v1093_v16, %v1092_v10  ;;  %v1097_v30 = vor.u32 %v1096_v18, %v1095_v12  ;;  %v1100_v31 = vor.u32 %v1099_v21, %v1098_v19  ;;  %v1103_v33 = vor.u32 %v1102_v24, %v1101_v22 }
  0xb6   : > { %7194 = vset.pattern.permute.xlu1 %v7511_v6  ;;  %v1106_v34 = vor.u32 %v1105_v27, %v1104_v25  ;;  %vm1108_vm4 = vcmp.lt.s32.totalorder %v1088_v8, 2  ;;  %v697_v56 = vpop.permute.xlu1 %696  ;;  %v640_v8 = vadd.f32 %v7668_v44, %v604_v0 }
  0xb7   : > { %788 = vperm.xlu1 %7194, %v7624_v15   ;;  %v1112_v36 = vsel %vm1110_vm2, %v1100_v31, 2102212464  ;;  %v1115_v37 = vsel %vm1107_vm1, %v1094_v29, %v1097_v30  ;;  %v1119_v40 = vsel %vm1107_vm1, %v1097_v30, %v1100_v31  ;;  %v1116_v42 = vsel %vm1110_vm2, %v1103_v33, 920167782 }
  0xb8   : > { %v1120_v45 = vsel %vm1110_vm2, %v1106_v34, 1326507024  ;;  %v1111_v6 = vsel %vm1107_vm1, %v1091_v35, %v1094_v29  ;;  %v1117_v49 = vsel %vm1109_vm3, %v1100_v31, %v1116_v42  ;;  %v1113_v52 = vsel %vm1109_vm3, %v1097_v30, %v1112_v36 }
  0xb9   : > { %v1121_v50 = vsel %vm1109_vm3, %v1103_v33, %v1120_v45  ;;  %v1118_v54 = vsel %vm1108_vm4, %v1115_v37, %v1117_v49  ;;  %v7713_v15 = vadd.f32 %v808_v48, %v644_v4  ;;  %v1114_v3 = vsel %vm1108_vm4, %v1111_v6, %v1113_v52  ;;  %v7726_v4 = vpop.permute.xlu0 %546 }
  0xba   : > { %v1122_v55 = vsel %vm1108_vm4, %v1119_v40, %v1121_v50  ;;  %v7718_v62 = vmul.u32.u64.low %v1123_v32, %v1118_v54  ;;  %v7719_v63 = vmul.u32.u64.high %v1123_v32, %v1118_v54, %v7718_v62  ;;  %v809_v7 = vmul.f32 %v7671_v46, %v697_v56 }
  0xbb   : > { %11830 = vst [vmem:[#allocation4_spill] sm:$0xff] %v7713_v15  ;;  %792 = vperm.xlu1 %7194, %v436_v60   ;;  %v7715_v57 = vmul.u32.u64.low %v1123_v32, %v1122_v55  ;;  %v7716_v59 = vmul.u32.u64.high %v1123_v32, %v1122_v55, %v7715_v57  ;;  %v1390_v1 = vand.u32 2139095040, %v7713_v15  ;;  %v804_v60 = vmul.f32 %v7671_v46, %v7666_v43 }
  0xbc   : > { %v1133_v12 = vadd.s32 1, %v7719_v63  ;;  %v7733_v16 = vadd.f32 %v809_v7, %v645_v5  ;;  %v1130_v18 = vmul.u32 %v1123_v32, %v1114_v3  ;;  %v11602_v43 = vand.u32 2147483647, %v7713_v15 }
  0xbd   : > { %v1391_v10 = vshrl.u32 %v1390_v1, 23  ;;  %vm1132_vm5 = vc.u32 %v7716_v59, %v7718_v62  ;;  %v7737_v24 = vadd.f32 %v804_v60, %v640_v8  ;;  %v7739_v27 = vpop.permute.xlu0 %566 }
  0xbe   : > { %11831 = vst [vmem:[#allocation5_spill] sm:$0xff] %v7733_v16  ;;  %v1134_v14 = vsel %vm1132_vm5, %v1133_v12, %v7719_v63  ;;  %v1494_v21 = vand.u32 2139095040, %v7733_v16  ;;  %v1394_v33 = vand.u32 8388607, %v11602_v43 }
  0xbf   : > { %v6397_v19 = vadd.s32 4294967169, %v1391_v10  ;;  %v1135_v0 = vadd.s32 %v1134_v14, %v1130_v18  ;;  %11832 = vst [vmem:[#allocation6_spill] sm:$0xff] %v7737_v24  ;;  %v974_v32 = vand.u32 2139095040, %v7737_v24 }
  0xc0   : > { %v1495_v28 = vshrl.u32 %v1494_v21, 23  ;;  %v1395_v57 = vor.u32 8388608, %v1394_v33 }
  0xc1   : > { %v1397_v22 = vadd.s32 1, %v6397_v19  ;;  %v1136_v25 = vadd.s32 536870912, %v1135_v0  ;;  %v7754_v50 = vpop.permute.xlu0 %586  ;;  %v975_v10 = vshrl.u32 %v974_v32, 23 }
  0xc2   : > { %v6401_v35 = vadd.s32 4294967169, %v1495_v28 }
  0xc3   : > { %vm1398_vm6 = vcmp.gt.s32.totalorder %v1397_v22, 0  ;;  %v7742_v30 = vshrl.u32 %v1136_v25, 30 }
  0xc4   : > { %v1399_v29 = vsel %vm1398_vm6, %v1397_v22, 0  ;;  %v1501_v1 = vadd.s32 1, %v6401_v35  ;;  %v1435_v22 = vshll.u32 %v1395_v57, 8 }
  0xc5   : > { %v1401_v31 = vand.u32 31, %v1399_v29  ;;  %v1138_v36 = vshll.u32 %v7742_v30, 30  ;;  %v1400_v37 = vshrl.u32 %v1399_v29, 5  ;;  %v7765_v25 = vpop.permute.xlu0 %672 }
  0xc6   : > { %vm1502_vm11 = vcmp.gt.s32.totalorder %v1501_v1, 0 }
  0xc7   : > { %v1402_v34 = vsub.s32 32, %v1401_v31  ;;  %v1404_v40 = vshll.u32 %v11606_v9, %v1401_v31  ;;  %v1407_v42 = vshll.u32 %v11604_v11, %v1401_v31  ;;  %v1410_v48 = vshll.u32 %v11608_v17, %v1401_v31 }
  0xc8   : > { %v1413_v6 = vshll.u32 %v11620_v20, %v1401_v31  ;;  %v1416_v49 = vshll.u32 %v11612_v23, %v1401_v31  ;;  %v7760_v60 = vsub.s32 %v1135_v0, %v1138_v36  ;;  %vm1419_vm7 = vcmp.lt.s32.totalorder %v1400_v37, 1 }
  0xc9   : > { %v1405_v45 = vshrl.u32 %v11604_v11, %v1402_v34  ;;  %v1408_v52 = vshrl.u32 %v11608_v17, %v1402_v34  ;;  %v1411_v54 = vshrl.u32 %v11620_v20, %v1402_v34  ;;  %v1414_v55 = vshrl.u32 %v11612_v23, %v1402_v34 }
  0xca   : > { %v1417_v56 = vshrl.u32 %v11610_v26, %v1402_v34  ;;  %vm1422_vm8 = vcmp.lt.s32.totalorder %v1400_v37, 4  ;;  %vm1421_vm9 = vcmp.lt.s32.totalorder %v1400_v37, 3  ;;  %vm1420_vm10 = vcmp.lt.s32.totalorder %v1400_v37, 2 }
  0xcb   : > { %v1406_v63 = vor.u32 %v1405_v45, %v1404_v40  ;;  %v1409_v3 = vor.u32 %v1408_v52, %v1407_v42  ;;  %v1412_v5 = vor.u32 %v1411_v54, %v1410_v48  ;;  %v1415_v7 = vor.u32 %v1414_v55, %v1413_v6  ;;  %v685_v54 = vpop.permute.xlu0 %684 }
  0xcc   : > { %v1418_v8 = vor.u32 %v1417_v56, %v1416_v49  ;;  %v1403_v31 = vshrl.u32 %v11606_v9, %v1402_v34  ;;  %v1141_v36 = vsub.s32 0, %v7760_v60  ;;  %v1503_v45 = vsel %vm1502_vm11, %v1501_v1, 0 }
  0xcd   : > { %v1427_v12 = vsel %vm1419_vm7, %v1406_v63, %v1409_v3  ;;  %v1428_v18 = vsel %vm1422_vm8, %v1415_v7, 920167782  ;;  %v1431_v19 = vsel %vm1419_vm7, %v1409_v3, %v1412_v5  ;;  %v1424_v28 = vsel %vm1422_vm8, %v1412_v5, 2102212464 }
  0xce   : > { %v1429_v14 = vsel %vm1421_vm9, %v1412_v5, %v1428_v18  ;;  %v1432_v21 = vsel %vm1422_vm8, %v1418_v8, 1326507024  ;;  %v1423_v48 = vsel %vm1419_vm7, %v1403_v31, %v1406_v63  ;;  %v1425_v6 = vsel %vm1421_vm9, %v1409_v3, %v1424_v28 }
  0xcf   : > { %v1430_v29 = vsel %vm1420_vm10, %v1427_v12, %v1429_v14  ;;  %v1433_v0 = vsel %vm1421_vm9, %v1415_v7, %v1432_v21  ;;  %v1505_v49 = vand.u32 31, %v1503_v45  ;;  %v6381_v52 = vadd.s32 4294967169, %v975_v10 }
  0xd0   : > { %v1434_v32 = vsel %vm1420_vm10, %v1431_v19, %v1433_v0  ;;  %v7771_v33 = vmul.u32.u64.low %v1435_v22, %v1430_v29  ;;  %v7772_v35 = vmul.u32.u64.high %v1435_v22, %v1430_v29, %v7771_v33  ;;  %v6386_v55 = vmin.u32 %v1141_v36, %v7760_v60 }
  0xd1   : > { %v7776_v40 = vmul.u32.u64.low %v1435_v22, %v1434_v32  ;;  %v7777_v42 = vmul.u32.u64.high %v1435_v22, %v1434_v32, %v7776_v40  ;;  %v1426_v56 = vsel %vm1420_vm10, %v1423_v48, %v1425_v6  ;;  %v7786_v57 = vsub.s32 32, %v1505_v49 }
  0xd2   : > { %v1445_v34 = vadd.s32 1, %v7772_v35  ;;  %v606_v1 = vmul.f32 %v7662_v39, %v7660_v38  ;;  %v981_v63 = vadd.s32 1, %v6381_v52  ;;  %v11601_v5 = vand.u32 2147483647, %v7733_v16 }
  0xd3   : > { %vm1444_vm12 = vc.u32 %v7777_v42, %v7771_v33  ;;  %v806_v7 = vmul.f32 %v7671_v46, %v685_v54  ;;  %v1442_v8 = vmul.u32 %v1435_v22, %v1426_v56  ;;  %v1509_v37 = vshrl.u32 %v11604_v11, %v7786_v57 }
  0xd4   : > { %v1446_v3 = vsel %vm1444_vm12, %v1445_v34, %v7772_v35  ;;  %v1512_v10 = vshrl.u32 %v11608_v17, %v7786_v57  ;;  %v1515_v12 = vshrl.u32 %v11620_v20, %v7786_v57  ;;  %v1143_v18 = vclz %v6386_v55 }
  0xd5   : > { %v7799_v19 = vshrl.u32 %v1503_v45, 5  ;;  %v1508_v38 = vshll.u32 %v11606_v9, %v1505_v49  ;;  %v1511_v14 = vshll.u32 %v11604_v11, %v1505_v49  ;;  %v1447_v21 = vadd.s32 %v1446_v3, %v1442_v8 }
  0xd6   : > { %v1514_v28 = vshll.u32 %v11608_v17, %v1505_v49  ;;  %v1517_v22 = vshll.u32 %v11620_v20, %v1505_v49  ;;  %v1518_v29 = vshrl.u32 %v11612_v23, %v7786_v57  ;;  %v642_v0 = vadd.f32 %v7668_v44, %v606_v1 }
  0xd7   : > { %v1498_v31 = vand.u32 8388607, %v11601_v5  ;;  %v1520_v32 = vshll.u32 %v11612_v23, %v1505_v49  ;;  %v1521_v35 = vshrl.u32 %v11610_v26, %v7786_v57  ;;  %v1510_v36 = vor.u32 %v1509_v37, %v1508_v38 }
  0xd8   : > { %v1513_v40 = vor.u32 %v1512_v10, %v1511_v14  ;;  %v1516_v45 = vor.u32 %v1515_v12, %v1514_v28  ;;  %v1519_v48 = vor.u32 %v1518_v29, %v1517_v22  ;;  %v6387_v6 = vadd.s32 4294967294, %v1143_v18 }
  0xd9   : > { %v1522_v52 = vor.u32 %v1521_v35, %v1520_v32  ;;  %vm982_vm13 = vcmp.gt.s32.totalorder %v981_v63, 0  ;;  %v1448_v34 = vadd.s32 536870912, %v1447_v21  ;;  %vm1526_vm14 = vcmp.lt.s32.totalorder %v7799_v19, 4 }
  0xda   : > { %v7814_v54 = vadd.f32 %v806_v7, %v642_v0  ;;  %vm1523_vm15 = vcmp.lt.s32.totalorder %v7799_v19, 1  ;;  %vm1525_vm0 = vcmp.lt.s32.totalorder %v7799_v19, 3  ;;  %v1532_v49 = vsel %vm1526_vm14, %v1519_v48, 920167782 }
  0xdb   : > { %v1499_v55 = vor.u32 8388608, %v1498_v31  ;;  %v1531_v56 = vsel %vm1523_vm15, %v1510_v36, %v1513_v40  ;;  %v1533_v1 = vsel %vm1525_vm0, %v1516_v45, %v1532_v49  ;;  %v983_v3 = vsel %vm982_vm13, %v981_v63, 0 }
  0xdc   : > { %11833 = vst [vmem:[#allocation7_spill] sm:$0xff] %v7814_v54  ;;  %vm6388_vm1 = vcmp.lt.s32.totalorder %v6387_v6, 0  ;;  %v1535_v7 = vsel %vm1523_vm15, %v1513_v40, %v1516_v45  ;;  %v1536_v8 = vsel %vm1526_vm14, %v1522_v52, 1326507024  ;;  %v7828_v37 = vshrl.u32 %v1448_v34, 30 }
  0xdd   : > { %vm1524_vm2 = vcmp.lt.s32.totalorder %v7799_v19, 2  ;;  %v1537_v10 = vsel %vm1525_vm0, %v1519_v48, %v1536_v8  ;;  %v1182_v12 = vand.u32 2139095040, %v7814_v54  ;;  %v603_v18 = vmul.f32 %v7662_v39, %v7664_v41 }
  0xde   : > { %v1534_v63 = vsel %vm1524_vm2, %v1531_v56, %v1533_v1  ;;  %v7838_v38 = vand.u32 31, %v983_v3  ;;  %v612_v14 = vmul.f32 %v7662_v39, %v7685_v61  ;;  %v1538_v28 = vsel %vm1524_vm2, %v1535_v7, %v1537_v10 }
  0xdf   : > { %v7844_v22 = vshll.u32 %v1499_v55, 8  ;;  %v7846_v29 = vsel %vm6388_vm1, 0, %v6387_v6  ;;  %v616_v0 = vmul.f32 %v7662_v39, %v7696_v13  ;;  %v607_v41 = vmul.f32 %v7662_v39, %v7680_v53 }
  0xe0   : > { %11834 = vst [vmem:[#allocation8_spill] sm:$0xff] %v7838_v38  ;;  %v620_v31 = vmul.f32 %v7662_v39, %v7710_v47  ;;  %v1450_v32 = vshll.u32 %v7828_v37, 30  ;;  %v1183_v48 = vshrl.u32 %v1182_v12, 23  ;;  %v639_v13 = vadd.f32 %v7668_v44, %v603_v18 }
  0xe1   : > { %v7856_v61 = vmul.u32.u64.low %v7844_v22, %v1534_v63  ;;  %v7857_v35 = vmul.u32.u64.high %v7844_v22, %v1534_v63, %v7856_v61  ;;  %v7861_v6 = vmul.u32.u64.low %v7844_v22, %v1538_v28  ;;  %v7862_v52 = vmul.u32.u64.high %v7844_v22, %v1538_v28, %v7861_v6 }
  0xe2   : > { %v7866_v34 = vsub.s32 32, %v7838_v38  ;;  %v1528_v53 = vsel %vm1526_vm14, %v1516_v45, 2102212464  ;;  %v6389_v47 = vadd.s32 4294967169, %v1183_v48  ;;  %v1151_v49 = vsub.s32 4294967266, %v7846_v29 }
  0xe3   : > { %v7872_v55 = vadd.f32 %v7668_v44, %v612_v14  ;;  %v7875_v56 = vadd.f32 %v7668_v44, %v616_v0  ;;  %v1507_v1 = vshrl.u32 %v11606_v9, %v7786_v57  ;;  %v7880_v7 = vadd.f32 %v7668_v44, %v607_v41 }
  0xe4   : > { %11835 = vst [vmem:[#allocation9_spill] sm:$0xff] %v7866_v34  ;;  %v7883_v8 = vadd.f32 %v7668_v44, %v620_v31  ;;  %v7885_v10 = vsub.s32 %v1447_v21, %v1450_v32  ;;  %v1189_v45 = vadd.s32 1, %v6389_v47  ;;  %v7887_v12 = vshrl.u32 %v983_v3, 5 }
  0xe5   : > { %11836 = vst [vmem:[#allocation10_spill] sm:$0xff] %v7875_v56  ;;  %v624_v18 = vmul.f32 %v7662_v39, %v7726_v4  ;;  %v1527_v63 = vsel %vm1523_vm15, %v1507_v1, %v1510_v36  ;;  %v1529_v57 = vsel %vm1525_vm0, %v1513_v40, %v1528_v53  ;;  %v997_v14 = vshll.u32 %v11620_v20, %v7838_v38 }
  0xe6   : > { %11837 = vst [vmem:[#allocation11_spill] sm:$0xff] %v7883_v8  ;;  %11838 = vst [vmem:[#allocation12_spill] sm:$0xff] %v7887_v12  ;;  %v998_v28 = vshrl.u32 %v11612_v23, %v7866_v34  ;;  %v803_v21 = vmul.f32 %v7671_v46, %v7765_v25  ;;  %vm1190_vm3 = vcmp.gt.s32.totalorder %v1189_v45, 0  ;;  %v7903_v3 = vshll.u32 %v11612_v23, %v7838_v38 }
  0xe7   : > { %v1152_v4 = vadd.s32 127, %v1151_v49  ;;  %v11600_v36 = vand.u32 2147483647, %v7814_v54  ;;  %v1191_v0 = vsel %vm1190_vm3, %v1189_v45, 0  ;;  %v1453_v40 = vsub.s32 0, %v7885_v10 }
  0xe8   : > { %v1530_v41 = vsel %vm1524_vm2, %v1527_v63, %v1529_v57  ;;  %v1549_v31 = vadd.s32 1, %v7857_v35  ;;  %v1193_v32 = vand.u32 31, %v1191_v0  ;;  %v7912_v25 = vshrl.u32 %v11610_v26, %v7866_v34 }
  0xe9   : > { %v7915_v48 = vadd.f32 %v7668_v44, %v624_v18  ;;  %v610_v6 = vmul.f32 %v7662_v39, %v7690_v2  ;;  %vm1548_vm4 = vc.u32 %v7862_v52, %v7856_v61  ;;  %v7921_v53 = vor.u32 %v998_v28, %v997_v14 }
  0xea   : > { %v1131_v19 = vadd.s32 %v7718_v62, %v7716_v59  ;;  %v7925_v47 = vadd.f32 %v803_v21, %v639_v13  ;;  %v1194_v49 = vsub.s32 32, %v1193_v32  ;;  %v1147_v1 = vsub.s32 32, %v7846_v29  ;;  %v689_v59 = vpop.permute.xlu0 %688 }
  0xeb   : > { %11839 = vst [vmem:[#allocation13_spill] sm:$0xff] %v7915_v48  ;;  %11840 = vst [vmem:[#allocation14_spill] sm:$0xff] %v7921_v53  ;;  %v1153_v45 = vshll.u32 %v1152_v4, 23  ;;  %v1546_v18 = vmul.u32 %v7844_v22, %v1530_v41  ;;  %v1186_v63 = vand.u32 8388607, %v11600_v36  ;;  %v6398_v2 = vmin.u32 %v1453_v40, %v7885_v10 }
  0xec   : > { %11841 = vst [vmem:[#allocation15_spill] sm:$0xff] %v7925_v47  ;;  %v1550_v57 = vsel %vm1548_vm4, %v1549_v31, %v7857_v35  ;;  %v1196_v14 = vshll.u32 %v11606_v9, %v1193_v32  ;;  %v1197_v28 = vshrl.u32 %v11604_v11, %v1194_v49  ;;  %v1192_v62 = vshrl.u32 %v1191_v0, 5 }
  0xed   : > { %v1199_v13 = vshll.u32 %v11604_v11, %v1193_v32  ;;  %v1200_v21 = vshrl.u32 %v11608_v17, %v1194_v49  ;;  %v1203_v4 = vshrl.u32 %v11620_v20, %v1194_v49  ;;  %v1202_v41 = vshll.u32 %v11608_v17, %v1193_v32 }
  0xee   : > { %v1198_v22 = vor.u32 %v1197_v28, %v1196_v14  ;;  %v1205_v36 = vshll.u32 %v11620_v20, %v1193_v32  ;;  %v1206_v40 = vshrl.u32 %v11612_v23, %v1194_v49  ;;  %v1208_v31 = vshll.u32 %v11612_v23, %v1193_v32 }
  0xef   : > { %v1201_v35 = vor.u32 %v1200_v21, %v1199_v13  ;;  %v1209_v5 = vshrl.u32 %v11610_v26, %v1194_v49  ;;  %v807_v0 = vmul.f32 %v7671_v46, %v689_v59  ;;  %v1148_v43 = vshll.u32 %v7760_v60, %v7846_v29  ;;  %v482_v29 = vpop.permute.xlu1 %481 }
  0xf0   : > { %v1149_v58 = vshrl.u32 %v1131_v19, %v1147_v1  ;;  %v1204_v11 = vor.u32 %v1203_v4, %v1202_v41  ;;  %v1207_v9 = vor.u32 %v1206_v40, %v1205_v36  ;;  %v7946_v14 = vadd.s32 %v1550_v57, %v1546_v18 }
  0xf1   : > { %v1187_v28 = vor.u32 8388608, %v1186_v63  ;;  %v1210_v17 = vor.u32 %v1209_v5, %v1208_v31  ;;  %vm1211_vm5 = vcmp.lt.s32.totalorder %v1192_v62, 1  ;;  %vm11683_vm6 = vcmp.lt.s32.totalorder %v7887_v12, 4 }
  0xf2   : > { %v1154_v13 = vor.u32 4788187, %v1153_v45  ;;  %v1455_v21 = vclz %v6398_v2  ;;  %vm1214_vm7 = vcmp.lt.s32.totalorder %v1192_v62, 4  ;;  %v1219_v32 = vsel %vm1211_vm5, %v1198_v22, %v1201_v35 }
  0xf3   : > { %v11842_v26 = vmov 683565275   ;;  %vm1213_vm8 = vcmp.lt.s32.totalorder %v1192_v62, 3  ;;  %v1220_v23 = vsel %vm1214_vm7, %v1207_v9, 920167782  ;;  %v7952_v60 = vadd.f32 %v807_v0, %v7880_v7 }
  0xf4   : > { %v1195_v59 = vshrl.u32 %v11842_v26, %v1194_v49  ;;  %vm1212_vm9 = vcmp.lt.s32.totalorder %v1192_v62, 2  ;;  %v1216_v36 = vsel %vm1214_vm7, %v1204_v11, 2102212464  ;;  %v1221_v5 = vsel %vm1213_vm8, %v1204_v11, %v1220_v23 }
  0xf5   : > { %11843 = vst [vmem:[#allocation16_spill] sm:$0xff] %v7952_v60  ;;  %v1223_v19 = vsel %vm1211_vm5, %v1201_v35, %v1204_v11  ;;  %v1552_v1 = vadd.s32 536870912, %v7946_v14  ;;  %v1222_v45 = vsel %vm1212_vm9, %v1219_v32, %v1221_v5  ;;  %v1224_v18 = vsel %vm1214_vm7, %v1210_v17, 1326507024  ;;  %v701_v11 = vpop.permute.xlu0 %700 }
  0xf6   : > { %v1227_v63 = vshll.u32 %v1187_v28, 8  ;;  %v1150_v2 = vor.u32 %v1149_v58, %v1148_v43  ;;  %v870_v49 = vand.u32 2139095040, %v7925_v47  ;;  %v1215_v57 = vsel %vm1211_vm5, %v1195_v59, %v1198_v22  ;;  %v492_v59 = vpop.permute.xlu1 %491 }
  0xf7   : > { %v1225_v7 = vsel %vm1213_vm8, %v1207_v9, %v1224_v18  ;;  %v1217_v4 = vsel %vm1213_vm8, %v1201_v35, %v1216_v36  ;;  %v1155_v31 = vand.u32 2147483647, %v1154_v13  ;;  %v646_v17 = vadd.f32 %v7668_v44, %v610_v6 }
  0xf8   : > { %v1226_v41 = vsel %vm1212_vm9, %v1223_v19, %v1225_v7  ;;  %v7963_v23 = vmul.u32.u64.low %v1227_v63, %v1222_v45  ;;  %v7964_v40 = vmul.u32.u64.high %v1227_v63, %v1222_v45, %v7963_v23  ;;  %v6399_v0 = vadd.s32 4294967294, %v1455_v21 }
  0xf9   : > { %v1286_v58 = vand.u32 2139095040, %v7952_v60  ;;  %v628_v43 = vmul.f32 %v7662_v39, %v7739_v27  ;;  %v7971_v22 = vshrl.u32 %v1552_v1, 30  ;;  %vm1077_vm10 = vcmp.lt.s32.totalorder %v7677_v51, 0 }
  0xfa   : > { %v7973_v9 = vmul.u32.u64.low %v1227_v63, %v1226_v41  ;;  %v7974_v35 = vmul.u32.u64.high %v1227_v63, %v1226_v41, %v7973_v9  ;;  %v1157_v28 = vcvt.s32.f32 %v1150_v2  ;;  %v1218_v32 = vsel %vm1212_vm9, %v1215_v57, %v1217_v4 }
  0xfb   : > { %v1287_v13 = vshrl.u32 %v1286_v58, 23  ;;  %v810_v6 = vmul.f32 %v7671_v46, %v701_v11  ;;  %v1002_v21 = vor.u32 %v7912_v25, %v7903_v3  ;;  %v7984_v27 = vsel %vm11683_vm6, %v7921_v53, 920167782 }
  0xfc   : > { %11844 = vst [vmem:[#allocation17_spill] sm:$0xff] %v7984_v27  ;;  %v871_v36 = vshrl.u32 %v870_v49, 23  ;;  %v1237_v5 = vadd.s32 1, %v7964_v40  ;;  %v1158_v19 = vmul.f32 %v1157_v28, %v1155_v31  ;;  %vm6400_vm11 = vcmp.lt.s32.totalorder %v6399_v0, 0 }
  0xfd   : > { %v11614_v62 = vand.u32 2147483647, %v7952_v60  ;;  %v6393_v1 = vadd.s32 4294967169, %v1287_v13  ;;  %v1554_v45 = vshll.u32 %v7971_v22, 30  ;;  %v1234_v18 = vmul.u32 %v1227_v63, %v1218_v32 }
  0xfe   : > { %vm1236_vm12 = vc.u32 %v7974_v35, %v7963_v23  ;;  %v7991_v3 = vadd.f32 %v810_v6, %v646_v17  ;;  %v632_v25 = vmul.f32 %v7662_v39, %v7754_v50  ;;  %v611_v2 = vmul.f32 %v7662_v39, %v482_v29  ;;  %v8010_v29 = vpop.permute.xlu1 %496 }
  0xff   : > { %v1238_v49 = vsel %vm1236_vm12, %v1237_v5, %v7964_v40  ;;  %v1293_v57 = vadd.s32 1, %v6393_v1  ;;  %v7999_v7 = vsel %vm11683_vm6, %v1002_v21, 1326507024  ;;  %v1161_v4 = vsub.s32 4, %v7742_v30 }
 0x100   : > { %11845 = vst [vmem:[#allocation18_spill] sm:$0xff] %v7991_v3  ;;  %11846 = vst [vmem:[#allocation19_spill] sm:$0xff] %v7999_v7  ;;  %v6377_v63 = vadd.s32 4294967169, %v871_v36  ;;  %v8002_v41 = vadd.s32 %v1238_v49, %v1234_v18  ;;  %v1159_v11 = vxor.u32 2147483648, %v1158_v19  ;;  %v8005_v31 = vadd.f32 %v7668_v44, %v628_v43 }
 0x101   : > { %v8008_v50 = vsel %vm6400_vm11, 0, %v6399_v0  ;;  %vm1294_vm13 = vcmp.gt.s32.totalorder %v1293_v57, 0  ;;  %v8013_v40 = vsub.s32 %v7946_v14, %v1554_v45  ;;  %v1290_v17 = vand.u32 8388607, %v11614_v62 }
 0x102   : > { %11847 = vst [vmem:[#allocation20_spill] sm:$0xff] %v8005_v31  ;;  %v1295_v58 = vsel %vm1294_vm13, %v1293_v57, 0  ;;  %v1598_v9 = vand.u32 2139095040, %v7991_v3  ;;  %v8019_v28 = vadd.f32 %v7668_v44, %v632_v25  ;;  %v8022_v43 = vadd.f32 %v7668_v44, %v611_v2 }
 0x103   : > { %v8025_v0 = vmul.f32 %v7662_v39, %v492_v59  ;;  %v1297_v32 = vand.u32 31, %v1295_v58  ;;  %v8030_v14 = vsel %vm1077_vm10, %v1161_v4, %v7742_v30  ;;  %v8034_v13 = vadd.s32 %v7771_v33, %v7777_v42 }
 0x104   : > { %11848 = vst [vmem:[#allocation21_spill] sm:$0xff] %v8019_v28  ;;  %11849 = vst [vmem:[#allocation22_spill] sm:$0xff] %v8030_v14  ;;  %v8036_v6 = vadd.s32 1, %v6377_v63  ;;  %v1240_v21 = vadd.s32 536870912, %v8002_v41  ;;  %v1160_v36 = vsel %vm1077_vm10, %v1159_v11, %v1158_v19  ;;  %v1459_v59 = vsub.s32 32, %v8008_v50  ;;  %v709_v19 = vpop.permute.xlu1 %708 }
 0x105   : > { %v1473_v5 = vsub.s32 4, %v7828_v37  ;;  %v1298_v1 = vsub.s32 32, %v1297_v32  ;;  %v1463_v45 = vsub.s32 4294967266, %v8008_v50  ;;  %v1557_v30 = vsub.s32 0, %v8013_v40 }
 0x106   : > { %v1291_v18 = vor.u32 8388608, %v1290_v17  ;;  %v1599_v25 = vshrl.u32 %v1598_v9, 23  ;;  %v1300_v33 = vshll.u32 %v11842_v26, %v1297_v32  ;;  %v11850_v42 = vmov 2475754826  }
 0x107   : > { %v1301_v2 = vshrl.u32 %v11850_v42, %v1298_v1  ;;  %v1303_v49 = vshll.u32 %v11850_v42, %v1297_v32  ;;  %v11851_v57 = vmov 2131351028   ;;  %v8049_v63 = vshrl.u32 %v1240_v21, 30 }
 0x108   : > { %v1304_v4 = vshrl.u32 %v11851_v57, %v1298_v1  ;;  %v1296_v11 = vshrl.u32 %v1295_v58, 5  ;;  %v1306_v62 = vshll.u32 %v11851_v57, %v1297_v32  ;;  %v1307_v28 = vshrl.u32 %v11620_v20, %v1298_v1 }
 0x109   : > { %vm878_vm14 = vcmp.gt.s32.totalorder %v8036_v6, 0  ;;  %v1302_v17 = vor.u32 %v1301_v2, %v1300_v33  ;;  %v1309_v31 = vshll.u32 %v11620_v20, %v1297_v32  ;;  %v11852_v14 = vmov 920167782  }
 0x10a   : > { %v1305_v9 = vor.u32 %v1304_v4, %v1303_v49  ;;  %v1310_v53 = vshrl.u32 %v11852_v14, %v1298_v1  ;;  %v11853_v7 = vand.u32 2147483647, %v7677_v51  ;;  %v11854_v27 = vmov 0 }
 0x10b   : > { %vm1389_vm0 = vcmp.lt.s32.totalorder %v7713_v15, 0  ;;  %v1464_v58 = vadd.s32 127, %v1463_v45  ;;  %v6402_v21 = vmin.u32 %v1557_v30, %v8013_v40  ;;  %v1308_v12 = vor.u32 %v1307_v28, %v1306_v62 }
 0x10c   : > { %vm8058_vm15 = vcmp.le.f32.partialorder %v11853_v7, 0.7853982  ;;  %v812_v38 = vmul.f32 %v7671_v46, %v709_v19  ;;  %v1311_v33 = vor.u32 %v1310_v53, %v1309_v31  ;;  %v1312_v2 = vshll.u32 %v11852_v14, %v1297_v32 }
 0x10d   : > { %v11855_v27 = vsel %vm8058_vm15, 4294967295, %v11854_v27  ;;  %v11857_v49 = vmov 1326507024   ;;  %v1331_v20 = vshll.u32 %v1291_v18, 8  ;;  %v1242_v34 = vshll.u32 %v8049_v63, 30 }
 0x10e   : > { %11856 = vst [vmem:[#allocation23_spill] sm:$0xff] %v11855_v27  ;;  %v1313_v4 = vshrl.u32 %v11857_v49, %v1298_v1  ;;  %vm1315_vm1 = vcmp.lt.s32.totalorder %v1296_v11, 1  ;;  %vm1318_vm2 = vcmp.lt.s32.totalorder %v1296_v11, 4  ;;  %v6405_v7 = vadd.s32 4294967169, %v1599_v25 }
 0x10f   : > { %vm1317_vm3 = vcmp.lt.s32.totalorder %v1296_v11, 3  ;;  %v1323_v45 = vsel %vm1315_vm1, %v1302_v17, %v1305_v9  ;;  %v1324_v47 = vsel %vm1318_vm2, %v1311_v33, 920167782  ;;  %vm1316_vm4 = vcmp.lt.s32.totalorder %v1296_v11, 2 }
 0x110   : > { %v1314_v24 = vor.u32 %v1313_v4, %v1312_v2  ;;  %v1320_v62 = vsel %vm1318_vm2, %v1308_v12, 2102212464  ;;  %v1325_v28 = vsel %vm1317_vm3, %v1308_v12, %v1324_v47  ;;  %v1327_v53 = vsel %vm1315_vm1, %v1305_v9, %v1308_v12 }
 0x111   : > { %v1465_v31 = vshll.u32 %v1464_v58, 23  ;;  %v1299_v32 = vshrl.u32 %v11842_v26, %v1298_v1  ;;  %v1326_v30 = vsel %vm1316_vm4, %v1323_v45, %v1325_v28  ;;  %v1559_v19 = vclz %v6402_v21 }
 0x112   : > { %v1328_v18 = vsel %vm1318_vm2, %v1314_v24, 1326507024  ;;  %v8072_v8 = vmul.u32.u64.low %v1331_v20, %v1326_v30  ;;  %v8073_v25 = vmul.u32.u64.high %v1331_v20, %v1326_v30, %v8072_v8  ;;  %v1321_v4 = vsel %vm1317_vm3, %v1305_v9, %v1320_v62 }
 0x113   : > { %v1329_v48 = vsel %vm1317_vm3, %v1311_v33, %v1328_v18  ;;  %v1319_v2 = vsel %vm1315_vm1, %v1299_v32, %v1302_v17  ;;  %v1605_v47 = vadd.s32 1, %v6405_v7  ;;  %v8079_v12 = vsub.s32 %v8002_v41, %v1242_v34 }
 0x114   : > { %v1330_v56 = vsel %vm1316_vm4, %v1327_v53, %v1329_v48  ;;  %v8085_v24 = vadd.f32 %v812_v38, %v7872_v55  ;;  %v1163_v21 = vsel %vm8058_vm15, %v7677_v51, %v1160_v36  ;;  %v8093_v17 = vsel %vm1389_vm0, %v1473_v5, %v7828_v37  ;;  %v705_v51 = vpop.permute.xlu0 %704 }
 0x115   : > { %v8081_v58 = vmul.u32.u64.low %v1331_v20, %v1330_v56  ;;  %v8082_v1 = vmul.u32.u64.high %v1331_v20, %v1330_v56, %v8081_v58  ;;  %11859 = vst [vmem:[#allocation25_spill] sm:$0xff] %v8093_v17  ;;  %v8097_v48 = vadd.f32 %v7668_v44, %v8025_v0  ;;  %vm1606_vm5 = vcmp.gt.s32.totalorder %v1605_v47, 0 }
 0x116   : > { %11858 = vst [vmem:[#allocation24_spill] sm:$0xff] %v8085_v24  ;;  %v1461_v34 = vshrl.u32 %v8034_v13, %v1459_v59  ;;  %v879_v38 = vsel %vm878_vm14, %v8036_v6, 0  ;;  %v1322_v55 = vsel %vm1316_vm4, %v1319_v2, %v1321_v4  ;;  %v1341_v56 = vadd.s32 1, %v8073_v25 }
 0x117   : > { %v1460_v41 = vshll.u32 %v7885_v10, %v8008_v50  ;;  %v1466_v37 = vor.u32 4788187, %v1465_v31  ;;  %v6403_v36 = vadd.s32 4294967294, %v1559_v19  ;;  %v1607_v5 = vsel %vm1606_vm5, %v1605_v47, 0 }
 0x118   : > { %v1245_v0 = vsub.s32 0, %v8079_v12  ;;  %vm1340_vm7 = vc.u32 %v8082_v1, %v8072_v8  ;;  %v11628_v13 = vand.u32 2147483647, %v7991_v3  ;;  %v1806_v59 = vand.u32 2139095040, %v8085_v24 }
 0x119   : > { %7230 = vcosq.f32 %v1163_v21  ;;  %v1338_v6 = vmul.u32 %v1331_v20, %v1322_v55  ;;  %v1342_v11 = vsel %vm1340_vm7, %v1341_v56, %v8073_v25  ;;  %v1609_v9 = vand.u32 31, %v1607_v5 }
 0x11a   : > { %7232 = vsinq.f32 %v1163_v21  ;;  %v1462_v33 = vor.u32 %v1461_v34, %v1460_v41  ;;  %v8113_v10 = vshrl.u32 %v879_v38, 5  ;;  %v8115_v50 = vand.u32 31, %v879_v38 }
 0x11b   : > { %v1467_v7 = vand.u32 2147483647, %v1466_v37  ;;  %vm6404_vm8 = vcmp.lt.s32.totalorder %v6403_v36, 0  ;;  %v8117_v45 = vadd.s32 %v1342_v11, %v1338_v6  ;;  %v8119_v62 = vsub.s32 32, %v1609_v9 }
 0x11c   : > { %11860 = vst [vmem:[#allocation26_spill] sm:$0xff] %v8113_v10  ;;  %11861 = vst [vmem:[#allocation27_spill] sm:$0xff] %v8115_v50  ;;  %v6390_v28 = vmin.u32 %v1245_v0, %v8079_v12  ;;  %v1602_v20 = vand.u32 8388607, %v11628_v13  ;;  %v1612_v53 = vshll.u32 %v11842_v26, %v1609_v9  ;;  %v1807_v31 = vshrl.u32 %v1806_v59, 23 }
 0x11d   : > { %v1613_v32 = vshrl.u32 %v11850_v42, %v8119_v62  ;;  %v1615_v30 = vshll.u32 %v11850_v42, %v1609_v9  ;;  %v1616_v18 = vshrl.u32 %v11851_v57, %v8119_v62  ;;  %v11862_v19 = vmov 2102212464  }
 0x11e   : > { %v1619_v25 = vshrl.u32 %v11862_v19, %v8119_v62  ;;  %v8132_v2 = vshrl.u32 %v1607_v5, 5  ;;  %v1618_v4 = vshll.u32 %v11851_v57, %v1609_v9  ;;  %v1621_v47 = vshll.u32 %v11862_v19, %v1609_v9 }
 0x11f   : > { %v1622_v58 = vshrl.u32 %v11852_v14, %v8119_v62  ;;  %v1344_v21 = vadd.s32 536870912, %v8117_v45  ;;  %v1614_v34 = vor.u32 %v1613_v32, %v1612_v53  ;;  %v1617_v38 = vor.u32 %v1616_v18, %v1615_v30 }
 0x120   : > { %v1625_v55 = vshrl.u32 %v11857_v49, %v8119_v62  ;;  %v1620_v56 = vor.u32 %v1619_v25, %v1618_v4  ;;  %v1624_v37 = vshll.u32 %v11852_v14, %v1609_v9  ;;  %v6413_v5 = vadd.s32 4294967169, %v1807_v31 }
 0x121   : > { %v1623_v41 = vor.u32 %v1622_v58, %v1621_v47  ;;  %v1469_v0 = vcvt.s32.f32 %v1462_v33  ;;  %v8143_v59 = vsel %vm6404_vm8, 0, %v6403_v36  ;;  %v8146_v6 = vsub.s32 32, %v8115_v50 }
 0x122   : > { %v1247_v11 = vclz %v6390_v28  ;;  %v1603_v13 = vor.u32 8388608, %v1602_v20  ;;  %v1626_v17 = vor.u32 %v1625_v55, %v1624_v37  ;;  %vm1627_vm9 = vcmp.lt.s32.totalorder %v8132_v2, 1 }
 0x123   : > { %11863 = vst [vmem:[#allocation28_spill] sm:$0xff] %v8146_v6  ;;  %vm1630_vm10 = vcmp.lt.s32.totalorder %v8132_v2, 4  ;;  %v8150_v53 = vpop.eup %7230  ;;  %v8152_v32 = vshrl.u32 %v1344_v21, 30  ;;  %vm1629_vm11 = vcmp.lt.s32.totalorder %v8132_v2, 3  ;;  %v1635_v36 = vsel %vm1627_vm9, %v1614_v34, %v1617_v38 }
 0x124   : > { %11864 = vst [vmem:[#allocation29_spill] sm:$0xff] %v8150_v53  ;;  %v1636_v9 = vsel %vm1630_vm10, %v1623_v41, 920167782  ;;  %v8159_v33 = vpop.eup %7232  ;;  %v1470_v28 = vmul.f32 %v1469_v0, %v1467_v7  ;;  %v1567_v20 = vsub.s32 4294967266, %v8143_v59  ;;  %v1813_v30 = vadd.s32 1, %v6413_v5 }
 0x125   : > { %11865 = vst [vmem:[#allocation30_spill] sm:$0xff] %v8152_v32  ;;  %11866 = vst [vmem:[#allocation31_spill] sm:$0xff] %v8159_v33  ;;  %v1637_v31 = vsel %vm1629_vm11, %v1620_v56, %v1636_v9  ;;  %v893_v18 = vshll.u32 %v11862_v19, %v8115_v50  ;;  %vm1628_vm12 = vcmp.lt.s32.totalorder %v8132_v2, 2  ;;  %v1639_v25 = vsel %vm1627_vm9, %v1617_v38, %v1620_v56 }
 0x126   : > { %v894_v47 = vshrl.u32 %v11852_v14, %v8146_v6  ;;  %v8174_v7 = vshll.u32 %v11852_v14, %v8115_v50  ;;  %v1638_v58 = vsel %vm1628_vm12, %v1635_v36, %v1637_v31  ;;  %v1640_v21 = vsel %vm1630_vm10, %v1626_v17, 1326507024 }
 0x127   : > { %v6391_v55 = vadd.s32 4294967294, %v1247_v11  ;;  %v1346_v37 = vshll.u32 %v8152_v32, 30  ;;  %v1641_v5 = vsel %vm1629_vm11, %v1623_v41, %v1640_v21  ;;  %v8183_v0 = vshll.u32 %v1603_v13, 8 }
 0x128   : > { %v1471_v9 = vxor.u32 2147483648, %v1470_v28  ;;  %v1568_v4 = vadd.s32 127, %v1567_v20  ;;  %v1642_v53 = vsel %vm1628_vm12, %v1639_v25, %v1641_v5  ;;  %vm1814_vm13 = vcmp.gt.s32.totalorder %v1813_v30, 0 }
 0x129   : > { %v8188_v36 = vmul.u32.u64.low %v8183_v0, %v1638_v58  ;;  %v8189_v31 = vmul.u32.u64.high %v8183_v0, %v1638_v58, %v8188_v36  ;;  %v11867_v17 = vand.u32 2147483647, %v8085_v24  ;;  %v1815_v33 = vsel %vm1814_vm13, %v1813_v30, 0 }
 0x12a   : > { %v1632_v13 = vsel %vm1630_vm10, %v1620_v56, 2102212464  ;;  %v8197_v41 = vmul.u32.u64.low %v8183_v0, %v1642_v53  ;;  %v8198_v20 = vmul.u32.u64.high %v8183_v0, %v1642_v53, %v8197_v41  ;;  %v1817_v21 = vand.u32 31, %v1815_v33 }
 0x12b   : > { %v1810_v11 = vand.u32 8388607, %v11867_v17  ;;  %vm6392_vm14 = vcmp.lt.s32.totalorder %v6391_v55, 0  ;;  %v8201_v25 = vsub.s32 %v8117_v45, %v1346_v37  ;;  %v1611_v58 = vshrl.u32 %v11842_v26, %v8119_v62 }
 0x12c   : > { %v811_v5 = vmul.f32 %v7671_v46, %v705_v51  ;;  %v1547_v30 = vadd.s32 %v7856_v61, %v7862_v52  ;;  %v8208_v17 = vor.u32 %v894_v47, %v893_v18  ;;  %v8212_v56 = vshrl.u32 %v11857_v49, %v8146_v6 }
 0x12d   : > { %v1818_v53 = vsub.s32 32, %v1817_v21  ;;  %v8216_v41 = vsel %vm1389_vm0, %v1471_v9, %v1470_v28  ;;  %v1563_v45 = vsub.s32 32, %v8143_v59  ;;  %v1631_v62 = vsel %vm1627_vm9, %v1611_v58, %v1614_v34 }
 0x12e   : > { %11868 = vst [vmem:[#allocation32_spill] sm:$0xff] %v8208_v17  ;;  %v1633_v51 = vsel %vm1629_vm11, %v1617_v38, %v1632_v13  ;;  %v1564_v61 = vshll.u32 %v8013_v40, %v8143_v59  ;;  %v1569_v52 = vshll.u32 %v1568_v4, 23  ;;  %v8225_v18 = vsel %vm6392_vm14, 0, %v6391_v55 }
 0x12f   : > { %v1811_v47 = vor.u32 8388608, %v1810_v11  ;;  %v1349_v37 = vsub.s32 0, %v8201_v25  ;;  %v1821_v28 = vshrl.u32 %v11850_v42, %v1818_v53  ;;  %v1824_v9 = vshrl.u32 %v11851_v57, %v1818_v53 }
 0x130   : > { %v8231_v27 = vadd.f32 %v811_v5, %v8022_v43  ;;  %v1634_v34 = vsel %vm1628_vm12, %v1631_v62, %v1633_v51  ;;  %v1820_v38 = vshll.u32 %v11842_v26, %v1817_v21  ;;  %v1823_v40 = vshll.u32 %v11850_v42, %v1817_v21 }
 0x131   : > { %v1827_v59 = vshrl.u32 %v11862_v19, %v1818_v53  ;;  %v1816_v4 = vshrl.u32 %v1815_v33, 5  ;;  %v1826_v55 = vshll.u32 %v11851_v57, %v1817_v21  ;;  %v1829_v11 = vshll.u32 %v11862_v19, %v1817_v21 }
 0x132   : > { %11869 = vst [vmem:[#allocation33_spill] sm:$0xff] %v8231_v27  ;;  %v1830_v13 = vshrl.u32 %v11852_v14, %v1818_v53  ;;  %vm1652_vm0 = vc.u32 %v8198_v20, %v8188_v36  ;;  %v1653_v43 = vadd.s32 1, %v8189_v31  ;;  %v1822_v2 = vor.u32 %v1821_v28, %v1820_v38 }
 0x133   : > { %v1825_v58 = vor.u32 %v1824_v9, %v1823_v40  ;;  %v1828_v5 = vor.u32 %v1827_v59, %v1826_v55  ;;  %v1832_v51 = vshll.u32 %v11852_v14, %v1817_v21  ;;  %v1833_v50 = vshrl.u32 %v11857_v49, %v1818_v53 }
 0x134   : > { %v1831_v62 = vor.u32 %v1830_v13, %v1829_v11  ;;  %v1565_v33 = vshrl.u32 %v1547_v30, %v1563_v45  ;;  %v1570_v6 = vor.u32 4788187, %v1569_v52  ;;  %v1255_v24 = vsub.s32 4294967266, %v8225_v18 }
 0x135   : > { %v6394_v3 = vmin.u32 %v1349_v37, %v8201_v25  ;;  %v11870_v60 = vand.u32 2147483647, %v7713_v15  ;;  %v11871_v32 = vmov 0  ;;  %v1650_v28 = vmul.u32 %v8183_v0, %v1634_v34 }
 0x136   : > { %v1834_v9 = vor.u32 %v1833_v50, %v1832_v51  ;;  %vm1835_vm2 = vcmp.lt.s32.totalorder %v1816_v4, 1  ;;  %v1851_v38 = vshll.u32 %v1811_v47, 8  ;;  %v1654_v21 = vsel %vm1652_vm0, %v1653_v43, %v8189_v31 }
 0x137   : > { %vm8250_vm1 = vcmp.le.f32.partialorder %v11870_v60, 0.7853982  ;;  %vm1838_vm3 = vcmp.lt.s32.totalorder %v1816_v4, 4  ;;  %v1843_v30 = vsel %vm1835_vm2, %v1822_v2, %v1825_v58  ;;  %v1702_v45 = vand.u32 2139095040, %v8231_v27 }
 0x138   : > { %v11872_v32 = vsel %vm8250_vm1, 4294967295, %v11871_v32  ;;  %v1819_v60 = vshrl.u32 %v11842_v26, %v1818_v53  ;;  %vm1837_vm4 = vcmp.lt.s32.totalorder %v1816_v4, 3  ;;  %v1840_v52 = vsel %vm1838_vm3, %v1828_v5, 2102212464 }
 0x139   : > { %11873 = vst [vmem:[#allocation34_spill] sm:$0xff] %v11872_v32  ;;  %v1844_v37 = vsel %vm1838_vm3, %v1831_v62, 920167782  ;;  %vm11691_vm5 = vcmp.lt.s32.totalorder %v8113_v10, 4  ;;  %v1351_v50 = vclz %v6394_v3  ;;  %vm1836_vm7 = vcmp.lt.s32.totalorder %v1816_v4, 2 }
 0x13a   : > { %v1845_v0 = vsel %vm1837_vm4, %v1828_v5, %v1844_v37  ;;  %v1847_v47 = vsel %vm1835_vm2, %v1825_v58, %v1828_v5  ;;  %v8264_v34 = vadd.s32 %v1654_v21, %v1650_v28  ;;  %v1839_v31 = vsel %vm1835_vm2, %v1819_v60, %v1822_v2 }
 0x13b   : > { %v1846_v40 = vsel %vm1836_vm7, %v1843_v30, %v1845_v0  ;;  %v1848_v59 = vsel %vm1838_vm3, %v1834_v9, 1326507024  ;;  %v1841_v55 = vsel %vm1837_vm4, %v1825_v58, %v1840_v52  ;;  %v1566_v43 = vor.u32 %v1565_v33, %v1564_v61  ;;  %v713_v58 = vpop.permute.xlu1 %712 }
 0x13c   : > { %v1849_v11 = vsel %vm1837_vm4, %v1831_v62, %v1848_v59  ;;  %v8268_v53 = vmul.u32.u64.low %v1851_v38, %v1846_v40  ;;  %v8269_v13 = vmul.u32.u64.high %v1851_v38, %v1846_v40, %v8268_v53  ;;  %v1256_v51 = vadd.s32 127, %v1255_v24 }
 0x13d   : > { %v1850_v3 = vsel %vm1836_vm7, %v1847_v47, %v1849_v11  ;;  %v1703_v37 = vshrl.u32 %v1702_v45, 23  ;;  %vm1493_vm8 = vcmp.lt.s32.totalorder %v7733_v16, 0  ;;  %v1577_v5 = vsub.s32 4, %v7971_v22 }
 0x13e   : > { %v898_v2 = vor.u32 %v8212_v56, %v8174_v7  ;;  %v8277_v28 = vmul.u32.u64.low %v1851_v38, %v1850_v3  ;;  %v8278_v9 = vmul.u32.u64.high %v1851_v38, %v1850_v3, %v8277_v28  ;;  %v1571_v62 = vand.u32 2147483647, %v1570_v6 }
 0x13f   : > { %v6395_v21 = vadd.s32 4294967294, %v1351_v50  ;;  %v1842_v30 = vsel %vm1836_vm7, %v1839_v31, %v1841_v55  ;;  %v6409_v61 = vadd.s32 4294967169, %v1703_v37  ;;  %v8285_v24 = vsel %vm8250_vm1, %v7713_v15, %v8216_v41 }
 0x140   : > { %v1251_v33 = vsub.s32 32, %v8225_v18  ;;  %v1656_v45 = vadd.s32 536870912, %v8264_v34  ;;  %v1861_v7 = vadd.s32 1, %v8269_v13  ;;  %v1573_v56 = vcvt.s32.f32 %v1566_v43 }
 0x141   : > { %v1257_v60 = vshll.u32 %v1256_v51, 23  ;;  %v1709_v52 = vadd.s32 1, %v6409_v61  ;;  %v813_v6 = vmul.f32 %v7671_v46, %v713_v58  ;;  %v1235_v4 = vadd.s32 %v7963_v23, %v7974_v35 }
 0x142   : > { %v1858_v50 = vmul.u32 %v1851_v38, %v1842_v30  ;;  %vm1860_vm9 = vc.u32 %v8278_v9, %v8268_v53  ;;  %v11646_v41 = vand.u32 2147483647, %v8231_v27  ;;  %v8296_v0 = vmul.f32 %v1573_v56, %v1571_v62 }
 0x143   : > { %vm6396_vm10 = vcmp.lt.s32.totalorder %v6395_v21, 0  ;;  %v1862_v47 = vsel %vm1860_vm9, %v1861_v7, %v8269_v13  ;;  %vm1710_vm11 = vcmp.gt.s32.totalorder %v1709_v52, 0  ;;  %v1253_v31 = vshrl.u32 %v1235_v4, %v1251_v33 }
 0x144   : > { %v8299_v40 = vshrl.u32 %v1656_v45, 30  ;;  %v1863_v59 = vadd.s32 %v1862_v47, %v1858_v50  ;;  %v1711_v55 = vsel %vm1710_vm11, %v1709_v52, 0  ;;  %v8304_v23 = vsel %vm11691_vm5, %v8208_v17, 920167782 }
 0x145   : > { %11874 = vst [vmem:[#allocation35_spill] sm:$0xff] %v8304_v23  ;;  %v1252_v35 = vshll.u32 %v8079_v12, %v8225_v18  ;;  %v8308_v38 = vor.u32 4788187, %v1257_v60  ;;  %v8311_v11 = vadd.f32 %v813_v6, %v8097_v48  ;;  %v8313_v13 = vsel %vm6396_vm10, 0, %v6395_v21 }
 0x146   : > { %v1864_v43 = vadd.s32 536870912, %v1863_v59  ;;  %v1706_v51 = vand.u32 8388607, %v11646_v41  ;;  %v1713_v3 = vand.u32 31, %v1711_v55  ;;  %7234 = vcosq.f32 %v8285_v24 }
 0x147   : > { %11875 = vst [vmem:[#allocation36_spill] sm:$0xff] %v8311_v11  ;;  %v8321_v37 = vsel %vm1493_vm8, %v1577_v5, %v7971_v22  ;;  %v8325_v12 = vsel %vm11691_vm5, %v898_v2, 1326507024  ;;  %v614_v48 = vmul.f32 %v7662_v39, %v8010_v29  ;;  %v1575_v18 = vxor.u32 2147483648, %v8296_v0 }
 0x148   : > { %11876 = vst [vmem:[#allocation37_spill] sm:$0xff] %v8321_v37  ;;  %11877 = vst [vmem:[#allocation38_spill] sm:$0xff] %v8325_v12  ;;  %v1254_v28 = vor.u32 %v1253_v31, %v1252_v35  ;;  %v1658_v58 = vshll.u32 %v8299_v40, 30  ;;  %v1714_v62 = vsub.s32 32, %v1713_v3  ;;  %v1259_v21 = vand.u32 2147483647, %v8308_v38 }
 0x149   : > { %v1359_v30 = vsub.s32 4294967266, %v8313_v13  ;;  %v1712_v61 = vshrl.u32 %v1711_v55, 5  ;;  %v1910_v22 = vand.u32 2139095040, %v8311_v11  ;;  %v8334_v5 = vshrl.u32 %v1864_v43, 30 }
 0x14a   : > { %v1707_v2 = vor.u32 8388608, %v1706_v51  ;;  %v1716_v33 = vshll.u32 %v11842_v26, %v1713_v3  ;;  %v1717_v29 = vshrl.u32 %v11850_v42, %v1714_v62  ;;  %v1719_v45 = vshll.u32 %v11850_v42, %v1713_v3 }
 0x14b   : > { %v1720_v7 = vshrl.u32 %v11851_v57, %v1714_v62  ;;  %v1722_v56 = vshll.u32 %v11851_v57, %v1713_v3  ;;  %v1723_v60 = vshrl.u32 %v11862_v19, %v1714_v62  ;;  %v8343_v52 = vsub.s32 %v8264_v34, %v1658_v58 }
 0x14c   : > { %v1718_v6 = vor.u32 %v1717_v29, %v1716_v33  ;;  %v1725_v4 = vshll.u32 %v11862_v19, %v1713_v3  ;;  %v1726_v50 = vshrl.u32 %v11852_v14, %v1714_v62  ;;  %vm1731_vm12 = vcmp.lt.s32.totalorder %v1712_v61, 1 }
 0x14d   : > { %v1721_v47 = vor.u32 %v1720_v7, %v1719_v45  ;;  %v1724_v31 = vor.u32 %v1723_v60, %v1722_v56  ;;  %v1911_v55 = vshrl.u32 %v1910_v22, 23  ;;  %v1866_v35 = vshll.u32 %v8334_v5, 30 }
 0x14e   : > { %v1727_v38 = vor.u32 %v1726_v50, %v1725_v4  ;;  %v1728_v43 = vshll.u32 %v11852_v14, %v1713_v3  ;;  %v1729_v51 = vshrl.u32 %v11857_v49, %v1714_v62  ;;  %v1715_v41 = vshrl.u32 %v11842_v26, %v1714_v62 }
 0x14f   : > { %vm1734_vm13 = vcmp.lt.s32.totalorder %v1712_v61, 4  ;;  %v1739_v34 = vsel %vm1731_vm12, %v1718_v6, %v1721_v47  ;;  %v1747_v58 = vshll.u32 %v1707_v2, 8  ;;  %vm1733_vm14 = vcmp.lt.s32.totalorder %v1712_v61, 3 }
 0x150   : > { %v1730_v33 = vor.u32 %v1729_v51, %v1728_v43  ;;  %v1736_v29 = vsel %vm1734_vm13, %v1724_v31, 2102212464  ;;  %v1740_v45 = vsel %vm1734_vm13, %v1727_v38, 920167782  ;;  %v8354_v22 = vpop.eup %7234  ;;  %v11879_v7 = vand.u32 2147483647, %v7733_v16 }
 0x151   : > { %11878 = vst [vmem:[#allocation39_spill] sm:$0xff] %v8354_v22  ;;  %v11880_v3 = vmov 0  ;;  %vm1732_vm2 = vcmp.lt.s32.totalorder %v1712_v61, 2  ;;  %v1741_v62 = vsel %vm1733_vm14, %v1724_v31, %v1740_v45  ;;  %v1743_v56 = vsel %vm1731_vm12, %v1721_v47, %v1724_v31 }
 0x152   : > { %vm8358_vm0 = vcmp.le.f32.partialorder %v11879_v7, 0.7853982  ;;  %v6417_v60 = vadd.s32 4294967169, %v1911_v55  ;;  %v8363_v2 = vsub.s32 %v1863_v59, %v1866_v35  ;;  %v1735_v4 = vsel %vm1731_vm12, %v1715_v41, %v1718_v6 }
 0x153   : > { %v11881_v3 = vsel %vm8358_vm0, 4294967295, %v11880_v3  ;;  %v1742_v50 = vsel %vm1732_vm2, %v1739_v34, %v1741_v62  ;;  %v1744_v43 = vsel %vm1734_vm13, %v1730_v33, 1326507024  ;;  %v1737_v51 = vsel %vm1733_vm14, %v1721_v47, %v1736_v29 }
 0x154   : > { %11882 = vst [vmem:[#allocation40_spill] sm:$0xff] %v11881_v3  ;;  %v1745_v15 = vsel %vm1733_vm14, %v1727_v38, %v1744_v43  ;;  %v8368_v37 = vmul.u32.u64.low %v1747_v58, %v1742_v50  ;;  %v8369_v7 = vmul.u32.u64.high %v1747_v58, %v1742_v50, %v8368_v37  ;;  %v1261_v22 = vcvt.s32.f32 %v1254_v28 }
 0x155   : > { %v1360_v32 = vadd.s32 127, %v1359_v30  ;;  %v1661_v45 = vsub.s32 0, %v8343_v52  ;;  %v1746_v31 = vsel %vm1732_vm2, %v1743_v56, %v1745_v15  ;;  %7236 = vsinq.f32 %v8285_v24 }
 0x156   : > { %v8375_v59 = vmul.u32.u64.low %v1747_v58, %v1746_v31  ;;  %v8376_v41 = vmul.u32.u64.high %v1747_v58, %v1746_v31, %v8375_v59  ;;  %v1917_v6 = vadd.s32 1, %v6417_v60  ;;  %v1576_v47 = vsel %vm1493_vm8, %v1575_v18, %v8296_v0 }
 0x157   : > { %v1262_v55 = vmul.f32 %v1261_v22, %v1259_v21  ;;  %v8382_v35 = vadd.f32 %v7668_v44, %v614_v48  ;;  %v1738_v28 = vsel %vm1732_vm2, %v1735_v4, %v1737_v51  ;;  %v1355_v30 = vsub.s32 32, %v8313_v13 }
 0x158   : > { %v1869_v15 = vsub.s32 0, %v8363_v2  ;;  %v1757_v24 = vadd.s32 1, %v8369_v7  ;;  %vm1918_vm3 = vcmp.gt.s32.totalorder %v1917_v6, 0  ;;  %vm1181_vm4 = vcmp.lt.s32.totalorder %v7814_v54, 0 }
 0x159   : > { %v1361_v38 = vshll.u32 %v1360_v32, 23  ;;  %v6406_v34 = vmin.u32 %v1661_v45, %v8343_v52  ;;  %v11650_v0 = vand.u32 2147483647, %v8311_v11  ;;  %v1919_v18 = vsel %vm1918_vm3, %v1917_v6, 0 }
 0x15a   : > { %v1754_v21 = vmul.u32 %v1747_v58, %v1738_v28  ;;  %vm1756_vm7 = vc.u32 %v8376_v41, %v8368_v37  ;;  %v1921_v61 = vand.u32 31, %v1919_v18  ;;  %v8397_v33 = vsel %vm8358_vm0, %v7733_v16, %v1576_v47 }
 0x15b   : > { %v1263_v29 = vxor.u32 2147483648, %v1262_v55  ;;  %v1339_v32 = vadd.s32 %v8072_v8, %v8082_v1  ;;  %v1758_v22 = vsel %vm1756_vm7, %v1757_v24, %v8369_v7  ;;  %v1356_v62 = vshll.u32 %v8201_v25, %v8313_v13  ;;  %v717_v24 = vpop.permute.xlu0 %716 }
 0x15c   : > { %v6414_v58 = vmin.u32 %v1869_v15, %v8363_v2  ;;  %v8405_v56 = vadd.s32 %v1758_v22, %v1754_v21  ;;  %v1922_v60 = vsub.s32 32, %v1921_v61  ;;  %v8407_v50 = vor.u32 4788187, %v1361_v38 }
 0x15d   : > { %v1357_v4 = vshrl.u32 %v1339_v32, %v1355_v30  ;;  %v1663_v43 = vclz %v6406_v34  ;;  %v1914_v51 = vand.u32 8388607, %v11650_v0  ;;  %v1924_v45 = vshll.u32 %v11842_v26, %v1921_v61  ;;  %v11884_v0 = vld [vmem:[#allocation30_spill] sm:$0xff] }
 0x15e   : > { %v1925_v8 = vshrl.u32 %v11850_v42, %v1922_v60  ;;  %v1927_v1 = vshll.u32 %v11850_v42, %v1921_v61  ;;  %v1928_v25 = vshrl.u32 %v11851_v57, %v1922_v60  ;;  %v1760_v13 = vadd.s32 536870912, %v8405_v56 }
 0x15f   : > { %v1931_v7 = vshrl.u32 %v11862_v19, %v1922_v60  ;;  %v1933_v31 = vshll.u32 %v11862_v19, %v1921_v61  ;;  %v1934_v59 = vshrl.u32 %v11852_v14, %v1922_v60  ;;  %v8419_v6 = vpop.eup %7236  ;;  %v1871_v47 = vclz %v6414_v58 }
 0x160   : > { %11883 = vst [vmem:[#allocation41_spill] sm:$0xff] %v8419_v6  ;;  %v8421_v28 = vshrl.u32 %v1919_v18, 5  ;;  %v1926_v30 = vor.u32 %v1925_v8, %v1924_v45  ;;  %v1930_v15 = vshll.u32 %v11851_v57, %v1921_v61  ;;  %v1929_v38 = vor.u32 %v1928_v25, %v1927_v1 }
 0x161   : > { %v1935_v34 = vor.u32 %v1934_v59, %v1933_v31  ;;  %v1936_v21 = vshll.u32 %v11852_v14, %v1921_v61  ;;  %v1937_v32 = vshrl.u32 %v11857_v49, %v1922_v60  ;;  %v1264_v22 = vsel %vm1181_vm4, %v1263_v29, %v1262_v55 }
 0x162   : > { %v1369_v48 = vsub.s32 4, %v11884_v0  ;;  %v1915_v16 = vor.u32 8388608, %v1914_v51  ;;  %v1932_v3 = vor.u32 %v1931_v7, %v1930_v15  ;;  %v1358_v58 = vor.u32 %v1357_v4, %v1356_v62  ;;  %v11889_v7 = vld [vmem:[#allocation16_spill] sm:$0xff] }
 0x163   : > { %v8429_v18 = vshrl.u32 %v1760_v13, 30  ;;  %v1938_v45 = vor.u32 %v1937_v32, %v1936_v21  ;;  %v814_v8 = vmul.f32 %v7671_v46, %v717_v24  ;;  %v6407_v6 = vadd.s32 4294967294, %v1663_v43  ;;  %v502_v43 = vpop.permute.xlu1 %501 }
 0x164   : > { %v6415_v1 = vadd.s32 4294967294, %v1871_v47  ;;  %vm1939_vm8 = vcmp.lt.s32.totalorder %v8421_v28, 1  ;;  %vm1942_vm9 = vcmp.lt.s32.totalorder %v8421_v28, 4  ;;  %v11885_v61 = vand.u32 2147483647, %v7814_v54 }
 0x165   : > { %v11886_v55 = vmov 0  ;;  %v1363_v29 = vand.u32 2147483647, %v8407_v50  ;;  %vm1941_vm11 = vcmp.lt.s32.totalorder %v8421_v28, 3  ;;  %v1947_v62 = vsel %vm1939_vm8, %v1926_v30, %v1929_v38 }
 0x166   : > { %vm8436_vm10 = vcmp.le.f32.partialorder %v11885_v61, 0.7853982  ;;  %v1948_v4 = vsel %vm1942_vm9, %v1935_v34, 920167782  ;;  %vm1940_vm12 = vcmp.lt.s32.totalorder %v8421_v28, 2  ;;  %v1951_v25 = vsel %vm1939_vm8, %v1929_v38, %v1932_v3 }
 0x167   : > { %v11887_v55 = vsel %vm8436_vm10, 4294967295, %v11886_v55  ;;  %v1949_v51 = vsel %vm1941_vm11, %v1932_v3, %v1948_v4  ;;  %v1955_v13 = vshll.u32 %v1915_v16, 8  ;;  %vm1285_vm13 = vcmp.lt.s32.totalorder %v11889_v7, 0 }
 0x168   : > { %11888 = vst [vmem:[#allocation30_spill] sm:$0xff] %v11887_v55  ;;  %v1762_v50 = vshll.u32 %v8429_v18, 30  ;;  %v1950_v31 = vsel %vm1940_vm12, %v1947_v62, %v1949_v51  ;;  %v1952_v59 = vsel %vm1942_vm9, %v1938_v45, 1326507024  ;;  %v8458_v47 = vadd.f32 %v814_v8, %v8382_v35  ;;  %v721_v45 = vpop.permute.xlu0 %720 }
 0x169   : > { %vm6408_vm14 = vcmp.lt.s32.totalorder %v6407_v6, 0  ;;  %vm6416_vm2 = vcmp.lt.s32.totalorder %v6415_v1, 0  ;;  %v1953_v15 = vsel %vm1941_vm11, %v1935_v34, %v1952_v59  ;;  %v615_v16 = vmul.f32 %v7662_v39, %v502_v43 }
 0x16a   : > { %11890 = vst [vmem:[#allocation42_spill] sm:$0xff] %v8458_v47  ;;  %v1944_v24 = vsel %vm1942_vm9, %v1932_v3, 2102212464  ;;  %v1954_v21 = vsel %vm1940_vm12, %v1951_v25, %v1953_v15  ;;  %v8467_v32 = vmul.u32.u64.low %v1955_v13, %v1950_v31  ;;  %v8468_v61 = vmul.u32.u64.high %v1955_v13, %v1950_v31, %v8467_v32 }
 0x16b   : > { %v1365_v35 = vcvt.s32.f32 %v1358_v58  ;;  %v1923_v8 = vshrl.u32 %v11842_v26, %v1922_v60  ;;  %v8472_v62 = vmul.u32.u64.low %v1955_v13, %v1954_v21  ;;  %v8473_v4 = vmul.u32.u64.high %v1955_v13, %v1954_v21, %v8472_v62 }
 0x16c   : > { %v8475_v34 = vsel %vm6408_vm14, 0, %v6407_v6  ;;  %v8477_v43 = vsel %vm6416_vm2, 0, %v6415_v1  ;;  %v8480_v3 = vsub.s32 %v8405_v56, %v1762_v50  ;;  %v2014_v51 = vand.u32 2139095040, %v8458_v47 }
 0x16d   : > { %v1943_v25 = vsel %vm1939_vm8, %v1923_v8, %v1926_v30  ;;  %v1945_v58 = vsel %vm1941_vm11, %v1929_v38, %v1944_v24  ;;  %v651_v60 = vadd.f32 %v7668_v44, %v615_v16  ;;  %v815_v31 = vmul.f32 %v7671_v46, %v721_v45 }
 0x16e   : > { %v11891_v6 = vsub.s32 4, %v8049_v63  ;;  %v1366_v56 = vmul.f32 %v1365_v35, %v1363_v29  ;;  %v1965_v50 = vadd.s32 1, %v8468_v61  ;;  %v2015_v59 = vshrl.u32 %v2014_v51, 23 }
 0x16f   : > { %7238 = vcosq.f32 %v8397_v33  ;;  %v8501_v30 = vsel %vm8436_vm10, %v7814_v54, %v1264_v22  ;;  %v1671_v38 = vsub.s32 4294967266, %v8475_v34  ;;  %vm1964_vm3 = vc.u32 %v8473_v4, %v8467_v32 }
 0x170   : > { %v8494_v1 = vsel %vm1181_vm4, %v11891_v6, %v8049_v63  ;;  %v1879_v15 = vsub.s32 4294967266, %v8477_v43  ;;  %v1765_v63 = vsub.s32 0, %v8480_v3  ;;  %v1946_v29 = vsel %vm1940_vm12, %v1943_v25, %v1945_v58 }
 0x171   : > { %11892 = vst [vmem:[#allocation43_spill] sm:$0xff] %v8494_v1  ;;  %v6421_v16 = vadd.s32 4294967169, %v2015_v59  ;;  %7240 = vsinq.f32 %v8397_v33  ;;  %v8514_v22 = vsel %vm1285_vm13, %v1369_v48, %v11884_v0  ;;  %v11655_v24 = vand.u32 2147483647, %v8458_v47 }
 0x172   : > { %11893 = vst [vmem:[#allocation44_spill] sm:$0xff] %v8514_v22  ;;  %v8517_v21 = vadd.f32 %v815_v31, %v651_v60  ;;  %7242 = vcosq.f32 %v8501_v30  ;;  %v1367_v45 = vxor.u32 2147483648, %v1366_v56  ;;  %v1966_v35 = vsel %vm1964_vm3, %v1965_v50, %v8468_v61 }
 0x173   : > { %v2021_v8 = vadd.s32 1, %v6421_v16  ;;  %v1651_v28 = vadd.s32 %v8188_v36, %v8198_v20  ;;  %v1667_v33 = vsub.s32 32, %v8475_v34  ;;  %v1672_v62 = vadd.s32 127, %v1671_v38 }
 0x174   : > { %11894 = vst [vmem:[#allocation45_spill] sm:$0xff] %v8517_v21  ;;  %v1962_v51 = vmul.u32 %v1955_v13, %v1946_v29  ;;  %v1875_v0 = vsub.s32 32, %v8477_v43  ;;  %v1880_v48 = vadd.s32 127, %v1879_v15  ;;  %v6410_v25 = vmin.u32 %v1765_v63, %v8480_v3 }
 0x175   : > { %vm2022_vm4 = vcmp.gt.s32.totalorder %v2021_v8, 0  ;;  %v2018_v60 = vand.u32 8388607, %v11655_v24  ;;  %v2118_v31 = vand.u32 2139095040, %v8517_v21  ;;  %v8533_v36 = vsel %vm1285_vm13, %v1367_v45, %v1366_v56 }
 0x176   : > { %v8526_v58 = vadd.s32 %v1966_v35, %v1962_v51  ;;  %v2023_v61 = vsel %vm2022_vm4, %v2021_v8, 0  ;;  %v1859_v13 = vadd.s32 %v8268_v53, %v8278_v9  ;;  %v1668_v50 = vshll.u32 %v8343_v52, %v8475_v34 }
 0x177   : > { %v2025_v6 = vand.u32 31, %v2023_v61  ;;  %v1669_v59 = vshrl.u32 %v1651_v28, %v1667_v33  ;;  %v1673_v38 = vshll.u32 %v1672_v62, 23  ;;  %v1876_v15 = vshll.u32 %v8363_v2, %v8477_v43 }
 0x178   : > { %v1877_v63 = vshrl.u32 %v1859_v13, %v1875_v0  ;;  %v1881_v29 = vshll.u32 %v1880_v48, 23  ;;  %v1767_v16 = vclz %v6410_v25  ;;  %v1968_v45 = vadd.s32 536870912, %v8526_v58 }
 0x179   : > { %v2026_v35 = vsub.s32 32, %v2025_v6  ;;  %v8542_v56 = vpop.eup %7238  ;;  %v2019_v8 = vor.u32 8388608, %v2018_v60  ;;  %v2028_v53 = vshll.u32 %v11842_v26, %v2025_v6  ;;  %v2119_v9 = vshrl.u32 %v2118_v31, 23 }
 0x17a   : > { %11895 = vst [vmem:[#allocation46_spill] sm:$0xff] %v8542_v56  ;;  %v2031_v52 = vshll.u32 %v11850_v42, %v2025_v6  ;;  %v2024_v28 = vshrl.u32 %v2023_v61, 5  ;;  %v2034_v33 = vshll.u32 %v11851_v57, %v2025_v6  ;;  %v2037_v62 = vshll.u32 %v11862_v19, %v2025_v6 }
 0x17b   : > { %v2029_v51 = vshrl.u32 %v11850_v42, %v2026_v35  ;;  %v2032_v34 = vshrl.u32 %v11851_v57, %v2026_v35  ;;  %v2035_v2 = vshrl.u32 %v11862_v19, %v2026_v35  ;;  %v8550_v43 = vpop.eup %7240  ;;  %v2038_v0 = vshrl.u32 %v11852_v14, %v2026_v35 }
 0x17c   : > { %11896 = vst [vmem:[#allocation47_spill] sm:$0xff] %v8550_v43  ;;  %v8555_v48 = vpop.eup %7242  ;;  %v2040_v31 = vshll.u32 %v11852_v14, %v2025_v6  ;;  %v2041_v13 = vshrl.u32 %v11857_v49, %v2026_v35  ;;  %v1670_v24 = vor.u32 %v1669_v59, %v1668_v50  ;;  %v8559_v20 = vshrl.u32 %v1968_v45, 30  ;;  %v11902_v6 = vld [vmem:[#allocation18_spill] sm:$0xff] }
 0x17d   : > { %11897 = vst [vmem:[#allocation48_spill] sm:$0xff] %v8555_v48  ;;  %v2030_v25 = vor.u32 %v2029_v51, %v2028_v53  ;;  %v2033_v60 = vor.u32 %v2032_v34, %v2031_v52  ;;  %v2036_v56 = vor.u32 %v2035_v2, %v2034_v33  ;;  %v2039_v43 = vor.u32 %v2038_v0, %v2037_v62  ;;  %v8574_v34 = vpop.permute.xlu1 %511 }
 0x17e   : > { %v1674_v61 = vor.u32 4788187, %v1673_v38  ;;  %v1878_v54 = vor.u32 %v1877_v63, %v1876_v15  ;;  %v1882_v22 = vor.u32 4788187, %v1881_v29  ;;  %v2042_v55 = vor.u32 %v2041_v13, %v2040_v31 }
 0x17f   : > { %v6411_v1 = vadd.s32 4294967294, %v1767_v16  ;;  %vm2043_vm7 = vcmp.lt.s32.totalorder %v2024_v28, 1  ;;  %vm2046_vm8 = vcmp.lt.s32.totalorder %v2024_v28, 4  ;;  %v2059_v17 = vshll.u32 %v2019_v8, 8 }
 0x180   : > { %v11898_v53 = vand.u32 2147483647, %v11889_v7  ;;  %v11899_v51 = vmov 0  ;;  %vm1597_vm11 = vcmp.lt.s32.totalorder %v11902_v6, 0  ;;  %vm2045_vm12 = vcmp.lt.s32.totalorder %v2024_v28, 3 }
 0x181   : > { %v2051_v50 = vsel %vm2043_vm7, %v2030_v25, %v2033_v60  ;;  %v2052_v59 = vsel %vm2046_vm8, %v2039_v43, 920167782  ;;  %v6425_v38 = vadd.s32 4294967169, %v2119_v9  ;;  %v1970_v15 = vshll.u32 %v8559_v20, 30 }
 0x182   : > { %vm8563_vm9 = vcmp.le.f32.partialorder %v11898_v53, 0.7853982  ;;  %vm2044_vm13 = vcmp.lt.s32.totalorder %v2024_v28, 2  ;;  %v2048_v63 = vsel %vm2046_vm8, %v2036_v56, 2102212464  ;;  %v2053_v29 = vsel %vm2045_vm12, %v2036_v56, %v2052_v59 }
 0x183   : > { %v11900_v51 = vsel %vm8563_vm9, 4294967295, %v11899_v51  ;;  %v2027_v16 = vshrl.u32 %v11842_v26, %v2026_v35  ;;  %v2054_v45 = vsel %vm2044_vm13, %v2051_v50, %v2053_v29  ;;  %v2055_v8 = vsel %vm2043_vm7, %v2033_v60, %v2036_v56 }
 0x184   : > { %11901 = vst [vmem:[#allocation49_spill] sm:$0xff] %v11900_v51  ;;  %v2056_v52 = vsel %vm2046_vm8, %v2042_v55, 1326507024  ;;  %v8577_v33 = vmul.u32.u64.low %v2059_v17, %v2054_v45  ;;  %v8578_v62 = vmul.u32.u64.high %v2059_v17, %v2054_v45, %v8577_v33  ;;  %v11662_v9 = vand.u32 2147483647, %v8517_v21 }
 0x185   : > { %v2057_v2 = vsel %vm2045_vm12, %v2039_v43, %v2056_v52  ;;  %v2047_v0 = vsel %vm2043_vm7, %v2027_v16, %v2030_v25  ;;  %v2049_v31 = vsel %vm2045_vm12, %v2033_v60, %v2048_v63  ;;  %v2125_v13 = vadd.s32 1, %v6425_v38  ;;  %v517_v38 = vpop.permute.xlu1 %516 }
 0x186   : > { %v2058_v35 = vsel %vm2044_vm13, %v2055_v8, %v2057_v2  ;;  %v1675_v53 = vand.u32 2147483647, %v1674_v61  ;;  %v1677_v56 = vcvt.s32.f32 %v1670_v24  ;;  %vm6412_vm14 = vcmp.lt.s32.totalorder %v6411_v1, 0 }
 0x187   : > { %v8586_v55 = vsub.s32 %v8526_v58, %v1970_v15  ;;  %v1883_v43 = vand.u32 2147483647, %v1882_v22  ;;  %v8588_v50 = vmul.u32.u64.low %v2059_v17, %v2058_v35  ;;  %v8589_v59 = vmul.u32.u64.high %v2059_v17, %v2058_v35, %v8588_v50 }
 0x188   : > { %vm2126_vm2 = vcmp.gt.s32.totalorder %v2125_v13, 0  ;;  %v2050_v29 = vsel %vm2044_vm13, %v2047_v0, %v2049_v31  ;;  %v2069_v25 = vadd.s32 1, %v8578_v62  ;;  %v2122_v60 = vand.u32 8388607, %v11662_v9 }
 0x189   : > { %v2127_v63 = vsel %vm2126_vm2, %v2125_v13, 0  ;;  %7244 = vsinq.f32 %v8501_v30  ;;  %v1885_v24 = vcvt.s32.f32 %v1878_v54  ;;  %v8596_v61 = vsel %vm6412_vm14, 0, %v6411_v1 }
 0x18a   : > { %v2129_v58 = vand.u32 31, %v2127_v63  ;;  %v8602_v22 = vsel %vm8563_vm9, %v11889_v7, %v8533_v36  ;;  %v1678_v28 = vmul.f32 %v1677_v56, %v1675_v53  ;;  %v11903_v15 = vsub.s32 4, %v8299_v40 }
 0x18b   : > { %v1973_v54 = vsub.s32 0, %v8586_v55  ;;  %v8612_v1 = vmul.f32 %v1885_v24, %v1883_v43  ;;  %v2066_v30 = vmul.u32 %v2059_v17, %v2050_v29  ;;  %vm2068_vm3 = vc.u32 %v8589_v59, %v8577_v33 }
 0x18c   : > { %v8609_v16 = vsel %vm1597_vm11, %v11903_v15, %v8299_v40  ;;  %v2130_v45 = vsub.s32 32, %v2129_v58  ;;  %v1775_v36 = vsub.s32 4294967266, %v8596_v61  ;;  %v2070_v8 = vsel %vm2068_vm3, %v2069_v25, %v8578_v62  ;;  %v733_v62 = vpop.permute.xlu0 %732 }
 0x18d   : > { %11904 = vst [vmem:[#allocation50_spill] sm:$0xff] %v8609_v16  ;;  %v2123_v52 = vor.u32 8388608, %v2122_v60  ;;  %v618_v2 = vmul.f32 %v7662_v39, %v517_v38  ;;  %v8619_v0 = vadd.s32 %v2070_v8, %v2066_v30  ;;  %v2132_v40 = vshll.u32 %v11842_v26, %v2129_v58 }
 0x18e   : > { %v2133_v31 = vshrl.u32 %v11850_v42, %v2130_v45  ;;  %v2136_v35 = vshrl.u32 %v11851_v57, %v2130_v45  ;;  %v6418_v17 = vmin.u32 %v1973_v54, %v8586_v55  ;;  %v2135_v13 = vshll.u32 %v11850_v42, %v2129_v58 }
 0x18f   : > { %v2138_v53 = vshll.u32 %v11851_v57, %v2129_v58  ;;  %v2139_v56 = vshrl.u32 %v11862_v19, %v2130_v45  ;;  %v2128_v43 = vshrl.u32 %v2127_v63, 5  ;;  %v2141_v29 = vshll.u32 %v11862_v19, %v2129_v58 }
 0x190   : > { %v2134_v50 = vor.u32 %v2133_v31, %v2132_v40  ;;  %v2142_v25 = vshrl.u32 %v11852_v14, %v2130_v45  ;;  %v2137_v60 = vor.u32 %v2136_v35, %v2135_v13  ;;  %v2144_v38 = vshll.u32 %v11852_v14, %v2129_v58  ;;  %v11905_v40 = vld [vmem:[#allocation24_spill] sm:$0xff] }
 0x191   : > { %v2140_v24 = vor.u32 %v2139_v56, %v2138_v53  ;;  %v2145_v15 = vshrl.u32 %v11857_v49, %v2130_v45  ;;  %v2072_v54 = vadd.s32 536870912, %v8619_v0  ;;  %v654_v8 = vadd.f32 %v7668_v44, %v618_v2 }
 0x192   : > { %v2143_v30 = vor.u32 %v2142_v25, %v2141_v29  ;;  %v818_v9 = vmul.f32 %v7671_v46, %v733_v62  ;;  %7246 = vcosq.f32 %v8602_v22  ;;  %v1679_v63 = vxor.u32 2147483648, %v1678_v28 }
 0x193   : > { %vm1805_vm4 = vcmp.lt.s32.totalorder %v11905_v40, 0  ;;  %v1887_v31 = vxor.u32 2147483648, %v8612_v1  ;;  %v2146_v35 = vor.u32 %v2145_v15, %v2144_v38  ;;  %v8638_v13 = vpop.eup %7244  ;;  %v11907_v58 = vand.u32 2147483647, %v11902_v6 }
 0x194   : > { %11906 = vst [vmem:[#allocation51_spill] sm:$0xff] %v8638_v13  ;;  %v11908_v53 = vmov 0  ;;  %v1776_v56 = vadd.s32 127, %v1775_v36  ;;  %v1975_v2 = vclz %v6418_v17  ;;  %vm2147_vm8 = vcmp.lt.s32.totalorder %v2128_v43, 1  ;;  %v725_v13 = vpop.permute.xlu1 %724 }
 0x195   : > { %vm8642_vm7 = vcmp.le.f32.partialorder %v11907_v58, 0.7853982  ;;  %vm2150_vm12 = vcmp.lt.s32.totalorder %v2128_v43, 4  ;;  %v2155_v29 = vsel %vm2147_vm8, %v2134_v50, %v2137_v60  ;;  %v2163_v16 = vshll.u32 %v2123_v52, 8 }
 0x196   : > { %v11909_v53 = vsel %vm8642_vm7, 4294967295, %v11908_v53  ;;  %v2152_v62 = vsel %vm2150_vm12, %v2140_v24, 2102212464  ;;  %v2156_v25 = vsel %vm2150_vm12, %v2143_v30, 920167782  ;;  %v11912_v38 = vmov 0 }
 0x197   : > { %11910 = vst [vmem:[#allocation52_spill] sm:$0xff] %v11909_v53  ;;  %v11911_v7 = vand.u32 2147483647, %v11905_v40  ;;  %v8653_v15 = vshrl.u32 %v2072_v54, 30  ;;  %v2131_v58 = vshrl.u32 %v11842_v26, %v2130_v45  ;;  %vm2149_vm14 = vcmp.lt.s32.totalorder %v2128_v43, 3 }
 0x198   : > { %v8656_v36 = vadd.f32 %v818_v9, %v654_v8  ;;  %vm2148_vm2 = vcmp.lt.s32.totalorder %v2128_v43, 2  ;;  %v2157_v17 = vsel %vm2149_vm14, %v2140_v24, %v2156_v25  ;;  %v2159_v51 = vsel %vm2147_vm8, %v2137_v60, %v2140_v24 }
 0x199   : > { %vm8649_vm13 = vcmp.le.f32.partialorder %v11911_v7, 0.7853982  ;;  %v2160_v48 = vsel %vm2150_vm12, %v2146_v35, 1326507024  ;;  %v2151_v52 = vsel %vm2147_vm8, %v2131_v58, %v2134_v50  ;;  %v2153_v12 = vsel %vm2149_vm14, %v2137_v60, %v2152_v62 }
 0x19a   : > { %v11913_v38 = vsel %vm8649_vm13, 4294967295, %v11912_v38  ;;  %11915 = vst [vmem:[#allocation54_spill] sm:$0xff] %v8656_v36  ;;  %v2158_v7 = vsel %vm2148_vm2, %v2155_v29, %v2157_v17  ;;  %v2161_v23 = vsel %vm2149_vm14, %v2143_v30, %v2160_v48  ;;  %v1680_v54 = vsel %vm1597_vm11, %v1679_v63, %v1678_v28 }
 0x19b   : > { %11914 = vst [vmem:[#allocation53_spill] sm:$0xff] %v11913_v38  ;;  %v2162_v45 = vsel %vm2148_vm2, %v2159_v51, %v2161_v23  ;;  %v8664_v10 = vmul.u32.u64.low %v2163_v16, %v2158_v7  ;;  %v8665_v9 = vmul.u32.u64.high %v2163_v16, %v2158_v7, %v8664_v10  ;;  %v1771_v8 = vsub.s32 32, %v8596_v61 }
 0x19c   : > { %v8669_v24 = vmul.u32.u64.low %v2163_v16, %v2162_v45  ;;  %v8670_v35 = vmul.u32.u64.high %v2163_v16, %v2162_v45, %v8669_v24  ;;  %v816_v50 = vmul.f32 %v7671_v46, %v725_v13  ;;  %7248 = vsinq.f32 %v8602_v22  ;;  %v8683_v13 = vpop.eup %7246 }
 0x19d   : > { %v1777_v60 = vshll.u32 %v1776_v56, 23  ;;  %v2154_v48 = vsel %vm2148_vm2, %v2151_v52, %v2153_v12  ;;  %v2430_v28 = vand.u32 2139095040, %v8656_v36  ;;  %v1888_v23 = vsel %vm1805_vm4, %v1887_v31, %v8612_v1  ;;  %11916 = vst [vmem:[#allocation55_spill] sm:$0xff] %v8683_v13 }
 0x19e   : > { %vm1701_vm11 = vcmp.lt.s32.totalorder %v8231_v27, 0  ;;  %v1755_v51 = vadd.s32 %v8368_v37, %v8376_v41  ;;  %v6419_v30 = vadd.s32 4294967294, %v1975_v2  ;;  %v2074_v63 = vshll.u32 %v8653_v15, 30  ;;  %v11917_v37 = vld [vmem:[#allocation10_spill] sm:$0xff] }
 0x19f   : > { %v1683_v12 = vsel %vm8642_vm7, %v11902_v6, %v1680_v54  ;;  %v1889_v22 = vsub.s32 4, %v8334_v5  ;;  %v2173_v43 = vadd.s32 1, %v8665_v9  ;;  %v2431_v56 = vshrl.u32 %v2430_v28, 23 }
 0x1a0   : > { %v1773_v1 = vshrl.u32 %v1755_v51, %v1771_v8  ;;  %v2170_v31 = vmul.u32 %v2163_v16, %v2154_v48  ;;  %vm2172_vm3 = vc.u32 %v8670_v35, %v8664_v10  ;;  %v8693_v41 = vadd.f32 %v816_v50, %v11917_v37 }
 0x1a1   : > { %v1891_v2 = vsel %vm8649_vm13, %v11905_v40, %v1888_v23  ;;  %v1778_v62 = vor.u32 4788187, %v1777_v60  ;;  %v2174_v29 = vsel %vm2172_vm3, %v2173_v43, %v8665_v9  ;;  %v6437_v25 = vadd.s32 4294967169, %v2431_v56 }
 0x1a2   : > { %11918 = vst [vmem:[#allocation10_spill] sm:$0xff] %v8693_v41  ;;  %v1772_v58 = vshll.u32 %v8480_v3, %v8596_v61  ;;  %vm6420_vm8 = vcmp.lt.s32.totalorder %v6419_v30, 0  ;;  %v8702_v16 = vsub.s32 %v8619_v0, %v2074_v63  ;;  %v2175_v17 = vadd.s32 %v2174_v29, %v2170_v31 }
 0x1a3   : > { %7250 = vcosq.f32 %v1683_v12  ;;  %v8707_v52 = vsel %vm1805_vm4, %v1889_v22, %v8334_v5  ;;  %v1785_v7 = vsub.s32 4, %v8429_v18  ;;  %v2437_v54 = vadd.s32 1, %v6437_v25  ;;  %v7195_v22 = vld [vmem:[%s8729_s22] sm:$0xff]  }
 0x1a4   : > { %11919 = vst [vmem:[#allocation56_spill] sm:$0xff] %v8707_v52  ;;  %7252 = vsinq.f32 %v1683_v12  ;;  %v1774_v45 = vor.u32 %v1773_v1, %v1772_v58  ;;  %v2176_v9 = vadd.s32 536870912, %v2175_v17  ;;  %v2222_v3 = vand.u32 2139095040, %v8693_v41  ;;  %6777 = vmatprep.subr.bf16.mxu0 %v7195_v22  ;;  %7007 = vmatprep.subr.bf16.mxu1 %v7195_v22 }
 0x1a5   : > { %7254 = vcosq.f32 %v1891_v2  ;;  %v1779_v61 = vand.u32 2147483647, %v1778_v62  ;;  %v8711_v8 = vsel %vm6420_vm8, 0, %v6419_v30  ;;  %vm2438_vm12 = vcmp.gt.s32.totalorder %v2437_v54, 0  ;;  %6778 = vmatpush3.bf16.msra.mxu0 %v7195_v22  ;;  %7010 = vmatpush3.bf16.msra.mxu1 %v7195_v22 }
 0x1a6   : > { %v2077_v0 = vsub.s32 0, %v8702_v16  ;;  %v8715_v24 = vshrl.u32 %v2176_v9, 30  ;;  %v11669_v5 = vand.u32 2147483647, %v8656_v36  ;;  %v2439_v50 = vsel %vm2438_vm12, %v2437_v54, 0  ;;  %v8718_v60 = vpop.eup %7248 }
 0x1a7   : > { %11920 = vst [vmem:[#allocation57_spill] sm:$0xff] %v8718_v60  ;;  %7256 = vsinq.f32 %v1891_v2  ;;  %v8723_v48 = vsel %vm1701_vm11, %v1785_v7, %v8429_v18  ;;  %v2441_v23 = vand.u32 31, %v2439_v50  ;;  %v1781_v51 = vcvt.s32.f32 %v1774_v45 }
 0x1a8   : > { %11921 = vst [vmem:[#allocation58_spill] sm:$0xff] %v8723_v48  ;;  %v1979_v30 = vsub.s32 32, %v8711_v8  ;;  %v1983_v63 = vsub.s32 4294967266, %v8711_v8  ;;  %v2223_v12 = vshrl.u32 %v2222_v3, 23  ;;  %v1963_v18 = vadd.s32 %v8467_v32, %v8473_v4 }
 0x1a9   : > { %v2178_v43 = vshll.u32 %v8715_v24, 30  ;;  %v8739_v56 = vmul.f32 %v7662_v39, %v8574_v34  ;;  %v2442_v1 = vsub.s32 32, %v2441_v23  ;;  %v8741_v31 = vmul.f32 %v1781_v51, %v1779_v61 }
 0x1aa   : > { %v6422_v37 = vmin.u32 %v2077_v0, %v8702_v16  ;;  %v2434_v2 = vand.u32 8388607, %v11669_v5  ;;  %v2444_v62 = vshll.u32 %v11842_v26, %v2441_v23  ;;  %v2447_v4 = vshll.u32 %v11850_v42, %v2441_v23 }
 0x1ab   : > { %v2445_v32 = vshrl.u32 %v11850_v42, %v2442_v1  ;;  %v2448_v29 = vshrl.u32 %v11851_v57, %v2442_v1  ;;  %v2451_v34 = vshrl.u32 %v11862_v19, %v2442_v1  ;;  %v2440_v25 = vshrl.u32 %v2439_v50, 5 }
 0x1ac   : > { %v2450_v58 = vshll.u32 %v11851_v57, %v2441_v23  ;;  %v2453_v7 = vshll.u32 %v11862_v19, %v2441_v23  ;;  %v2454_v54 = vshrl.u32 %v11852_v14, %v2442_v1  ;;  %v8756_v9 = vsub.s32 %v2175_v17, %v2178_v43 }
 0x1ad   : > { %v8754_v45 = vpop.eup %7250  ;;  %v2446_v3 = vor.u32 %v2445_v32, %v2444_v62  ;;  %v2449_v61 = vor.u32 %v2448_v29, %v2447_v4  ;;  %v6429_v0 = vadd.s32 4294967169, %v2223_v12  ;;  %v2456_v50 = vshll.u32 %v11852_v14, %v2441_v23 }
 0x1ae   : > { %11922 = vst [vmem:[#allocation59_spill] sm:$0xff] %v8754_v45  ;;  %v8758_v51 = vpop.eup %7252  ;;  %v2452_v5 = vor.u32 %v2451_v34, %v2450_v58  ;;  %v2455_v28 = vor.u32 %v2454_v54, %v2453_v7  ;;  %v2457_v40 = vshrl.u32 %v11857_v49, %v2442_v1  ;;  %v1980_v22 = vshll.u32 %v8586_v55, %v8711_v8 }
 0x1af   : > { %11923 = vst [vmem:[#allocation60_spill] sm:$0xff] %v8758_v51  ;;  %v8762_v38 = vpop.eup %7254  ;;  %v1981_v52 = vshrl.u32 %v1963_v18, %v1979_v30  ;;  %v1984_v48 = vadd.s32 127, %v1983_v63  ;;  %v2079_v17 = vclz %v6422_v37  ;;  %vm1909_vm4 = vcmp.lt.s32.totalorder %v8311_v11, 0  ;;  %v729_v63 = vpop.permute.xlu1 %728 }
 0x1b0   : > { %11924 = vst [vmem:[#allocation61_spill] sm:$0xff] %v8762_v38  ;;  %v2435_v43 = vor.u32 8388608, %v2434_v2  ;;  %v2458_v12 = vor.u32 %v2457_v40, %v2456_v50  ;;  %vm2459_vm14 = vcmp.lt.s32.totalorder %v2440_v25, 1  ;;  %vm2462_vm2 = vcmp.lt.s32.totalorder %v2440_v25, 4 }
 0x1b1   : > { %v8767_v62 = vpop.eup %7256  ;;  %vm2461_vm3 = vcmp.lt.s32.totalorder %v2440_v25, 3  ;;  %v2467_v23 = vsel %vm2459_vm14, %v2446_v3, %v2449_v61  ;;  %v2468_v32 = vsel %vm2462_vm2, %v2455_v28, 920167782  ;;  %v2229_v4 = vadd.s32 1, %v6429_v0 }
 0x1b2   : > { %11925 = vst [vmem:[#allocation62_spill] sm:$0xff] %v8767_v62  ;;  %v2181_v29 = vsub.s32 0, %v8756_v9  ;;  %v2469_v55 = vsel %vm2461_vm3, %v2452_v5, %v2468_v32  ;;  %v2471_v8 = vsel %vm2459_vm14, %v2449_v61, %v2452_v5  ;;  %v1985_v18 = vshll.u32 %v1984_v48, 23 }
 0x1b3   : > { %vm2460_vm8 = vcmp.lt.s32.totalorder %v2440_v25, 2  ;;  %v2464_v40 = vsel %vm2462_vm2, %v2452_v5, 2102212464  ;;  %v2472_v37 = vsel %vm2462_vm2, %v2458_v12, 1326507024  ;;  %v6423_v2 = vadd.s32 4294967294, %v2079_v17 }
 0x1b4   : > { %v2443_v34 = vshrl.u32 %v11842_v26, %v2442_v1  ;;  %v2470_v58 = vsel %vm2460_vm8, %v2467_v23, %v2469_v55  ;;  %v2473_v7 = vsel %vm2461_vm3, %v2455_v28, %v2472_v37  ;;  %v2475_v0 = vshll.u32 %v2435_v43, 8 }
 0x1b5   : > { %v2474_v54 = vsel %vm2460_vm8, %v2471_v8, %v2473_v7  ;;  %vm2230_vm12 = vcmp.gt.s32.totalorder %v2229_v4, 0  ;;  %v817_v50 = vmul.f32 %v7671_v46, %v729_v63  ;;  %v6426_v32 = vmin.u32 %v2181_v29, %v8756_v9 }
 0x1b6   : > { %v2463_v48 = vsel %vm2459_vm14, %v2443_v34, %v2446_v3  ;;  %v2465_v5 = vsel %vm2461_vm3, %v2449_v61, %v2464_v40  ;;  %v2231_v12 = vsel %vm2230_vm12, %v2229_v4, 0  ;;  %vm6424_vm2 = vcmp.lt.s32.totalorder %v6423_v2, 0 }
 0x1b7   : > { %v8782_v17 = vmul.u32.u64.low %v2475_v0, %v2474_v54  ;;  %v8783_v30 = vmul.u32.u64.high %v2475_v0, %v2474_v54, %v8782_v17  ;;  %v8785_v1 = vmul.u32.u64.low %v2475_v0, %v2470_v58  ;;  %v8786_v23 = vmul.u32.u64.high %v2475_v0, %v2470_v58, %v8785_v1 }
 0x1b8   : > { %v653_v28 = vadd.f32 %v7668_v44, %v8739_v56  ;;  %v11926_v43 = vand.u32 2147483647, %v8693_v41  ;;  %v2233_v55 = vand.u32 31, %v2231_v12  ;;  %v8794_v61 = vor.u32 %v1981_v52, %v1980_v22 }
 0x1b9   : > { %v11927_v4 = vsub.s32 4, %v8559_v20  ;;  %v2466_v63 = vsel %vm2460_vm8, %v2463_v48, %v2465_v5  ;;  %v8804_v40 = vor.u32 4788187, %v1985_v18  ;;  %v8808_v56 = vadd.s32 %v8577_v33, %v8589_v59 }
 0x1ba   : > { %v2226_v29 = vand.u32 8388607, %v11926_v43  ;;  %v2183_v37 = vclz %v6426_v32  ;;  %v2234_v34 = vsub.s32 32, %v2233_v55  ;;  %v8810_v58 = vsel %vm6424_vm2, 0, %v6423_v2 }
 0x1bb   : > { %v8801_v8 = vsel %vm1909_vm4, %v11927_v4, %v8559_v20  ;;  %vm2484_vm14 = vc.u32 %v8783_v30, %v8785_v1  ;;  %v2485_v52 = vadd.s32 1, %v8786_v23  ;;  %v8815_v22 = vadd.f32 %v817_v50, %v653_v28  ;;  %v7196_v20 = vld [vmem:[%s8729_s22 + $0x8] sm:$0xff]  }
 0x1bc   : > { %11928 = vst [vmem:[#allocation63_spill] sm:$0xff] %v8801_v8  ;;  %v2482_v25 = vmul.u32 %v2475_v0, %v2466_v63  ;;  %v2227_v7 = vor.u32 8388608, %v2226_v29  ;;  %v2236_v18 = vshll.u32 %v11842_v26, %v2233_v55  ;;  %v2237_v54 = vshrl.u32 %v11850_v42, %v2234_v34  ;;  %6779 = vmatprep.subr.bf16.mxu0 %v7196_v20 }
 0x1bd   : > { %11929 = vst [vmem:[#allocation64_spill] sm:$0xff] %v8815_v22  ;;  %v2486_v33 = vsel %vm2484_vm14, %v2485_v52, %v8786_v23  ;;  %v2239_v59 = vshll.u32 %v11850_v42, %v2233_v55  ;;  %v2240_v2 = vshrl.u32 %v11851_v57, %v2234_v34  ;;  %v2243_v32 = vshrl.u32 %v11862_v19, %v2234_v34 }
 0x1be   : > { %v6427_v48 = vadd.s32 4294967294, %v2183_v37  ;;  %v2487_v5 = vadd.s32 %v2486_v33, %v2482_v25  ;;  %v2232_v50 = vshrl.u32 %v2231_v12, 5  ;;  %v2242_v17 = vshll.u32 %v11851_v57, %v2233_v55  ;;  %6780 = vmatpush3.bf16.msra.mxu0 %v7196_v20  ;;  %7008 = vmatprep.subr.bf16.mxu1 %v7196_v20 }
 0x1bf   : > { %v2238_v0 = vor.u32 %v2237_v54, %v2236_v18  ;;  %v2241_v28 = vor.u32 %v2240_v2, %v2239_v59  ;;  %v2245_v43 = vshll.u32 %v11862_v19, %v2233_v55  ;;  %v2246_v23 = vshrl.u32 %v11852_v14, %v2234_v34  ;;  %7011 = vmatpush3.bf16.msra.mxu1 %v7196_v20 }
 0x1c0   : > { %v2488_v29 = vadd.s32 536870912, %v2487_v5  ;;  %v2244_v4 = vor.u32 %v2243_v32, %v2242_v17  ;;  %v2248_v63 = vshll.u32 %v11852_v14, %v2233_v55  ;;  %v2249_v52 = vshrl.u32 %v11857_v49, %v2234_v34 }
 0x1c1   : > { %v2083_v37 = vsub.s32 32, %v8810_v58  ;;  %v2087_v12 = vsub.s32 4294967266, %v8810_v58  ;;  %v2247_v25 = vor.u32 %v2246_v23, %v2245_v43  ;;  %v2267_v33 = vshll.u32 %v2227_v7, 8  ;;  %v522_v23 = vpop.permute.xlu1 %521 }
 0x1c2   : > { %v8831_v3 = vshrl.u32 %v2488_v29, 30  ;;  %v2250_v18 = vor.u32 %v2249_v52, %v2248_v63  ;;  %vm2251_vm3 = vcmp.lt.s32.totalorder %v2232_v50, 1  ;;  %vm2254_vm8 = vcmp.lt.s32.totalorder %v2232_v50, 4 }
 0x1c3   : > { %vm6428_vm12 = vcmp.lt.s32.totalorder %v6427_v48, 0  ;;  %v2259_v20 = vsel %vm2251_vm3, %v2238_v0, %v2241_v28  ;;  %v2260_v54 = vsel %vm2254_vm8, %v2247_v25, 920167782  ;;  %v2326_v59 = vand.u32 2139095040, %v8815_v22 }
 0x1c4   : > { %v2490_v55 = vshll.u32 %v8831_v3, 30  ;;  %v2235_v2 = vshrl.u32 %v11842_v26, %v2234_v34  ;;  %vm2253_vm2 = vcmp.lt.s32.totalorder %v2232_v50, 3  ;;  %v2256_v32 = vsel %vm2254_vm8, %v2244_v4, 2102212464 }
 0x1c5   : > { %vm2252_vm14 = vcmp.lt.s32.totalorder %v2232_v50, 2  ;;  %v2261_v17 = vsel %vm2253_vm2, %v2244_v4, %v2260_v54  ;;  %v2263_v7 = vsel %vm2251_vm3, %v2241_v28, %v2244_v4  ;;  %v2264_v43 = vsel %vm2254_vm8, %v2250_v18, 1326507024 }
 0x1c6   : > { %v2088_v29 = vadd.s32 127, %v2087_v12  ;;  %v8838_v63 = vsub.s32 %v2487_v5, %v2490_v55  ;;  %v2255_v52 = vsel %vm2251_vm3, %v2235_v2, %v2238_v0  ;;  %v2262_v8 = vsel %vm2252_vm14, %v2259_v20, %v2261_v17  ;;  %v737_v2 = vpop.permute.xlu0 %736 }
 0x1c7   : > { %v2257_v38 = vsel %vm2253_vm2, %v2241_v28, %v2256_v32  ;;  %v2265_v62 = vsel %vm2253_vm2, %v2247_v25, %v2264_v43  ;;  %v8842_v6 = vmul.u32.u64.low %v2267_v33, %v2262_v8  ;;  %v8843_v45 = vmul.u32.u64.high %v2267_v33, %v2262_v8, %v8842_v6 }
 0x1c8   : > { %v2186_v34 = vsel %vm6428_vm12, 0, %v6427_v48  ;;  %v2493_v54 = vsub.s32 0, %v8838_v63  ;;  %v2266_v4 = vsel %vm2252_vm14, %v2263_v7, %v2265_v62  ;;  %v2327_v18 = vshrl.u32 %v2326_v59, 23 }
 0x1c9   : > { %v1987_v5 = vand.u32 2147483647, %v8804_v40  ;;  %v2085_v12 = vshrl.u32 %v8808_v56, %v2083_v37  ;;  %v8851_v0 = vmul.u32.u64.low %v2267_v33, %v2266_v4  ;;  %v8852_v55 = vmul.u32.u64.high %v2267_v33, %v2266_v4, %v8851_v0  ;;  %v8859_v40 = vpop.permute.xlu1 %531 }
 0x1ca   : > { %v2089_v28 = vshll.u32 %v2088_v29, 23  ;;  %v6438_v25 = vmin.u32 %v2493_v54, %v8838_v63  ;;  %v2258_v8 = vsel %vm2252_vm14, %v2255_v52, %v2257_v38  ;;  %v6433_v20 = vadd.s32 4294967169, %v2327_v18 }
 0x1cb   : > { %v1989_v48 = vcvt.s32.f32 %v8794_v61  ;;  %v2191_v32 = vsub.s32 4294967266, %v2186_v34  ;;  %v2277_v62 = vadd.s32 1, %v8843_v45  ;;  %v11676_v59 = vand.u32 2147483647, %v8815_v22 }
 0x1cc   : > { %v2084_v56 = vshll.u32 %v8702_v16, %v8810_v58  ;;  %v2187_v37 = vsub.s32 32, %v2186_v34  ;;  %v2495_v17 = vclz %v6438_v25  ;;  %v2333_v7 = vadd.s32 1, %v6433_v20 }
 0x1cd   : > { %v8863_v43 = vmul.f32 %v1989_v48, %v1987_v5  ;;  %v2171_v38 = vadd.s32 %v8664_v10, %v8670_v35  ;;  %v2274_v50 = vmul.u32 %v2267_v33, %v2258_v8  ;;  %vm2276_vm3 = vc.u32 %v8852_v55, %v8842_v6  ;;  %v537_v8 = vpop.permute.xlu1 %536 }
 0x1ce   : > { %v8869_v61 = vor.u32 %v2085_v12, %v2084_v56  ;;  %v8871_v29 = vor.u32 4788187, %v2089_v28  ;;  %v2278_v52 = vsel %vm2276_vm3, %v2277_v62, %v8843_v45  ;;  %vm2334_vm8 = vcmp.gt.s32.totalorder %v2333_v7, 0  ;;  %v749_v12 = vpop.permute.xlu0 %748 }
 0x1cf   : > { %v2192_v16 = vadd.s32 127, %v2191_v32  ;;  %v6439_v58 = vadd.s32 4294967294, %v2495_v17  ;;  %v2279_v54 = vadd.s32 %v2278_v52, %v2274_v50  ;;  %v2335_v4 = vsel %vm2334_vm8, %v2333_v7, 0 }
 0x1d0   : > { %v11930_v18 = vxor.u32 2147483648, %v8741_v31  ;;  %v2189_v35 = vshrl.u32 %v2171_v38, %v2187_v37  ;;  %v2330_v33 = vand.u32 8388607, %v11676_v59  ;;  %v2337_v5 = vand.u32 31, %v2335_v4 }
 0x1d1   : > { %v2280_v0 = vadd.s32 536870912, %v2279_v54  ;;  %v8885_v28 = vmul.f32 %v7671_v46, %v737_v2  ;;  %v8888_v25 = vmul.f32 %v7671_v46, %v749_v12  ;;  %v2188_v48 = vshll.u32 %v8756_v9, %v2186_v34 }
 0x1d2   : > { %v8879_v10 = vsel %vm1701_vm11, %v11930_v18, %v8741_v31  ;;  %v2338_v32 = vsub.s32 32, %v2337_v5  ;;  %v2193_v62 = vshll.u32 %v2192_v16, 23  ;;  %vm6440_vm11 = vcmp.lt.s32.totalorder %v6439_v58, 0 }
 0x1d3   : > { %v8893_v56 = vshrl.u32 %v2280_v0, 30  ;;  %v619_v37 = vmul.f32 %v7662_v39, %v522_v23  ;;  %v8896_v17 = vor.u32 %v2189_v35, %v2188_v48  ;;  %v2331_v2 = vor.u32 8388608, %v2330_v33 }
 0x1d4   : > { %v2341_v7 = vshrl.u32 %v11850_v42, %v2338_v32  ;;  %v622_v38 = vmul.f32 %v7662_v39, %v537_v8  ;;  %v2344_v52 = vshrl.u32 %v11851_v57, %v2338_v32  ;;  %v2346_v9 = vshll.u32 %v11851_v57, %v2337_v5 }
 0x1d5   : > { %v2282_v50 = vshll.u32 %v8893_v56, 30  ;;  %v2347_v34 = vshrl.u32 %v11862_v19, %v2338_v32  ;;  %v8904_v16 = vsel %vm6440_vm11, 0, %v6439_v58  ;;  %v2336_v18 = vshrl.u32 %v2335_v4, 5 }
 0x1d6   : > { %v2340_v23 = vshll.u32 %v11842_v26, %v2337_v5  ;;  %v2343_v35 = vshll.u32 %v11850_v42, %v2337_v5  ;;  %v8908_v33 = vor.u32 4788187, %v2193_v62  ;;  %v655_v8 = vadd.f32 %v7668_v44, %v619_v37 }
 0x1d7   : > { %v8910_v12 = vsub.s32 %v2279_v54, %v2282_v50  ;;  %v2348_v0 = vor.u32 %v2347_v34, %v2346_v9  ;;  %v11931_v48 = vand.u32 2147483647, %v8231_v27  ;;  %v11932_v59 = vmov 0 }
 0x1d8   : > { %v2342_v58 = vor.u32 %v2341_v7, %v2340_v23  ;;  %v2345_v45 = vor.u32 %v2344_v52, %v2343_v35  ;;  %v2349_v4 = vshll.u32 %v11862_v19, %v2337_v5  ;;  %v2350_v31 = vshrl.u32 %v11852_v14, %v2338_v32 }
 0x1d9   : > { %vm8915_vm12 = vcmp.le.f32.partialorder %v11931_v48, 0.7853982  ;;  %v2503_v62 = vsub.s32 4294967266, %v8904_v16  ;;  %v2285_v54 = vsub.s32 0, %v8910_v12  ;;  %v2352_v50 = vshll.u32 %v11852_v14, %v2337_v5 }
 0x1da   : > { %v11933_v59 = vsel %vm8915_vm12, 4294967295, %v11932_v59  ;;  %v2353_v37 = vshrl.u32 %v11857_v49, %v2338_v32  ;;  %v2351_v9 = vor.u32 %v2350_v31, %v2349_v4  ;;  %vm2358_vm2 = vcmp.lt.s32.totalorder %v2336_v18, 4 }
 0x1db   : > { %11934 = vst [vmem:[#allocation65_spill] sm:$0xff] %v11933_v59  ;;  %v2371_v34 = vshll.u32 %v2331_v2, 8  ;;  %v658_v48 = vadd.f32 %v7668_v44, %v622_v38  ;;  %v6430_v7 = vmin.u32 %v2285_v54, %v8910_v12  ;;  %vm2355_vm14 = vcmp.lt.s32.totalorder %v2336_v18, 1 }
 0x1dc   : > { %v2354_v52 = vor.u32 %v2353_v37, %v2352_v50  ;;  %v2360_v23 = vsel %vm2358_vm2, %v2348_v0, 2102212464  ;;  %v11935_v35 = vand.u32 2147483647, %v8311_v11  ;;  %v11936_v20 = vmov 0 }
 0x1dd   : > { %v2339_v5 = vshrl.u32 %v11842_v26, %v2338_v32  ;;  %vm2357_vm8 = vcmp.lt.s32.totalorder %v2336_v18, 3  ;;  %v2363_v31 = vsel %vm2355_vm14, %v2342_v58, %v2345_v45  ;;  %v2364_v2 = vsel %vm2358_vm2, %v2351_v9, 920167782 }
 0x1de   : > { %vm8930_vm3 = vcmp.le.f32.partialorder %v11935_v35, 0.7853982  ;;  %v2504_v4 = vadd.s32 127, %v2503_v62  ;;  %vm2356_vm11 = vcmp.lt.s32.totalorder %v2336_v18, 2  ;;  %v2365_v38 = vsel %vm2357_vm8, %v2348_v0, %v2364_v2 }
 0x1df   : > { %v11937_v20 = vsel %vm8930_vm3, 4294967295, %v11936_v20  ;;  %v2367_v54 = vsel %vm2355_vm14, %v2345_v45, %v2348_v0  ;;  %v2359_v50 = vsel %vm2355_vm14, %v2339_v5, %v2342_v58  ;;  %v2361_v37 = vsel %vm2357_vm8, %v2345_v45, %v2360_v23 }
 0x1e0   : > { %11938 = vst [vmem:[#allocation66_spill] sm:$0xff] %v11937_v20  ;;  %v2366_v51 = vsel %vm2356_vm11, %v2363_v31, %v2365_v38  ;;  %v2368_v53 = vsel %vm2358_vm2, %v2354_v52, 1326507024  ;;  %v2287_v35 = vclz %v6430_v7  ;;  %vm2013_vm6 = vcmp.lt.s32.totalorder %v8458_v47, 0 }
 0x1e1   : > { %v2369_v13 = vsel %vm2357_vm8, %v2351_v9, %v2368_v53  ;;  %v8938_v60 = vmul.u32.u64.low %v2371_v34, %v2366_v51  ;;  %v8939_v22 = vmul.u32.u64.high %v2371_v34, %v2366_v51, %v8938_v60  ;;  %v2499_v32 = vsub.s32 32, %v8904_v16 }
 0x1e2   : > { %v2370_v62 = vsel %vm2356_vm11, %v2367_v54, %v2369_v13  ;;  %v8946_v0 = vadd.f32 %v8885_v28, %v655_v8  ;;  %v8949_v45 = vadd.f32 %v8888_v25, %v658_v48  ;;  %v1787_v53 = vsel %vm8915_vm12, %v8231_v27, %v8879_v10 }
 0x1e3   : > { %v11941_v51 = vand.u32 2147483647, %v8871_v29  ;;  %v11942_v58 = vcvt.s32.f32 %v8869_v61  ;;  %v8959_v7 = vmul.u32.u64.low %v2371_v34, %v2370_v62  ;;  %v8960_v52 = vmul.u32.u64.high %v2371_v34, %v2370_v62, %v8959_v7 }
 0x1e4   : > { %11939 = vst [vmem:[#allocation67_spill] sm:$0xff] %v8946_v0  ;;  %11940 = vst [vmem:[#allocation68_spill] sm:$0xff] %v8949_v45  ;;  %v11943_v13 = vxor.u32 2147483648, %v8863_v43  ;;  %v2195_v25 = vand.u32 2147483647, %v8908_v33  ;;  %v2483_v8 = vadd.s32 %v8785_v1, %v8783_v30  ;;  %v2362_v10 = vsel %vm2356_vm11, %v2359_v50, %v2361_v37 }
 0x1e5   : > { %v2094_v9 = vmul.f32 %v11942_v58, %v11941_v51  ;;  %v2097_v29 = vsub.s32 4, %v8653_v15  ;;  %v2197_v61 = vcvt.s32.f32 %v8896_v17  ;;  %v2505_v48 = vshll.u32 %v2504_v4, 23  ;;  %v741_v58 = vpop.permute.xlu1 %740 }
 0x1e6   : > { %v1992_v28 = vsel %vm1909_vm4, %v11943_v13, %v8863_v43  ;;  %v6431_v23 = vadd.s32 4294967294, %v2287_v35  ;;  %v2501_v5 = vshrl.u32 %v2483_v8, %v2499_v32  ;;  %v2381_v31 = vadd.s32 1, %v8939_v22  ;;  %v9003_v8 = vpop.permute.xlu0 %752 }
 0x1e7   : > { %v2534_v2 = vand.u32 2139095040, %v8946_v0  ;;  %v2846_v43 = vand.u32 2139095040, %v8949_v45  ;;  %v1995_v33 = vsel %vm8930_vm3, %v8311_v11, %v1992_v28  ;;  %v11944_v30 = vand.u32 2147483647, %v8458_v47 }
 0x1e8   : > { %v11945_v1 = vmov 0  ;;  %v2095_v17 = vxor.u32 2147483648, %v2094_v9  ;;  %vm2117_vm2 = vcmp.lt.s32.totalorder %v8517_v21, 0  ;;  %v2378_v18 = vmul.u32 %v2371_v34, %v2362_v10 }
 0x1e9   : > { %vm8981_vm4 = vcmp.le.f32.partialorder %v11944_v30, 0.7853982  ;;  %vm2380_vm14 = vc.u32 %v8960_v52, %v8938_v60  ;;  %v2198_v4 = vmul.f32 %v2197_v61, %v2195_v25  ;;  %v2500_v38 = vshll.u32 %v8838_v63, %v8904_v16 }
 0x1ea   : > { %v11946_v1 = vsel %vm8981_vm4, 4294967295, %v11945_v1  ;;  %v2382_v54 = vsel %vm2380_vm14, %v2381_v31, %v8939_v22  ;;  %v2847_v50 = vshrl.u32 %v2846_v43, 23  ;;  %7258 = vcosq.f32 %v1787_v53 }
 0x1eb   : > { %11947 = vst [vmem:[#allocation69_spill] sm:$0xff] %v11946_v1  ;;  %v2506_v37 = vor.u32 4788187, %v2505_v48  ;;  %vm6432_vm8 = vcmp.lt.s32.totalorder %v6431_v23, 0  ;;  %v2383_v35 = vadd.s32 %v2382_v54, %v2378_v18  ;;  %7260 = vsinq.f32 %v1787_v53  ;;  %v11950_v18 = vld [vmem:[#allocation11_spill] sm:$0xff] }
 0x1ec   : > { %v2502_v32 = vor.u32 %v2501_v5, %v2500_v38  ;;  %v2535_v62 = vshrl.u32 %v2534_v2, 23  ;;  %v6453_v51 = vadd.s32 4294967169, %v2847_v50  ;;  %7262 = vcosq.f32 %v1995_v33 }
 0x1ed   : > { %v8994_v34 = vsel %vm2013_vm6, %v2097_v29, %v8653_v15  ;;  %v2201_v63 = vsub.s32 4, %v8715_v24  ;;  %v2384_v16 = vadd.s32 536870912, %v2383_v35  ;;  %v2096_v22 = vsel %vm2013_vm6, %v2095_v17, %v2094_v9 }
 0x1ee   : > { %11948 = vst [vmem:[#allocation70_spill] sm:$0xff] %v8994_v34  ;;  %v2199_v7 = vxor.u32 2147483648, %v2198_v4  ;;  %v8999_v13 = vsel %vm6432_vm8, 0, %v6431_v23  ;;  %v2853_v53 = vadd.s32 1, %v6453_v51  ;;  %v2507_v28 = vand.u32 2147483647, %v2506_v37  ;;  %v9042_v51 = vpop.permute.xlu0 %764 }
 0x1ef   : > { %v9001_v25 = vshrl.u32 %v2384_v16, 30  ;;  %v621_v10 = vmul.f32 %v7662_v39, %v8859_v40  ;;  %v820_v15 = vmul.f32 %v7671_v46, %v741_v58  ;;  %7264 = vsinq.f32 %v1995_v33 }
 0x1f0   : > { %v2509_v29 = vcvt.s32.f32 %v2502_v32  ;;  %v6441_v61 = vadd.s32 4294967169, %v2535_v62  ;;  %vm2854_vm11 = vcmp.gt.s32.totalorder %v2853_v53, 0  ;;  %v2295_v9 = vsub.s32 4294967266, %v8999_v13 }
 0x1f1   : > { %v2386_v48 = vshll.u32 %v9001_v25, 30  ;;  %v11684_v23 = vand.u32 2147483647, %v8949_v45  ;;  %v2855_v5 = vsel %vm2854_vm11, %v2853_v53, 0  ;;  %v9014_v31 = vsel %vm8981_vm4, %v8458_v47, %v2096_v22 }
 0x1f2   : > { %v9018_v40 = vsel %vm2117_vm2, %v2199_v7, %v2198_v4  ;;  %v9023_v2 = vsel %vm2117_vm2, %v2201_v63, %v8715_v24  ;;  %v2857_v43 = vand.u32 31, %v2855_v5  ;;  %v9025_v33 = vmul.f32 %v2509_v29, %v2507_v28  ;;  %v745_v29 = vpop.permute.xlu1 %744 }
 0x1f3   : > { %11949 = vst [vmem:[#allocation71_spill] sm:$0xff] %v9023_v2  ;;  %v2275_v30 = vadd.s32 %v8842_v6, %v8852_v55  ;;  %v657_v17 = vadd.f32 %v7668_v44, %v621_v10  ;;  %v9031_v38 = vadd.f32 %v820_v15, %v11950_v18  ;;  %v2291_v54 = vsub.s32 32, %v8999_v13 }
 0x1f4   : > { %v9036_v50 = vadd.s32 1, %v6441_v61  ;;  %v2858_v24 = vsub.s32 32, %v2857_v43  ;;  %v9038_v37 = vpop.eup %7258  ;;  %v2296_v32 = vadd.s32 127, %v2295_v9  ;;  %v9040_v62 = vsub.s32 %v2383_v35, %v2386_v48 }
 0x1f5   : > { %11951 = vst [vmem:[#allocation11_spill] sm:$0xff] %v9031_v38  ;;  %11952 = vst [vmem:[#allocation72_spill] sm:$0xff] %v9038_v37  ;;  %v2850_v6 = vand.u32 8388607, %v11684_v23  ;;  %v9046_v55 = vshrl.u32 %v2855_v5, 5  ;;  %v9048_v58 = vpop.eup %7260  ;;  %v2860_v63 = vshll.u32 %v11842_v26, %v2857_v43  ;;  %v2863_v22 = vshll.u32 %v11850_v42, %v2857_v43 }
 0x1f6   : > { %11953 = vst [vmem:[#allocation73_spill] sm:$0xff] %v9048_v58  ;;  %v2861_v16 = vshrl.u32 %v11850_v42, %v2858_v24  ;;  %v2864_v7 = vshrl.u32 %v11851_v57, %v2858_v24  ;;  %v9054_v53 = vpop.eup %7262  ;;  %v2866_v35 = vshll.u32 %v11851_v57, %v2857_v43  ;;  %v2867_v28 = vshrl.u32 %v11862_v19, %v2858_v24  ;;  %v542_v34 = vpop.permute.xlu1 %541 }
 0x1f7   : > { %11954 = vst [vmem:[#allocation74_spill] sm:$0xff] %v9054_v53  ;;  %v2869_v10 = vshll.u32 %v11862_v19, %v2857_v43  ;;  %v2870_v15 = vshrl.u32 %v11852_v14, %v2858_v24  ;;  %v2872_v48 = vshll.u32 %v11852_v14, %v2857_v43  ;;  %v2873_v5 = vshrl.u32 %v11857_v49, %v2858_v24 }
 0x1f8   : > { %v2862_v61 = vor.u32 %v2861_v16, %v2860_v63  ;;  %v2865_v9 = vor.u32 %v2864_v7, %v2863_v22  ;;  %v2297_v18 = vshll.u32 %v2296_v32, 23  ;;  %v2389_v23 = vsub.s32 0, %v9040_v62  ;;  %v9078_v22 = vpop.permute.xlu0 %768 }
 0x1f9   : > { %v2868_v4 = vor.u32 %v2867_v28, %v2866_v35  ;;  %v2871_v0 = vor.u32 %v2870_v15, %v2869_v10  ;;  %v9063_v2 = vpop.eup %7264  ;;  %v11956_v47 = vand.u32 2147483647, %v8517_v21  ;;  %v11957_v11 = vmov 0 }
 0x1fa   : > { %11955 = vst [vmem:[#allocation75_spill] sm:$0xff] %v9063_v2  ;;  %v2851_v1 = vor.u32 8388608, %v2850_v6  ;;  %v2874_v63 = vor.u32 %v2873_v5, %v2872_v48  ;;  %vm2875_vm2 = vcmp.lt.s32.totalorder %v9046_v55, 1  ;;  %v821_v43 = vmul.f32 %v7671_v46, %v745_v29 }
 0x1fb   : > { %vm9067_vm6 = vcmp.le.f32.partialorder %v11956_v47, 0.7853982  ;;  %v2859_v32 = vshrl.u32 %v11842_v26, %v2858_v24  ;;  %vm2877_vm14 = vcmp.lt.s32.totalorder %v9046_v55, 3  ;;  %vm2878_vm8 = vcmp.lt.s32.totalorder %v9046_v55, 4 }
 0x1fc   : > { %v11958_v11 = vsel %vm9067_vm6, 4294967295, %v11957_v11  ;;  %v2883_v16 = vsel %vm2875_vm2, %v2862_v61, %v2865_v9  ;;  %vm2429_vm11 = vcmp.lt.s32.totalorder %v8656_v36, 0  ;;  %v2880_v47 = vsel %vm2878_vm8, %v2868_v4, 2102212464 }
 0x1fd   : > { %11959 = vst [vmem:[#allocation76_spill] sm:$0xff] %v11958_v11  ;;  %v2884_v6 = vsel %vm2878_vm8, %v2871_v0, 920167782  ;;  %v2887_v7 = vsel %vm2875_vm2, %v2865_v9, %v2868_v4  ;;  %v2888_v35 = vsel %vm2878_vm8, %v2874_v63, 1326507024  ;;  %v6434_v28 = vmin.u32 %v2389_v23, %v9040_v62 }
 0x1fe   : > { %vm2876_vm5 = vcmp.lt.s32.totalorder %v9046_v55, 2  ;;  %v2885_v24 = vsel %vm2877_vm14, %v2868_v4, %v2884_v6  ;;  %v2889_v10 = vsel %vm2877_vm14, %v2871_v0, %v2888_v35  ;;  %v2293_v15 = vshrl.u32 %v2275_v30, %v2291_v54  ;;  %v781_v35 = vpop.permute.xlu0 %780 }
 0x1ff   : > { %v2886_v29 = vsel %vm2876_vm5, %v2883_v16, %v2885_v24  ;;  %v2890_v48 = vsel %vm2876_vm5, %v2887_v7, %v2889_v10  ;;  %v2891_v5 = vshll.u32 %v2851_v1, 8  ;;  %v11960_v63 = vand.u32 2147483647, %v8656_v36 }
 0x200   : > { %v11961_v23 = vmov 0  ;;  %v2298_v53 = vor.u32 4788187, %v2297_v18  ;;  %v2879_v4 = vsel %vm2875_vm2, %v2859_v32, %v2862_v61  ;;  %v2881_v0 = vsel %vm2877_vm14, %v2865_v9, %v2880_v47 }
 0x201   : > { %vm9095_vm8 = vcmp.le.f32.partialorder %v11960_v63, 0.7853982  ;;  %v9103_v30 = vadd.f32 %v821_v43, %v657_v17  ;;  %v9105_v54 = vmul.u32.u64.low %v2891_v5, %v2890_v48  ;;  %v9106_v16 = vmul.u32.u64.high %v2891_v5, %v2890_v48, %v9105_v54 }
 0x202   : > { %v11962_v23 = vsel %vm9095_vm8, 4294967295, %v11961_v23  ;;  %v9108_v1 = vmul.u32.u64.low %v2891_v5, %v2886_v29  ;;  %v9109_v6 = vmul.u32.u64.high %v2891_v5, %v2886_v29, %v9108_v1  ;;  %7266 = vcosq.f32 %v9014_v31 }
 0x203   : > { %11963 = vst [vmem:[#allocation77_spill] sm:$0xff] %v11962_v23  ;;  %11964 = vst [vmem:[#allocation78_spill] sm:$0xff] %v9103_v30  ;;  %v2511_v7 = vxor.u32 2147483648, %v9025_v33  ;;  %v2391_v18 = vclz %v6434_v28  ;;  %v623_v61 = vmul.f32 %v7662_v39, %v542_v34  ;;  %7268 = vsinq.f32 %v9014_v31 }
 0x204   : > { %v2513_v17 = vsub.s32 4, %v8831_v3  ;;  %v11965_v9 = vshll.u32 %v8910_v12, %v8999_v13  ;;  %v2882_v32 = vsel %vm2876_vm5, %v2879_v4, %v2881_v0  ;;  %v2203_v47 = vsel %vm9067_vm6, %v8517_v21, %v9018_v40 }
 0x205   : > { %vm2542_vm14 = vcmp.gt.s32.totalorder %v9036_v50, 0  ;;  %v823_v34 = vmul.f32 %v7671_v46, %v9003_v8  ;;  %v2742_v31 = vand.u32 2139095040, %v9103_v30  ;;  %v2299_v28 = vand.u32 2147483647, %v2298_v53 }
 0x206   : > { %v2294_v43 = vor.u32 %v2293_v15, %v11965_v9  ;;  %vm2900_vm2 = vc.u32 %v9106_v16, %v9108_v1  ;;  %v2901_v12 = vadd.s32 1, %v9109_v6  ;;  %v2638_v13 = vand.u32 2139095040, %v9031_v38 }
 0x207   : > { %v2512_v55 = vsel %vm2429_vm11, %v2511_v7, %v9025_v33  ;;  %v6435_v40 = vadd.s32 4294967294, %v2391_v18  ;;  %v2898_v24 = vmul.u32 %v2891_v5, %v2882_v32  ;;  %v659_v10 = vadd.f32 %v7668_v44, %v623_v61  ;;  %v785_v5 = vpop.permute.xlu0 %784 }
 0x208   : > { %7270 = vcosq.f32 %v2203_v47  ;;  %v9142_v8 = vsel %vm2429_vm11, %v2513_v17, %v8831_v3  ;;  %v2301_v53 = vcvt.s32.f32 %v2294_v43  ;;  %v2902_v15 = vsel %vm2900_vm2, %v2901_v12, %v9109_v6 }
 0x209   : > { %11966 = vst [vmem:[#allocation79_spill] sm:$0xff] %v9142_v8  ;;  %v2305_v29 = vsub.s32 4, %v8893_v56  ;;  %v2543_v48 = vsel %vm2542_vm14, %v9036_v50, 0  ;;  %v2903_v33 = vadd.s32 %v2902_v15, %v2898_v24  ;;  %v2743_v63 = vshrl.u32 %v2742_v31, 23 }
 0x20a   : > { %v2515_v4 = vsel %vm9095_vm8, %v8656_v36, %v2512_v55  ;;  %v2302_v0 = vmul.f32 %v2301_v53, %v2299_v28  ;;  %v2639_v54 = vshrl.u32 %v2638_v13, 23  ;;  %v11693_v3 = vand.u32 2147483647, %v9103_v30 }
 0x20b   : > { %vm6436_vm5 = vcmp.lt.s32.totalorder %v6435_v40, 0  ;;  %v2904_v7 = vadd.s32 536870912, %v2903_v33  ;;  %v6449_v6 = vadd.s32 4294967169, %v2743_v63  ;;  %v9153_v18 = vadd.f32 %v823_v34, %v659_v10  ;;  %v797_v13 = vpop.permute.xlu0 %796 }
 0x20c   : > { %7272 = vsinq.f32 %v2203_v47  ;;  %v9155_v61 = vand.u32 31, %v2543_v48  ;;  %v9159_v50 = vmul.f32 %v7671_v46, %v9042_v51  ;;  %v9163_v17 = vmul.f32 %v7671_v46, %v9078_v22  ;;  %v9165_v9 = vpop.eup %7266 }
 0x20d   : > { %11967 = vst [vmem:[#allocation80_spill] sm:$0xff] %v9153_v18  ;;  %11969 = vst [vmem:[#allocation82_spill] sm:$0xff] %v9165_v9  ;;  %7274 = vcosq.f32 %v2515_v4  ;;  %vm11970_vm11 = vcmp.lt.s32.totalorder %v8693_v41, 0  ;;  %v9172_v32 = vshrl.u32 %v2904_v7, 30  ;;  %v2749_v47 = vadd.s32 1, %v6449_v6  ;;  %v9174_v34 = vpop.eup %7268 }
 0x20e   : > { %11968 = vst [vmem:[#allocation81_spill] sm:$0xff] %v9155_v61  ;;  %v9170_v43 = vsel %vm11970_vm11, %v2305_v29, %v8893_v56  ;;  %11973 = vst [vmem:[#allocation85_spill] sm:$0xff] %v9174_v34  ;;  %7276 = vsinq.f32 %v2515_v4  ;;  %v2303_v51 = vxor.u32 2147483648, %v2302_v0  ;;  %v9177_v31 = vsel %vm6436_vm5, 0, %v6435_v40 }
 0x20f   : > { %11971 = vst [vmem:[#allocation83_spill] sm:$0xff] %v9170_v43  ;;  %11972 = vst [vmem:[#allocation84_spill] sm:$0xff] %v9172_v32  ;;  %v6445_v22 = vadd.s32 4294967169, %v2639_v54  ;;  %v2906_v28 = vshll.u32 %v9172_v32, 30  ;;  %v2746_v12 = vand.u32 8388607, %v11693_v3  ;;  %v9185_v55 = vadd.s32 %v8938_v60, %v8960_v52 }
 0x210   : > { %vm2750_vm2 = vcmp.gt.s32.totalorder %v2749_v47, 0  ;;  %v2950_v56 = vand.u32 2139095040, %v9153_v18  ;;  %v9187_v24 = vshrl.u32 %v2543_v48, 5  ;;  %v9190_v10 = vsub.s32 32, %v9155_v61  ;;  %vm11978_vm14 = vmmov %vm11970_vm11 }
 0x211   : > { %v2751_v40 = vsel %vm2750_vm2, %v2749_v47, 0  ;;  %v9192_v53 = vsub.s32 %v2903_v33, %v2906_v28  ;;  %v9195_v15 = vmul.f32 %v7671_v46, %v781_v35  ;;  %v9198_v63 = vmul.f32 %v7671_v46, %v785_v5  ;;  %v9210_v47 = vpop.permute.xlu1 %551 }
 0x212   : > { %11974 = vst [vmem:[#allocation86_spill] sm:$0xff] %v9187_v24  ;;  %11975 = vst [vmem:[#allocation87_spill] sm:$0xff] %v9190_v10  ;;  %v2753_v29 = vand.u32 31, %v2751_v40  ;;  %v9200_v4 = vpop.eup %7270  ;;  %v2304_v60 = vsel %vm11978_vm14, %v2303_v51, %v2302_v0  ;;  %v2399_v52 = vsub.s32 4294967266, %v9177_v31  ;;  %v9205_v48 = vadd.s32 1, %v6445_v22 }
 0x213   : > { %11976 = vst [vmem:[#allocation88_spill] sm:$0xff] %v9198_v63  ;;  %11977 = vst [vmem:[#allocation89_spill] sm:$0xff] %v9200_v4  ;;  %v9208_v54 = vmul.f32 %v7671_v46, %v797_v13  ;;  %v2747_v33 = vor.u32 8388608, %v2746_v12  ;;  %v2752_v7 = vshrl.u32 %v2751_v40, 5  ;;  %v2951_v6 = vshrl.u32 %v2950_v56, 23 }
 0x214   : > { %v2754_v35 = vsub.s32 32, %v2753_v29  ;;  %v2909_v5 = vsub.s32 0, %v9192_v53  ;;  %v2756_v28 = vshll.u32 %v11842_v26, %v2753_v29  ;;  %v2759_v3 = vshll.u32 %v11850_v42, %v2753_v29 }
 0x215   : > { %11979 = vst [vmem:[#allocation90_spill] sm:$0xff] %v9208_v54  ;;  %v2762_v13 = vshll.u32 %v11851_v57, %v2753_v29  ;;  %v2765_v12 = vshll.u32 %v11862_v19, %v2753_v29  ;;  %v2768_v38 = vshll.u32 %v11852_v14, %v2753_v29  ;;  %v11982_v0 = vand.u32 2147483647, %v8693_v41 }
 0x216   : > { %v2757_v51 = vshrl.u32 %v11850_v42, %v2754_v35  ;;  %v2760_v22 = vshrl.u32 %v11851_v57, %v2754_v35  ;;  %v9220_v40 = vpop.eup %7272  ;;  %v2763_v56 = vshrl.u32 %v11862_v19, %v2754_v35  ;;  %v2766_v32 = vshrl.u32 %v11852_v14, %v2754_v35 }
 0x217   : > { %11980 = vst [vmem:[#allocation91_spill] sm:$0xff] %v9220_v40  ;;  %v2769_v24 = vshrl.u32 %v11857_v49, %v2754_v35  ;;  %v9226_v61 = vpop.eup %7274  ;;  %vm9230_vm5 = vcmp.le.f32.partialorder %v11982_v0, 0.7853982  ;;  %v11983_v10 = vmov 0  ;;  %vm2771_vm11 = vcmp.lt.s32.totalorder %v2752_v7, 1 }
 0x218   : > { %11981 = vst [vmem:[#allocation92_spill] sm:$0xff] %v9226_v61  ;;  %v11984_v10 = vsel %vm9230_vm5, 4294967295, %v11983_v10  ;;  %v2758_v36 = vor.u32 %v2757_v51, %v2756_v28  ;;  %v2761_v23 = vor.u32 %v2760_v22, %v2759_v3  ;;  %v6457_v8 = vadd.s32 4294967169, %v2951_v6  ;;  %v9234_v21 = vpop.eup %7276  ;;  %v557_v61 = vpop.permute.xlu1 %556 }
 0x219   : > { %11985 = vst [vmem:[#allocation93_spill] sm:$0xff] %v11984_v10  ;;  %11986 = vst [vmem:[#allocation94_spill] sm:$0xff] %v9234_v21  ;;  %v6454_v43 = vmin.u32 %v2909_v5, %v9192_v53  ;;  %v2764_v4 = vor.u32 %v2763_v56, %v2762_v13  ;;  %v2767_v29 = vor.u32 %v2766_v32, %v2765_v12  ;;  %vm2773_vm2 = vcmp.lt.s32.totalorder %v2752_v7, 3 }
 0x21a   : > { %v2770_v40 = vor.u32 %v2769_v24, %v2768_v38  ;;  %v2755_v11 = vshrl.u32 %v11842_v26, %v2754_v35  ;;  %vm2774_vm14 = vcmp.lt.s32.totalorder %v2752_v7, 4  ;;  %v2779_v0 = vsel %vm2771_vm11, %v2758_v36, %v2761_v23 }
 0x21b   : > { %v2776_v54 = vsel %vm2774_vm14, %v2764_v4, 2102212464  ;;  %v2780_v63 = vsel %vm2774_vm14, %v2767_v29, 920167782  ;;  %v2783_v3 = vsel %vm2771_vm11, %v2761_v23, %v2764_v4  ;;  %vm2772_vm8 = vcmp.lt.s32.totalorder %v2752_v7, 2 }
 0x21c   : > { %v2784_v28 = vsel %vm2774_vm14, %v2770_v40, 1326507024  ;;  %v2781_v6 = vsel %vm2773_vm2, %v2764_v4, %v2780_v63  ;;  %v2957_v51 = vadd.s32 1, %v6457_v8  ;;  %v2787_v24 = vshll.u32 %v2747_v33, 8 }
 0x21d   : > { %v2785_v5 = vsel %vm2773_vm2, %v2767_v29, %v2784_v28  ;;  %v2782_v38 = vsel %vm2772_vm8, %v2779_v0, %v2781_v6  ;;  %v626_v35 = vmul.f32 %v7662_v39, %v557_v61  ;;  %v2395_v22 = vsub.s32 32, %v9177_v31  ;;  %v757_v0 = vpop.permute.xlu1 %756 }
 0x21e   : > { %v2786_v32 = vsel %vm2772_vm8, %v2783_v3, %v2785_v5  ;;  %v2400_v13 = vadd.s32 127, %v2399_v52  ;;  %v2775_v12 = vsel %vm2771_vm11, %v2755_v11, %v2758_v36  ;;  %v2777_v40 = vsel %vm2773_vm2, %v2761_v23, %v2776_v54 }
 0x21f   : > { %v9248_v56 = vmul.u32.u64.low %v2787_v24, %v2786_v32  ;;  %v9249_v21 = vmul.u32.u64.high %v2787_v24, %v2786_v32, %v9248_v56  ;;  %v9251_v63 = vmul.u32.u64.low %v2787_v24, %v2782_v38  ;;  %v9252_v4 = vmul.u32.u64.high %v2787_v24, %v2782_v38, %v9251_v63 }
 0x220   : > { %v2911_v29 = vclz %v6454_v43  ;;  %v11987_v33 = vand.u32 2147483647, %v9153_v18  ;;  %vm2958_vm14 = vcmp.gt.s32.totalorder %v2957_v51, 0  ;;  %v9261_v11 = vsel %vm9230_vm5, %v8693_v41, %v2304_v60 }
 0x221   : > { %v2778_v36 = vsel %vm2772_vm8, %v2775_v12, %v2777_v40  ;;  %v2959_v23 = vsel %vm2958_vm14, %v2957_v51, 0  ;;  %v662_v52 = vadd.f32 %v7668_v44, %v626_v35  ;;  %v2396_v54 = vshll.u32 %v9040_v62, %v9177_v31 }
 0x222   : > { %v2954_v61 = vand.u32 8388607, %v11987_v33  ;;  %v2397_v43 = vshrl.u32 %v9185_v55, %v2395_v22  ;;  %vm2646_vm11 = vcmp.gt.s32.totalorder %v9205_v48, 0  ;;  %v2961_v3 = vand.u32 31, %v2959_v23 }
 0x223   : > { %v2401_v28 = vshll.u32 %v2400_v13, 23  ;;  %vm2796_vm2 = vc.u32 %v9249_v21, %v9251_v63  ;;  %v2797_v60 = vadd.s32 1, %v9252_v4  ;;  %v824_v7 = vmul.f32 %v7671_v46, %v757_v0 }
 0x224   : > { %v6455_v6 = vadd.s32 4294967294, %v2911_v29  ;;  %v2794_v5 = vmul.u32 %v2787_v24, %v2778_v36  ;;  %v2955_v51 = vor.u32 8388608, %v2954_v61  ;;  %v2962_v38 = vsub.s32 32, %v2961_v3 }
 0x225   : > { %v2798_v32 = vsel %vm2796_vm2, %v2797_v60, %v9252_v4  ;;  %v2960_v62 = vshrl.u32 %v2959_v23, 5  ;;  %v2964_v31 = vshll.u32 %v11842_v26, %v2961_v3  ;;  %v9276_v55 = vadd.f32 %v9159_v50, %v662_v52 }
 0x226   : > { %v2799_v35 = vadd.s32 %v2798_v32, %v2794_v5  ;;  %v2965_v22 = vshrl.u32 %v11850_v42, %v2962_v38  ;;  %v2967_v13 = vshll.u32 %v11850_v42, %v2961_v3  ;;  %v2970_v12 = vshll.u32 %v11851_v57, %v2961_v3 }
 0x227   : > { %11988 = vst [vmem:[#allocation95_spill] sm:$0xff] %v9276_v55  ;;  %v2968_v40 = vshrl.u32 %v11851_v57, %v2962_v38  ;;  %v2971_v24 = vshrl.u32 %v11862_v19, %v2962_v38  ;;  %v2973_v56 = vshll.u32 %v11862_v19, %v2961_v3  ;;  %v2974_v4 = vshrl.u32 %v11852_v14, %v2962_v38 }
 0x228   : > { %vm6456_vm8 = vcmp.lt.s32.totalorder %v6455_v6, 0  ;;  %v2800_v29 = vadd.s32 536870912, %v2799_v35  ;;  %v2976_v50 = vshll.u32 %v11852_v14, %v2961_v3  ;;  %v2977_v33 = vshrl.u32 %v11857_v49, %v2962_v38 }
 0x229   : > { %v2966_v61 = vor.u32 %v2965_v22, %v2964_v31  ;;  %v2969_v0 = vor.u32 %v2968_v40, %v2967_v13  ;;  %v2972_v36 = vor.u32 %v2971_v24, %v2970_v12  ;;  %v2975_v23 = vor.u32 %v2974_v4, %v2973_v56  ;;  %v11989_v13 = vld [vmem:[#allocation13_spill] sm:$0xff] }
 0x22a   : > { %v9287_v52 = vor.u32 %v2397_v43, %v2396_v54  ;;  %v9289_v60 = vor.u32 4788187, %v2401_v28  ;;  %v9294_v5 = vsel %vm2646_vm11, %v9205_v48, 0  ;;  %v9296_v32 = vshrl.u32 %v2800_v29, 30  ;;  %v11991_v29 = vld [vmem:[#allocation64_spill] sm:$0xff] }
 0x22b   : > { %v9298_v8 = vsel %vm6456_vm8, 0, %v6455_v6  ;;  %v2978_v3 = vor.u32 %v2977_v33, %v2976_v50  ;;  %vm2982_vm14 = vcmp.lt.s32.totalorder %v2960_v62, 4  ;;  %v2995_v41 = vshll.u32 %v2955_v51, 8 }
 0x22c   : > { %v2802_v31 = vshll.u32 %v9296_v32, 30  ;;  %vm2979_vm2 = vcmp.lt.s32.totalorder %v2960_v62, 1  ;;  %v2984_v54 = vsel %vm2982_vm14, %v2972_v36, 2102212464  ;;  %v3262_v43 = vand.u32 2139095040, %v9276_v55 }
 0x22d   : > { %v2963_v28 = vshrl.u32 %v11842_v26, %v2962_v38  ;;  %v2987_v22 = vsel %vm2979_vm2, %v2966_v61, %v2969_v0  ;;  %v2988_v48 = vsel %vm2982_vm14, %v2975_v23, 920167782  ;;  %v9306_v12 = vadd.f32 %v824_v7, %v11989_v13 }
 0x22e   : > { %v9308_v6 = vsub.s32 %v2799_v35, %v2802_v31  ;;  %vm2980_vm11 = vcmp.lt.s32.totalorder %v2960_v62, 2  ;;  %vm2981_vm8 = vcmp.lt.s32.totalorder %v2960_v62, 3  ;;  %v2991_v51 = vsel %vm2979_vm2, %v2969_v0, %v2972_v36 }
 0x22f   : > { %11990 = vst [vmem:[#allocation13_spill] sm:$0xff] %v9306_v12  ;;  %v2983_v40 = vsel %vm2979_vm2, %v2963_v28, %v2966_v61  ;;  %v2985_v24 = vsel %vm2981_vm8, %v2969_v0, %v2984_v54  ;;  %v2989_v56 = vsel %vm2981_vm8, %v2972_v36, %v2988_v48  ;;  %v2992_v4 = vsel %vm2982_vm14, %v2978_v3, 1326507024  ;;  %v9321_v61 = vld [vmem:[%s8729_s22 + $0x10] ss:$0 sps:$4 sm:$0xff]   ;;  %s11496_s22 = scalar_lea.vmem %s11599_s8, %s6659_s9 }
 0x230   : > { %vm11725_vm5 = vcmp.lt.s32.totalorder %v11991_v29, 0  ;;  %v2805_v38 = vsub.s32 0, %v9308_v6  ;;  %v2990_v50 = vsel %vm2980_vm11, %v2987_v22, %v2989_v56  ;;  %v2993_v33 = vsel %vm2981_vm8, %v2975_v23, %v2992_v4 }
 0x231   : > { %v3263_v7 = vshrl.u32 %v3262_v43, 23  ;;  %v2915_v35 = vsub.s32 32, %v9298_v8  ;;  %v2994_v31 = vsel %vm2980_vm11, %v2991_v51, %v2993_v33  ;;  %v2919_v0 = vsub.s32 4294967266, %v9298_v8 }
 0x232   : > { %v9316_v13 = vmul.u32.u64.low %v2995_v41, %v2990_v50  ;;  %v9317_v10 = vmul.u32.u64.high %v2995_v41, %v2990_v50, %v9316_v13  ;;  %v9324_v36 = vmul.u32.u64.low %v2995_v41, %v2994_v31  ;;  %v9325_v3 = vmul.u32.u64.high %v2995_v41, %v2994_v31, %v9324_v36 }
 0x233   : > { %v6469_v54 = vadd.s32 4294967169, %v3263_v7  ;;  %7278 = vcosq.f32 %v9261_v11  ;;  %v2899_v23 = vadd.s32 %v9108_v1, %v9106_v16  ;;  %v6450_v43 = vmin.u32 %v2805_v38, %v9308_v6 }
 0x234   : > { %v2986_v28 = vsel %vm2980_vm11, %v2983_v40, %v2985_v24  ;;  %v9333_v22 = vand.u32 31, %v9294_v5  ;;  %v3054_v51 = vand.u32 2139095040, %v9306_v12  ;;  %vm11724_vm14 = vcmask 1043456  }
 0x235   : > { %v3269_v48 = vadd.s32 1, %v6469_v54  ;;  %v2403_v56 = vand.u32 2147483647, %v9289_v60  ;;  %v2405_v4 = vcvt.s32.f32 %v9287_v52  ;;  %v2917_v50 = vshrl.u32 %v2899_v23, %v2915_v35  ;;  %7013 = vmatprep.subr.msk.bf16.mxu0 %vm11724_vm14, %v9321_v61  ;;  %7014 = vmatprep.subr.msk.bf16.mxu1 %vm11724_vm14, %v9321_v61 }
 0x236   : > { %11992 = vst [vmem:[#allocation64_spill] sm:$0xff] %v9333_v22  ;;  %v3005_v33 = vadd.s32 1, %v9317_v10  ;;  %v2920_v16 = vadd.s32 127, %v2919_v0  ;;  %v3002_v1 = vmul.u32 %v2995_v41, %v2986_v28  ;;  %vm3004_vm2 = vc.u32 %v9325_v3, %v9316_v13 }
 0x237   : > { %vm3270_vm11 = vcmp.gt.s32.totalorder %v3269_v48, 0  ;;  %v2807_v62 = vclz %v6450_v43  ;;  %v11717_v52 = vand.u32 2147483647, %v9276_v55  ;;  %v2916_v24 = vshll.u32 %v9192_v53, %v9298_v8 }
 0x238   : > { %v3006_v60 = vsel %vm3004_vm2, %v3005_v33, %v9317_v10  ;;  %v3271_v40 = vsel %vm3270_vm11, %v3269_v48, 0  ;;  %v3055_v35 = vshrl.u32 %v3054_v51, 23  ;;  %7280 = vsinq.f32 %v9261_v11 }
 0x239   : > { %v3007_v38 = vadd.s32 %v3006_v60, %v3002_v1  ;;  %v3273_v7 = vand.u32 31, %v3271_v40  ;;  %v11993_v41 = vsub.s32 4, %v9001_v25  ;;  %v9358_v10 = vshrl.u32 %v9294_v5, 5 }
 0x23a   : > { %v9362_v0 = vmul.f32 %v7662_v39, %v9210_v47  ;;  %v9364_v53 = vmul.f32 %v2405_v4, %v2403_v56  ;;  %v9366_v8 = vor.u32 %v2917_v50, %v2916_v24  ;;  %v9369_v11 = vsub.s32 32, %v9333_v22 }
 0x23b   : > { %v9355_v31 = vsel %vm11725_vm5, %v11993_v41, %v9001_v25  ;;  %11995 = vst [vmem:[#allocation97_spill] sm:$0xff] %v9358_v10  ;;  %v3008_v36 = vadd.s32 536870912, %v3007_v38  ;;  %v2921_v54 = vshll.u32 %v2920_v16, 23  ;;  %v6451_v23 = vadd.s32 4294967294, %v2807_v62 }
 0x23c   : > { %11994 = vst [vmem:[#allocation96_spill] sm:$0xff] %v9355_v31  ;;  %11996 = vst [vmem:[#allocation98_spill] sm:$0xff] %v9369_v11  ;;  %v3266_v25 = vand.u32 8388607, %v11717_v52  ;;  %v3274_v43 = vsub.s32 32, %v3273_v7  ;;  %v3276_v28 = vshll.u32 %v11842_v26, %v3273_v7  ;;  %v3279_v47 = vshll.u32 %v11850_v42, %v3273_v7 }
 0x23d   : > { %v9373_v5 = vshrl.u32 %v3008_v36, 30  ;;  %v6461_v48 = vadd.s32 4294967169, %v3055_v35  ;;  %v9377_v51 = vpop.eup %7278  ;;  %v3282_v50 = vshll.u32 %v11851_v57, %v3273_v7  ;;  %v3272_v1 = vshrl.u32 %v3271_v40, 5 }
 0x23e   : > { %11998 = vst [vmem:[#allocation100_spill] sm:$0xff] %v9377_v51  ;;  %v3277_v56 = vshrl.u32 %v11850_v42, %v3274_v43  ;;  %v3280_v4 = vshrl.u32 %v11851_v57, %v3274_v43  ;;  %v3283_v33 = vshrl.u32 %v11862_v19, %v3274_v43  ;;  %v3285_v62 = vshll.u32 %v11862_v19, %v3273_v7 }
 0x23f   : > { %11997 = vst [vmem:[#allocation99_spill] sm:$0xff] %v9373_v5  ;;  %v3010_v16 = vshll.u32 %v9373_v5, 30  ;;  %v3286_v60 = vshrl.u32 %v11852_v14, %v3274_v43  ;;  %v2922_v24 = vor.u32 4788187, %v2921_v54  ;;  %v3267_v31 = vor.u32 8388608, %v3266_v25 }
 0x240   : > { %v3278_v41 = vor.u32 %v3277_v56, %v3276_v28  ;;  %v3281_v35 = vor.u32 %v3280_v4, %v3279_v47  ;;  %v3284_v36 = vor.u32 %v3283_v33, %v3282_v50  ;;  %v11727_v9 = vand.u32 2147483647, %v9306_v12 }
 0x241   : > { %v9386_v52 = vsub.s32 %v3007_v38, %v3010_v16  ;;  %v3287_v51 = vor.u32 %v3286_v60, %v3285_v62  ;;  %vm6452_vm8 = vcmp.lt.s32.totalorder %v6451_v23, 0  ;;  %v3288_v34 = vshll.u32 %v11852_v14, %v3273_v7 }
 0x242   : > { %v3289_v5 = vshrl.u32 %v11857_v49, %v3274_v43  ;;  %v3061_v40 = vadd.s32 1, %v6461_v48  ;;  %vm3291_vm2 = vcmp.lt.s32.totalorder %v3272_v1, 1  ;;  %vm3293_vm11 = vcmp.lt.s32.totalorder %v3272_v1, 3  ;;  %v9392_v54 = vpop.eup %7280 }
 0x243   : > { %v3013_v2 = vsub.s32 0, %v9386_v52  ;;  %vm3294_vm14 = vcmp.lt.s32.totalorder %v3272_v1, 4  ;;  %11999 = vst [vmem:[#allocation101_spill] sm:$0xff] %v9392_v54  ;;  %v3299_v25 = vsel %vm3291_vm2, %v3278_v41, %v3281_v35  ;;  %v3275_v56 = vshrl.u32 %v11842_v26, %v3274_v43 }
 0x244   : > { %v3290_v28 = vor.u32 %v3289_v5, %v3288_v34  ;;  %v3296_v38 = vsel %vm3294_vm14, %v3284_v36, 2102212464  ;;  %v3300_v47 = vsel %vm3294_vm14, %v3287_v51, 920167782  ;;  %vm3292_vm5 = vcmp.lt.s32.totalorder %v3272_v1, 2 }
 0x245   : > { %v3301_v7 = vsel %vm3293_vm11, %v3284_v36, %v3300_v47  ;;  %v3307_v4 = vshll.u32 %v3267_v31, 8  ;;  %v6458_v48 = vmin.u32 %v3013_v2, %v9386_v52  ;;  %v3303_v33 = vsel %vm3291_vm2, %v3281_v35, %v3284_v36  ;;  %v761_v2 = vpop.permute.xlu1 %760 }
 0x246   : > { %v3302_v50 = vsel %vm3292_vm5, %v3299_v25, %v3301_v7  ;;  %v3304_v16 = vsel %vm3294_vm14, %v3290_v28, 1326507024  ;;  %v9401_v62 = vsel %vm6452_vm8, 0, %v6451_v23  ;;  %v3295_v34 = vsel %vm3291_vm2, %v3275_v56, %v3278_v41 }
 0x247   : > { %v3297_v5 = vsel %vm3293_vm11, %v3281_v35, %v3296_v38  ;;  %v3305_v43 = vsel %vm3293_vm11, %v3287_v51, %v3304_v16  ;;  %v9407_v47 = vmul.u32.u64.low %v3307_v4, %v3302_v50  ;;  %v9408_v31 = vmul.u32.u64.high %v3307_v4, %v3302_v50, %v9407_v47 }
 0x248   : > { %v3306_v60 = vsel %vm3292_vm5, %v3303_v33, %v3305_v43  ;;  %vm3062_vm6 = vcmp.gt.s32.totalorder %v3061_v40, 0  ;;  %v2923_v25 = vand.u32 2147483647, %v2922_v24  ;;  %v3058_v23 = vand.u32 8388607, %v11727_v9 }
 0x249   : > { %v9411_v36 = vmul.u32.u64.low %v3307_v4, %v3306_v60  ;;  %v9412_v28 = vmul.u32.u64.high %v3307_v4, %v3306_v60, %v9411_v36  ;;  %v2925_v41 = vcvt.s32.f32 %v9366_v8  ;;  %v9419_v51 = vshll.u32 %v11862_v19, %v9333_v22 }
 0x24a   : > { %v3015_v35 = vclz %v6458_v48  ;;  %v3063_v38 = vsel %vm3062_vm6, %v3061_v40, 0  ;;  %v2815_v56 = vsub.s32 4294967266, %v9401_v62  ;;  %v3298_v7 = vsel %vm3292_vm5, %v3295_v34, %v3297_v5 }
 0x24b   : > { %v3065_v50 = vand.u32 31, %v3063_v38  ;;  %v825_v24 = vmul.f32 %v7671_v46, %v761_v2  ;;  %v9426_v33 = vshrl.u32 %v11852_v14, %v9369_v11  ;;  %v9430_v8 = vshll.u32 %v11852_v14, %v9333_v22 }
 0x24c   : > { %v661_v16 = vadd.f32 %v7668_v44, %v9362_v0  ;;  %v3317_v40 = vadd.s32 1, %v9408_v31  ;;  %v2407_v48 = vxor.u32 2147483648, %v9364_v53  ;;  %v9436_v1 = vmul.f32 %v2925_v41, %v2923_v25 }
 0x24d   : > { %v2795_v34 = vadd.s32 %v9251_v63, %v9249_v21  ;;  %v3059_v5 = vor.u32 8388608, %v3058_v23  ;;  %v6459_v43 = vadd.s32 4294967294, %v3015_v35  ;;  %v3314_v60 = vmul.u32 %v3307_v4, %v3298_v7 }
 0x24e   : > { %vm3316_vm6 = vc.u32 %v9412_v28, %v9407_v47  ;;  %v3066_v2 = vsub.s32 32, %v3065_v50  ;;  %v2811_v36 = vsub.s32 32, %v9401_v62  ;;  %v2816_v9 = vadd.s32 127, %v2815_v56 }
 0x24f   : > { %v3318_v0 = vsel %vm3316_vm6, %v3317_v40, %v9408_v31  ;;  %v9444_v22 = vadd.f32 %v825_v24, %v661_v16  ;;  %v3064_v25 = vshrl.u32 %v3063_v38, 5  ;;  %v3068_v63 = vshll.u32 %v11842_v26, %v3065_v50 }
 0x250   : > { %v3319_v54 = vadd.s32 %v3318_v0, %v3314_v60  ;;  %v3069_v41 = vshrl.u32 %v11850_v42, %v3066_v2  ;;  %v3072_v21 = vshrl.u32 %v11851_v57, %v3066_v2  ;;  %v3071_v4 = vshll.u32 %v11850_v42, %v3065_v50 }
 0x251   : > { %12000 = vst [vmem:[#allocation102_spill] sm:$0xff] %v9444_v22  ;;  %v3074_v23 = vshll.u32 %v11851_v57, %v3065_v50  ;;  %v3075_v35 = vshrl.u32 %v11862_v19, %v3066_v2  ;;  %vm6460_vm5 = vcmp.lt.s32.totalorder %v6459_v43, 0  ;;  %v3077_v31 = vshll.u32 %v11862_v19, %v3065_v50 }
 0x252   : > { %v3320_v56 = vadd.s32 536870912, %v3319_v54  ;;  %v3078_v7 = vshrl.u32 %v11852_v14, %v3066_v2  ;;  %v2813_v24 = vshrl.u32 %v2795_v34, %v2811_v36  ;;  %v3070_v38 = vor.u32 %v3069_v41, %v3068_v63 }
 0x253   : > { %v3073_v16 = vor.u32 %v3072_v21, %v3071_v4  ;;  %v3076_v40 = vor.u32 %v3075_v35, %v3074_v23  ;;  %v3080_v20 = vshll.u32 %v11852_v14, %v3065_v50  ;;  %v3081_v46 = vshrl.u32 %v11857_v49, %v3066_v2 }
 0x254   : > { %v9454_v60 = vshrl.u32 %v3320_v56, 30  ;;  %v3079_v0 = vor.u32 %v3078_v7, %v3077_v31  ;;  %v2817_v27 = vshll.u32 %v2816_v9, 23  ;;  %v9458_v37 = vsel %vm6460_vm5, 0, %v6459_v43 }
 0x255   : > { %vm3086_vm14 = vcmp.lt.s32.totalorder %v3064_v25, 4  ;;  %v3099_v58 = vshll.u32 %v3059_v5, 8  ;;  %v12002_v59 = vand.u32 2147483647, %v11991_v29  ;;  %v12003_v12 = vmov 0 }
 0x256   : > { %12001 = vst [vmem:[#allocation103_spill] sm:$0xff] %v9454_v60  ;;  %v3322_v34 = vshll.u32 %v9454_v60, 30  ;;  %v3082_v36 = vor.u32 %v3081_v46, %v3080_v20  ;;  %vm3083_vm11 = vcmp.lt.s32.totalorder %v3064_v25, 1  ;;  %v3088_v50 = vsel %vm3086_vm14, %v3076_v40, 2102212464 }
 0x257   : > { %vm9462_vm8 = vcmp.le.f32.partialorder %v12002_v59, 0.7853982  ;;  %v3067_v9 = vshrl.u32 %v11842_v26, %v3066_v2  ;;  %vm3085_vm6 = vcmp.lt.s32.totalorder %v3064_v25, 3  ;;  %v3091_v43 = vsel %vm3083_vm11, %v3070_v38, %v3073_v16 }
 0x258   : > { %v12004_v12 = vsel %vm9462_vm8, 4294967295, %v12003_v12  ;;  %v3092_v5 = vsel %vm3086_vm14, %v3079_v0, 920167782  ;;  %v9471_v41 = vsub.s32 %v3319_v54, %v3322_v34  ;;  %vm3084_vm5 = vcmp.lt.s32.totalorder %v3064_v25, 2 }
 0x259   : > { %v3093_v59 = vsel %vm3085_vm6, %v3076_v40, %v3092_v5  ;;  %v3095_v21 = vsel %vm3083_vm11, %v3073_v16, %v3076_v40  ;;  %v3087_v63 = vsel %vm3083_vm11, %v3067_v9, %v3070_v38  ;;  %v3089_v4 = vsel %vm3085_vm6, %v3073_v16, %v3088_v50 }
 0x25a   : > { %v3094_v23 = vsel %vm3084_vm5, %v3091_v43, %v3093_v59  ;;  %v3096_v46 = vsel %vm3086_vm14, %v3082_v36, 1326507024  ;;  %v3325_v20 = vsub.s32 0, %v9471_v41  ;;  %vm12005_vm2 = vcmp.lt.s32.totalorder %v11991_v29, 0 }
 0x25b   : > { %v3097_v35 = vsel %vm3085_vm6, %v3079_v0, %v3096_v46  ;;  %v9476_v56 = vmul.u32.u64.low %v3099_v58, %v3094_v23  ;;  %v9477_v2 = vmul.u32.u64.high %v3099_v58, %v3094_v23, %v9476_v56  ;;  %v2408_v54 = vsel %vm12005_vm2, %v2407_v48, %v9364_v53 }
 0x25c   : > { %v12006_v31 = vand.u32 2147483647, %v8949_v45  ;;  %v12007_v7 = vmov 0  ;;  %v2927_v38 = vxor.u32 2147483648, %v9436_v1  ;;  %v3098_v16 = vsel %vm3084_vm5, %v3095_v21, %v3097_v35 }
 0x25d   : > { %v3158_v40 = vand.u32 2139095040, %v9444_v22  ;;  %v2812_v0 = vshll.u32 %v9308_v6, %v9401_v62  ;;  %v2818_v34 = vor.u32 4788187, %v2817_v27  ;;  %v2665_v53 = vshrl.u32 %v11857_v49, %v9369_v11 }
 0x25e   : > { %vm9485_vm4 = vcmp.le.f32.partialorder %v12006_v31, 0.7853982  ;;  %v9494_v36 = vmul.u32.u64.low %v3099_v58, %v3098_v16  ;;  %v9495_v50 = vmul.u32.u64.high %v3099_v58, %v3098_v16, %v9494_v36  ;;  %v3023_v48 = vsub.s32 4294967266, %v9458_v37 }
 0x25f   : > { %v12008_v7 = vsel %vm9485_vm4, 4294967295, %v12007_v7  ;;  %v3090_v9 = vsel %vm3084_vm5, %v3087_v63, %v3089_v4  ;;  %v3159_v43 = vshrl.u32 %v3158_v40, 23  ;;  %vm11754_vm14 = vcmp.lt.s32.totalorder %v9358_v10, 4 }
 0x260   : > { %12009 = vst [vmem:[#allocation104_spill] sm:$0xff] %v12008_v7  ;;  %v2814_v5 = vor.u32 %v2813_v24, %v2812_v0  ;;  %v6470_v59 = vmin.u32 %v3325_v20, %v9471_v41  ;;  %v3109_v21 = vadd.s32 1, %v9477_v2  ;;  %v2411_v27 = vsel %vm9462_vm8, %v11991_v29, %v2408_v54 }
 0x261   : > { %vm12010_vm2 = vcmp.lt.s32.totalorder %v8949_v45, 0  ;;  %v9512_v62 = vor.u32 %v9426_v33, %v9419_v51  ;;  %v6465_v25 = vadd.s32 4294967169, %v3159_v43  ;;  %v2819_v63 = vand.u32 2147483647, %v2818_v34 }
 0x262   : > { %v2928_v6 = vsel %vm12010_vm2, %v2927_v38, %v9436_v1  ;;  %v3019_v24 = vsub.s32 32, %v9458_v37  ;;  %v3106_v4 = vmul.u32 %v3099_v58, %v3090_v9  ;;  %vm3108_vm11 = vc.u32 %v9495_v50, %v9476_v56 }
 0x263   : > { %12011 = vst [vmem:[#allocation105_spill] sm:$0xff] %v9512_v62  ;;  %v3024_v23 = vadd.s32 127, %v3023_v48  ;;  %v3110_v46 = vsel %vm3108_vm11, %v3109_v21, %v9477_v2  ;;  %v11742_v20 = vand.u32 2147483647, %v9444_v22  ;;  %v3165_v35 = vadd.s32 1, %v6465_v25 }
 0x264   : > { %v2821_v54 = vcvt.s32.f32 %v2814_v5  ;;  %v3003_v1 = vadd.s32 %v9316_v13, %v9325_v3  ;;  %v3327_v51 = vclz %v6470_v59  ;;  %v3111_v33 = vadd.s32 %v3110_v46, %v3106_v4  ;;  %v12015_v4 = vld [vmem:[#allocation28_spill] sm:$0xff] }
 0x265   : > { %7282 = vcosq.f32 %v2411_v27  ;;  %v2666_v31 = vor.u32 %v2665_v53, %v9430_v8  ;;  %v9525_v58 = vsel %vm11754_vm14, %v9512_v62, 920167782  ;;  %vm3166_vm6 = vcmp.gt.s32.totalorder %v3165_v35, 0  ;;  %v12013_v53 = vld [vmem:[#allocation15_spill] sm:$0xff] }
 0x266   : > { %12012 = vst [vmem:[#allocation106_spill] sm:$0xff] %v9525_v58  ;;  %v2931_v2 = vsel %vm9485_vm4, %v8949_v45, %v2928_v6  ;;  %v9530_v38 = vmul.f32 %v2821_v54, %v2819_v63  ;;  %v3021_v16 = vshrl.u32 %v3003_v1, %v3019_v24  ;;  %v3112_v40 = vadd.s32 536870912, %v3111_v33 }
 0x267   : > { %7284 = vsinq.f32 %v2411_v27  ;;  %v3025_v13 = vshll.u32 %v3024_v23, 23  ;;  %v3162_v3 = vand.u32 8388607, %v11742_v20  ;;  %v3167_v8 = vsel %vm3166_vm6, %v3165_v35, 0 }
 0x268   : > { %v3020_v0 = vshll.u32 %v9386_v52, %v9458_v37  ;;  %v6471_v34 = vadd.s32 4294967294, %v3327_v51  ;;  %v9536_v36 = vshrl.u32 %v3112_v40, 30  ;;  %v11743_v48 = vand.u32 2147483647, %v12013_v53 }
 0x269   : > { %7286 = vcosq.f32 %v2931_v2  ;;  %v9541_v9 = vsel %vm11754_vm14, %v2666_v31, 1326507024  ;;  %v3169_v5 = vand.u32 31, %v3167_v8  ;;  %v9549_v37 = vadd.s32 %v9407_v47, %v9412_v28 }
 0x26a   : > { %12014 = vst [vmem:[#allocation15_spill] sm:$0xff] %v9541_v9  ;;  %7288 = vsinq.f32 %v2931_v2  ;;  %v9545_v21 = vor.u32 %v3021_v16, %v3020_v0  ;;  %v9551_v52 = vor.u32 4788187, %v3025_v13  ;;  %v3114_v27 = vshll.u32 %v9536_v36, 30 }
 0x26b   : > { %v3163_v6 = vor.u32 8388608, %v3162_v3  ;;  %v3170_v25 = vsub.s32 32, %v3169_v5  ;;  %vm6472_vm5 = vcmp.lt.s32.totalorder %v6471_v34, 0  ;;  %v3172_v63 = vshll.u32 %v11842_v26, %v3169_v5  ;;  %v12016_v3 = vld [vmem:[#allocation27_spill] sm:$0xff] }
 0x26c   : > { %v9557_v24 = vand.u32 8388607, %v11743_v48  ;;  %v9561_v23 = vshrl.u32 %v11842_v26, %v12015_v4  ;;  %v3175_v28 = vshll.u32 %v11850_v42, %v3169_v5  ;;  %v3168_v54 = vshrl.u32 %v3167_v8, 5 }
 0x26d   : > { %v3173_v47 = vshrl.u32 %v11850_v42, %v3170_v25  ;;  %v3176_v46 = vshrl.u32 %v11851_v57, %v3170_v25  ;;  %v3179_v35 = vshrl.u32 %v11862_v19, %v3170_v25  ;;  %v3178_v1 = vshll.u32 %v11851_v57, %v3169_v5 }
 0x26e   : > { %v3181_v51 = vshll.u32 %v11862_v19, %v3169_v5  ;;  %v3182_v31 = vshrl.u32 %v11852_v14, %v3170_v25  ;;  %v9572_v16 = vsub.s32 %v3111_v33, %v3114_v27  ;;  %v884_v0 = vshll.u32 %v11842_v26, %v12016_v3 }
 0x26f   : > { %v9570_v2 = vpop.eup %7282  ;;  %v3174_v40 = vor.u32 %v3173_v47, %v3172_v63  ;;  %v3177_v13 = vor.u32 %v3176_v46, %v3175_v28  ;;  %v3180_v20 = vor.u32 %v3179_v35, %v3178_v1  ;;  %v3184_v43 = vshll.u32 %v11852_v14, %v3169_v5 }
 0x270   : > { %v3183_v48 = vor.u32 %v3182_v31, %v3181_v51  ;;  %v3185_v8 = vshrl.u32 %v11857_v49, %v3170_v25  ;;  %v9581_v60 = vsel %vm6472_vm5, 0, %v6471_v34  ;;  %v885_v33 = vshrl.u32 %v11850_v42, %v12015_v4 }
 0x271   : > { %v9578_v59 = vpop.eup %7284  ;;  %v887_v27 = vshll.u32 %v11850_v42, %v12016_v3  ;;  %v888_v63 = vshrl.u32 %v11851_v57, %v12015_v4  ;;  %vm3187_vm2 = vcmp.lt.s32.totalorder %v3168_v54, 1  ;;  %vm3190_vm11 = vcmp.lt.s32.totalorder %v3168_v54, 4 }
 0x272   : > { %v3186_v47 = vor.u32 %v3185_v8, %v3184_v43  ;;  %v890_v5 = vshll.u32 %v11851_v57, %v12016_v3  ;;  %vm3189_vm6 = vcmp.lt.s32.totalorder %v3168_v54, 3  ;;  %v3195_v34 = vsel %vm3187_vm2, %v3174_v40, %v3177_v13 }
 0x273   : > { %v9591_v28 = vpop.eup %7286  ;;  %v3196_v46 = vsel %vm3190_vm11, %v3183_v48, 920167782  ;;  %v891_v35 = vshrl.u32 %v11862_v19, %v12015_v4  ;;  %v3117_v51 = vsub.s32 0, %v9572_v16  ;;  %v3199_v31 = vsel %vm3187_vm2, %v3177_v13, %v3180_v20 }
 0x274   : > { %12017 = vst [vmem:[#allocation28_spill] sm:$0xff] %v9591_v28  ;;  %v9596_v1 = vpop.eup %7288  ;;  %v3197_v43 = vsel %vm3189_vm6, %v3180_v20, %v3196_v46  ;;  %v3203_v8 = vshll.u32 %v3163_v6, 8  ;;  %v3331_v3 = vsub.s32 32, %v9581_v60  ;;  %vm3188_vm5 = vcmp.lt.s32.totalorder %v3168_v54, 2  ;;  %v12019_v46 = vld [vmem:[#allocation26_spill] sm:$0xff] }
 0x275   : > { %12018 = vst [vmem:[#allocation27_spill] sm:$0xff] %v9596_v1  ;;  %v3192_v28 = vsel %vm3190_vm11, %v3180_v20, 2102212464  ;;  %v3200_v7 = vsel %vm3190_vm11, %v3186_v47, 1326507024  ;;  %v3171_v45 = vshrl.u32 %v11842_v26, %v3170_v25  ;;  %v3198_v58 = vsel %vm3188_vm5, %v3195_v34, %v3197_v43 }
 0x276   : > { %v3201_v4 = vsel %vm3189_vm6, %v3183_v48, %v3200_v7  ;;  %v886_v62 = vor.u32 %v885_v33, %v884_v0  ;;  %v889_v9 = vor.u32 %v888_v63, %v887_v27  ;;  %v892_v10 = vor.u32 %v891_v35, %v890_v5  ;;  %v12022_v27 = vld [vmem:[#allocation35_spill] sm:$0xff] }
 0x277   : > { %v3202_v1 = vsel %vm3188_vm5, %v3199_v31, %v3201_v4  ;;  %v6462_v6 = vmin.u32 %v3117_v51, %v9572_v16  ;;  %v3191_v11 = vsel %vm3187_vm2, %v3171_v45, %v3174_v40  ;;  %v3193_v20 = vsel %vm3189_vm6, %v3177_v13, %v3192_v28  ;;  %v12030_v51 = vld [vmem:[#allocation32_spill] sm:$0xff] }
 0x278   : > { %vm901_vm11 = vcmp.lt.s32.totalorder %v12019_v46, 3  ;;  %v9612_v25 = vmul.u32.u64.low %v3203_v8, %v3202_v1  ;;  %v9613_v47 = vmul.u32.u64.high %v3203_v8, %v3202_v1, %v9612_v25  ;;  %v3335_v0 = vsub.s32 4294967266, %v9581_v60  ;;  %v12029_v1 = vld [vmem:[#allocation38_spill] sm:$0xff] }
 0x279   : > { %v9615_v7 = vmul.u32.u64.low %v3203_v8, %v3198_v58  ;;  %v9616_v48 = vmul.u32.u64.high %v3203_v8, %v3198_v58, %v9615_v7  ;;  %v875_v33 = vor.u32 8388608, %v9557_v24  ;;  %vm900_vm14 = vcmp.lt.s32.totalorder %v12019_v46, 2 }
 0x27a   : > { %vm12020_vm2 = vcmp.lt.s32.totalorder %v12019_v46, 4  ;;  %v3194_v40 = vsel %vm3188_vm5, %v3191_v11, %v3193_v20  ;;  %vm12021_vm6 = vcmp.lt.s32.totalorder %v12019_v46, 1  ;;  %v909_v58 = vsel %vm901_vm11, %v892_v10, %v12022_v27 }
 0x27b   : > { %v904_v45 = vsel %vm12020_vm2, %v892_v10, 2102212464  ;;  %v907_v13 = vsel %vm12021_vm6, %v886_v62, %v889_v9  ;;  %vm12023_vm4 = vmmov %vm12021_vm6  ;;  %v12024_v5 = vand.u32 2147483647, %v9103_v30  ;;  %v12025_v24 = vmov 0 }
 0x27c   : > { %v911_v63 = vsel %vm12023_vm4, %v889_v9, %v892_v10  ;;  %v3027_v28 = vand.u32 2147483647, %v9551_v52  ;;  %v3333_v11 = vshrl.u32 %v9549_v37, %v3331_v3  ;;  %v3119_v54 = vclz %v6462_v6  ;;  %vm12028_vm5 = vmmov %vm12023_vm4 }
 0x27d   : > { %vm9634_vm8 = vcmp.le.f32.partialorder %v12024_v5, 0.7853982  ;;  %v903_v34 = vsel %vm12028_vm5, %v9561_v23, %v886_v62  ;;  %vm3212_vm2 = vc.u32 %v9613_v47, %v9615_v7  ;;  %v3213_v10 = vadd.s32 1, %v9616_v48 }
 0x27e   : > { %v12026_v24 = vsel %vm9634_vm8, 4294967295, %v12025_v24  ;;  %v905_v35 = vsel %vm901_vm11, %v889_v9, %v904_v45  ;;  %v913_v52 = vsel %vm901_vm11, %v12030_v51, %v12029_v1  ;;  %v3210_v43 = vmul.u32 %v3203_v8, %v3194_v40 }
 0x27f   : > { %12027 = vst [vmem:[#allocation26_spill] sm:$0xff] %v12026_v24  ;;  %v910_v37 = vsel %vm900_vm14, %v907_v13, %v909_v58  ;;  %v914_v62 = vsel %vm900_vm14, %v911_v63, %v913_v52  ;;  %v915_v23 = vshll.u32 %v875_v33, 8  ;;  %v3029_v31 = vcvt.s32.f32 %v9545_v21  ;;  %v12031_v33 = vld [vmem:[#allocation6_spill] sm:$0xff]  ;;  %v12034_v63 = vld [vmem:[#allocation9_spill] sm:$0xff] }
 0x280   : > { %v3332_v3 = vshll.u32 %v9471_v41, %v9581_v60  ;;  %v3336_v4 = vadd.s32 127, %v3335_v0  ;;  %v3214_v9 = vsel %vm3212_vm2, %v3213_v10, %v9616_v48  ;;  %v906_v20 = vsel %vm900_vm14, %v903_v34, %v905_v35  ;;  %v12035_v10 = vld [vmem:[#allocation8_spill] sm:$0xff] }
 0x281   : > { %v3215_v6 = vadd.s32 %v3214_v9, %v3210_v43  ;;  %v9662_v8 = vmul.u32.u64.low %v915_v23, %v914_v62  ;;  %v9663_v25 = vmul.u32.u64.high %v915_v23, %v914_v62, %v9662_v8  ;;  %v6463_v45 = vadd.s32 4294967294, %v3119_v54 }
 0x282   : > { %v9665_v40 = vmul.u32.u64.low %v915_v23, %v910_v37  ;;  %v9666_v13 = vmul.u32.u64.high %v915_v23, %v910_v37, %v9665_v40  ;;  %v11759_v21 = vand.u32 2147483647, %v12031_v33  ;;  %v12032_v60 = vxor.u32 2147483648, %v9530_v38 }
 0x283   : > { %vm12033_vm4 = vcmp.lt.s32.totalorder %v9103_v30, 0  ;;  %v3030_v48 = vmul.f32 %v3029_v31, %v3027_v28  ;;  %v3334_v0 = vor.u32 %v3333_v11, %v3332_v3  ;;  %v3216_v46 = vadd.s32 536870912, %v3215_v6 }
 0x284   : > { %v2824_v41 = vsel %vm12033_vm4, %v12032_v60, %v9530_v38  ;;  %v3337_v27 = vshll.u32 %v3336_v4, 23  ;;  %v922_v58 = vmul.u32 %v915_v23, %v906_v20  ;;  %v989_v5 = vshrl.u32 %v11850_v42, %v12034_v63 }
 0x285   : > { %v992_v54 = vshrl.u32 %v11851_v57, %v12034_v63  ;;  %v9679_v34 = vshrl.u32 %v3216_v46, 30  ;;  %vm924_vm14 = vc.u32 %v9663_v25, %v9665_v40  ;;  %v988_v35 = vshll.u32 %v11842_v26, %v12035_v10  ;;  %v12036_v46 = vld [vmem:[#allocation12_spill] sm:$0xff] }
 0x286   : > { %v991_v38 = vshll.u32 %v11850_v42, %v12035_v10  ;;  %v2827_v28 = vsel %vm9634_vm8, %v9103_v30, %v2824_v41  ;;  %vm6464_vm11 = vcmp.lt.s32.totalorder %v6463_v45, 0  ;;  %v925_v11 = vadd.s32 1, %v9666_v13 }
 0x287   : > { %v978_v1 = vand.u32 8388607, %v11759_v21  ;;  %v3031_v51 = vxor.u32 2147483648, %v3030_v48  ;;  %v3218_v52 = vshll.u32 %v9679_v34, 30  ;;  %v990_v43 = vor.u32 %v989_v5, %v988_v35  ;;  %v12043_v35 = vld [vmem:[#allocation19_spill] sm:$0xff] }
 0x288   : > { %v993_v37 = vor.u32 %v992_v54, %v991_v38  ;;  %vm11761_vm6 = vcmp.lt.s32.totalorder %v9153_v18, 0  ;;  %v3338_v62 = vor.u32 4788187, %v3337_v27  ;;  %v926_v23 = vsel %vm924_vm14, %v925_v11, %v9666_v13  ;;  %v12044_v38 = vld [vmem:[#allocation14_spill] sm:$0xff] }
 0x289   : > { %v994_v31 = vshll.u32 %v11851_v57, %v12035_v10  ;;  %v995_v3 = vshrl.u32 %v11862_v19, %v12034_v63  ;;  %v3341_v4 = vcvt.s32.f32 %v3334_v0  ;;  %v9700_v9 = vsel %vm6464_vm11, 0, %v6463_v45 }
 0x28a   : > { %v9702_v20 = vsub.s32 %v3215_v6, %v3218_v52  ;;  %v927_v8 = vadd.s32 %v926_v23, %v922_v58  ;;  %v979_v60 = vor.u32 8388608, %v978_v1  ;;  %vm1003_vm5 = vcmp.lt.s32.totalorder %v12036_v46, 1  ;;  %v12042_v58 = vld [vmem:[#allocation17_spill] sm:$0xff] }
 0x28b   : > { %v996_v41 = vor.u32 %v995_v3, %v994_v31  ;;  %vm1004_vm2 = vcmp.lt.s32.totalorder %v12036_v46, 2  ;;  %vm1005_vm4 = vcmp.lt.s32.totalorder %v12036_v46, 3  ;;  %v1011_v5 = vsel %vm1003_vm5, %v990_v43, %v993_v37 }
 0x28c   : > { %v3221_v13 = vsub.s32 0, %v9702_v20  ;;  %v928_v27 = vadd.s32 536870912, %v927_v8  ;;  %v12037_v45 = vand.u32 2147483647, %v9153_v18  ;;  %v12038_v6 = vmov 0 }
 0x28d   : > { %vm12041_vm11 = vcmp.lt.s32.totalorder %v12036_v46, 4  ;;  %v1013_v54 = vsel %vm1005_vm4, %v996_v41, %v12042_v58  ;;  %v1015_v10 = vsel %vm1003_vm5, %v993_v37, %v996_v41  ;;  %v1017_v11 = vsel %vm1005_vm4, %v12044_v38, %v12043_v35 }
 0x28e   : > { %vm9712_vm14 = vcmp.le.f32.partialorder %v12037_v45, 0.7853982  ;;  %v1008_v0 = vsel %vm12041_vm11, %v996_v41, 2102212464  ;;  %v3339_v1 = vand.u32 2147483647, %v3338_v62  ;;  %v987_v23 = vshrl.u32 %v11842_v26, %v12034_v63 }
 0x28f   : > { %v12039_v6 = vsel %vm9712_vm14, 4294967295, %v12038_v6  ;;  %v929_v52 = vshrl.u32 %v928_v27, 30  ;;  %v1014_v31 = vsel %vm1004_vm2, %v1011_v5, %v1013_v54  ;;  %v3123_v3 = vsub.s32 32, %v9700_v9  ;;  %v562_v27 = vpop.permute.xlu1 %561 }
 0x290   : > { %12040 = vst [vmem:[#allocation35_spill] sm:$0xff] %v12039_v6  ;;  %v3127_v45 = vsub.s32 4294967266, %v9700_v9  ;;  %v1018_v41 = vsel %vm1004_vm2, %v1015_v10, %v1017_v11  ;;  %v1019_v58 = vshll.u32 %v979_v60, 8  ;;  %v6466_v21 = vmin.u32 %v3221_v13, %v9702_v20 }
 0x291   : > { %v930_v24 = vshll.u32 %v929_v52, 30  ;;  %v1007_v62 = vsel %vm1003_vm5, %v987_v23, %v990_v43  ;;  %v1009_v63 = vsel %vm1005_vm4, %v993_v37, %v1008_v0  ;;  %7290 = vcosq.f32 %v2827_v28 }
 0x292   : > { %v9740_v35 = vmul.u32.u64.low %v1019_v58, %v1018_v41  ;;  %v9741_v5 = vmul.u32.u64.high %v1019_v58, %v1018_v41, %v9740_v35  ;;  %v9743_v54 = vmul.u32.u64.low %v1019_v58, %v1014_v31  ;;  %v9744_v38 = vmul.u32.u64.high %v1019_v58, %v1014_v31, %v9743_v54 }
 0x293   : > { %v3032_v60 = vsel %vm11761_vm6, %v3031_v51, %v3030_v48  ;;  %vm11770_vm11 = vcmp.lt.s32.totalorder %v9276_v55, 0  ;;  %v3342_v13 = vmul.f32 %v3341_v4, %v3339_v1  ;;  %v9750_v10 = vsub.s32 %v927_v8, %v930_v24 }
 0x294   : > { %v3107_v43 = vadd.s32 %v9476_v56, %v9495_v50  ;;  %v1010_v37 = vsel %vm1004_vm2, %v1007_v62, %v1009_v63  ;;  %vm12045_vm5 = vcmask 1043456   ;;  %v627_v11 = vmul.f32 %v7662_v39, %v562_v27 }
 0x295   : > { %v4289_v0 = vsel %vm12045_vm5, %v9321_v61, 0  ;;  %v12046_v23 = vsub.s32 4, %v9296_v32  ;;  %vm12047_vm4 = vcmp.lt.s32.totalorder %v9103_v30, 0  ;;  %7292 = vsinq.f32 %v2827_v28 }
 0x296   : > { %v3223_v24 = vclz %v6466_v21  ;;  %v933_v51 = vsub.s32 0, %v9750_v10  ;;  %6782 = vmatpush3.bf16.msra.mxu0 %v4289_v0  ;;  %7012 = vmatpush3.bf16.msra.mxu1 %v4289_v0  ;;  %v3125_v56 = vshrl.u32 %v3107_v43, %v3123_v3  ;;  %v3128_v50 = vadd.s32 127, %v3127_v45 }
 0x297   : > { %v9764_v48 = vsel %vm12047_vm4, %v12046_v23, %v9296_v32  ;;  %vm1028_vm2 = vc.u32 %v9741_v5, %v9743_v54  ;;  %v1029_v61 = vadd.s32 1, %v9744_v38  ;;  %v9773_v4 = vsel %vm9712_vm14, %v9153_v18, %v3032_v60 }
 0x298   : > { %v3343_v32 = vxor.u32 2147483648, %v3342_v13  ;;  %v6378_v28 = vmin.u32 %v933_v51, %v9750_v10  ;;  %v1026_v21 = vmul.u32 %v1019_v58, %v1010_v37  ;;  %v3124_v8 = vshll.u32 %v9572_v16, %v9700_v9 }
 0x299   : > { %v953_v46 = vsub.s32 4, %v929_v52  ;;  %v1030_v1 = vsel %vm1028_vm2, %v1029_v61, %v9744_v38  ;;  %v663_v31 = vadd.f32 %v7668_v44, %v627_v11  ;;  %v6467_v3 = vadd.s32 4294967294, %v3223_v24 }
 0x29a   : > { %vm869_vm5 = vcmp.lt.s32.totalorder %v12013_v53, 0  ;;  %v935_v45 = vclz %v6378_v28  ;;  %v1031_v41 = vadd.s32 %v1030_v1, %v1026_v21  ;;  %7294 = vcosq.f32 %v9773_v4 }
 0x29b   : > { %v9782_v62 = vor.u32 %v3125_v56, %v3124_v8  ;;  %v3129_v63 = vshll.u32 %v3128_v50, 23  ;;  %v9785_v58 = vadd.f32 %v9163_v17, %v663_v31  ;;  %v12049_v9 = vand.u32 2147483647, %v12013_v53  ;;  %v9803_v0 = vpop.eup %7290 }
 0x29c   : > { %v6379_v35 = vadd.s32 4294967294, %v935_v45  ;;  %v1032_v38 = vadd.s32 536870912, %v1031_v41  ;;  %v9796_v60 = vsel %vm11770_vm11, %v3343_v32, %v3342_v13  ;;  %v3211_v43 = vadd.s32 %v9615_v7, %v9613_v47  ;;  %12052 = vst [vmem:[#allocation32_spill] sm:$0xff] %v9803_v0  ;;  %v12053_v45 = vld [vmem:[#allocation22_spill] sm:$0xff] }
 0x29d   : > { %12048 = vst [vmem:[#allocation38_spill] sm:$0xff] %v9785_v58  ;;  %vm9790_vm4 = vcmp.le.f32.partialorder %v12049_v9, 0.7853982  ;;  %v954_v17 = vsel %vm869_vm5, %v953_v46, %v929_v52  ;;  %v3366_v37 = vand.u32 2139095040, %v9785_v58  ;;  %vm6468_vm2 = vcmp.lt.s32.totalorder %v6467_v3, 0 }
 0x29e   : > { %vm6380_vm6 = vcmp.lt.s32.totalorder %v6379_v35, 0  ;;  %v1033_v11 = vshrl.u32 %v1032_v38, 30  ;;  %v11762_v23 = vand.u32 2147483647, %v9785_v58  ;;  %v9806_v24 = vor.u32 4788187, %v3129_v63 }
 0x29f   : > { %v938_v51 = vsel %vm6380_vm6, 0, %v6379_v35  ;;  %v3367_v56 = vshrl.u32 %v3366_v37, 23  ;;  %v9809_v50 = vpop.eup %7292  ;;  %v923_v47 = vadd.s32 %v9665_v40, %v9663_v25  ;;  %v9814_v32 = vsel %vm6468_vm2, 0, %v6467_v3 }
 0x2a0   : > { %v939_v7 = vsub.s32 32, %v938_v51  ;;  %v940_v52 = vshll.u32 %v9750_v10, %v938_v51  ;;  %v943_v61 = vsub.s32 4294967266, %v938_v51  ;;  %v956_v28 = vsel %vm9790_vm4, 0, %v954_v17 }
 0x2a1   : > { %v1034_v21 = vshll.u32 %v1033_v11, 30  ;;  %v6473_v8 = vadd.s32 4294967169, %v3367_v56  ;;  %v3370_v31 = vand.u32 8388607, %v11762_v23  ;;  %v1164_v25 = vsel %vm8058_vm15, 0, %v12053_v45 }
 0x2a2   : > { %v941_v46 = vshrl.u32 %v923_v47, %v939_v7  ;;  %v944_v1 = vadd.s32 127, %v943_v61  ;;  %vm11771_vm6 = vcmp.lt.s32.totalorder %v12031_v33, 0  ;;  %v1057_v10 = vsub.s32 4, %v1033_v11 }
 0x2a3   : > { %v9824_v40 = vsub.s32 %v1031_v41, %v1034_v21  ;;  %v3373_v3 = vadd.s32 1, %v6473_v8  ;;  %v3227_v9 = vsub.s32 32, %v9814_v32  ;;  %v960_v17 = vadd.s32 3, %v956_v28 }
 0x2a4   : > { %v942_v35 = vor.u32 %v941_v46, %v940_v52  ;;  %v945_v38 = vshll.u32 %v944_v1, 23  ;;  %v9827_v37 = vpop.eup %7294  ;;  %v3231_v51 = vsub.s32 4294967266, %v9814_v32  ;;  %v1168_v47 = vadd.s32 3, %v1164_v25 }
 0x2a5   : > { %12055 = vst [vmem:[#allocation6_spill] sm:$0xff] %v9827_v37  ;;  %v1037_v56 = vsub.s32 0, %v9824_v40  ;;  %vm3374_vm2 = vcmp.gt.s32.totalorder %v3373_v3, 0  ;;  %v3371_v41 = vor.u32 8388608, %v3370_v31  ;;  %v12056_v8 = vand.u32 2147483647, %v12031_v33 }
 0x2a6   : > { %v946_v61 = vor.u32 4788187, %v945_v38  ;;  %v3375_v21 = vsel %vm3374_vm2, %v3373_v3, 0  ;;  %v1027_v52 = vadd.s32 %v9743_v54, %v9741_v5  ;;  %v9843_v46 = vsel %vm11771_vm6, %v1057_v10, %v1033_v11 }
 0x2a7   : > { %vm9834_vm15 = vcmp.le.f32.partialorder %v12056_v8, 0.7853982  ;;  %v6382_v28 = vmin.u32 %v1037_v56, %v9824_v40  ;;  %v949_v63 = vcvt.s32.f32 %v942_v35  ;;  %v9845_v25 = vand.u32 3, %v960_v17 }
 0x2a8   : > { %v947_v1 = vand.u32 2147483647, %v946_v61  ;;  %v3377_v31 = vand.u32 31, %v3375_v21  ;;  %v9847_v3 = vshrl.u32 %v3211_v43, %v3227_v9  ;;  %v9849_v38 = vadd.s32 127, %v3231_v51 }
 0x2a9   : > { %v1039_v8 = vclz %v6382_v28  ;;  %v9851_v23 = vand.u32 3, %v1168_v47  ;;  %v1060_v5 = vsel %vm9834_vm15, 0, %v9843_v46  ;;  %v9856_v11 = vshll.u32 %v3371_v41, 8 }
 0x2aa   : > { %v950_v16 = vmul.f32 %v949_v63, %v947_v1  ;;  %v3378_v54 = vsub.s32 32, %v3377_v31  ;;  %v3376_v35 = vshrl.u32 %v3375_v21, 5  ;;  %v3380_v17 = vshll.u32 %v11842_v26, %v3377_v31 }
 0x2ab   : > { %v6383_v10 = vadd.s32 4294967294, %v1039_v8  ;;  %v3383_v43 = vshll.u32 %v11850_v42, %v3377_v31  ;;  %v3386_v47 = vshll.u32 %v11851_v57, %v3377_v31  ;;  %v3389_v28 = vshll.u32 %v11862_v19, %v3377_v31 }
 0x2ac   : > { %v951_v9 = vxor.u32 2147483648, %v950_v16  ;;  %v3381_v51 = vshrl.u32 %v11850_v42, %v3378_v54  ;;  %v3384_v56 = vshrl.u32 %v11851_v57, %v3378_v54  ;;  %v3387_v61 = vshrl.u32 %v11862_v19, %v3378_v54 }
 0x2ad   : > { %vm6384_vm2 = vcmp.lt.s32.totalorder %v6383_v10, 0  ;;  %v3390_v41 = vshrl.u32 %v11852_v14, %v3378_v54  ;;  %v3392_v63 = vshll.u32 %v11852_v14, %v3377_v31  ;;  %v3393_v30 = vshrl.u32 %v11857_v49, %v3378_v54 }
 0x2ae   : > { %v952_v21 = vsel %vm869_vm5, %v951_v9, %v950_v16  ;;  %v1042_v46 = vsel %vm6384_vm2, 0, %v6383_v10  ;;  %v3382_v1 = vor.u32 %v3381_v51, %v3380_v17  ;;  %v3385_v37 = vor.u32 %v3384_v56, %v3383_v43  ;;  %v12059_v9 = vld [vmem:[#allocation31_spill] sm:$0xff] }
 0x2af   : > { %v955_v8 = vsel %vm9790_vm4, %v12013_v53, %v952_v21  ;;  %v1043_v13 = vsub.s32 32, %v1042_v46  ;;  %v1047_v7 = vsub.s32 4294967266, %v1042_v46  ;;  %v3388_v6 = vor.u32 %v3387_v61, %v3386_v47 }
 0x2b0   : > { %7296 = vcosq.f32 %v955_v8  ;;  %v3391_v18 = vor.u32 %v3390_v41, %v3389_v28  ;;  %v1044_v0 = vshll.u32 %v9824_v40, %v1042_v46  ;;  %v3379_v17 = vshrl.u32 %v11842_v26, %v3378_v54 }
 0x2b1   : > { %7298 = vsinq.f32 %v955_v8  ;;  %v1045_v16 = vshrl.u32 %v1027_v52, %v1043_v13  ;;  %v1048_v10 = vadd.s32 127, %v1047_v7  ;;  %v3394_v31 = vor.u32 %v3393_v30, %v3392_v63 }
 0x2b2   : > { %vm3398_vm5 = vcmp.lt.s32.totalorder %v3376_v35, 4  ;;  %v1172_v27 = vxor.u32 2147483648, %v12059_v9  ;;  %vm3395_vm4 = vcmp.lt.s32.totalorder %v3376_v35, 1  ;;  %vm3396_vm2 = vcmp.lt.s32.totalorder %v3376_v35, 2 }
 0x2b3   : > { %v1046_v51 = vor.u32 %v1045_v16, %v1044_v0  ;;  %v1049_v21 = vshll.u32 %v1048_v10, 23  ;;  %v3400_v43 = vsel %vm3398_vm5, %v3388_v6, 2102212464  ;;  %vm3397_vm11 = vcmp.lt.s32.totalorder %v3376_v35, 3  ;;  %v12060_v10 = vld [vmem:[#allocation3_spill] sm:$0xff]  ;;  %v9904_v35 = vpop.permute.xlu1 %571 }
 0x2b4   : > { %v3403_v56 = vsel %vm3395_vm4, %v3382_v1, %v3385_v37  ;;  %v3404_v47 = vsel %vm3398_vm5, %v3391_v18, 920167782  ;;  %v3399_v40 = vsel %vm3395_vm4, %v3379_v17, %v3382_v1  ;;  %v3407_v7 = vsel %vm3395_vm4, %v3385_v37, %v3388_v6  ;;  %v12061_v1 = vld [vmem:[#allocation29_spill] sm:$0xff]  ;;  %v12062_v17 = vld [vmem:[#allocation43_spill] sm:$0xff] }
 0x2b5   : > { %v1050_v61 = vor.u32 4788187, %v1049_v21  ;;  %v3405_v13 = vsel %vm3397_vm11, %v3388_v6, %v3404_v47  ;;  %v1053_v52 = vcvt.s32.f32 %v1046_v51  ;;  %v3401_v54 = vsel %vm3397_vm11, %v3385_v37, %v3400_v43  ;;  %v12066_v37 = vld [vmem:[#allocation48_spill] sm:$0xff] }
 0x2b6   : > { %v3406_v30 = vsel %vm3396_vm2, %v3403_v56, %v3405_v13  ;;  %v3408_v28 = vsel %vm3398_vm5, %v3394_v31, 1326507024  ;;  %v1064_v8 = vadd.s32 3, %v1060_v5  ;;  %v1175_v6 = vxor.u32 2147483648, %v12061_v1 }
 0x2b7   : > { %v1051_v0 = vand.u32 2147483647, %v1050_v61  ;;  %v3409_v41 = vsel %vm3397_vm11, %v3391_v18, %v3408_v28  ;;  %v9881_v46 = vmul.u32.u64.low %v9856_v11, %v3406_v30  ;;  %v9882_v63 = vmul.u32.u64.high %v9856_v11, %v3406_v30, %v9881_v46 }
 0x2b8   : > { %v3410_v16 = vsel %vm3396_vm2, %v3407_v7, %v3409_v41  ;;  %v1268_v51 = vsel %vm8436_vm10, 0, %v12062_v17  ;;  %vm1171_vm11 = vcmp.eq.s32.totalorder %v9851_v23, 0  ;;  %v3402_v5 = vsel %vm3396_vm2, %v3399_v40, %v3401_v54 }
 0x2b9   : > { %v1054_v21 = vmul.f32 %v1053_v52, %v1051_v0  ;;  %v9892_v31 = vmul.u32.u64.low %v9856_v11, %v3410_v16  ;;  %v9893_v18 = vmul.u32.u64.high %v9856_v11, %v3410_v16, %v9892_v31  ;;  %v1173_v56 = vsel %vm1171_vm11, %v12061_v1, %v1172_v27 }
 0x2ba   : > { %v7297_v43 = vpop.eup %7296  ;;  %vm1174_vm5 = vcmp.eq.s32.totalorder %v9851_v23, 2  ;;  %v1272_v47 = vadd.s32 3, %v1268_v51  ;;  %v3421_v30 = vadd.s32 1, %v9882_v63  ;;  %vm963_vm10 = vcmp.eq.s32.totalorder %v9845_v25, 0 }
 0x2bb   : > { %v7299_v61 = vpop.eup %7298  ;;  %v967_v13 = vxor.u32 2147483648, %v7297_v43  ;;  %v1055_v7 = vxor.u32 2147483648, %v1054_v21  ;;  %v1176_v52 = vsel %vm1174_vm5, %v1175_v6, %v12059_v9  ;;  %vm966_vm4 = vcmp.eq.s32.totalorder %v9845_v25, 2 }
 0x2bc   : > { %v964_v28 = vxor.u32 2147483648, %v7299_v61  ;;  %vm1170_vm6 = vcmp.lt.s32.totalorder %v9851_v23, 2  ;;  %vm959_vm2 = vweird.f32 %v12013_v53  ;;  %vm12064_vm11 = vcmp.lt.s32.totalorder %v12031_v33, 0 }
 0x2bd   : > { %v1056_v27 = vsel %vm12064_vm11, %v1055_v7, %v1054_v21  ;;  %v3418_v40 = vmul.u32 %v9856_v11, %v3402_v5  ;;  %vm3420_vm14 = vc.u32 %v9893_v18, %v9881_v46  ;;  %v1273_v9 = vand.u32 3, %v1272_v47  ;;  %v12065_v11 = vld [vmem:[#allocation51_spill] sm:$0xff] }
 0x2be   : > { %v1059_v54 = vsel %vm9834_vm15, %v12031_v33, %v1056_v27  ;;  %v9915_v0 = vand.u32 3, %v1064_v8  ;;  %v3422_v23 = vsel %vm3420_vm14, %v3421_v30, %v9882_v63  ;;  %v1177_v41 = vsel %vm1170_vm6, %v1173_v56, %v1176_v52  ;;  %v12068_v8 = vld [vmem:[#allocation44_spill] sm:$0xff]  ;;  %v12070_v5 = vld [vmem:[#allocation7_spill] sm:$0xff]  ;;  %v577_v56 = vpop.permute.xlu1 %576  ;;  %v12074_v30 = vld [vmem:[#allocation25_spill] sm:$0xff] }
 0x2bf   : > { %v965_v16 = vsel %vm963_vm10, %v7297_v43, %v964_v28  ;;  %v968_v1 = vsel %vm966_vm4, %v967_v13, %v7299_v61  ;;  %7300 = vcosq.f32 %v1059_v54  ;;  %v3423_v6 = vadd.s32 %v3422_v23, %v3418_v40  ;;  %v12072_v61 = vld [vmem:[#allocation57_spill] sm:$0xff]  ;;  %v12073_v13 = vld [vmem:[#allocation55_spill] sm:$0xff] }
 0x2c0   : > { %vm962_vm5 = vcmp.lt.s32.totalorder %v9845_v25, 2  ;;  %7302 = vsinq.f32 %v1059_v54  ;;  %v1276_v17 = vxor.u32 2147483648, %v12065_v11  ;;  %v1279_v51 = vxor.u32 2147483648, %v12066_v37 }
 0x2c1   : > { %v3424_v21 = vadd.s32 536870912, %v3423_v6  ;;  %vm12067_vm11 = vweird.f32 %v12060_v10  ;;  %vm1274_vm15 = vcmp.lt.s32.totalorder %v1273_v9, 2  ;;  %v1372_v31 = vsel %vm8563_vm9, 0, %v12068_v8 }
 0x2c2   : > { %v9923_v45 = vsel %vm12067_vm11, nan, %v1177_v41  ;;  %v969_v43 = vsel %vm962_vm5, %v965_v16, %v968_v1  ;;  %vm1271_vm14 = vweird.f32 %v12070_v5  ;;  %vm1275_vm6 = vcmp.eq.s32.totalorder %v1273_v9, 0  ;;  %v12076_v16 = vld [vmem:[#allocation41_spill] sm:$0xff] }
 0x2c3   : > { %vm1278_vm10 = vcmp.eq.s32.totalorder %v1273_v9, 2  ;;  %v1376_v25 = vadd.s32 3, %v1372_v31  ;;  %v9930_v47 = vshrl.u32 %v3424_v21, 30  ;;  %v1380_v10 = vxor.u32 2147483648, %v12072_v61  ;;  %v12077_v21 = vld [vmem:[#allocation39_spill] sm:$0xff]  ;;  %v12080_v9 = vld [vmem:[#allocation37_spill] sm:$0xff] }
 0x2c4   : > { %v1383_v7 = vxor.u32 2147483648, %v12073_v13  ;;  %v1476_v28 = vsel %vm8250_vm1, 0, %v12074_v30  ;;  %v1277_v27 = vsel %vm1275_vm6, %v12066_v37, %v1276_v17  ;;  %v1280_v40 = vsel %vm1278_vm10, %v1279_v51, %v12065_v11 }
 0x2c5   : > { %12071 = vst [vmem:[#allocation9_spill] sm:$0xff] %v9930_v47  ;;  %v1377_v54 = vand.u32 3, %v1376_v25  ;;  %v1480_v23 = vadd.s32 3, %v1476_v28  ;;  %v3426_v41 = vshll.u32 %v9930_v47, 30  ;;  %v1484_v1 = vxor.u32 2147483648, %v12076_v16 }
 0x2c6   : > { %v1487_v8 = vxor.u32 2147483648, %v12077_v21  ;;  %v630_v63 = vmul.f32 %v7662_v39, %v577_v56  ;;  %v970_v31 = vsel %vm959_vm2, nan, %v969_v43  ;;  %vm1063_vm1 = vweird.f32 %v12031_v33 }
 0x2c7   : > { %vm1379_vm11 = vcmp.eq.s32.totalorder %v1377_v54, 0  ;;  %vm1382_vm6 = vcmp.eq.s32.totalorder %v1377_v54, 2  ;;  %v1481_v11 = vand.u32 3, %v1480_v23  ;;  %vm11803_vm10 = vcmask 326656  }
 0x2c8   : > { %v9948_v17 = vsub.s32 %v3423_v6, %v3426_v41  ;;  %v1381_v37 = vsel %vm1379_vm11, %v12073_v13, %v1380_v10  ;;  %v1384_v51 = vsel %vm1382_vm6, %v1383_v7, %v12072_v61  ;;  %v666_v25 = vadd.f32 %v7668_v44, %v630_v63  ;;  %v12078_v10 = vld [vmem:[#allocation16_spill] sm:$0xff] }
 0x2c9   : > { %v1281_v30 = vsel %vm1274_vm15, %v1277_v27, %v1280_v40  ;;  %vm1378_vm5 = vcmp.lt.s32.totalorder %v1377_v54, 2  ;;  %vm1483_vm9 = vcmp.eq.s32.totalorder %v1481_v11, 0  ;;  %vm1486_vm4 = vcmp.eq.s32.totalorder %v1481_v11, 2  ;;  %v7301_v53 = vpop.eup %7300  ;;  %v12086_v54 = vld [vmem:[#allocation13_spill] sm:$0xff] }
 0x2ca   : > { %v3429_v43 = vsub.s32 0, %v9948_v17  ;;  %v1385_v56 = vsel %vm1378_vm5, %v1381_v37, %v1384_v51  ;;  %v1485_v52 = vsel %vm1483_vm9, %v12077_v21, %v1484_v1  ;;  %v1488_v6 = vsel %vm1486_vm4, %v1487_v8, %v12076_v16  ;;  %v7303_v28 = vpop.eup %7302 }
 0x2cb   : > { %v1071_v23 = vxor.u32 2147483648, %v7301_v53  ;;  %vm1375_vm2 = vweird.f32 %v12078_v10  ;;  %v9959_v61 = vadd.f32 %v9195_v15, %v666_v25  ;;  %v1580_v7 = vsel %vm8358_vm0, 0, %v12080_v9 }
 0x2cc   : > { %v12082_v27 = vand.u32 2147483647, %v9276_v55  ;;  %v12083_v40 = vmov 0  ;;  %vm3053_vm9 = vcmp.lt.s32.totalorder %v12086_v54, 0  ;;  %v1068_v41 = vxor.u32 2147483648, %v7303_v28 }
 0x2cd   : > { %12079 = vst [vmem:[#allocation8_spill] sm:$0xff] %v9959_v61  ;;  %v6474_v16 = vmin.u32 %v3429_v43, %v9948_v17  ;;  %v1282_v1 = vsel %vm1271_vm14, nan, %v1281_v30  ;;  %vm1482_vm4 = vcmp.lt.s32.totalorder %v1481_v11, 2  ;;  %vm12087_vm5 = vcmp.eq.s32.totalorder %v9915_v0, 2  ;;  %v12090_v30 = vld [vmem:[#allocation4_spill] sm:$0xff] }
 0x2ce   : > { %vm9966_vm15 = vcmp.le.f32.partialorder %v12082_v27, 0.7853982  ;;  %v1072_v15 = vsel %vm12087_vm5, %v1071_v23, %v7303_v28  ;;  %v1386_v21 = vsel %vm1375_vm2, nan, %v1385_v56  ;;  %v1489_v8 = vsel %vm1482_vm4, %v1485_v52, %v1488_v6 }
 0x2cf   : > { %v12084_v40 = vsel %vm9966_vm15, 4294967295, %v12083_v40  ;;  %v11773_v63 = vand.u32 2147483647, %v9959_v61  ;;  %vm12088_vm0 = vcmp.eq.s32.totalorder %v9915_v0, 0  ;;  %v3431_v51 = vclz %v6474_v16 }
 0x2d0   : > { %12085 = vst [vmem:[#allocation12_spill] sm:$0xff] %v12084_v40  ;;  %v1069_v37 = vsel %vm12088_vm0, %v7301_v53, %v1068_v41  ;;  %v3678_v25 = vand.u32 2139095040, %v9959_v61  ;;  %v1584_v10 = vadd.s32 3, %v1580_v7  ;;  %v3233_v43 = vshll.u32 %v9849_v38, 23  ;;  %v12094_v41 = vld [vmem:[#allocation46_spill] sm:$0xff] }
 0x2d1   : > { %vm12089_vm11 = vcmp.lt.s32.totalorder %v9915_v0, 2  ;;  %v4196_v11 = vpack.c.bf16 %v1282_v1, %v9923_v45  ;;  %vm1479_vm14 = vweird.f32 %v12090_v30  ;;  %v6475_v52 = vadd.s32 4294967294, %v3431_v51 }
 0x2d2   : > { %v1073_v5 = vsel %vm12089_vm11, %v1069_v37, %v1072_v15  ;;  %v1490_v6 = vsel %vm1479_vm14, nan, %v1489_v8  ;;  %v3679_v28 = vshrl.u32 %v3678_v25, 23  ;;  %v12091_v53 = vand.u32 2147483647, %v9806_v24  ;;  %v12101_v8 = vld [vmem:[#allocation18_spill] sm:$0xff] }
 0x2d3   : > { %v1074_v56 = vsel %vm1063_vm1, nan, %v1073_v5  ;;  %v12092_v23 = vcvt.s32.f32 %v9782_v62  ;;  %v4197_v13 = vpack.c.bf16 %v1490_v6, %v1386_v21  ;;  %v3682_v0 = vand.u32 8388607, %v11773_v63  ;;  %v12093_v62 = vld [vmem:[#allocation47_spill] sm:$0xff] }
 0x2d4   : > { %v4195_v38 = vpack.c.bf16 %v1074_v56, %v970_v31  ;;  %v3228_v45 = vshll.u32 %v9702_v20, %v9814_v32  ;;  %vm6476_vm6 = vcmp.lt.s32.totalorder %v6475_v52, 0  ;;  %v6485_v33 = vadd.s32 4294967169, %v3679_v28  ;;  %v12095_v32 = vld [vmem:[#allocation50_spill] sm:$0xff] }
 0x2d5   : > { %v9991_v9 = vmul.f32 %v12092_v23, %v12091_v53  ;;  %v1585_v7 = vand.u32 3, %v1584_v10  ;;  %7304 = vsinq.f32 %v9773_v4  ;;  %v9999_v24 = vsel %vm6476_vm6, 0, %v6475_v52 }
 0x2d6   : > { %6783 = vmatprep.mubr.msk.bf16.mxu0 %vm11803_vm10, %v4195_v38  ;;  %v1588_v27 = vxor.u32 2147483648, %v12093_v62  ;;  %v1591_v31 = vxor.u32 2147483648, %v12094_v41  ;;  %v10004_v16 = vor.u32 %v9847_v3, %v3228_v45  ;;  %v10006_v1 = vor.u32 4788187, %v3233_v43 }
 0x2d7   : > { %6784 = vmatmul.mubr.msk.bf16.vlgmr.msra.gmra.mrb[0].mxu0 %vm11803_vm10, %v4196_v11  ;;  %v3685_v20 = vadd.s32 1, %v6485_v33  ;;  %v1684_v4 = vsel %vm8642_vm7, 0, %v12095_v32  ;;  %v10016_v21 = vsel %vm9966_vm15, %v9276_v55, %v9796_v60  ;;  %v12097_v3 = vsub.s32 4, %v9536_v36 }
 0x2d8   : > { %6787 = vmatprep.mubr.msk.bf16.mxu0 %vm11803_vm10, %v4197_v13  ;;  %v3683_v51 = vor.u32 8388608, %v3682_v0  ;;  %v3439_v25 = vsub.s32 4294967266, %v9999_v24  ;;  %vm1587_vm1 = vcmp.eq.s32.totalorder %v1585_v7, 0  ;;  %vm1590_vm2 = vcmp.eq.s32.totalorder %v1585_v7, 2  ;;  %v12098_v13 = vld [vmem:[#allocation60_spill] sm:$0xff] }
 0x2d9   : > { %v10024_v37 = vsel %vm3053_vm9, %v12097_v3, %v9536_v36  ;;  %vm3686_vm7 = vcmp.gt.s32.totalorder %v3685_v20, 0  ;;  %v1589_v60 = vsel %vm1587_vm1, %v12094_v41, %v1588_v27  ;;  %v1592_v43 = vsel %vm1590_vm2, %v1591_v31, %v12093_v62  ;;  %v12099_v62 = vld [vmem:[#allocation5_spill] sm:$0xff] }
 0x2da   : > { %v3687_v10 = vsel %vm3686_vm7, %v3685_v20, 0  ;;  %v1688_v5 = vadd.s32 3, %v1684_v4  ;;  %v10034_v36 = vmul.f32 %v7662_v39, %v9904_v35  ;;  %v10038_v52 = vadd.s32 %v9881_v46, %v9893_v18 }
 0x2db   : > { %v3689_v56 = vand.u32 31, %v3687_v10  ;;  %v10041_v28 = vshll.u32 %v3683_v51, 8  ;;  %vm1586_vm4 = vcmp.lt.s32.totalorder %v1585_v7, 2  ;;  %v10043_v53 = vadd.s32 127, %v3439_v25 }
 0x2dc   : > { %v1593_v38 = vsel %vm1586_vm4, %v1589_v60, %v1592_v43  ;;  %v1692_v0 = vxor.u32 2147483648, %v12098_v13  ;;  %v3688_v45 = vshrl.u32 %v3687_v10, 5  ;;  %vm1583_vm5 = vweird.f32 %v12099_v62  ;;  %v12100_v10 = vld [vmem:[#allocation59_spill] sm:$0xff]  ;;  %v12105_v62 = vld [vmem:[#allocation72_spill] sm:$0xff] }
 0x2dd   : > { %v3690_v23 = vsub.s32 32, %v3689_v56  ;;  %v3692_v35 = vshll.u32 %v11842_v26, %v3689_v56  ;;  %v3695_v33 = vshll.u32 %v11850_v42, %v3689_v56  ;;  %v1689_v46 = vand.u32 3, %v1688_v5 }
 0x2de   : > { %v3698_v7 = vshll.u32 %v11851_v57, %v3689_v56  ;;  %v3701_v41 = vshll.u32 %v11862_v19, %v3689_v56  ;;  %v3704_v15 = vshll.u32 %v11852_v14, %v3689_v56  ;;  %v1695_v60 = vxor.u32 2147483648, %v12100_v10 }
 0x2df   : > { %v3693_v18 = vshrl.u32 %v11850_v42, %v3690_v23  ;;  %v3696_v27 = vshrl.u32 %v11851_v57, %v3690_v23  ;;  %v10053_v31 = vpop.eup %7304  ;;  %v3699_v20 = vshrl.u32 %v11862_v19, %v3690_v23  ;;  %v3702_v32 = vshrl.u32 %v11852_v14, %v3690_v23 }
 0x2e0   : > { %v3705_v4 = vshrl.u32 %v11857_v49, %v3690_v23  ;;  %v3691_v3 = vshrl.u32 %v11842_v26, %v3690_v23  ;;  %vm3707_vm0 = vcmp.lt.s32.totalorder %v3688_v45, 1  ;;  %vm1687_vm11 = vweird.f32 %v12101_v8 }
 0x2e1   : > { %v3694_v51 = vor.u32 %v3693_v18, %v3692_v35  ;;  %v3697_v25 = vor.u32 %v3696_v27, %v3695_v33  ;;  %v3700_v43 = vor.u32 %v3699_v20, %v3698_v7  ;;  %v3703_v5 = vor.u32 %v3702_v32, %v3701_v41  ;;  %v12102_v41 = vld [vmem:[#allocation58_spill] sm:$0xff] }
 0x2e2   : > { %v3706_v63 = vor.u32 %v3705_v4, %v3704_v15  ;;  %vm3709_vm14 = vcmp.lt.s32.totalorder %v3688_v45, 3  ;;  %vm3710_vm6 = vcmp.lt.s32.totalorder %v3688_v45, 4  ;;  %vm3708_vm7 = vcmp.lt.s32.totalorder %v3688_v45, 2 }
 0x2e3   : > { %v3711_v6 = vsel %vm3707_vm0, %v3691_v3, %v3694_v51  ;;  %v3715_v30 = vsel %vm3707_vm0, %v3694_v51, %v3697_v25  ;;  %v3712_v11 = vsel %vm3710_vm6, %v3700_v43, 2102212464  ;;  %v3716_v56 = vsel %vm3710_vm6, %v3703_v5, 920167782  ;;  %v12104_v51 = vld [vmem:[#allocation73_spill] sm:$0xff] }
 0x2e4   : > { %v3719_v47 = vsel %vm3707_vm0, %v3697_v25, %v3700_v43  ;;  %v3720_v40 = vsel %vm3710_vm6, %v3706_v63, 1326507024  ;;  %v3713_v23 = vsel %vm3709_vm14, %v3697_v25, %v3712_v11  ;;  %v3717_v35 = vsel %vm3709_vm14, %v3700_v43, %v3716_v56  ;;  %v12106_v43 = vld [vmem:[#allocation56_spill] sm:$0xff] }
 0x2e5   : > { %v3721_v33 = vsel %vm3709_vm14, %v3703_v5, %v3720_v40  ;;  %v3714_v18 = vsel %vm3708_vm7, %v3711_v6, %v3713_v23  ;;  %v3718_v27 = vsel %vm3708_vm7, %v3715_v30, %v3717_v35  ;;  %v1788_v32 = vsel %vm8915_vm12, 0, %v12102_v41  ;;  %v12109_v23 = vld [vmem:[#allocation62_spill] sm:$0xff]  ;;  %v12116_v5 = vld [vmem:[#allocation24_spill] sm:$0xff] }
 0x2e6   : > { %v3722_v7 = vsel %vm3708_vm7, %v3719_v47, %v3721_v33  ;;  %v1594_v3 = vsel %vm1583_vm5, nan, %v1593_v38  ;;  %vm1691_vm1 = vcmp.eq.s32.totalorder %v1689_v46, 0  ;;  %vm1694_vm2 = vcmp.eq.s32.totalorder %v1689_v46, 2  ;;  %v773_v33 = vpop.permute.xlu1 %772 }
 0x2e7   : > { %v10066_v15 = vmul.u32.u64.low %v10041_v28, %v3722_v7  ;;  %v10067_v4 = vmul.u32.u64.high %v10041_v28, %v3722_v7, %v10066_v15  ;;  %v10072_v63 = vmul.u32.u64.low %v10041_v28, %v3718_v27  ;;  %v10073_v11 = vmul.u32.u64.high %v10041_v28, %v3718_v27, %v10072_v63 }
 0x2e8   : > { %v1693_v40 = vsel %vm1691_vm1, %v12100_v10, %v1692_v0  ;;  %v3730_v47 = vmul.u32 %v10041_v28, %v3714_v18  ;;  %vm1690_vm4 = vcmp.lt.s32.totalorder %v1689_v46, 2  ;;  %v1696_v30 = vsel %vm1694_vm2, %v1695_v60, %v12098_v13  ;;  %v12108_v28 = vld [vmem:[#allocation33_spill] sm:$0xff] }
 0x2e9   : > { %v1792_v6 = vadd.s32 3, %v1788_v32  ;;  %v1697_v45 = vsel %vm1690_vm4, %v1693_v40, %v1696_v30  ;;  %v1796_v25 = vxor.u32 2147483648, %v12104_v51  ;;  %v1799_v38 = vxor.u32 2147483648, %v12105_v62  ;;  %v12110_v18 = vld [vmem:[#allocation61_spill] sm:$0xff]  ;;  %v12112_v30 = vld [vmem:[#allocation63_spill] sm:$0xff] }
 0x2ea   : > { %v1892_v56 = vsel %vm8649_vm13, 0, %v12106_v43  ;;  %vm3732_vm12 = vc.u32 %v10067_v4, %v10072_v63  ;;  %v1698_v0 = vsel %vm1687_vm11, nan, %v1697_v45  ;;  %vm1791_vm5 = vweird.f32 %v12108_v28 }
 0x2eb   : > { %v1793_v46 = vand.u32 3, %v1792_v6  ;;  %v3733_v13 = vadd.s32 1, %v10073_v11  ;;  %v4198_v10 = vpack.c.bf16 %v1698_v0, %v1594_v3  ;;  %v1896_v60 = vadd.s32 3, %v1892_v56  ;;  %v12111_v3 = vld [vmem:[#allocation2_spill] sm:$0xff] }
 0x2ec   : > { %v1900_v35 = vxor.u32 2147483648, %v12109_v23  ;;  %v1903_v27 = vxor.u32 2147483648, %v12110_v18  ;;  %v828_v40 = vmul.f32 %v12111_v3, %v773_v33  ;;  %v1996_v45 = vsel %vm8930_vm3, 0, %v12112_v30  ;;  %v12124_v30 = vld [vmem:[#allocation69_spill] sm:$0xff] }
 0x2ed   : > { %vm1794_vm0 = vcmp.lt.s32.totalorder %v1793_v46, 2  ;;  %vm1795_vm14 = vcmp.eq.s32.totalorder %v1793_v46, 0  ;;  %vm1798_vm6 = vcmp.eq.s32.totalorder %v1793_v46, 2  ;;  %v3734_v7 = vsel %vm3732_vm12, %v3733_v13, %v10073_v11  ;;  %6788 = vmatmul.mubr.msk.bf16.gmra.mrb[4].mxu0 %vm11803_vm10, %v4198_v10  ;;  %v12118_v10 = vld [vmem:[#allocation75_spill] sm:$0xff] }
 0x2ee   : > { %v1797_v8 = vsel %vm1795_vm14, %v12105_v62, %v1796_v25  ;;  %v1800_v41 = vsel %vm1798_vm6, %v1799_v38, %v12104_v51  ;;  %v1897_v20 = vand.u32 3, %v1896_v60  ;;  %v3735_v32 = vadd.s32 %v3734_v7, %v3730_v47  ;;  %v12114_v62 = vld [vmem:[#allocation20_spill] sm:$0xff] }
 0x2ef   : > { %v1801_v15 = vsel %vm1794_vm0, %v1797_v8, %v1800_v41  ;;  %v10105_v47 = vadd.f32 %v828_v40, %v12114_v62  ;;  %v3441_v38 = vshll.u32 %v10043_v53, 23  ;;  %vm1895_vm1 = vweird.f32 %v12116_v5  ;;  %v12123_v40 = vld [vmem:[#allocation70_spill] sm:$0xff] }
 0x2f0   : > { %v1802_v43 = vsel %vm1791_vm5, nan, %v1801_v15  ;;  %vm1898_vm13 = vcmp.lt.s32.totalorder %v1897_v20, 2  ;;  %vm1899_vm11 = vcmp.eq.s32.totalorder %v1897_v20, 0  ;;  %vm1902_vm7 = vcmp.eq.s32.totalorder %v1897_v20, 2 }
 0x2f1   : > { %v3736_v11 = vadd.s32 536870912, %v3735_v32  ;;  %v1901_v25 = vsel %vm1899_vm11, %v12110_v18, %v1900_v35  ;;  %v1904_v51 = vsel %vm1902_vm7, %v1903_v27, %v12109_v23  ;;  %12115 = vst [vmem:[#allocation17_spill] sm:$0xff] %v10105_v47  ;;  %v2000_v0 = vadd.s32 3, %v1996_v45  ;;  %v12119_v18 = vld [vmem:[#allocation74_spill] sm:$0xff] }
 0x2f2   : > { %v1905_v56 = vsel %vm1898_vm13, %v1901_v25, %v1904_v51  ;;  %v11778_v13 = vand.u32 2147483647, %v10105_v47  ;;  %v2004_v60 = vxor.u32 2147483648, %v12118_v10  ;;  %v3470_v35 = vand.u32 2139095040, %v10105_v47 }
 0x2f3   : > { %v10109_v46 = vshrl.u32 %v3736_v11, 30  ;;  %v1906_v28 = vsel %vm1895_vm1, nan, %v1905_v56  ;;  %v2001_v23 = vand.u32 3, %v2000_v0  ;;  %v2007_v27 = vxor.u32 2147483648, %v12119_v18  ;;  %v777_v11 = vpop.permute.xlu1 %776  ;;  %v12126_v56 = vld [vmem:[#allocation85_spill] sm:$0xff] }
 0x2f4   : > { %v4199_v33 = vpack.c.bf16 %v1906_v28, %v1802_v43  ;;  %v12120_v7 = vand.u32 2147483647, %v10006_v1  ;;  %v12121_v53 = vcvt.s32.f32 %v10004_v16  ;;  %v12122_v41 = vsub.s32 32, %v9999_v24 }
 0x2f5   : > { %12117 = vst [vmem:[#allocation19_spill] sm:$0xff] %v10109_v46  ;;  %v3738_v15 = vshll.u32 %v10109_v46, 30  ;;  %vm12125_vm3 = vnez %v12124_v30  ;;  %v3436_v45 = vshll.u32 %v9948_v17, %v9999_v24  ;;  %v665_v1 = vadd.f32 %v7668_v44, %v10034_v36 }
 0x2f6   : > { %v10119_v8 = vmul.f32 %v12121_v53, %v12120_v7  ;;  %v3437_v20 = vshrl.u32 %v10038_v52, %v12122_v41  ;;  %v2100_v6 = vsel %vm12125_vm3, 0, %v12123_v40  ;;  %6791 = vmatprep.mubr.msk.bf16.mxu0 %vm11803_vm10, %v4199_v33  ;;  %v3471_v16 = vshrl.u32 %v3470_v35, 23 }
 0x2f7   : > { %v3474_v43 = vand.u32 8388607, %v11778_v13  ;;  %v10135_v52 = vor.u32 4788187, %v3441_v38  ;;  %v10137_v25 = vsub.s32 %v3735_v32, %v3738_v15  ;;  %vm2003_vm2 = vcmp.eq.s32.totalorder %v2001_v23, 0  ;;  %v12127_v32 = vld [vmem:[#allocation82_spill] sm:$0xff] }
 0x2f8   : > { %vm2006_vm4 = vcmp.eq.s32.totalorder %v2001_v23, 2  ;;  %v6477_v51 = vadd.s32 4294967169, %v3471_v16  ;;  %v2005_v62 = vsel %vm2003_vm2, %v12119_v18, %v2004_v60  ;;  %v2104_v24 = vadd.s32 3, %v2100_v6  ;;  %v12128_v6 = vld [vmem:[#allocation36_spill] sm:$0xff] }
 0x2f9   : > { %v2008_v17 = vsel %vm2006_vm4, %v2007_v27, %v12118_v10  ;;  %v10141_v36 = vor.u32 %v3437_v20, %v3436_v45  ;;  %v3741_v5 = vsub.s32 0, %v10137_v25  ;;  %vm2002_vm12 = vcmp.lt.s32.totalorder %v2001_v23, 2  ;;  %v582_v27 = vpop.permute.xlu1 %581 }
 0x2fa   : > { %v2108_v0 = vxor.u32 2147483648, %v12126_v56  ;;  %v3475_v28 = vor.u32 8388608, %v3474_v43  ;;  %v3477_v38 = vadd.s32 1, %v6477_v51  ;;  %v2105_v33 = vand.u32 3, %v2104_v24 }
 0x2fb   : > { %v2111_v35 = vxor.u32 2147483648, %v12127_v32  ;;  %v3443_v7 = vand.u32 2147483647, %v10135_v52  ;;  %v3731_v60 = vadd.s32 %v10072_v63, %v10067_v4  ;;  %v6486_v10 = vmin.u32 %v3741_v5, %v10137_v25  ;;  %v12129_v4 = vld [vmem:[#allocation42_spill] sm:$0xff] }
 0x2fc   : > { %v2009_v18 = vsel %vm2002_vm12, %v2005_v62, %v2008_v17  ;;  %vm3478_vm5 = vcmp.gt.s32.totalorder %v3477_v38, 0  ;;  %vm2107_vm0 = vcmp.eq.s32.totalorder %v2105_v33, 0  ;;  %vm2110_vm14 = vcmp.eq.s32.totalorder %v2105_v33, 2 }
 0x2fd   : > { %v829_v23 = vmul.f32 %v12111_v3, %v777_v11  ;;  %v3743_v53 = vclz %v6486_v10  ;;  %v3479_v41 = vsel %vm3478_vm5, %v3477_v38, 0  ;;  %v2109_v20 = vsel %vm2107_vm0, %v12127_v32, %v2108_v0 }
 0x2fe   : > { %v2112_v15 = vsel %vm2110_vm14, %v2111_v35, %v12126_v56  ;;  %v3481_v40 = vand.u32 31, %v3479_v41  ;;  %v10153_v30 = vshll.u32 %v3475_v28, 8  ;;  %vm1999_vm6 = vweird.f32 %v12128_v6 }
 0x2ff   : > { %vm2103_vm13 = vweird.f32 %v12129_v4  ;;  %v6487_v63 = vadd.s32 4294967294, %v3743_v53  ;;  %v2010_v45 = vsel %vm1999_vm6, nan, %v2009_v18  ;;  %vm2106_vm11 = vcmp.lt.s32.totalorder %v2105_v33, 2 }
 0x300   : > { %v631_v16 = vmul.f32 %v7662_v39, %v582_v27  ;;  %v10158_v43 = vshrl.u32 %v3479_v41, 5  ;;  %v3482_v11 = vsub.s32 32, %v3481_v40  ;;  %v2113_v51 = vsel %vm2106_vm11, %v2109_v20, %v2112_v15 }
 0x301   : > { %v10160_v62 = vadd.f32 %v829_v23, %v665_v1  ;;  %vm6488_vm7 = vcmp.lt.s32.totalorder %v6487_v63, 0  ;;  %v3484_v17 = vshll.u32 %v11842_v26, %v3481_v40  ;;  %v3487_v24 = vshll.u32 %v11850_v42, %v3481_v40 }
 0x302   : > { %v3490_v5 = vshll.u32 %v11851_v57, %v3481_v40  ;;  %v3746_v56 = vsel %vm6488_vm7, 0, %v6487_v63  ;;  %v3485_v0 = vshrl.u32 %v11850_v42, %v3482_v11  ;;  %v3488_v28 = vshrl.u32 %v11851_v57, %v3482_v11 }
 0x303   : > { %v3493_v38 = vshll.u32 %v11862_v19, %v3481_v40  ;;  %v3747_v33 = vsub.s32 32, %v3746_v56  ;;  %v3751_v32 = vsub.s32 4294967266, %v3746_v56  ;;  %v3491_v35 = vshrl.u32 %v11862_v19, %v3482_v11 }
 0x304   : > { %v3496_v1 = vshll.u32 %v11852_v14, %v3481_v40  ;;  %v3486_v10 = vor.u32 %v3485_v0, %v3484_v17  ;;  %v3489_v18 = vor.u32 %v3488_v28, %v3487_v24  ;;  %v3494_v23 = vshrl.u32 %v11852_v14, %v3482_v11  ;;  %v10177_v40 = vpop.permute.xlu1 %591 }
 0x305   : > { %v3497_v27 = vshrl.u32 %v11857_v49, %v3482_v11  ;;  %v3752_v53 = vadd.s32 127, %v3751_v32  ;;  %v3492_v41 = vor.u32 %v3491_v35, %v3490_v5  ;;  %v2114_v20 = vsel %vm2103_vm13, nan, %v2113_v51 }
 0x306   : > { %v667_v15 = vadd.f32 %v7668_v44, %v631_v16  ;;  %v3495_v6 = vor.u32 %v3494_v23, %v3493_v38  ;;  %vm3499_vm1 = vcmp.lt.s32.totalorder %v10158_v43, 1  ;;  %vm3502_vm3 = vcmp.lt.s32.totalorder %v10158_v43, 4 }
 0x307   : > { %v3498_v63 = vor.u32 %v3497_v27, %v3496_v1  ;;  %v3748_v17 = vshll.u32 %v10137_v25, %v3746_v56  ;;  %v3753_v24 = vshll.u32 %v3752_v53, 23  ;;  %v3483_v0 = vshrl.u32 %v11842_v26, %v3482_v11 }
 0x308   : > { %v3504_v5 = vsel %vm3502_vm3, %v3492_v41, 2102212464  ;;  %v3749_v4 = vshrl.u32 %v3731_v60, %v3747_v33  ;;  %vm3501_vm2 = vcmp.lt.s32.totalorder %v10158_v43, 3  ;;  %v3507_v16 = vsel %vm3499_vm1, %v3486_v10, %v3489_v18 }
 0x309   : > { %v3508_v51 = vsel %vm3502_vm3, %v3495_v6, 920167782  ;;  %v12130_v28 = vand.u32 2147483647, %v12086_v54  ;;  %vm3500_vm12 = vcmp.lt.s32.totalorder %v10158_v43, 2  ;;  %v3503_v25 = vsel %vm3499_vm1, %v3483_v0, %v3486_v10 }
 0x30a   : > { %v3509_v11 = vsel %vm3501_vm2, %v3492_v41, %v3508_v51  ;;  %v3511_v56 = vsel %vm3499_vm1, %v3489_v18, %v3492_v41  ;;  %vm3157_vm5 = vcmp.lt.s32.totalorder %v9444_v22, 0  ;;  %v3505_v60 = vsel %vm3501_vm2, %v3489_v18, %v3504_v5  ;;  %v12137_v5 = vld [vmem:[#allocation88_spill] sm:$0xff] }
 0x30b   : > { %vm10188_vm4 = vcmp.le.f32.partialorder %v12130_v28, 0.7853982  ;;  %v3510_v33 = vsel %vm3500_vm12, %v3507_v16, %v3509_v11  ;;  %v3512_v32 = vsel %vm3502_vm3, %v3498_v63, 1326507024  ;;  %v4200_v35 = vpack.c.bf16 %v2114_v20, %v2010_v45  ;;  %v597_v63 = vpop.permute.xlu1 %596 }
 0x30c   : > { %v3754_v1 = vor.u32 4788187, %v3753_v24  ;;  %v3513_v23 = vsel %vm3501_vm2, %v3495_v6, %v3512_v32  ;;  %v10199_v27 = vmul.u32.u64.low %v10153_v30, %v3510_v33  ;;  %v10200_v53 = vmul.u32.u64.high %v10153_v30, %v3510_v33, %v10199_v27 }
 0x30d   : > { %v3445_v10 = vcvt.s32.f32 %v10141_v36  ;;  %v3514_v41 = vsel %vm3500_vm12, %v3511_v56, %v3513_v23  ;;  %6792 = vmatmul.mubr.msk.bf16.gmra.mrb[8].mxu0 %vm11803_vm10, %v4200_v35  ;;  %v11777_v18 = vand.u32 2147483647, %v10160_v62  ;;  %v3574_v0 = vand.u32 2139095040, %v10160_v62 }
 0x30e   : > { %v12133_v45 = vand.u32 2147483647, %v9444_v22  ;;  %v12134_v20 = vmov 0  ;;  %v3750_v6 = vor.u32 %v3749_v4, %v3748_v17  ;;  %v10220_v16 = vadd.f32 %v12137_v5, %v667_v15 }
 0x30f   : > { %v10216_v24 = vmul.u32.u64.low %v10153_v30, %v3514_v41  ;;  %v10217_v36 = vmul.u32.u64.high %v10153_v30, %v3514_v41, %v10216_v24  ;;  %v12139_v51 = vxor.u32 2147483648, %v9991_v9  ;;  %v3446_v11 = vmul.f32 %v3445_v10, %v3443_v7 }
 0x310   : > { %vm10211_vm0 = vcmp.le.f32.partialorder %v12133_v45, 0.7853982  ;;  %12138 = vst [vmem:[#allocation22_spill] sm:$0xff] %v10220_v16  ;;  %v3506_v56 = vsel %vm3500_vm12, %v3503_v25, %v3505_v60  ;;  %v3575_v17 = vshrl.u32 %v3574_v0, 23  ;;  %v3239_v4 = vxor.u32 2147483648, %v10119_v8 }
 0x311   : > { %v12135_v20 = vsel %vm10211_vm0, 4294967295, %v12134_v20  ;;  %v3136_v28 = vsel %vm3053_vm9, %v12139_v51, %v9991_v9  ;;  %v3755_v33 = vand.u32 2147483647, %v3754_v1  ;;  %v3525_v32 = vadd.s32 1, %v10200_v53 }
 0x312   : > { %12136 = vst [vmem:[#allocation14_spill] sm:$0xff] %v12135_v20  ;;  %v634_v15 = vmul.f32 %v7662_v39, %v597_v63  ;;  %7306 = vcosq.f32 %v10016_v21  ;;  %v6481_v35 = vadd.s32 4294967169, %v3575_v17  ;;  %v3578_v9 = vand.u32 8388607, %v11777_v18  ;;  %v12140_v17 = vld [vmem:[#allocation90_spill] sm:$0xff] }
 0x313   : > { %v3782_v52 = vand.u32 2139095040, %v10220_v16  ;;  %7308 = vsinq.f32 %v10016_v21  ;;  %v3757_v7 = vcvt.s32.f32 %v3750_v6  ;;  %v3522_v43 = vmul.u32 %v10153_v30, %v3506_v56 }
 0x314   : > { %vm3524_vm9 = vc.u32 %v10217_v36, %v10199_v27  ;;  %v3139_v25 = vsel %vm10188_vm4, %v12086_v54, %v3136_v28  ;;  %v3447_v60 = vxor.u32 2147483648, %v3446_v11  ;;  %v3581_v23 = vadd.s32 1, %v6481_v35 }
 0x315   : > { %v3526_v1 = vsel %vm3524_vm9, %v3525_v32, %v10200_v53  ;;  %v3240_v10 = vsel %vm3157_vm5, %v3239_v4, %v10119_v8  ;;  %v10249_v41 = vmul.f32 %v3757_v7, %v3755_v33  ;;  %v670_v30 = vadd.f32 %v7668_v44, %v634_v15 }
 0x316   : > { %v3527_v21 = vadd.s32 %v3526_v1, %v3522_v43  ;;  %v3579_v63 = vor.u32 8388608, %v3578_v9  ;;  %vm3582_vm14 = vcmp.gt.s32.totalorder %v3581_v23, 0  ;;  %v3783_v45 = vshrl.u32 %v3782_v52, 23 }
 0x317   : > { %7310 = vcosq.f32 %v3139_v25  ;;  %vm11802_vm6 = vcmp.lt.s32.totalorder %v9785_v58, 0  ;;  %v3583_v53 = vsel %vm3582_vm14, %v3581_v23, 0  ;;  %v10257_v8 = vsel %vm10211_vm0, %v9444_v22, %v3240_v10 }
 0x318   : > { %v3528_v6 = vadd.s32 536870912, %v3527_v21  ;;  %7312 = vsinq.f32 %v3139_v25  ;;  %v3448_v24 = vsel %vm11802_vm6, %v3447_v60, %v3446_v11  ;;  %v3585_v5 = vand.u32 31, %v3583_v53 }
 0x319   : > { %v10266_v4 = vadd.f32 %v12140_v17, %v670_v30  ;;  %v3584_v33 = vshrl.u32 %v3583_v53, 5  ;;  %v10268_v15 = vshll.u32 %v3579_v63, 8  ;;  %v6489_v35 = vadd.s32 4294967169, %v3783_v45 }
 0x31a   : > { %v10262_v28 = vshrl.u32 %v3528_v6, 30  ;;  %v3586_v32 = vsub.s32 32, %v3585_v5  ;;  %v3588_v52 = vshll.u32 %v11842_v26, %v3585_v5  ;;  %v3591_v11 = vshll.u32 %v11850_v42, %v3585_v5 }
 0x31b   : > { %v3594_v7 = vshll.u32 %v11851_v57, %v3585_v5  ;;  %v3597_v23 = vshll.u32 %v11862_v19, %v3585_v5  ;;  %v12143_v30 = vand.u32 2147483647, %v9785_v58  ;;  %v12144_v63 = vmov 0 }
 0x31c   : > { %v3530_v9 = vshll.u32 %v10262_v28, 30  ;;  %v10274_v43 = vpop.eup %7306  ;;  %v3589_v25 = vshrl.u32 %v11850_v42, %v3586_v32  ;;  %v3592_v60 = vshrl.u32 %v11851_v57, %v3586_v32  ;;  %v3595_v1 = vshrl.u32 %v11862_v19, %v3586_v32 }
 0x31d   : > { %12141 = vst [vmem:[#allocation23_spill] sm:$0xff] %v10274_v43  ;;  %v10280_v10 = vpop.eup %7308  ;;  %vm10284_vm13 = vcmp.le.f32.partialorder %v12143_v30, 0.7853982  ;;  %v3598_v6 = vshrl.u32 %v11852_v14, %v3586_v32  ;;  %v3600_v53 = vshll.u32 %v11852_v14, %v3585_v5  ;;  %v3601_v17 = vshrl.u32 %v11857_v49, %v3586_v32 }
 0x31e   : > { %12142 = vst [vmem:[#allocation31_spill] sm:$0xff] %v10280_v10  ;;  %v12145_v63 = vsel %vm10284_vm13, 4294967295, %v12144_v63  ;;  %v10288_v45 = vsub.s32 %v3527_v21, %v3530_v9  ;;  %v3590_v18 = vor.u32 %v3589_v25, %v3588_v52  ;;  %v3593_v13 = vor.u32 %v3592_v60, %v3591_v11 }
 0x31f   : > { %12146 = vst [vmem:[#allocation3_spill] sm:$0xff] %v12145_v63  ;;  %v3596_v51 = vor.u32 %v3595_v1, %v3594_v7  ;;  %v3789_v56 = vadd.s32 1, %v6489_v35  ;;  %v3599_v46 = vor.u32 %v3598_v6, %v3597_v23  ;;  %v3602_v43 = vor.u32 %v3601_v17, %v3600_v53 }
 0x320   : > { %v3533_v0 = vsub.s32 0, %v10288_v45  ;;  %vm3603_vm11 = vcmp.lt.s32.totalorder %v3584_v33, 1  ;;  %v3587_v30 = vshrl.u32 %v11842_v26, %v3586_v32  ;;  %vm3605_vm7 = vcmp.lt.s32.totalorder %v3584_v33, 3 }
 0x321   : > { %vm3606_vm1 = vcmp.lt.s32.totalorder %v3584_v33, 4  ;;  %v3611_v21 = vsel %vm3603_vm11, %v3590_v18, %v3593_v13  ;;  %v10296_v9 = vpop.eup %7310  ;;  %v3615_v11 = vsel %vm3603_vm11, %v3593_v13, %v3596_v51  ;;  %vm3604_vm3 = vcmp.lt.s32.totalorder %v3584_v33, 2 }
 0x322   : > { %12147 = vst [vmem:[#allocation29_spill] sm:$0xff] %v10296_v9  ;;  %v6478_v5 = vmin.u32 %v3533_v0, %v10288_v45  ;;  %v3608_v10 = vsel %vm3606_vm1, %v3596_v51, 2102212464  ;;  %v3612_v52 = vsel %vm3606_vm1, %v3599_v46, 920167782  ;;  %v10300_v35 = vpop.eup %7312  ;;  %vm3790_vm2 = vcmp.gt.s32.totalorder %v3789_v56, 0 }
 0x323   : > { %v3613_v7 = vsel %vm3605_vm7, %v3596_v51, %v3612_v52  ;;  %v3616_v25 = vsel %vm3606_vm1, %v3602_v43, 1326507024  ;;  %v3607_v60 = vsel %vm3603_vm11, %v3587_v30, %v3590_v18  ;;  %v3609_v0 = vsel %vm3605_vm7, %v3593_v13, %v3608_v10 }
 0x324   : > { %v3535_v32 = vclz %v6478_v5  ;;  %v3614_v1 = vsel %vm3604_vm3, %v3611_v21, %v3613_v7  ;;  %v3617_v23 = vsel %vm3605_vm7, %v3599_v46, %v3616_v25  ;;  %v3791_v5 = vsel %vm3790_vm2, %v3789_v56, 0 }
 0x325   : > { %v3618_v6 = vsel %vm3604_vm3, %v3615_v11, %v3617_v23  ;;  %v10309_v53 = vmul.u32.u64.low %v10268_v15, %v3614_v1  ;;  %v10310_v17 = vmul.u32.u64.high %v10268_v15, %v3614_v1, %v10309_v53  ;;  %v12148_v18 = vsub.s32 4, %v9679_v34 }
 0x326   : > { %v6479_v55 = vadd.s32 4294967294, %v3535_v32  ;;  %v10314_v51 = vmul.u32.u64.low %v10268_v15, %v3618_v6  ;;  %v10315_v43 = vmul.u32.u64.high %v10268_v15, %v3618_v6, %v10314_v51  ;;  %7314 = vcosq.f32 %v10257_v8 }
 0x327   : > { %v10322_v46 = vsel %vm3157_vm5, %v12148_v18, %v9679_v34  ;;  %v10328_v13 = vsel %vm10284_vm13, %v9785_v58, %v3448_v24  ;;  %v3793_v10 = vand.u32 31, %v3791_v5  ;;  %7316 = vsinq.f32 %v10257_v8 }
 0x328   : > { %12149 = vst [vmem:[#allocation43_spill] sm:$0xff] %v10322_v46  ;;  %vm11801_vm12 = vcmp.lt.s32.totalorder %v9959_v61, 0  ;;  %vm6480_vm9 = vcmp.lt.s32.totalorder %v6479_v55, 0  ;;  %v3610_v56 = vsel %vm3604_vm3, %v3607_v60, %v3609_v0  ;;  %v3629_v34 = vadd.s32 1, %v10310_v17 }
 0x329   : > { %v10333_v30 = vsel %vm6480_vm9, 0, %v6479_v55  ;;  %v12150_v21 = vand.u32 2147483647, %v10220_v16  ;;  %v3794_v11 = vsub.s32 32, %v3793_v10  ;;  %7318 = vcosq.f32 %v10328_v13 }
 0x32a   : > { %v12151_v24 = vxor.u32 2147483648, %v10249_v41  ;;  %v3523_v33 = vadd.s32 %v10199_v27, %v10217_v36  ;;  %v3626_v7 = vmul.u32 %v10268_v15, %v3610_v56  ;;  %vm3628_vm5 = vc.u32 %v10315_v43, %v10309_v53 }
 0x32b   : > { %v3786_v52 = vand.u32 8388607, %v12150_v21  ;;  %v3796_v25 = vshll.u32 %v11842_v26, %v3793_v10  ;;  %v3797_v32 = vshrl.u32 %v11850_v42, %v3794_v11  ;;  %v3543_v60 = vsub.s32 4294967266, %v10333_v30 }
 0x32c   : > { %v10344_v8 = vsel %vm11801_vm12, %v12151_v24, %v10249_v41  ;;  %v3630_v1 = vsel %vm3628_vm5, %v3629_v34, %v10310_v17  ;;  %v3799_v41 = vshll.u32 %v11850_v42, %v3793_v10  ;;  %v3800_v23 = vshrl.u32 %v11851_v57, %v3794_v11 }
 0x32d   : > { %v3631_v27 = vadd.s32 %v3630_v1, %v3626_v7  ;;  %v3787_v36 = vor.u32 8388608, %v3786_v52  ;;  %v3802_v0 = vshll.u32 %v11851_v57, %v3793_v10  ;;  %v3803_v15 = vshrl.u32 %v11862_v19, %v3794_v11 }
 0x32e   : > { %v3792_v6 = vshrl.u32 %v3791_v5, 5  ;;  %v3798_v51 = vor.u32 %v3797_v32, %v3796_v25  ;;  %v3801_v18 = vor.u32 %v3800_v23, %v3799_v41  ;;  %v4094_v56 = vand.u32 2139095040, %v10266_v4 }
 0x32f   : > { %v3632_v21 = vadd.s32 536870912, %v3631_v27  ;;  %v3804_v24 = vor.u32 %v3803_v15, %v3802_v0  ;;  %v3805_v55 = vshll.u32 %v11862_v19, %v3793_v10  ;;  %v3806_v17 = vshrl.u32 %v11852_v14, %v3794_v11 }
 0x330   : > { %v3539_v34 = vsub.s32 32, %v10333_v30  ;;  %v3544_v63 = vadd.s32 127, %v3543_v60  ;;  %v3808_v52 = vshll.u32 %v11852_v14, %v3793_v10  ;;  %v3809_v7 = vshrl.u32 %v11857_v49, %v3794_v11  ;;  %v10366_v1 = vpop.eup %7314 }
 0x331   : > { %12152 = vst [vmem:[#allocation30_spill] sm:$0xff] %v10366_v1  ;;  %v10368_v5 = vshrl.u32 %v3632_v21, 30  ;;  %v3807_v25 = vor.u32 %v3806_v17, %v3805_v55  ;;  %v3827_v32 = vshll.u32 %v3787_v36, 8  ;;  %v12153_v41 = vand.u32 2147483647, %v10266_v4  ;;  %v10374_v0 = vpop.eup %7316 }
 0x332   : > { %12154 = vst [vmem:[#allocation51_spill] sm:$0xff] %v10374_v0  ;;  %v12155_v15 = vand.u32 2147483647, %v9959_v61  ;;  %v12156_v60 = vmov 0  ;;  %v3810_v10 = vor.u32 %v3809_v7, %v3808_v52  ;;  %vm3811_vm11 = vcmp.lt.s32.totalorder %v3792_v6, 1 }
 0x333   : > { %v10372_v23 = vand.u32 8388607, %v12153_v41  ;;  %vm3814_vm7 = vcmp.lt.s32.totalorder %v3792_v6, 4  ;;  %v4095_v58 = vshrl.u32 %v4094_v56, 23  ;;  %v3634_v21 = vshll.u32 %v10368_v5, 30  ;;  %v10386_v41 = vpop.eup %7318 }
 0x334   : > { %vm10378_vm14 = vcmp.le.f32.partialorder %v12155_v15, 0.7853982  ;;  %v3795_v55 = vshrl.u32 %v11842_v26, %v3794_v11  ;;  %v3816_v36 = vsel %vm3814_vm7, %v3804_v24, 2102212464  ;;  %v3819_v17 = vsel %vm3811_vm11, %v3798_v51, %v3801_v18  ;;  %12159 = vst [vmem:[#allocation44_spill] sm:$0xff] %v10386_v41 }
 0x335   : > { %v12157_v60 = vsel %vm10378_vm14, 4294967295, %v12156_v60  ;;  %v3541_v22 = vshrl.u32 %v3523_v33, %v3539_v34  ;;  %v3545_v54 = vshll.u32 %v3544_v63, 23  ;;  %vm3813_vm1 = vcmp.lt.s32.totalorder %v3792_v6, 3 }
 0x336   : > { %12158 = vst [vmem:[#allocation48_spill] sm:$0xff] %v12157_v60  ;;  %v3820_v15 = vsel %vm3814_vm7, %v3807_v25, 920167782  ;;  %v10389_v1 = vsub.s32 %v3631_v27, %v3634_v21  ;;  %vm3812_vm3 = vcmp.lt.s32.totalorder %v3792_v6, 2  ;;  %v3823_v56 = vsel %vm3811_vm11, %v3801_v18, %v3804_v24 }
 0x337   : > { %v3821_v52 = vsel %vm3813_vm1, %v3804_v24, %v3820_v15  ;;  %v3815_v7 = vsel %vm3811_vm11, %v3795_v55, %v3798_v51  ;;  %v3817_v11 = vsel %vm3813_vm1, %v3801_v18, %v3816_v36  ;;  %v3824_v20 = vsel %vm3814_vm7, %v3810_v10, 1326507024 }
 0x338   : > { %v3822_v0 = vsel %vm3812_vm3, %v3819_v17, %v3821_v52  ;;  %v3637_v46 = vsub.s32 0, %v10389_v1  ;;  %v3825_v41 = vsel %vm3813_vm1, %v3807_v25, %v3824_v20  ;;  %v3540_v27 = vshll.u32 %v10288_v45, %v10333_v30  ;;  %v12160_v25 = vld [vmem:[#allocation71_spill] sm:$0xff] }
 0x339   : > { %v10395_v33 = vmul.u32.u64.low %v3827_v32, %v3822_v0  ;;  %v10396_v63 = vmul.u32.u64.high %v3827_v32, %v3822_v0, %v10395_v33  ;;  %v3546_v34 = vor.u32 4788187, %v3545_v54  ;;  %v3826_v21 = vsel %vm3812_vm3, %v3823_v56, %v3825_v41  ;;  %v12161_v0 = vld [vmem:[#allocation76_spill] sm:$0xff] }
 0x33a   : > { %v6501_v15 = vadd.s32 4294967169, %v4095_v58  ;;  %v6482_v24 = vmin.u32 %v3637_v46, %v10389_v1  ;;  %v3818_v51 = vsel %vm3812_vm3, %v3815_v7, %v3817_v11  ;;  %7320 = vsinq.f32 %v10328_v13 }
 0x33b   : > { %v10402_v18 = vmul.u32.u64.low %v3827_v32, %v3826_v21  ;;  %v10403_v55 = vmul.u32.u64.high %v3827_v32, %v3826_v21, %v10402_v18  ;;  %v3542_v6 = vor.u32 %v3541_v22, %v3540_v27  ;;  %vm12162_vm2 = vnez %v12161_v0 }
 0x33c   : > { %v4101_v20 = vadd.s32 1, %v6501_v15  ;;  %v2204_v10 = vsel %vm12162_vm2, 0, %v12160_v25  ;;  %v10413_v54 = vsel %vm10378_vm14, %v9959_v61, %v10344_v8  ;;  %v3639_v58 = vclz %v6482_v24  ;;  %v12164_v24 = vld [vmem:[#allocation89_spill] sm:$0xff] }
 0x33d   : > { %v3837_v45 = vadd.s32 1, %v10396_v63  ;;  %v10418_v46 = vmul.f32 %v7662_v39, %v10177_v40  ;;  %v3547_v13 = vand.u32 2147483647, %v3546_v34  ;;  %v3834_v22 = vmul.u32 %v3827_v32, %v3818_v51  ;;  %v12163_v32 = vld [vmem:[#allocation91_spill] sm:$0xff]  ;;  %v12166_v18 = vld [vmem:[#allocation93_spill] sm:$0xff] }
 0x33e   : > { %v4099_v30 = vor.u32 8388608, %v10372_v23  ;;  %vm4102_vm9 = vcmp.gt.s32.totalorder %v4101_v20, 0  ;;  %v6483_v36 = vadd.s32 4294967294, %v3639_v58  ;;  %vm3836_vm5 = vc.u32 %v10403_v55, %v10395_v33  ;;  %v12165_v51 = vld [vmem:[#allocation83_spill] sm:$0xff] }
 0x33f   : > { %v4103_v17 = vsel %vm4102_vm9, %v4101_v20, 0  ;;  %v2208_v41 = vadd.s32 3, %v2204_v10  ;;  %7322 = vcosq.f32 %v10413_v54  ;;  %v3549_v8 = vcvt.s32.f32 %v3542_v6 }
 0x340   : > { %v3838_v52 = vsel %vm3836_vm5, %v3837_v45, %v10396_v63  ;;  %v4105_v56 = vand.u32 31, %v4103_v17  ;;  %v3627_v39 = vadd.s32 %v10309_v53, %v10315_v43  ;;  %vm6484_vm11 = vcmp.lt.s32.totalorder %v6483_v36, 0 }
 0x341   : > { %v3839_v40 = vadd.s32 %v3838_v52, %v3834_v22  ;;  %v10428_v7 = vmul.f32 %v3549_v8, %v3547_v13  ;;  %v10430_v11 = vsel %vm6484_vm11, 0, %v6483_v36  ;;  %v10432_v34 = vshll.u32 %v4099_v30, 8 }
 0x342   : > { %v4106_v27 = vsub.s32 32, %v4105_v56  ;;  %v10434_v15 = vand.u32 3, %v2208_v41  ;;  %v2215_v63 = vxor.u32 2147483648, %v12164_v24  ;;  %vm12167_vm7 = vnez %v12166_v18 }
 0x343   : > { %v3840_v21 = vadd.s32 536870912, %v3839_v40  ;;  %v2308_v53 = vsel %vm12167_vm7, 0, %v12165_v51  ;;  %v4108_v43 = vshll.u32 %v11842_v26, %v4105_v56  ;;  %v4111_v20 = vshll.u32 %v11850_v42, %v4105_v56 }
 0x344   : > { %v4109_v6 = vshrl.u32 %v11850_v42, %v4106_v27  ;;  %v4112_v25 = vshrl.u32 %v11851_v57, %v4106_v27  ;;  %v3647_v0 = vsub.s32 4294967266, %v10430_v11  ;;  %v4114_v58 = vshll.u32 %v11851_v57, %v4105_v56  ;;  %v10449_v13 = vpop.eup %7320 }
 0x345   : > { %v10445_v10 = vshrl.u32 %v3840_v21, 30  ;;  %v4115_v45 = vshrl.u32 %v11862_v19, %v4106_v27  ;;  %12169 = vst [vmem:[#allocation7_spill] sm:$0xff] %v10449_v13  ;;  %v4104_v22 = vshrl.u32 %v4103_v17, 5  ;;  %v4117_v30 = vshll.u32 %v11862_v19, %v4105_v56 }
 0x346   : > { %v4118_v36 = vshrl.u32 %v11852_v14, %v4106_v27  ;;  %v2312_v41 = vadd.s32 3, %v2308_v53  ;;  %v4110_v52 = vor.u32 %v4109_v6, %v4108_v43  ;;  %v4113_v51 = vor.u32 %v4112_v25, %v4111_v20 }
 0x347   : > { %12168 = vst [vmem:[#allocation49_spill] sm:$0xff] %v10445_v10  ;;  %v3842_v8 = vshll.u32 %v10445_v10, 30  ;;  %v4116_v18 = vor.u32 %v4115_v45, %v4114_v58  ;;  %v4120_v21 = vshll.u32 %v11852_v14, %v4105_v56  ;;  %v4121_v60 = vshrl.u32 %v11857_v49, %v4106_v27 }
 0x348   : > { %v4119_v23 = vor.u32 %v4118_v36, %v4117_v30  ;;  %vm2211_vm1 = vcmp.eq.s32.totalorder %v10434_v15, 0  ;;  %v3643_v61 = vsub.s32 32, %v10430_v11  ;;  %v3648_v17 = vadd.s32 127, %v3647_v0 }
 0x349   : > { %v10458_v13 = vsub.s32 %v3839_v40, %v3842_v8  ;;  %v4107_v9 = vshrl.u32 %v11842_v26, %v4106_v27  ;;  %v10461_v53 = vpop.eup %7322  ;;  %v4122_v10 = vor.u32 %v4121_v60, %v4120_v21  ;;  %vm4123_vm3 = vcmp.lt.s32.totalorder %v4104_v22, 1 }
 0x34a   : > { %12170 = vst [vmem:[#allocation57_spill] sm:$0xff] %v10461_v53  ;;  %vm4125_vm2 = vcmp.lt.s32.totalorder %v4104_v22, 3  ;;  %vm4126_vm9 = vcmp.lt.s32.totalorder %v4104_v22, 4  ;;  %v4131_v20 = vsel %vm4123_vm3, %v4110_v52, %v4113_v51  ;;  %v4135_v45 = vsel %vm4123_vm3, %v4113_v51, %v4116_v18 }
 0x34b   : > { %v3845_v43 = vsub.s32 0, %v10458_v13  ;;  %v4127_v56 = vsel %vm4123_vm3, %v4107_v9, %v4110_v52  ;;  %v4128_v6 = vsel %vm4126_vm9, %v4116_v18, 2102212464  ;;  %v4132_v58 = vsel %vm4126_vm9, %v4119_v23, 920167782 }
 0x34c   : > { %v4129_v25 = vsel %vm4125_vm2, %v4113_v51, %v4128_v6  ;;  %v4136_v0 = vsel %vm4126_vm9, %v4122_v10, 1326507024  ;;  %vm4124_vm5 = vcmp.lt.s32.totalorder %v4104_v22, 2  ;;  %v4133_v27 = vsel %vm4125_vm2, %v4116_v18, %v4132_v58  ;;  %v12171_v58 = vld [vmem:[#allocation45_spill] sm:$0xff] }
 0x34d   : > { %v6490_v40 = vmin.u32 %v3845_v43, %v10458_v13  ;;  %vm2214_vm11 = vcmp.eq.s32.totalorder %v10434_v15, 2  ;;  %v3644_v60 = vshll.u32 %v10389_v1, %v10430_v11  ;;  %v3645_v30 = vshrl.u32 %v3627_v39, %v3643_v61 }
 0x34e   : > { %v4134_v36 = vsel %vm4124_vm5, %v4131_v20, %v4133_v27  ;;  %v4137_v9 = vsel %vm4125_vm2, %v4119_v23, %v4136_v0  ;;  %v3649_v8 = vshll.u32 %v3648_v17, 23  ;;  %v4130_v21 = vsel %vm4124_vm5, %v4127_v56, %v4129_v25  ;;  %v12173_v17 = vld [vmem:[#allocation10_spill] sm:$0xff]  ;;  %v12174_v56 = vld [vmem:[#allocation101_spill] sm:$0xff]  ;;  %v12175_v0 = vld [vmem:[#allocation100_spill] sm:$0xff]  ;;  %v789_v27 = vpop.permute.xlu1 %788 }
 0x34f   : > { %v3847_v52 = vclz %v6490_v40  ;;  %v4138_v6 = vsel %vm4124_vm5, %v4135_v45, %v4137_v9  ;;  %v10476_v43 = vmul.u32.u64.low %v10432_v34, %v4134_v36  ;;  %v10477_v18 = vmul.u32.u64.high %v10432_v34, %v4134_v36, %v10476_v43 }
 0x350   : > { %v10472_v10 = vmul.u32.u64.low %v10432_v34, %v4138_v6  ;;  %v10473_v51 = vmul.u32.u64.high %v10432_v34, %v4138_v6, %v10472_v10  ;;  %vm2207_vm7 = vweird.f32 %v12171_v58  ;;  %v12172_v61 = vxor.u32 2147483648, %v12163_v32 }
 0x351   : > { %v6491_v1 = vadd.s32 4294967294, %v3847_v52  ;;  %v2216_v23 = vsel %vm2214_vm11, %v2215_v63, %v12163_v32  ;;  %v2313_v11 = vand.u32 3, %v2312_v41  ;;  %v3835_v22 = vadd.s32 %v10395_v33, %v10403_v55  ;;  %v12178_v10 = vld [vmem:[#allocation21_spill] sm:$0xff] }
 0x352   : > { %v2213_v39 = vsel %vm2211_vm1, %v12164_v24, %v12172_v61  ;;  %vm2210_vm3 = vcmp.lt.s32.totalorder %v10434_v15, 2  ;;  %vm2311_vm2 = vweird.f32 %v12173_v17  ;;  %v2316_v20 = vxor.u32 2147483648, %v12174_v56 }
 0x353   : > { %v3646_v25 = vor.u32 %v3645_v30, %v3644_v60  ;;  %v3650_v45 = vor.u32 4788187, %v3649_v8  ;;  %vm6492_vm9 = vcmp.lt.s32.totalorder %v6491_v1, 0  ;;  %v2319_v40 = vxor.u32 2147483648, %v12175_v0  ;;  %v12176_v60 = vld [vmem:[#allocation96_spill] sm:$0xff] }
 0x354   : > { %v3850_v36 = vsel %vm6492_vm9, 0, %v6491_v1  ;;  %v4146_v24 = vmul.u32 %v10432_v34, %v4130_v21  ;;  %vm4148_vm1 = vc.u32 %v10473_v51, %v10476_v43  ;;  %v2217_v32 = vsel %vm2210_vm3, %v2213_v39, %v2216_v23 }
 0x355   : > { %v3851_v33 = vsub.s32 32, %v3850_v36  ;;  %v3855_v55 = vsub.s32 4294967266, %v3850_v36  ;;  %v4149_v15 = vadd.s32 1, %v10477_v18  ;;  %vm2315_vm5 = vcmp.eq.s32.totalorder %v2313_v11, 0 }
 0x356   : > { %v2317_v63 = vsel %vm2315_vm5, %v12175_v0, %v2316_v20  ;;  %vm2318_vm11 = vcmp.eq.s32.totalorder %v2313_v11, 2  ;;  %v832_v41 = vmul.f32 %v12111_v3, %v789_v27  ;;  %vm12177_vm12 = vnez %v12004_v12 }
 0x357   : > { %v2412_v30 = vsel %vm12177_vm12, 0, %v12176_v60  ;;  %v3856_v9 = vadd.s32 127, %v3855_v55  ;;  %v4150_v34 = vsel %vm4148_vm1, %v4149_v15, %v10477_v18  ;;  %vm2314_vm9 = vcmp.lt.s32.totalorder %v2313_v11, 2  ;;  %v12180_v15 = vld [vmem:[#allocation79_spill] sm:$0xff] }
 0x358   : > { %v2320_v8 = vsel %vm2318_vm11, %v2319_v40, %v12174_v56  ;;  %v3651_v52 = vand.u32 2147483647, %v3650_v45  ;;  %v4151_v21 = vadd.s32 %v4150_v34, %v4146_v24  ;;  %v10505_v1 = vadd.f32 %v832_v41, %v12178_v10 }
 0x359   : > { %v2321_v6 = vsel %vm2314_vm9, %v2317_v63, %v2320_v8  ;;  %vm11804_vm3 = vcmp.lt.s32.totalorder %v10105_v47, 0  ;;  %v3857_v61 = vshll.u32 %v3856_v9, 23  ;;  %v2218_v39 = vsel %vm2207_vm7, nan, %v2217_v32  ;;  %v12181_v63 = vld [vmem:[#allocation77_spill] sm:$0xff] }
 0x35a   : > { %v2322_v12 = vsel %vm2311_vm2, nan, %v2321_v6  ;;  %v2416_v23 = vadd.s32 3, %v2412_v30  ;;  %v3853_v18 = vshrl.u32 %v3835_v22, %v3851_v33  ;;  %v4152_v11 = vadd.s32 536870912, %v4151_v21 }
 0x35b   : > { %v4201_v20 = vpack.c.bf16 %v2322_v12, %v2218_v39  ;;  %v11807_v56 = vand.u32 2147483647, %v10505_v1  ;;  %7324 = vsinq.f32 %v10413_v54  ;;  %v10516_v45 = vadd.f32 %v7668_v44, %v10418_v46  ;;  %v12183_v12 = vld [vmem:[#allocation94_spill] sm:$0xff] }
 0x35c   : > { %v3886_v0 = vand.u32 2139095040, %v10505_v1  ;;  %v2417_v40 = vand.u32 3, %v2416_v23  ;;  %v3653_v58 = vcvt.s32.f32 %v3646_v25  ;;  %v3852_v27 = vshll.u32 %v10458_v13, %v3850_v36 }
 0x35d   : > { %v10520_v17 = vshrl.u32 %v4152_v11, 30  ;;  %6795 = vmatprep.mubr.msk.bf16.mxu0 %vm11803_vm10, %v4201_v20  ;;  %v2420_v22 = vxor.u32 2147483648, %v9578_v59  ;;  %v3553_v24 = vsub.s32 4, %v10262_v28  ;;  %v3858_v32 = vor.u32 4788187, %v3857_v61 }
 0x35e   : > { %v3887_v54 = vshrl.u32 %v3886_v0, 23  ;;  %v3890_v44 = vand.u32 8388607, %v11807_v56  ;;  %v3551_v46 = vxor.u32 2147483648, %v10428_v7  ;;  %v10528_v33 = vmul.f32 %v3653_v58, %v3651_v52 }
 0x35f   : > { %12179 = vst [vmem:[#allocation55_spill] sm:$0xff] %v10520_v17  ;;  %v3854_v25 = vor.u32 %v3853_v18, %v3852_v27  ;;  %v4154_v13 = vshll.u32 %v10520_v17, 30  ;;  %vm2419_vm12 = vcmp.eq.s32.totalorder %v2417_v40, 0  ;;  %v2423_v55 = vxor.u32 2147483648, %v9570_v2 }
 0x360   : > { %v6493_v36 = vadd.s32 4294967169, %v3887_v54  ;;  %vm12182_vm7 = vnez %v12181_v63  ;;  %v2421_v30 = vsel %vm2419_vm12, %v9570_v2, %v2420_v22  ;;  %vm2422_vm2 = vcmp.eq.s32.totalorder %v2417_v40, 2  ;;  %v12185_v54 = vld [vmem:[#allocation92_spill] sm:$0xff] }
 0x361   : > { %v2516_v41 = vsel %vm12182_vm7, 0, %v12180_v15  ;;  %v10535_v60 = vsub.s32 %v4151_v21, %v4154_v13  ;;  %v3859_v34 = vand.u32 2147483647, %v3858_v32  ;;  %v3891_v8 = vor.u32 8388608, %v3890_v44 }
 0x362   : > { %v2520_v9 = vadd.s32 3, %v2516_v41  ;;  %v3893_v52 = vadd.s32 1, %v6493_v36  ;;  %v2424_v6 = vsel %vm2422_vm2, %v2423_v55, %v9578_v59  ;;  %v10542_v10 = vsel %vm11804_vm3, %v3551_v46, %v10428_v7  ;;  %v793_v7 = vpop.permute.xlu1 %792 }
 0x363   : > { %v4157_v61 = vsub.s32 0, %v10535_v60  ;;  %vm2418_vm1 = vcmp.lt.s32.totalorder %v2417_v40, 2  ;;  %v3861_v21 = vcvt.s32.f32 %v3854_v25  ;;  %v2524_v23 = vxor.u32 2147483648, %v12183_v12 }
 0x364   : > { %v10545_v39 = vand.u32 3, %v2520_v9  ;;  %vm3894_vm5 = vcmp.gt.s32.totalorder %v3893_v52, 0  ;;  %v2425_v2 = vsel %vm2418_vm1, %v2421_v30, %v2424_v6  ;;  %v3655_v18 = vxor.u32 2147483648, %v10528_v33 }
 0x365   : > { %v4147_v59 = vadd.s32 %v10476_v43, %v10473_v51  ;;  %v6502_v11 = vmin.u32 %v4157_v61, %v10535_v60  ;;  %v3895_v20 = vsel %vm3894_vm5, %v3893_v52, 0  ;;  %v10552_v0 = vpop.eup %7324  ;;  %v10554_v58 = vmul.f32 %v3861_v21, %v3859_v34  ;;  %v12186_v21 = vld [vmem:[#allocation54_spill] sm:$0xff] }
 0x366   : > { %12184 = vst [vmem:[#allocation25_spill] sm:$0xff] %v10552_v0  ;;  %v3897_v40 = vand.u32 31, %v3895_v20  ;;  %v10556_v27 = vshll.u32 %v3891_v8, 8  ;;  %vm2415_vm11 = vweird.f32 %v11991_v29  ;;  %vm2523_vm9 = vcmp.eq.s32.totalorder %v10545_v39, 0 }
 0x367   : > { %v4159_v22 = vclz %v6502_v11  ;;  %v10559_v32 = vsel %vm2415_vm11, nan, %v2425_v2  ;;  %v2527_v51 = vxor.u32 2147483648, %v12185_v54  ;;  %v10563_v43 = vshrl.u32 %v3895_v20, 5 }
 0x368   : > { %v3898_v44 = vsub.s32 32, %v3897_v40  ;;  %v2525_v46 = vsel %vm2523_vm9, %v12185_v54, %v2524_v23  ;;  %v833_v25 = vmul.f32 %v12111_v3, %v793_v7  ;;  %v3900_v36 = vshll.u32 %v11842_v26, %v3897_v40 }
 0x369   : > { %v6503_v13 = vadd.s32 4294967294, %v4159_v22  ;;  %v3903_v55 = vshll.u32 %v11850_v42, %v3897_v40  ;;  %v3906_v29 = vshll.u32 %v11851_v57, %v3897_v40  ;;  %vm2526_vm12 = vcmp.eq.s32.totalorder %v10545_v39, 2 }
 0x36a   : > { %v3901_v15 = vshrl.u32 %v11850_v42, %v3898_v44  ;;  %v3904_v63 = vshrl.u32 %v11851_v57, %v3898_v44  ;;  %v3907_v41 = vshrl.u32 %v11862_v19, %v3898_v44  ;;  %v3909_v30 = vshll.u32 %v11862_v19, %v3897_v40 }
 0x36b   : > { %vm2522_vm7 = vcmp.lt.s32.totalorder %v10545_v39, 2  ;;  %vm6504_vm2 = vcmp.lt.s32.totalorder %v6503_v13, 0  ;;  %v3910_v3 = vshrl.u32 %v11852_v14, %v3898_v44  ;;  %v3912_v9 = vshll.u32 %v11852_v14, %v3897_v40 }
 0x36c   : > { %v3913_v34 = vshrl.u32 %v11857_v49, %v3898_v44  ;;  %vm11822_vm1 = vcmp.lt.s32.totalorder %v10160_v62, 0  ;;  %v4162_v8 = vsel %vm6504_vm2, 0, %v6503_v13  ;;  %v3902_v52 = vor.u32 %v3901_v15, %v3900_v36 }
 0x36d   : > { %v3905_v6 = vor.u32 %v3904_v63, %v3903_v55  ;;  %v3908_v61 = vor.u32 %v3907_v41, %v3906_v29  ;;  %v4163_v2 = vsub.s32 32, %v4162_v8  ;;  %v4167_v23 = vsub.s32 4294967266, %v4162_v8 }
 0x36e   : > { %v3911_v11 = vor.u32 %v3910_v3, %v3909_v30  ;;  %vm3915_vm11 = vcmp.lt.s32.totalorder %v10563_v43, 1  ;;  %v12187_v20 = vand.u32 2147483647, %v10105_v47  ;;  %v3899_v40 = vshrl.u32 %v11842_v26, %v3898_v44 }
 0x36f   : > { %v3914_v22 = vor.u32 %v3913_v34, %v3912_v9  ;;  %vm3916_vm2 = vcmp.lt.s32.totalorder %v10563_v43, 2  ;;  %vm3918_vm6 = vcmp.lt.s32.totalorder %v10563_v43, 4  ;;  %v12190_v54 = vand.u32 2147483647, %v10160_v62 }
 0x370   : > { %vm10584_vm9 = vcmp.le.f32.partialorder %v12187_v20, 0.7853982  ;;  %v12191_v13 = vmov 0  ;;  %v4165_v36 = vshrl.u32 %v4147_v59, %v4163_v2  ;;  %v4168_v55 = vadd.s32 127, %v4167_v23 }
 0x371   : > { %vm10593_vm10 = vcmp.le.f32.partialorder %v12190_v54, 0.7853982  ;;  %v3920_v29 = vsel %vm3918_vm6, %v3908_v61, 2102212464  ;;  %v3923_v15 = vsel %vm3915_vm11, %v3902_v52, %v3905_v6  ;;  %vm3917_vm5 = vcmp.lt.s32.totalorder %v10563_v43, 3 }
 0x372   : > { %v12192_v13 = vsel %vm10593_vm10, 4294967295, %v12191_v13  ;;  %v3924_v44 = vsel %vm3918_vm6, %v3911_v11, 920167782  ;;  %v3927_v63 = vsel %vm3915_vm11, %v3905_v6, %v3908_v61  ;;  %v3928_v41 = vsel %vm3918_vm6, %v3914_v22, 1326507024 }
 0x373   : > { %12193 = vst [vmem:[#allocation34_spill] sm:$0xff] %v12192_v13  ;;  %v4164_v30 = vshll.u32 %v10535_v60, %v4162_v8  ;;  %v4169_v3 = vshll.u32 %v4168_v55, 23  ;;  %v3919_v59 = vsel %vm3915_vm11, %v3899_v40, %v3902_v52  ;;  %v3925_v9 = vsel %vm3917_vm5, %v3908_v61, %v3924_v44 }
 0x374   : > { %v3921_v34 = vsel %vm3917_vm5, %v3905_v6, %v3920_v29  ;;  %v3926_v2 = vsel %vm3916_vm2, %v3923_v15, %v3925_v9  ;;  %v3929_v23 = vsel %vm3917_vm5, %v3911_v11, %v3928_v41  ;;  %v2528_v20 = vsel %vm2526_vm12, %v2527_v51, %v12183_v12 }
 0x375   : > { %v12194_v54 = vand.u32 2147483647, %v10220_v16  ;;  %v12195_v22 = vmov 0  ;;  %v4166_v60 = vor.u32 %v4165_v36, %v4164_v30  ;;  %v4170_v8 = vor.u32 4788187, %v4169_v3 }
 0x376   : > { %v3930_v52 = vsel %vm3916_vm2, %v3927_v63, %v3929_v23  ;;  %v2529_v6 = vsel %vm2522_vm7, %v2525_v46, %v2528_v20  ;;  %v10626_v12 = vmul.u32.u64.low %v10556_v27, %v3926_v2  ;;  %v10627_v51 = vmul.u32.u64.high %v10556_v27, %v3926_v2, %v10626_v12  ;;  %v12203_v23 = vld [vmem:[#allocation87_spill] sm:$0xff] }
 0x377   : > { %vm10613_vm3 = vcmp.le.f32.partialorder %v12194_v54, 0.7853982  ;;  %v10622_v61 = vmul.u32.u64.low %v10556_v27, %v3930_v52  ;;  %v10623_v11 = vmul.u32.u64.high %v10556_v27, %v3930_v52, %v10622_v61  ;;  %v3656_v40 = vsel %vm11822_vm1, %v3655_v18, %v10528_v33 }
 0x378   : > { %v12196_v22 = vsel %vm10613_vm3, 4294967295, %v12195_v22  ;;  %v3863_v36 = vxor.u32 2147483648, %v10554_v58  ;;  %vm12198_vm6 = vweird.f32 %v12186_v21  ;;  %v10638_v46 = vadd.f32 %v833_v25, %v10516_v45  ;;  %v12200_v21 = vld [vmem:[#allocation67_spill] sm:$0xff] }
 0x379   : > { %12197 = vst [vmem:[#allocation41_spill] sm:$0xff] %v12196_v22  ;;  %v2530_v39 = vsel %vm12198_vm6, nan, %v2529_v6  ;;  %vm12199_vm12 = vcmp.lt.s32.totalorder %v10105_v47, 0  ;;  %v4171_v29 = vand.u32 2147483647, %v4170_v8  ;;  %v3922_v15 = vsel %vm3916_vm2, %v3919_v59, %v3921_v34 }
 0x37a   : > { %v10645_v55 = vsel %vm12199_vm12, %v3553_v24, %v10262_v28  ;;  %v4202_v33 = vpack.c.bf16 %v2530_v39, %v10559_v32  ;;  %v3555_v18 = vsel %vm10584_vm9, %v10105_v47, %v10542_v10  ;;  %v11805_v45 = vand.u32 2147483647, %v10638_v46 }
 0x37b   : > { %v3990_v25 = vand.u32 2139095040, %v10638_v46  ;;  %v11806_v44 = vand.u32 2147483647, %v12200_v21  ;;  %v10660_v28 = vsel %vm10593_vm10, %v10160_v62, %v3656_v40  ;;  %v4173_v24 = vcvt.s32.f32 %v4166_v60 }
 0x37c   : > { %vm3940_vm7 = vc.u32 %v10623_v11, %v10626_v12  ;;  %v3941_v32 = vadd.s32 1, %v10627_v51  ;;  %vm12201_vm5 = vcmask 326656   ;;  %vm12202_vm11 = vcmp.lt.s32.totalorder %v10220_v16, 0 }
 0x37d   : > { %6796 = vmatmul.mubr.msk.bf16.gmra.mrb[12].mxu0 %vm12201_vm5, %v4202_v33  ;;  %v3864_v10 = vsel %vm12202_vm11, %v3863_v36, %v10554_v58  ;;  %v3938_v43 = vmul.u32 %v10556_v27, %v3922_v15  ;;  %v3991_v63 = vshrl.u32 %v3990_v25, 23  ;;  %v3994_v41 = vand.u32 8388607, %v11805_v45 }
 0x37e   : > { %7326 = vcosq.f32 %v3555_v18  ;;  %v10672_v3 = vmul.f32 %v4173_v24, %v4171_v29  ;;  %v3942_v59 = vsel %vm3940_vm7, %v3941_v32, %v10627_v51  ;;  %v10677_v2 = vand.u32 8388607, %v11806_v44  ;;  %v12204_v51 = vld [vmem:[#allocation81_spill] sm:$0xff] }
 0x37f   : > { %7328 = vsinq.f32 %v3555_v18  ;;  %v3943_v9 = vadd.s32 %v3942_v59, %v3938_v43  ;;  %v6497_v34 = vadd.s32 4294967169, %v3991_v63  ;;  %v10683_v58 = vsel %vm10613_vm3, %v10220_v16, %v3864_v10 }
 0x380   : > { %7330 = vcosq.f32 %v10660_v28  ;;  %v3995_v27 = vor.u32 8388608, %v3994_v41  ;;  %v2549_v20 = vshrl.u32 %v11850_v42, %v12203_v23  ;;  %v10689_v8 = vshrl.u32 %v11842_v26, %v12203_v23 }
 0x381   : > { %v3944_v54 = vadd.s32 536870912, %v3943_v9  ;;  %v3997_v60 = vadd.s32 1, %v6497_v34  ;;  %v2552_v52 = vshrl.u32 %v11851_v57, %v12203_v23  ;;  %v10695_v61 = vadd.s32 %v10626_v12, %v10623_v11  ;;  %v10713_v12 = vld [vmem:[%s7603_s16] sm:$0xff]  }
 0x382   : > { %v2548_v40 = vshll.u32 %v11842_v26, %v12204_v51  ;;  %v2555_v36 = vshrl.u32 %v11862_v19, %v12203_v23  ;;  %v2551_v15 = vshll.u32 %v11850_v42, %v12204_v51  ;;  %v10706_v18 = vshll.u32 %v3995_v27, 8  ;;  %12205 = vst [vmem:[#allocation39_spill] sm:$0xff] %v10713_v12  ;;  %6815 = vmatprep.subr.bf16.mxu1 %v10713_v12 }
 0x383   : > { %v10701_v39 = vshrl.u32 %v3944_v54, 30  ;;  %vm3998_vm2 = vcmp.gt.s32.totalorder %v3997_v60, 0  ;;  %v2554_v11 = vshll.u32 %v11851_v57, %v12204_v51  ;;  %v2557_v43 = vshll.u32 %v11862_v19, %v12204_v51 }
 0x384   : > { %v3999_v33 = vsel %vm3998_vm2, %v3997_v60, 0  ;;  %v10708_v25 = vor.u32 %v2549_v20, %v2548_v40  ;;  %v10716_v10 = vor.u32 %v2552_v52, %v2551_v15  ;;  %v2558_v59 = vshrl.u32 %v11852_v14, %v12203_v23 }
 0x385   : > { %v3946_v24 = vshll.u32 %v10701_v39, 30  ;;  %v4001_v32 = vand.u32 31, %v3999_v33  ;;  %v4000_v63 = vshrl.u32 %v3999_v33, 5  ;;  %v10720_v41 = vor.u32 %v2555_v36, %v2554_v11 }
 0x386   : > { %v10726_v34 = vshll.u32 %v11852_v14, %v12204_v51  ;;  %v10734_v60 = vshrl.u32 %v11857_v49, %v12203_v23  ;;  %vm11823_vm2 = vcmp.lt.s32.totalorder %v10266_v4, 0  ;;  %7332 = vsinq.f32 %v10660_v28 }
 0x387   : > { %v10729_v27 = vsub.s32 %v3943_v9, %v3946_v24  ;;  %v4002_v20 = vsub.s32 32, %v4001_v32  ;;  %v4004_v54 = vshll.u32 %v11842_v26, %v4001_v32  ;;  %v4007_v40 = vshll.u32 %v11850_v42, %v4001_v32 }
 0x388   : > { %v10736_v52 = vpop.eup %7326  ;;  %v4010_v36 = vshll.u32 %v11851_v57, %v4001_v32  ;;  %v4013_v51 = vshll.u32 %v11862_v19, %v4001_v32  ;;  %v4016_v15 = vshll.u32 %v11852_v14, %v4001_v32  ;;  %vm4019_vm6 = vcmp.lt.s32.totalorder %v4000_v63, 1 }
 0x389   : > { %12206 = vst [vmem:[#allocation16_spill] sm:$0xff] %v10736_v52  ;;  %v10742_v33 = vpop.eup %7328  ;;  %v3949_v9 = vsub.s32 0, %v10729_v27  ;;  %v4003_v11 = vshrl.u32 %v11842_v26, %v4002_v20  ;;  %v4005_v24 = vshrl.u32 %v11850_v42, %v4002_v20  ;;  %v4008_v23 = vshrl.u32 %v11851_v57, %v4002_v20 }
 0x38a   : > { %12207 = vst [vmem:[#allocation37_spill] sm:$0xff] %v10742_v33  ;;  %v10748_v45 = vpop.eup %7330  ;;  %v4011_v44 = vshrl.u32 %v11862_v19, %v4002_v20  ;;  %v4014_v56 = vshrl.u32 %v11852_v14, %v4002_v20  ;;  %v4017_v30 = vshrl.u32 %v11857_v49, %v4002_v20  ;;  %vm4020_vm12 = vcmp.lt.s32.totalorder %v4000_v63, 2 }
 0x38b   : > { %12208 = vst [vmem:[#allocation40_spill] sm:$0xff] %v10748_v45  ;;  %v6494_v32 = vmin.u32 %v3949_v9, %v10729_v27  ;;  %v4006_v6 = vor.u32 %v4005_v24, %v4004_v54  ;;  %v4009_v29 = vor.u32 %v4008_v23, %v4007_v40  ;;  %vm4021_vm7 = vcmp.lt.s32.totalorder %v4000_v63, 3 }
 0x38c   : > { %v4012_v17 = vor.u32 %v4011_v44, %v4010_v36  ;;  %v4015_v12 = vor.u32 %v4014_v56, %v4013_v51  ;;  %v4018_v22 = vor.u32 %v4017_v30, %v4016_v15  ;;  %vm4022_vm5 = vcmp.lt.s32.totalorder %v4000_v63, 4 }
 0x38d   : > { %v3951_v16 = vclz %v6494_v32  ;;  %v4023_v53 = vsel %vm4019_vm6, %v4003_v11, %v4006_v6  ;;  %v4027_v0 = vsel %vm4019_vm6, %v4006_v6, %v4009_v29  ;;  %v2559_v44 = vor.u32 %v2558_v59, %v2557_v43 }
 0x38e   : > { %v4024_v45 = vsel %vm4022_vm5, %v4012_v17, 2102212464  ;;  %v4028_v13 = vsel %vm4022_vm5, %v4015_v12, 920167782  ;;  %v4031_v52 = vsel %vm4019_vm6, %v4009_v29, %v4012_v17  ;;  %v4032_v14 = vsel %vm4022_vm5, %v4018_v22, 1326507024 }
 0x38f   : > { %v6495_v47 = vadd.s32 4294967294, %v3951_v16  ;;  %v4025_v49 = vsel %vm4021_vm7, %v4009_v29, %v4024_v45  ;;  %v4029_v20 = vsel %vm4021_vm7, %v4012_v17, %v4028_v13  ;;  %v4033_v33 = vsel %vm4021_vm7, %v4015_v12, %v4032_v14 }
 0x390   : > { %v4030_v54 = vsel %vm4020_vm12, %v4027_v0, %v4029_v20  ;;  %v4034_v40 = vsel %vm4020_vm12, %v4031_v52, %v4033_v33  ;;  %v2562_v56 = vor.u32 %v10734_v60, %v10726_v34  ;;  %v4026_v30 = vsel %vm4020_vm12, %v4023_v53, %v4025_v49  ;;  %v12209_v0 = vld [vmem:[#allocation86_spill] sm:$0xff] }
 0x391   : > { %vm6496_vm11 = vcmp.lt.s32.totalorder %v6495_v47, 0  ;;  %v10760_v6 = vmul.u32.u64.low %v10706_v18, %v4034_v40  ;;  %v10761_v36 = vmul.u32.u64.high %v10706_v18, %v4034_v40, %v10760_v6  ;;  %vm2563_vm6 = vcmp.lt.s32.totalorder %v12209_v0, 1 }
 0x392   : > { %v3954_v16 = vsel %vm6496_vm11, 0, %v6495_v47  ;;  %v10765_v17 = vmul.u32.u64.low %v10706_v18, %v4030_v54  ;;  %v10766_v13 = vmul.u32.u64.high %v10706_v18, %v4030_v54, %v10765_v17  ;;  %vm2564_vm7 = vcmp.lt.s32.totalorder %v12209_v0, 2 }
 0x393   : > { %v3955_v22 = vsub.s32 32, %v3954_v16  ;;  %v3959_v45 = vsub.s32 4294967266, %v3954_v16  ;;  %vm2566_vm12 = vcmp.lt.s32.totalorder %v12209_v0, 4  ;;  %v4042_v53 = vmul.u32 %v10706_v18, %v4026_v30 }
 0x394   : > { %vm2565_vm5 = vcmp.lt.s32.totalorder %v12209_v0, 3  ;;  %v2571_v47 = vsel %vm2563_vm6, %v10708_v25, %v10716_v10  ;;  %v2572_v29 = vsel %vm2566_vm12, %v2559_v44, 920167782  ;;  %v12210_v12 = vand.u32 2147483647, %v10266_v4  ;;  %v12218_v0 = vld [vmem:[#allocation98_spill] sm:$0xff] }
 0x395   : > { %v12211_v43 = vmov 0  ;;  %v3957_v63 = vshrl.u32 %v10695_v61, %v3955_v22  ;;  %v3960_v59 = vadd.s32 127, %v3959_v45  ;;  %vm4044_vm1 = vc.u32 %v10761_v36, %v10765_v17 }
 0x396   : > { %vm10780_vm11 = vcmp.le.f32.partialorder %v12210_v12, 0.7853982  ;;  %v2568_v18 = vsel %vm2566_vm12, %v10720_v41, 2102212464  ;;  %v4045_v34 = vadd.s32 1, %v10766_v13  ;;  %v2573_v60 = vsel %vm2565_vm5, %v10720_v41, %v2572_v29  ;;  %v12219_v12 = vld [vmem:[#allocation64_spill] sm:$0xff] }
 0x397   : > { %v12212_v43 = vsel %vm10780_vm11, 4294967295, %v12211_v43  ;;  %v2575_v52 = vsel %vm2563_vm6, %v10716_v10, %v10720_v41  ;;  %v2576_v51 = vsel %vm2566_vm12, %v2562_v56, 1326507024  ;;  %v3956_v61 = vshll.u32 %v10729_v27, %v3954_v16  ;;  %v12217_v16 = vld [vmem:[#allocation11_spill] sm:$0xff] }
 0x398   : > { %v3961_v15 = vshll.u32 %v3960_v59, 23  ;;  %v2567_v33 = vsel %vm2563_vm6, %v10689_v8, %v10708_v25  ;;  %v2574_v9 = vsel %vm2564_vm7, %v2571_v47, %v2573_v60  ;;  %v4046_v11 = vsel %vm4044_vm1, %v4045_v34, %v10766_v13 }
 0x399   : > { %v2569_v24 = vsel %vm2565_vm5, %v10716_v10, %v2568_v18  ;;  %v2577_v41 = vsel %vm2565_vm5, %v2559_v44, %v2576_v51  ;;  %v12213_v27 = vor.u32 8388608, %v10677_v2  ;;  %v3958_v32 = vor.u32 %v3957_v63, %v3956_v61 }
 0x39a   : > { %v3962_v14 = vor.u32 4788187, %v3961_v15  ;;  %v4047_v49 = vadd.s32 %v4046_v11, %v4042_v53  ;;  %v2578_v8 = vsel %vm2564_vm7, %v2575_v52, %v2577_v41  ;;  %v12214_v10 = vxor.u32 2147483648, %v10672_v3 }
 0x39b   : > { %v2579_v23 = vshll.u32 %v12213_v27, 8  ;;  %v12215_v30 = vsub.s32 4, %v10368_v5  ;;  %vm12216_vm1 = vcmp.lt.s32.totalorder %v10160_v62, 0  ;;  %7334 = vcosq.f32 %v10683_v58 }
 0x39c   : > { %v4176_v2 = vsel %vm11823_vm2, %v12214_v10, %v10672_v3  ;;  %v3963_v44 = vand.u32 2147483647, %v3962_v14  ;;  %v4048_v56 = vadd.s32 536870912, %v4047_v49  ;;  %v2570_v28 = vsel %vm2564_vm7, %v2567_v33, %v2569_v24 }
 0x39d   : > { %v10813_v25 = vmul.u32.u64.low %v2579_v23, %v2578_v8  ;;  %v10814_v20 = vmul.u32.u64.high %v2579_v23, %v2578_v8, %v10813_v25  ;;  %v10816_v54 = vmul.u32.u64.low %v2579_v23, %v2574_v9  ;;  %v10817_v40 = vmul.u32.u64.high %v2579_v23, %v2574_v9, %v10816_v54 }
 0x39e   : > { %v10831_v6 = vsel %vm12216_vm1, %v12215_v30, %v10368_v5  ;;  %v2635_v13 = vand.u32 2147483647, %v12217_v16  ;;  %7336 = vsinq.f32 %v10683_v58  ;;  %vm3885_vm6 = vcmp.lt.s32.totalorder %v10505_v1, 0  ;;  %v12224_v25 = vld [vmem:[#allocation15_spill] sm:$0xff]  ;;  %v12226_v30 = vld [vmem:[#allocation106_spill] sm:$0xff] }
 0x39f   : > { %v3965_v3 = vcvt.s32.f32 %v3958_v32  ;;  %v10839_v22 = vshrl.u32 %v4048_v56, 30  ;;  %v4179_v45 = vsel %vm10780_vm11, %v10266_v4, %v4176_v2  ;;  %vm2588_vm12 = vc.u32 %v10814_v20, %v10816_v54 }
 0x3a0   : > { %v2589_v5 = vadd.s32 1, %v10817_v40  ;;  %v2653_v53 = vshrl.u32 %v11850_v42, %v12218_v0  ;;  %v2586_v29 = vmul.u32 %v2579_v23, %v2570_v28  ;;  %v2652_v63 = vshll.u32 %v11842_v26, %v12219_v12 }
 0x3a1   : > { %v3966_v47 = vmul.f32 %v3965_v3, %v3963_v44  ;;  %v4050_v58 = vshll.u32 %v10839_v22, 30  ;;  %v2642_v18 = vand.u32 8388607, %v2635_v13  ;;  %v2655_v34 = vshll.u32 %v11850_v42, %v12219_v12 }
 0x3a2   : > { %v2590_v59 = vsel %vm2588_vm12, %v2589_v5, %v10817_v40  ;;  %v2656_v60 = vshrl.u32 %v11851_v57, %v12218_v0  ;;  %7338 = vcosq.f32 %v4179_v45  ;;  %v3969_v52 = vsub.s32 4, %v10701_v39  ;;  %v12225_v40 = vld [vmem:[#allocation105_spill] sm:$0xff] }
 0x3a3   : > { %v10860_v51 = vsub.s32 %v4047_v49, %v4050_v58  ;;  %v2591_v61 = vadd.s32 %v2590_v59, %v2586_v29  ;;  %v2654_v15 = vor.u32 %v2653_v53, %v2652_v63  ;;  %v2658_v9 = vshll.u32 %v11851_v57, %v12219_v12  ;;  %v12223_v49 = vld [vmem:[#allocation97_spill] sm:$0xff]  ;;  %v10875_v57 = vpop.eup %7332 }
 0x3a4   : > { %v2657_v33 = vor.u32 %v2656_v60, %v2655_v34  ;;  %v2659_v11 = vshrl.u32 %v11862_v19, %v12218_v0  ;;  %7340 = vsinq.f32 %v4179_v45  ;;  %v12220_v42 = vand.u32 2147483647, %v10505_v1 }
 0x3a5   : > { %v12221_v24 = vmov 0  ;;  %v4053_v41 = vsub.s32 0, %v10860_v51  ;;  %v2592_v27 = vadd.s32 536870912, %v2591_v61  ;;  %v3967_v23 = vxor.u32 2147483648, %v3966_v47  ;;  %v10883_v2 = vpop.eup %7334 }
 0x3a6   : > { %vm10868_vm7 = vcmp.le.f32.partialorder %v12220_v42, 0.7853982  ;;  %v2643_v32 = vor.u32 8388608, %v2642_v18  ;;  %v2660_v14 = vor.u32 %v2659_v11, %v2658_v9  ;;  %vm11824_vm1 = vcmp.lt.s32.totalorder %v12223_v49, 3 }
 0x3a7   : > { %v12222_v24 = vsel %vm10868_vm7, 4294967295, %v12221_v24  ;;  %v6498_v19 = vmin.u32 %v4053_v41, %v10860_v51  ;;  %v2593_v8 = vshrl.u32 %v2592_v27, 30  ;;  %vm11825_vm12 = vcmp.lt.s32.totalorder %v12223_v49, 1 }
 0x3a8   : > { %v2681_v10 = vsel %vm11824_vm1, %v12225_v40, %v12224_v25  ;;  %v10888_v44 = vsel %vm3885_vm6, %v3969_v52, %v10701_v39  ;;  %v2675_v56 = vsel %vm11825_vm12, %v2654_v15, %v2657_v33  ;;  %v2677_v28 = vsel %vm11824_vm1, %v2660_v14, %v12226_v30  ;;  %v10897_v45 = vpop.eup %7336 }
 0x3a9   : > { %v2679_v3 = vsel %vm11825_vm12, %v2657_v33, %v2660_v14  ;;  %v4055_v5 = vclz %v6498_v19  ;;  %v12227_v53 = vand.u32 2147483647, %v12200_v21  ;;  %v2594_v39 = vshll.u32 %v2593_v8, 30 }
 0x3aa   : > { %v2651_v29 = vshrl.u32 %v11842_v26, %v12218_v0  ;;  %vm2668_vm5 = vcmp.lt.s32.totalorder %v12223_v49, 2  ;;  %v3968_v12 = vsel %vm3885_vm6, %v3967_v23, %v3966_v47  ;;  %vm12230_vm1 = vcmp.lt.s32.totalorder %v12223_v49, 4 }
 0x3ab   : > { %vm10901_vm2 = vcmp.le.f32.partialorder %v12227_v53, 0.7853982  ;;  %v2672_v63 = vsel %vm12230_vm1, %v2660_v14, 2102212464  ;;  %v2682_v59 = vsel %vm2668_vm5, %v2679_v3, %v2681_v10  ;;  %v2683_v18 = vshll.u32 %v2643_v32, 8 }
 0x3ac   : > { %v6499_v34 = vadd.s32 4294967294, %v4055_v5  ;;  %v10915_v60 = vsub.s32 %v2591_v61, %v2594_v39  ;;  %v2617_v52 = vsub.s32 4, %v2593_v8  ;;  %v2678_v26 = vsel %vm2668_vm5, %v2675_v56, %v2677_v28  ;;  %v10926_v42 = vpop.eup %7338 }
 0x3ad   : > { %v4043_v0 = vadd.s32 %v10765_v17, %v10761_v36  ;;  %vm12231_vm6 = vcmp.lt.s32.totalorder %v12223_v49, 1  ;;  %v10923_v9 = vmul.u32.u64.low %v2683_v18, %v2682_v59  ;;  %v10924_v11 = vmul.u32.u64.high %v2683_v18, %v2682_v59, %v10923_v9 }
 0x3ae   : > { %v2671_v47 = vsel %vm12231_vm6, %v2651_v29, %v2654_v15  ;;  %vm6500_vm1 = vcmp.lt.s32.totalorder %v6499_v34, 0  ;;  %v2597_v41 = vsub.s32 0, %v10915_v60  ;;  %vm12232_vm12 = vcmp.lt.s32.totalorder %v12223_v49, 3  ;;  %v10941_v14 = vpop.eup %7340  ;;  %v12237_v9 = vld [vmem:[#allocation84_spill] sm:$0xff] }
 0x3af   : > { %v2673_v61 = vsel %vm12232_vm12, %v2657_v33, %v2672_v63  ;;  %v2828_v23 = vsel %vm9634_vm8, 0, %v9764_v48  ;;  %v3971_v36 = vsel %vm10868_vm7, %v10505_v1, %v3968_v12  ;;  %v4058_v17 = vsel %vm6500_vm1, 0, %v6499_v34 }
 0x3b0   : > { %v10937_v15 = vmul.u32.u64.low %v2683_v18, %v2678_v26  ;;  %v10938_v32 = vmul.u32.u64.high %v2683_v18, %v2678_v26, %v10937_v15  ;;  %v4059_v19 = vsub.s32 32, %v4058_v17  ;;  %v4063_v25 = vsub.s32 4294967266, %v4058_v17 }
 0x3b1   : > { %v6442_v40 = vmin.u32 %v2597_v41, %v10915_v60  ;;  %vm12234_vm12 = vcmp.lt.s32.totalorder %v12200_v21, 0  ;;  %v4060_v48 = vshll.u32 %v10860_v51, %v4058_v17  ;;  %v4073_v10 = vsub.s32 4, %v10839_v22 }
 0x3b2   : > { %v2618_v33 = vsel %vm12234_vm12, %v2617_v52, %v2593_v8  ;;  %v2674_v56 = vsel %vm2668_vm5, %v2671_v47, %v2673_v61  ;;  %v2832_v30 = vadd.s32 3, %v2828_v23  ;;  %v4061_v28 = vshrl.u32 %v4043_v0, %v4059_v19  ;;  %v12236_v47 = vld [vmem:[#allocation32_spill] sm:$0xff]  ;;  %v10967_v61 = vpop.f32.mrb[0].mxu0 }
 0x3b3   : > { %v4064_v3 = vadd.s32 127, %v4063_v25  ;;  %v2599_v5 = vclz %v6442_v40  ;;  %vm2692_vm8 = vc.u32 %v10924_v11, %v10937_v15  ;;  %7342 = vcosq.f32 %v3971_v36 }
 0x3b4   : > { %v2587_v53 = vadd.s32 %v10816_v54, %v10814_v20  ;;  %v2620_v8 = vsel %vm10901_vm2, 0, %v2618_v33  ;;  %v2693_v51 = vadd.s32 1, %v10938_v32  ;;  %v4062_v39 = vor.u32 %v4061_v28, %v4060_v48  ;;  %v12243_v33 = vld [vmem:[#allocation78_spill] sm:$0xff]  ;;  %v12244_v48 = vld [vmem:[#allocation68_spill] sm:$0xff] }
 0x3b5   : > { %v4065_v29 = vshll.u32 %v4064_v3, 23  ;;  %v6443_v49 = vadd.s32 4294967294, %v2599_v5  ;;  %v2690_v12 = vmul.u32 %v2683_v18, %v2674_v56  ;;  %7344 = vsinq.f32 %v3971_v36 }
 0x3b6   : > { %vm12235_vm5 = vcmp.lt.s32.totalorder %v10638_v46, 0  ;;  %v2694_v59 = vsel %vm2692_vm8, %v2693_v51, %v10938_v32  ;;  %v2833_v34 = vand.u32 3, %v2832_v30  ;;  %v2624_v20 = vadd.s32 3, %v2620_v8  ;;  %v10975_v32 = vpop.f32.mrb[1].mxu0 }
 0x3b7   : > { %v10960_v63 = vsel %vm12235_vm5, %v4073_v10, %v10839_v22  ;;  %v4066_v52 = vor.u32 4788187, %v4065_v29  ;;  %vm6444_vm6 = vcmp.lt.s32.totalorder %v6443_v49, 0  ;;  %v2695_v54 = vadd.s32 %v2694_v59, %v2690_v12  ;;  %v10987_v10 = vpop.f32.mrb[2].mxu0  ;;  %v12246_v29 = vld [vmem:[#allocation104_spill] sm:$0xff] }
 0x3b8   : > { %v2602_v26 = vsel %vm6444_vm6, 0, %v6443_v49  ;;  %v2836_v0 = vxor.u32 2147483648, %v9809_v50  ;;  %v2839_v18 = vxor.u32 2147483648, %v12236_v47  ;;  %v2929_v41 = vsub.s32 4, %v12237_v9  ;;  %v10990_v5 = vpop.f32.mrb[3].mxu0 }
 0x3b9   : > { %v4067_v22 = vand.u32 2147483647, %v4066_v52  ;;  %v4069_v27 = vcvt.s32.f32 %v4062_v39  ;;  %v2603_v23 = vsub.s32 32, %v2602_v26  ;;  %v2607_v36 = vsub.s32 4294967266, %v2602_v26 }
 0x3ba   : > { %vm10971_vm12 = vcmp.le.f32.partialorder %v2635_v13, 0.7853982  ;;  %v12240_v19 = vand.u32 2147483647, %v10638_v46  ;;  %v2696_v40 = vadd.s32 536870912, %v2695_v54  ;;  %vm2835_vm6 = vcmp.eq.s32.totalorder %v2833_v34, 0 }
 0x3bb   : > { %vm2838_vm1 = vcmp.eq.s32.totalorder %v2833_v34, 2  ;;  %vm12245_vm11 = vcmp.lt.s32.totalorder %v12244_v48, 0  ;;  %v4070_v56 = vmul.f32 %v4069_v27, %v4067_v22  ;;  %v2604_v30 = vshll.u32 %v10915_v60, %v2602_v26 }
 0x3bc   : > { %vm10979_vm8 = vcmp.le.f32.partialorder %v12240_v19, 0.7853982  ;;  %v2930_v13 = vsel %vm12245_vm11, %v2929_v41, %v12237_v9  ;;  %v2605_v28 = vshrl.u32 %v2587_v53, %v2603_v23  ;;  %v2608_v3 = vadd.s32 127, %v2607_v36  ;;  %v12248_v53 = vld [vmem:[#allocation99_spill] sm:$0xff] }
 0x3bd   : > { %v2697_v8 = vshrl.u32 %v2696_v40, 30  ;;  %v2837_v51 = vsel %vm2835_vm6, %v12236_v47, %v2836_v0  ;;  %v2840_v39 = vsel %vm2838_vm1, %v2839_v18, %v9809_v50  ;;  %vm12247_vm5 = vnez %v12246_v29  ;;  %v10996_v41 = vpop.eup %7342  ;;  %v12251_v40 = vld [vmem:[#allocation80_spill] sm:$0xff] }
 0x3be   : > { %v2932_v49 = vsel %vm12247_vm5, 0, %v2930_v13  ;;  %v4071_v12 = vxor.u32 2147483648, %v4070_v56  ;;  %v2606_v59 = vor.u32 %v2605_v28, %v2604_v30  ;;  %v2609_v52 = vshll.u32 %v2608_v3, 23  ;;  %v12253_v28 = vld [vmem:[#allocation27_spill] sm:$0xff]  ;;  %v12254_v3 = vld [vmem:[#allocation28_spill] sm:$0xff] }
 0x3bf   : > { %v2936_v9 = vadd.s32 3, %v2932_v49  ;;  %v2698_v22 = vshll.u32 %v2697_v8, 30  ;;  %v2721_v60 = vsub.s32 4, %v2697_v8  ;;  %vm2834_vm11 = vcmp.lt.s32.totalorder %v2833_v34, 2  ;;  %v11003_v18 = vpop.eup %7344 }
 0x3c0   : > { %v3033_v26 = vsub.s32 4, %v12248_v53  ;;  %vm12249_vm7 = vcmp.lt.s32.totalorder %v10638_v46, 0  ;;  %v2610_v0 = vor.u32 4788187, %v2609_v52  ;;  %v11001_v47 = vand.u32 3, %v2624_v20 }
 0x3c1   : > { %v4072_v27 = vsel %vm12249_vm7, %v4071_v12, %v4070_v56  ;;  %v2841_v50 = vsel %vm2834_vm11, %v2837_v51, %v2840_v39  ;;  %v11005_v23 = vsub.s32 %v2695_v54, %v2698_v22  ;;  %vm12250_vm1 = vcmp.lt.s32.totalorder %v12217_v16, 0  ;;  %v12256_v12 = vld [vmem:[#allocation35_spill] sm:$0xff] }
 0x3c2   : > { %v2722_v36 = vsel %vm12250_vm1, %v2721_v60, %v2697_v8  ;;  %v2937_v19 = vand.u32 3, %v2936_v9  ;;  %vm12252_vm5 = vcmp.lt.s32.totalorder %v12251_v40, 0  ;;  %v2611_v13 = vand.u32 2147483647, %v2610_v0 }
 0x3c3   : > { %v3034_v34 = vsel %vm12252_vm5, %v3033_v26, %v12248_v53  ;;  %v2613_v30 = vcvt.s32.f32 %v2606_v59  ;;  %v2940_v56 = vxor.u32 2147483648, %v12253_v28  ;;  %v2943_v20 = vxor.u32 2147483648, %v12254_v3  ;;  %v12258_v26 = vld [vmem:[#allocation6_spill] sm:$0xff] }
 0x3c4   : > { %v2691_v51 = vadd.s32 %v10937_v15, %v10924_v11  ;;  %v2701_v54 = vsub.s32 0, %v11005_v23  ;;  %v2724_v39 = vsel %vm10971_vm12, 0, %v2722_v36  ;;  %v4075_v8 = vsel %vm10979_vm8, %v10638_v46, %v4072_v27 }
 0x3c5   : > { %v2614_v29 = vmul.f32 %v2613_v30, %v2611_v13  ;;  %vm12255_vm6 = vweird.f32 %v12243_v33  ;;  %vm12257_vm11 = vnez %v12256_v12  ;;  %vm2939_vm1 = vcmp.eq.s32.totalorder %v2937_v19, 0  ;;  %v12261_v12 = vld [vmem:[#allocation29_spill] sm:$0xff] }
 0x3c6   : > { %v11025_v49 = vsel %vm12255_vm6, nan, %v2841_v50  ;;  %v3036_v59 = vsel %vm12257_vm11, 0, %v3034_v34  ;;  %v6446_v11 = vmin.u32 %v2701_v54, %v11005_v23  ;;  %vm2942_vm5 = vcmp.eq.s32.totalorder %v2937_v19, 2 }
 0x3c7   : > { %v3040_v15 = vadd.s32 3, %v3036_v59  ;;  %v2615_v52 = vxor.u32 2147483648, %v2614_v29  ;;  %v2728_v9 = vadd.s32 3, %v2724_v39  ;;  %v2941_v22 = vsel %vm2939_vm1, %v12254_v3, %v2940_v56 }
 0x3c8   : > { %v2944_v60 = vsel %vm2942_vm5, %v2943_v20, %v12253_v28  ;;  %7346 = vcosq.f32 %v4075_v8  ;;  %v2703_v53 = vclz %v6446_v11  ;;  %v3044_v33 = vxor.u32 2147483648, %v10053_v31 }
 0x3c9   : > { %v3047_v27 = vxor.u32 2147483648, %v12258_v26  ;;  %7348 = vsinq.f32 %v4075_v8  ;;  %vm12259_vm6 = vcmp.lt.s32.totalorder %v12200_v21, 0  ;;  %vm2938_vm11 = vcmp.lt.s32.totalorder %v2937_v19, 2 }
 0x3ca   : > { %v2616_v0 = vsel %vm12259_vm6, %v2615_v52, %v2614_v29  ;;  %v3041_v50 = vand.u32 3, %v3040_v15  ;;  %v6447_v34 = vadd.s32 4294967294, %v2703_v53  ;;  %v2945_v13 = vsel %vm2938_vm11, %v2941_v22, %v2944_v60  ;;  %v12264_v22 = vld [vmem:[#allocation51_spill] sm:$0xff] }
 0x3cb   : > { %v2619_v36 = vsel %vm10901_vm2, %v12200_v21, %v2616_v0  ;;  %v3140_v30 = vsel %vm10188_vm4, 0, %v10024_v37  ;;  %v11042_v28 = vand.u32 3, %v2728_v9  ;;  %vm3039_vm1 = vweird.f32 %v12251_v40 }
 0x3cc   : > { %7350 = vcosq.f32 %v2619_v36  ;;  %vm3043_vm5 = vcmp.eq.s32.totalorder %v3041_v50, 0  ;;  %vm3046_vm7 = vcmp.eq.s32.totalorder %v3041_v50, 2  ;;  %vm6448_vm6 = vcmp.lt.s32.totalorder %v6447_v34, 0 }
 0x3cd   : > { %7352 = vsinq.f32 %v2619_v36  ;;  %v3045_v19 = vsel %vm3043_vm5, %v12258_v26, %v3044_v33  ;;  %v3048_v58 = vsel %vm3046_vm7, %v3047_v27, %v10053_v31  ;;  %v2706_v56 = vsel %vm6448_vm6, 0, %v6447_v34  ;;  %v12262_v31 = vld [vmem:[#allocation43_spill] sm:$0xff]  ;;  %v11062_v33 = vpop.f32.mrb[4].mxu0 }
 0x3ce   : > { %vm12260_vm2 = vweird.f32 %v12244_v48  ;;  %vm3042_vm11 = vcmp.lt.s32.totalorder %v3041_v50, 2  ;;  %v3144_v37 = vadd.s32 3, %v3140_v30  ;;  %v2707_v38 = vsub.s32 32, %v2706_v56  ;;  %v11068_v36 = vpop.f32.mrb[5].mxu0 }
 0x3cf   : > { %v11049_v3 = vsel %vm12260_vm2, nan, %v2945_v13  ;;  %v2711_v20 = vsub.s32 4294967266, %v2706_v56  ;;  %v3049_v54 = vsel %vm3042_vm11, %v3045_v19, %v3048_v58  ;;  %v3148_v39 = vxor.u32 2147483648, %v10300_v35  ;;  %v12266_v58 = vld [vmem:[#allocation103_spill] sm:$0xff] }
 0x3d0   : > { %vm2630_vm4 = vcmp.eq.s32.totalorder %v11001_v47, 2  ;;  %v2708_v8 = vshll.u32 %v11005_v23, %v2706_v56  ;;  %v3145_v29 = vand.u32 3, %v3144_v37  ;;  %v3151_v59 = vxor.u32 2147483648, %v12261_v12  ;;  %v12265_v23 = vld [vmem:[#allocation30_spill] sm:$0xff]  ;;  %v11075_v37 = vpop.f32.mrb[6].mxu0 }
 0x3d1   : > { %v3244_v48 = vsel %vm10211_vm0, 0, %v12262_v31  ;;  %vm2627_vm7 = vcmp.eq.s32.totalorder %v11001_v47, 0  ;;  %v2709_v15 = vshrl.u32 %v2691_v51, %v2707_v38  ;;  %v2712_v52 = vadd.s32 127, %v2711_v20 }
 0x3d2   : > { %v3248_v9 = vadd.s32 3, %v3244_v48  ;;  %v3252_v60 = vxor.u32 2147483648, %v12264_v22  ;;  %vm3146_vm6 = vcmp.lt.s32.totalorder %v3145_v29, 2  ;;  %vm3147_vm2 = vcmp.eq.s32.totalorder %v3145_v29, 0  ;;  %v11064_v26 = vpop.eup %7346 }
 0x3d3   : > { %vm3150_vm11 = vcmp.eq.s32.totalorder %v3145_v29, 2  ;;  %v3255_v53 = vxor.u32 2147483648, %v12265_v23  ;;  %v2710_v27 = vor.u32 %v2709_v15, %v2708_v8  ;;  %v2713_v0 = vshll.u32 %v2712_v52, 23  ;;  %v11070_v34 = vpop.eup %7348  ;;  %v11082_v8 = vpop.f32.mrb[7].mxu0 }
 0x3d4   : > { %v3149_v50 = vsel %vm3147_vm2, %v12261_v12, %v3148_v39  ;;  %v3152_v51 = vsel %vm3150_vm11, %v3151_v59, %v10300_v35  ;;  %v4204_v13 = vpack.c.bf16 %v11049_v3, %v11025_v49  ;;  %v3249_v19 = vand.u32 3, %v3248_v9  ;;  %v12267_v35 = vld [vmem:[#allocation13_spill] sm:$0xff]  ;;  %v12269_v9 = vld [vmem:[#allocation95_spill] sm:$0xff] }
 0x3d5   : > { %v3153_v30 = vsel %vm3146_vm6, %v3149_v50, %v3152_v51  ;;  %v3345_v56 = vsub.s32 4, %v12266_v58  ;;  %v2714_v38 = vor.u32 4788187, %v2713_v0  ;;  %v2717_v20 = vcvt.s32.f32 %v2710_v27  ;;  %v12301_v3 = vld [vmem:[#allocation39_spill] sm:$0xff] }
 0x3d6   : > { %v11079_v39 = vsel %vm3039_vm1, nan, %v3049_v54  ;;  %vm3143_vm0 = vweird.f32 %v12267_v35  ;;  %v7351_v29 = vpop.eup %7350  ;;  %vm3250_vm2 = vcmp.lt.s32.totalorder %v3249_v19, 2  ;;  %vm3251_vm6 = vcmp.eq.s32.totalorder %v3249_v19, 0  ;;  %v12268_v54 = vld [vmem:[#allocation102_spill] sm:$0xff] }
 0x3d7   : > { %v11084_v12 = vsel %vm3143_vm0, nan, %v3153_v30  ;;  %vm3254_vm11 = vcmp.eq.s32.totalorder %v3249_v19, 2  ;;  %v7353_v59 = vpop.eup %7352  ;;  %v2631_v31 = vxor.u32 2147483648, %v7351_v29  ;;  %v2715_v11 = vand.u32 2147483647, %v2714_v38  ;;  %v12273_v38 = vld [vmem:[#allocation9_spill] sm:$0xff] }
 0x3d8   : > { %v3253_v48 = vsel %vm3251_vm6, %v12265_v23, %v3252_v60  ;;  %v3256_v15 = vsel %vm3254_vm11, %v3255_v53, %v12264_v22  ;;  %vm2623_vm1 = vweird.f32 %v12200_v21  ;;  %v2628_v40 = vxor.u32 2147483648, %v7353_v59  ;;  %v12272_v22 = vld [vmem:[#allocation31_spill] sm:$0xff] }
 0x3d9   : > { %vm3247_vm5 = vweird.f32 %v12268_v54  ;;  %v3257_v52 = vsel %vm3250_vm2, %v3253_v48, %v3256_v15  ;;  %vm12270_vm0 = vcmp.lt.s32.totalorder %v12269_v9, 0  ;;  %v2632_v0 = vsel %vm2630_vm4, %v2631_v31, %v7353_v59  ;;  %v12275_v59 = vld [vmem:[#allocation23_spill] sm:$0xff]  ;;  %v12276_v48 = vld [vmem:[#allocation38_spill] sm:$0xff] }
 0x3da   : > { %v3346_v27 = vsel %vm12270_vm0, %v3345_v56, %v12266_v58  ;;  %v2718_v50 = vmul.f32 %v2717_v20, %v2715_v11  ;;  %vm3351_vm6 = vweird.f32 %v12269_v9  ;;  %v3356_v60 = vxor.u32 2147483648, %v12272_v22 }
 0x3db   : > { %v3348_v30 = vsel %vm9966_vm15, 0, %v3346_v27  ;;  %v2629_v23 = vsel %vm2627_vm7, %v7351_v29, %v2628_v40  ;;  %v4205_v53 = vpack.c.bf16 %v11084_v12, %v11079_v39  ;;  %v3449_v58 = vsub.s32 4, %v12273_v38  ;;  %v12278_v29 = vld [vmem:[#allocation7_spill] sm:$0xff]  ;;  %v7200_v39 = vld [vmem:[%s7603_s16 + $0x10] sm:$0xff]   ;;  %v11245_v12 = vld [vmem:[%s11594_s3] ss:$0 sm:$0xff] }
 0x3dc   : > { %v3352_v19 = vadd.s32 3, %v3348_v30  ;;  %vm12274_vm2 = vcmp.lt.s32.totalorder %v11001_v47, 2  ;;  %v2719_v20 = vxor.u32 2147483648, %v2718_v50  ;;  %v11106_v35 = vsel %vm3247_vm5, nan, %v3257_v52 }
 0x3dd   : > { %v2633_v56 = vsel %vm12274_vm2, %v2629_v23, %v2632_v0  ;;  %v3359_v31 = vxor.u32 2147483648, %v12275_v59  ;;  %vm12277_vm15 = vcmp.lt.s32.totalorder %v12276_v48, 0  ;;  %v3460_v40 = vxor.u32 2147483648, %v12278_v29  ;;  %v12281_v0 = vld [vmem:[#allocation44_spill] sm:$0xff] }
 0x3de   : > { %v3353_v11 = vand.u32 3, %v3352_v19  ;;  %v3450_v15 = vsel %vm12277_vm15, %v3449_v58, %v12273_v38  ;;  %v3556_v54 = vsel %vm10584_vm9, 0, %v10645_v55  ;;  %vm12279_vm4 = vcmp.lt.s32.totalorder %v12217_v16, 0  ;;  %v12282_v58 = vld [vmem:[#allocation37_spill] sm:$0xff] }
 0x3df   : > { %v2720_v47 = vsel %vm12279_vm4, %v2719_v20, %v2718_v50  ;;  %v3452_v52 = vsel %vm10284_vm13, 0, %v3450_v15  ;;  %vm3455_vm7 = vweird.f32 %v12276_v48  ;;  %v3463_v51 = vxor.u32 2147483648, %v12281_v0  ;;  %v12288_v48 = vld [vmem:[#allocation8_spill] sm:$0xff] }
 0x3e0   : > { %v3560_v30 = vadd.s32 3, %v3556_v54  ;;  %v2723_v23 = vsel %vm10971_vm12, %v12217_v16, %v2720_v47  ;;  %vm3354_vm5 = vcmp.lt.s32.totalorder %v3353_v11, 2  ;;  %vm3355_vm11 = vcmp.eq.s32.totalorder %v3353_v11, 0  ;;  %v12283_v54 = vld [vmem:[#allocation17_spill] sm:$0xff]  ;;  %v12284_v47 = vld [vmem:[#allocation16_spill] sm:$0xff] }
 0x3e1   : > { %vm3358_vm0 = vcmp.eq.s32.totalorder %v3353_v11, 2  ;;  %7354 = vcosq.f32 %v2723_v23  ;;  %v3357_v7 = vsel %vm3355_vm11, %v12275_v59, %v3356_v60  ;;  %v3456_v50 = vadd.s32 3, %v3452_v52 }
 0x3e2   : > { %v3360_v55 = vsel %vm3358_vm0, %v3359_v31, %v12272_v22  ;;  %7356 = vsinq.f32 %v2723_v23  ;;  %v3561_v38 = vand.u32 3, %v3560_v30  ;;  %v3564_v20 = vxor.u32 2147483648, %v12282_v58 }
 0x3e3   : > { %v3361_v19 = vsel %vm3354_vm5, %v3357_v7, %v3360_v55  ;;  %v11130_v15 = vsel %vm2623_vm1, nan, %v2633_v56  ;;  %v3457_v17 = vand.u32 3, %v3456_v50  ;;  %vm3559_vm13 = vweird.f32 %v12283_v54 }
 0x3e4   : > { %v3567_v11 = vxor.u32 2147483648, %v12284_v47  ;;  %v11136_v60 = vsel %vm3351_vm6, nan, %v3361_v19  ;;  %vm3562_vm9 = vcmp.lt.s32.totalorder %v3561_v38, 2  ;;  %vm3563_vm12 = vcmp.eq.s32.totalorder %v3561_v38, 0 }
 0x3e5   : > { %v3660_v59 = vsel %vm10593_vm10, 0, %v10831_v6  ;;  %vm2734_vm2 = vcmp.eq.s32.totalorder %v11042_v28, 2  ;;  %vm3459_vm15 = vcmp.eq.s32.totalorder %v3457_v17, 0  ;;  %vm3462_vm1 = vcmp.eq.s32.totalorder %v3457_v17, 2 }
 0x3e6   : > { %v3565_v21 = vsel %vm3563_vm12, %v12284_v47, %v3564_v20  ;;  %vm3566_vm4 = vcmp.eq.s32.totalorder %v3561_v38, 2  ;;  %vm2731_vm5 = vcmp.eq.s32.totalorder %v11042_v28, 0  ;;  %vm3458_vm11 = vcmp.lt.s32.totalorder %v3457_v17, 2  ;;  %v12291_v17 = vld [vmem:[#allocation57_spill] sm:$0xff] }
 0x3e7   : > { %v3461_v9 = vsel %vm3459_vm15, %v12281_v0, %v3460_v40  ;;  %v3464_v56 = vsel %vm3462_vm1, %v3463_v51, %v12278_v29  ;;  %v3568_v31 = vsel %vm3566_vm4, %v3567_v11, %v12282_v58  ;;  %vm2730_vm6 = vcmp.lt.s32.totalorder %v11042_v28, 2  ;;  %v12286_v29 = vld [vmem:[#allocation40_spill] sm:$0xff]  ;;  %v12287_v51 = vld [vmem:[#allocation19_spill] sm:$0xff]  ;;  %v12290_v58 = vld [vmem:[#allocation25_spill] sm:$0xff] }
 0x3e8   : > { %v3465_v27 = vsel %vm3458_vm11, %v3461_v9, %v3464_v56  ;;  %v3569_v6 = vsel %vm3562_vm9, %v3565_v21, %v3568_v31  ;;  %v3664_v52 = vadd.s32 3, %v3660_v59  ;;  %v3668_v30 = vxor.u32 2147483648, %v10875_v57  ;;  %v12292_v47 = vld [vmem:[#allocation49_spill] sm:$0xff] }
 0x3e9   : > { %vm2727_vm10 = vweird.f32 %v12217_v16  ;;  %v11152_v23 = vsel %vm3455_vm7, nan, %v3465_v27  ;;  %v11156_v40 = vsel %vm3559_vm13, nan, %v3569_v6  ;;  %v3671_v0 = vxor.u32 2147483648, %v12286_v29  ;;  %v7199_v16 = vld [vmem:[%s7603_s16 + $0x8] sm:$0xff]  }
 0x3ea   : > { %v3761_v7 = vsub.s32 4, %v12287_v51  ;;  %vm3663_vm0 = vweird.f32 %v10160_v62  ;;  %v3665_v19 = vand.u32 3, %v3664_v52  ;;  %vm12289_vm7 = vcmp.lt.s32.totalorder %v12288_v48, 0 }
 0x3eb   : > { %vm3767_vm13 = vweird.f32 %v12288_v48  ;;  %v3772_v20 = vxor.u32 2147483648, %v12290_v58  ;;  %v3775_v54 = vxor.u32 2147483648, %v12291_v17  ;;  %v3865_v11 = vsub.s32 4, %v12292_v47  ;;  %v7355_v22 = vpop.eup %7354 }
 0x3ec   : > { %v3762_v38 = vsel %vm12289_vm7, %v3761_v7, %v12287_v51  ;;  %vm3666_vm9 = vcmp.lt.s32.totalorder %v3665_v19, 2  ;;  %vm3667_vm12 = vcmp.eq.s32.totalorder %v3665_v19, 0  ;;  %vm3670_vm15 = vcmp.eq.s32.totalorder %v3665_v19, 2  ;;  %v7357_v9 = vpop.eup %7356  ;;  %v12294_v7 = vld [vmem:[#allocation22_spill] sm:$0xff] }
 0x3ed   : > { %v3764_v21 = vsel %vm10378_vm14, 0, %v3762_v38  ;;  %v2735_v56 = vxor.u32 2147483648, %v7355_v22  ;;  %v3669_v31 = vsel %vm3667_vm12, %v12286_v29, %v3668_v30  ;;  %v3672_v27 = vsel %vm3670_vm15, %v3671_v0, %v10875_v57 }
 0x3ee   : > { %v3768_v6 = vadd.s32 3, %v3764_v21  ;;  %v2732_v52 = vxor.u32 2147483648, %v7357_v9  ;;  %v3673_v51 = vsel %vm3666_vm9, %v3669_v31, %v3672_v27  ;;  %vm12295_vm1 = vcmp.lt.s32.totalorder %v12294_v7, 0 }
 0x3ef   : > { %v3866_v50 = vsel %vm12295_vm1, %v3865_v11, %v12292_v47  ;;  %vm3871_vm4 = vweird.f32 %v12294_v7  ;;  %v2736_v19 = vsel %vm2734_vm2, %v2735_v56, %v7357_v9  ;;  %v3876_v30 = vxor.u32 2147483648, %v10897_v45  ;;  %v11202_v56 = vpop.f32.mrb[8].mxu0  ;;  %v12302_v7 = vld [vmem:[#allocation55_spill] sm:$0xff] }
 0x3f0   : > { %v3769_v59 = vand.u32 3, %v3768_v6  ;;  %v3868_v55 = vsel %vm10613_vm3, 0, %v3866_v50  ;;  %v2733_v57 = vsel %vm2731_vm5, %v7355_v22, %v2732_v52  ;;  %v3879_v0 = vxor.u32 2147483648, %v10883_v2 }
 0x3f1   : > { %v3872_v29 = vadd.s32 3, %v3868_v55  ;;  %vm12297_vm14 = vnez %v12222_v24  ;;  %v2737_v11 = vsel %vm2730_vm6, %v2733_v57, %v2736_v19  ;;  %v11200_v24 = vsel %vm3663_vm0, nan, %v3673_v51 }
 0x3f2   : > { %v3972_v47 = vsel %vm12297_vm14, 0, %v10888_v44  ;;  %vm3770_vm2 = vcmp.lt.s32.totalorder %v3769_v59, 2  ;;  %vm3771_vm11 = vcmp.eq.s32.totalorder %v3769_v59, 0  ;;  %vm3774_vm7 = vcmp.eq.s32.totalorder %v3769_v59, 2 }
 0x3f3   : > { %v2738_v50 = vsel %vm2727_vm10, nan, %v2737_v11  ;;  %v3773_v21 = vsel %vm3771_vm11, %v12291_v17, %v3772_v20  ;;  %v3776_v55 = vsel %vm3774_vm7, %v3775_v54, %v12290_v58  ;;  %v3873_v22 = vand.u32 3, %v3872_v29  ;;  %v11210_v58 = vpop.f32.mrb[9].mxu0 }
 0x3f4   : > { %v4203_v9 = vpack.c.bf16 %v2738_v50, %v11130_v15  ;;  %v3777_v44 = vsel %vm3770_vm2, %v3773_v21, %v3776_v55  ;;  %v3976_v28 = vadd.s32 3, %v3972_v47  ;;  %vm3975_vm6 = vweird.f32 %v10505_v1  ;;  %v11215_v17 = vpop.f32.mrb[10].mxu0 }
 0x3f5   : > { %v11206_v31 = vsel %vm3767_vm13, nan, %v3777_v44  ;;  %vm3875_vm3 = vcmp.eq.s32.totalorder %v3873_v22, 0  ;;  %vm3878_vm5 = vcmp.eq.s32.totalorder %v3873_v22, 2  ;;  %vm12298_vm10 = vcmask 326656   ;;  %v11226_v6 = vpop.f32.mrb[11].mxu0 }
 0x3f6   : > { %6799 = vmatprep.mubr.msk.bf16.mxu1 %vm12298_vm10, %v4203_v9  ;;  %vm3874_vm9 = vcmp.lt.s32.totalorder %v3873_v22, 2  ;;  %v3877_v62 = vsel %vm3875_vm3, %v10883_v2, %v3876_v30  ;;  %v3880_v15 = vsel %vm3878_vm5, %v3879_v0, %v10897_v45  ;;  %v3977_v20 = vand.u32 3, %v3976_v28  ;;  %vm12299_vm0 = vmmov %vm12298_vm10  ;;  %v7201_v0 = vld [vmem:[%s7603_s16 + $0x18] sm:$0xff]   ;;  %v7202_v9 = vld [vmem:[%s7603_s16 + $0x20] sm:$0xff]  }
 0x3f7   : > { %6800 = vmatmul.mubr.msk.bf16.vlgmr.msra.gmra.mrb[0].mxu1 %vm12299_vm0, %v4204_v13  ;;  %v3881_v48 = vsel %vm3874_vm9, %v3877_v62, %v3880_v15  ;;  %v3980_v54 = vxor.u32 2147483648, %v11003_v18  ;;  %v3983_v27 = vxor.u32 2147483648, %v10996_v41  ;;  %v4076_v2 = vsel %vm10979_vm8, 0, %v10960_v63  ;;  %vm12300_vm13 = vmmov %vm12299_vm0 }
 0x3f8   : > { %6803 = vmatprep.mubr.msk.bf16.mxu1 %vm12300_vm13, %v4205_v53  ;;  %v4208_v45 = vpack.c.bf16 %v11206_v31, %v11200_v24  ;;  %v11236_v49 = vsel %vm3871_vm4, nan, %v3881_v48  ;;  %vm3979_vm12 = vcmp.eq.s32.totalorder %v3977_v20, 0  ;;  %vm3982_vm15 = vcmp.eq.s32.totalorder %v3977_v20, 2  ;;  %6816 = vmatpush3.bf16.msra.mxu1 %v12301_v3  ;;  %vm12308_vm10 = vmmov %vm12299_vm0  ;;  %v7203_v48 = vld [vmem:[%s7603_s16 + $0x28] sm:$0xff]  }
 0x3f9   : > { %vm3978_vm1 = vcmp.lt.s32.totalorder %v3977_v20, 2  ;;  %v3981_v63 = vsel %vm3979_vm12, %v10996_v41, %v3980_v54  ;;  %v3984_v25 = vsel %vm3982_vm15, %v3983_v27, %v11003_v18  ;;  %v4080_v13 = vadd.s32 3, %v4076_v2  ;;  %6817 = vmatprep.subr.bf16.mxu1 %v7199_v16 }
 0x3fa   : > { %v3985_v53 = vsel %vm3978_vm1, %v3981_v63, %v3984_v25  ;;  %v4084_v52 = vxor.u32 2147483648, %v11070_v34  ;;  %v4087_v51 = vxor.u32 2147483648, %v11064_v26  ;;  %v4177_v19 = vsub.s32 4, %v12302_v7 }
 0x3fb   : > { %v11252_v41 = vsel %vm3975_vm6, nan, %v3985_v53  ;;  %vm4079_vm8 = vweird.f32 %v10638_v46  ;;  %v4081_v18 = vand.u32 3, %v4080_v13  ;;  %v4188_v59 = vxor.u32 2147483648, %v10941_v14  ;;  %vm12306_vm6 = vmmov %vm12299_vm0  ;;  %v7204_v13 = vld [vmem:[%s7603_s16 + $0x30] sm:$0xff]  }
 0x3fc   : > { %v4209_v38 = vpack.c.bf16 %v11252_v41, %v11236_v49  ;;  %vm12303_vm4 = vcmp.lt.s32.totalorder %v10266_v4, 0  ;;  %vm4183_vm14 = vweird.f32 %v10266_v4  ;;  %v4191_v57 = vxor.u32 2147483648, %v10926_v42  ;;  %6818 = vmatpush3.bf16.msra.mxu1 %v7199_v16 }
 0x3fd   : > { %v4178_v30 = vsel %vm12303_vm4, %v4177_v19, %v12302_v7  ;;  %v4334_v1 = vadd.f32 %v10967_v61, %v11245_v12  ;;  %vm4082_vm2 = vcmp.lt.s32.totalorder %v4081_v18, 2  ;;  %vm4083_vm11 = vcmp.eq.s32.totalorder %v4081_v18, 0  ;;  %6819 = vmatprep.subr.bf16.mxu1 %v7200_v39  ;;  %vm12309_vm4 = vmmov %vm12306_vm6 }
 0x3fe   : > { %vm4086_vm7 = vcmp.eq.s32.totalorder %v4081_v18, 2  ;;  %vm12304_vm3 = vnez %v12212_v43  ;;  %v4085_v47 = vsel %vm4083_vm11, %v11064_v26, %v4084_v52  ;;  %v12305_v21 = vpack.c.bf16 %v11136_v60, %v11106_v35 }
 0x3ff   : > { %v4180_v29 = vsel %vm12304_vm3, 0, %v4178_v30  ;;  %v4088_v11 = vsel %vm4086_vm7, %v4087_v51, %v11070_v34  ;;  %vm4454_vm5 = vcmp.ge.f32.partialorder %v4334_v1, 0.0  ;;  %v4486_v55 = vmul.f32 0.2, %v4334_v1 }
 0x400   : > { %v4184_v50 = vadd.s32 3, %v4180_v29  ;;  %6804 = vmatmul.mubr.msk.bf16.gmra.mrb[4].mxu1 %vm12306_vm6, %v12305_v21  ;;  %v4089_v61 = vsel %vm4082_vm2, %v4085_v47, %v4088_v11  ;;  %v4326_v43 = vadd.f32 %v11245_v12, %v10975_v32  ;;  %v4337_v22 = vadd.f32 %v10987_v10, %v11245_v12 }
 0x401   : > { %v12307_v26 = vpack.c.bf16 %v11156_v40, %v11152_v23  ;;  %v11284_v34 = vsel %vm4079_vm8, nan, %v4089_v61  ;;  %6820 = vmatpush3.bf16.msra.mxu1 %v7200_v39  ;;  %v4329_v60 = vadd.f32 %v11245_v12, %v10990_v5  ;;  %v4350_v32 = vadd.f32 %v11062_v33, %v11245_v12 }
 0x402   : > { %v4185_v35 = vand.u32 3, %v4184_v50  ;;  %6821 = vmatprep.subr.bf16.mxu1 %v7201_v0  ;;  %v4518_v10 = vsel %vm4454_vm5, %v4334_v1, %v4486_v55  ;;  %vm4452_vm9 = vcmp.ge.f32.partialorder %v4326_v43, 0.0  ;;  %v4484_v44 = vmul.f32 0.2, %v4326_v43 }
 0x403   : > { %6807 = vmatprep.mubr.msk.bf16.mxu1 %vm12308_vm10, %v12307_v26  ;;  %vm4455_vm0 = vcmp.ge.f32.partialorder %v4337_v22, 0.0  ;;  %v11291_v46 = vmul.f32 1.4142135, %v4518_v10  ;;  %v4487_v28 = vmul.f32 0.2, %v4337_v22  ;;  %vm4453_vm1 = vcmp.ge.f32.partialorder %v4329_v60, 0.0  ;;  %vm12311_vm10 = vmmov %vm12309_vm4 }
 0x404   : > { %vm4186_vm13 = vcmp.lt.s32.totalorder %v4185_v35, 2  ;;  %vm4187_vm12 = vcmp.eq.s32.totalorder %v4185_v35, 0  ;;  %vm4190_vm15 = vcmp.eq.s32.totalorder %v4185_v35, 2  ;;  %v4516_v5 = vsel %vm4452_vm9, %v4326_v43, %v4484_v44 }
 0x405   : > { %v4189_v23 = vsel %vm4187_vm12, %v10926_v42, %v4188_v59  ;;  %v4192_v40 = vsel %vm4190_vm15, %v4191_v57, %v10941_v14  ;;  %6822 = vmatpush3.bf16.msra.mxu1 %v7201_v0  ;;  %v4548_v33 = vmul.f32 1.4142135, %v4516_v5  ;;  %v4485_v62 = vmul.f32 0.2, %v4329_v60  ;;  %v7205_v59 = vld [vmem:[%s7603_s16 + $0x38] sm:$0xff]  }
 0x406   : > { %v4193_v16 = vsel %vm4186_vm13, %v4189_v23, %v4192_v40  ;;  %6823 = vmatprep.subr.bf16.mxu1 %v7202_v9  ;;  %v4519_v20 = vsel %vm4455_vm0, %v4337_v22, %v4487_v28  ;;  %vm4458_vm8 = vcmp.ge.f32.partialorder %v4350_v32, 0.0  ;;  %v4490_v54 = vmul.f32 0.2, %v4350_v32 }
 0x407   : > { %v4194_v15 = vsel %vm4183_vm14, nan, %v4193_v16  ;;  %v4551_v14 = vmul.f32 1.4142135, %v4519_v20  ;;  %v4517_v27 = vsel %vm4453_vm1, %v4329_v60, %v4485_v62  ;;  %v4342_v2 = vadd.f32 %v11245_v12, %v11068_v36  ;;  %vm12310_vm14 = vmmov %vm12309_vm4 }
 0x408   : > { %v4210_v42 = vpack.c.bf16 %v4194_v15, %v11284_v34  ;;  %6808 = vmatmul.mubr.msk.bf16.gmra.mrb[8].mxu1 %vm12309_vm4, %v4208_v45  ;;  %v4549_v4 = vmul.f32 1.4142135, %v4517_v27  ;;  %v4522_v49 = vsel %vm4458_vm8, %v4350_v32, %v4490_v54  ;;  %v4353_v3 = vadd.f32 %v11075_v37, %v11245_v12  ;;  %v7207_v27 = vld [vmem:[%s7603_s16 + $0x48] sm:$0xff]  }
 0x409   : > { %v4345_v63 = vadd.f32 %v11245_v12, %v11082_v8  ;;  %6811 = vmatprep.mubr.msk.bf16.mxu1 %vm12310_vm14, %v4209_v38  ;;  %6824 = vmatpush3.bf16.msra.mxu1 %v7202_v9  ;;  %v4581_v25 = vpack.c.bf16 %v4551_v14, %v11291_v46  ;;  %v4554_v36 = vmul.f32 1.4142135, %v4522_v49  ;;  %vm4456_vm2 = vcmp.ge.f32.partialorder %v4342_v2, 0.0  ;;  %v7206_v14 = vld [vmem:[%s7603_s16 + $0x40] sm:$0xff]  }
 0x40a   : > { %v4488_v39 = vmul.f32 0.2, %v4342_v2  ;;  %6825 = vmatprep.subr.bf16.mxu1 %v7203_v48  ;;  %vm4459_vm11 = vcmp.ge.f32.partialorder %v4353_v3, 0.0  ;;  %v4491_v24 = vmul.f32 0.2, %v4353_v3  ;;  %v4580_v37 = vpack.c.bf16 %v4549_v4, %v4548_v33  ;;  %6863 = vmatprep.subr.bf16.mxu0 %v7206_v14  ;;  %v7209_v4 = vld [vmem:[%s7603_s16 + $0x58] sm:$0xff]  }
 0x40b   : > { %vm4457_vm7 = vcmp.ge.f32.partialorder %v4345_v63, 0.0  ;;  %v4489_v31 = vmul.f32 0.2, %v4345_v63  ;;  %v4366_v8 = vadd.f32 %v11202_v56, %v11245_v12  ;;  %v4358_v53 = vadd.f32 %v11245_v12, %v11210_v58  ;;  %6864 = vmatpush3.bf16.msra.mxu0 %v7206_v14  ;;  %v7210_v49 = vld [vmem:[%s7603_s16 + $0x60] sm:$0xff]  }
 0x40c   : > { %v4520_v45 = vsel %vm4456_vm2, %v4342_v2, %v4488_v39  ;;  %v4523_v51 = vsel %vm4459_vm11, %v4353_v3, %v4491_v24  ;;  %v4369_v19 = vadd.f32 %v11215_v17, %v11245_v12  ;;  %v4361_v56 = vadd.f32 %v11245_v12, %v11226_v6  ;;  %6865 = vmatprep.subr.bf16.mxu0 %v7207_v27  ;;  %v7208_v2 = vld [vmem:[%s7603_s16 + $0x50] sm:$0xff]   ;;  %v7211_v3 = vld [vmem:[%s7603_s16 + $0x68] sm:$0xff]  }
 0x40d   : > { %v4552_v52 = vmul.f32 1.4142135, %v4520_v45  ;;  %v4521_v7 = vsel %vm4457_vm7, %v4345_v63, %v4489_v31  ;;  %6826 = vmatpush3.bf16.msra.mxu1 %v7203_v48  ;;  %v4555_v41 = vmul.f32 1.4142135, %v4523_v51  ;;  %vm4462_vm3 = vcmp.ge.f32.partialorder %v4366_v8, 0.0  ;;  %v7212_v63 = vld [vmem:[%s7603_s16 + $0x70] sm:$0xff]  }
 0x40e   : > { %v4553_v18 = vmul.f32 1.4142135, %v4521_v7  ;;  %vm4460_vm5 = vcmp.ge.f32.partialorder %v4358_v53, 0.0  ;;  %6827 = vmatprep.subr.bf16.mxu1 %v7204_v13  ;;  %v4494_v38 = vmul.f32 0.2, %v4366_v8  ;;  %vm4463_vm6 = vcmp.ge.f32.partialorder %v4369_v19, 0.0 }
 0x40f   : > { %v4492_v30 = vmul.f32 0.2, %v4358_v53  ;;  %v4495_v58 = vmul.f32 0.2, %v4369_v19  ;;  %v4583_v1 = vpack.c.bf16 %v4555_v41, %v4554_v36  ;;  %vm4461_vm9 = vcmp.ge.f32.partialorder %v4361_v56, 0.0  ;;  %6866 = vmatpush3.bf16.msra.mxu0 %v7207_v27 }
 0x410   : > { %v4582_v57 = vpack.c.bf16 %v4553_v18, %v4552_v52  ;;  %6812 = vmatmul.mubr.msk.bf16.gmra.mrb[12].mxu1 %vm12311_vm10, %v4210_v42  ;;  %v4526_v29 = vsel %vm4462_vm3, %v4366_v8, %v4494_v38  ;;  %v4493_v0 = vmul.f32 0.2, %v4361_v56  ;;  %6867 = vmatprep.subr.bf16.mxu0 %v7208_v2 }
 0x411   : > { %v4524_v17 = vsel %vm4460_vm5, %v4358_v53, %v4492_v30  ;;  %6828 = vmatpush3.bf16.msra.mxu1 %v7204_v13  ;;  %6831 = vmatprep.mubr.bf16.mxu1 %v4580_v37  ;;  %v4527_v47 = vsel %vm4463_vm6, %v4369_v19, %v4495_v58  ;;  %v4558_v11 = vmul.f32 1.4142135, %v4526_v29 }
 0x412   : > { %6829 = vmatprep.subr.bf16.mxu1 %v7205_v59  ;;  %v4559_v50 = vmul.f32 1.4142135, %v4527_v47  ;;  %v4525_v21 = vsel %vm4461_vm9, %v4361_v56, %v4493_v0  ;;  %v4556_v61 = vmul.f32 1.4142135, %v4524_v17 }
 0x413   : > { %v4557_v55 = vmul.f32 1.4142135, %v4525_v21  ;;  %6868 = vmatpush3.bf16.msra.mxu0 %v7208_v2 }
 0x414   : > { %v4585_v43 = vpack.c.bf16 %v4559_v50, %v4558_v11  ;;  %6869 = vmatprep.subr.bf16.mxu0 %v7209_v4 }
 0x415   : > { %6830 = vmatpush3.bf16.msra.mxu1 %v7205_v59  ;;  %v4584_v6 = vpack.c.bf16 %v4557_v55, %v4556_v61 }
 0x417   : > { %6870 = vmatpush3.bf16.msra.mxu0 %v7209_v4 }
 0x418   : > { %6832 = vmatmul.mubr.bf16.vlgmr.msra.gmra.mrb[16].mxu1 %v4581_v25  ;;  %6871 = vmatprep.subr.bf16.mxu0 %v7210_v49  ;;  %v7213_v25 = vld [vmem:[%s7603_s16 + $0x78] sm:$0xff]  }
 0x419   : > { %6835 = vmatprep.mubr.bf16.mxu1 %v4582_v57 }
 0x41b   : > { %6872 = vmatpush3.bf16.msra.mxu0 %v7210_v49 }
 0x41c   : > { %6873 = vmatprep.subr.bf16.mxu0 %v7211_v3 }
 0x41f   : > { %6874 = vmatpush3.bf16.msra.mxu0 %v7211_v3 }
 0x420   : > { %6836 = vmatmul.mubr.bf16.gmra.mrb[20].mxu1 %v4583_v1  ;;  %6875 = vmatprep.subr.bf16.mxu0 %v7212_v63 }
 0x421   : > { %6839 = vmatprep.mubr.bf16.mxu1 %v4584_v6 }
 0x423   : > { %6876 = vmatpush3.bf16.msra.mxu0 %v7212_v63 }
 0x424   : > { %6877 = vmatprep.subr.bf16.mxu0 %v7213_v25 }
 0x427   : > { %6878 = vmatpush3.bf16.msra.mxu0 %v7213_v25 }
 0x428   : > { %6840 = vmatmul.mubr.bf16.gmra.mrb[24].mxu1 %v4585_v43 }
 0x450   : > { %v6797_v22 = vpop.f32.mrb[12].mxu0 }
 0x451   : > { %v4382_v26 = vadd.f32 %v6797_v22, %v11245_v12  ;;  %v4373_v34 = vpop.f32.mrb[13].mxu0 }
 0x452   : > { %v4374_v35 = vadd.f32 %v11245_v12, %v4373_v34  ;;  %v6798_v60 = vpop.f32.mrb[14].mxu0 }
 0x453   : > { %vm4466_vm0 = vcmp.ge.f32.partialorder %v4382_v26, 0.0  ;;  %v4498_v32 = vmul.f32 0.2, %v4382_v26  ;;  %v4385_v9 = vadd.f32 %v6798_v60, %v11245_v12  ;;  %v4376_v10 = vpop.f32.mrb[15].mxu0 }
 0x454   : > { %vm4464_vm13 = vcmp.ge.f32.partialorder %v4374_v35, 0.0  ;;  %v4496_v44 = vmul.f32 0.2, %v4374_v35  ;;  %v4377_v46 = vadd.f32 %v11245_v12, %v4376_v10 }
 0x455   : > { %v4530_v23 = vsel %vm4466_vm0, %v4382_v26, %v4498_v32  ;;  %vm4467_vm12 = vcmp.ge.f32.partialorder %v4385_v9, 0.0  ;;  %v4499_v40 = vmul.f32 0.2, %v4385_v9 }
 0x456   : > { %v4528_v5 = vsel %vm4464_vm13, %v4374_v35, %v4496_v44  ;;  %vm4465_vm15 = vcmp.ge.f32.partialorder %v4377_v46, 0.0  ;;  %v4497_v28 = vmul.f32 0.2, %v4377_v46  ;;  %v4562_v33 = vmul.f32 1.4142135, %v4530_v23 }
 0x457   : > { %v4531_v16 = vsel %vm4467_vm12, %v4385_v9, %v4499_v40  ;;  %v4560_v20 = vmul.f32 1.4142135, %v4528_v5 }
 0x458   : > { %v4563_v62 = vmul.f32 1.4142135, %v4531_v16  ;;  %v4529_v15 = vsel %vm4465_vm15, %v4377_v46, %v4497_v28 }
 0x459   : > { %v4561_v48 = vmul.f32 1.4142135, %v4529_v15 }
 0x45a   : > { %v4587_v54 = vpack.c.bf16 %v4563_v62, %v4562_v33 }
 0x45b   : > { %v4586_v42 = vpack.c.bf16 %v4561_v48, %v4560_v20 }
 0x45d   : > { %6843 = vmatprep.mubr.bf16.mxu1 %v4586_v42 }
 0x45e   : > { %6844 = vmatmul.mubr.bf16.gmra.mrb[28].mxu1 %v4587_v54 }
 0x4ca   : > { %v6801_v13 = vpop.f32.mrb[0].mxu1 }
 0x4cb   : > { %v4398_v36 = vadd.f32 %v6801_v13, %v11245_v12  ;;  %v4389_v39 = vpop.f32.mrb[1].mxu1 }
 0x4cc   : > { %v4390_v24 = vadd.f32 %v11245_v12, %v4389_v39  ;;  %v6802_v31 = vpop.f32.mrb[2].mxu1 }
 0x4cd   : > { %vm4470_vm1 = vcmp.ge.f32.partialorder %v4398_v36, 0.0  ;;  %v4502_v45 = vmul.f32 0.2, %v4398_v36  ;;  %v4401_v37 = vadd.f32 %v6802_v31, %v11245_v12  ;;  %v4392_v8 = vpop.f32.mrb[3].mxu1 }
 0x4ce   : > { %vm4468_vm8 = vcmp.ge.f32.partialorder %v4390_v24, 0.0  ;;  %v4500_v53 = vmul.f32 0.2, %v4390_v24  ;;  %v4393_v52 = vadd.f32 %v11245_v12, %v4392_v8 }
 0x4cf   : > { %v4534_v51 = vsel %vm4470_vm1, %v4398_v36, %v4502_v45  ;;  %vm4471_vm4 = vcmp.ge.f32.partialorder %v4401_v37, 0.0  ;;  %v4503_v7 = vmul.f32 0.2, %v4401_v37 }
 0x4d0   : > { %v4532_v19 = vsel %vm4468_vm8, %v4390_v24, %v4500_v53  ;;  %vm4469_vm14 = vcmp.ge.f32.partialorder %v4393_v52, 0.0  ;;  %v4501_v41 = vmul.f32 0.2, %v4393_v52  ;;  %v4566_v59 = vmul.f32 1.4142135, %v4534_v51 }
 0x4d1   : > { %v4535_v18 = vsel %vm4471_vm4, %v4401_v37, %v4503_v7  ;;  %v4564_v58 = vmul.f32 1.4142135, %v4532_v19 }
 0x4d2   : > { %v4567_v38 = vmul.f32 1.4142135, %v4535_v18  ;;  %v4533_v30 = vsel %vm4469_vm14, %v4393_v52, %v4501_v41 }
 0x4d3   : > { %v6805_v56 = vpop.f32.mrb[4].mxu1  ;;  %v4565_v57 = vmul.f32 1.4142135, %v4533_v30  ;;  %v11354_v30 = vld [vmem:[%s11596_s5] ss:$0 sm:$0xff] }
 0x4d4   : > { %v4414_v1 = vadd.f32 %v6805_v56, %v11245_v12  ;;  %v4405_v29 = vpop.f32.mrb[5].mxu1  ;;  %v4589_v17 = vpack.c.bf16 %v4567_v38, %v4566_v59 }
 0x4d5   : > { %v4406_v0 = vadd.f32 %v11245_v12, %v4405_v29  ;;  %v6806_v47 = vpop.f32.mrb[6].mxu1  ;;  %v4588_v11 = vpack.c.bf16 %v4565_v57, %v4564_v58 }
 0x4d6   : > { %vm4474_vm2 = vcmp.ge.f32.partialorder %v4414_v1, 0.0  ;;  %v4506_v50 = vmul.f32 0.2, %v4414_v1  ;;  %v4417_v21 = vadd.f32 %v6806_v47, %v11245_v12  ;;  %v4408_v61 = vpop.f32.mrb[7].mxu1 }
 0x4d7   : > { %vm4472_vm11 = vcmp.ge.f32.partialorder %v4406_v0, 0.0  ;;  %v4504_v55 = vmul.f32 0.2, %v4406_v0  ;;  %v4409_v43 = vadd.f32 %v11245_v12, %v4408_v61  ;;  %6847 = vmatprep.mubr.bf16.mxu1 %v4588_v11 }
 0x4d8   : > { %v4538_v6 = vsel %vm4474_vm2, %v4414_v1, %v4506_v50  ;;  %vm4475_vm7 = vcmp.ge.f32.partialorder %v4417_v21, 0.0  ;;  %v4507_v22 = vmul.f32 0.2, %v4417_v21  ;;  %6848 = vmatmul.mubr.bf16.gmra.mrb[32].mxu1 %v4589_v17 }
 0x4d9   : > { %v4536_v26 = vsel %vm4472_vm11, %v4406_v0, %v4504_v55  ;;  %vm4473_vm3 = vcmp.ge.f32.partialorder %v4409_v43, 0.0  ;;  %v4505_v34 = vmul.f32 0.2, %v4409_v43  ;;  %v4570_v60 = vmul.f32 1.4142135, %v4538_v6 }
 0x4da   : > { %v4539_v35 = vsel %vm4475_vm7, %v4417_v21, %v4507_v22  ;;  %v4568_v44 = vmul.f32 1.4142135, %v4536_v26 }
 0x4db   : > { %v4571_v32 = vmul.f32 1.4142135, %v4539_v35  ;;  %v4537_v9 = vsel %vm4473_vm3, %v4409_v43, %v4505_v34  ;;  %v6809_v10 = vpop.f32.mrb[8].mxu1 }
 0x4dc   : > { %v4569_v46 = vmul.f32 1.4142135, %v4537_v9  ;;  %v4430_v23 = vadd.f32 %v6809_v10, %v11245_v12  ;;  %v4421_v40 = vpop.f32.mrb[9].mxu1 }
 0x4dd   : > { %v4591_v5 = vpack.c.bf16 %v4571_v32, %v4570_v60  ;;  %v4422_v28 = vadd.f32 %v11245_v12, %v4421_v40  ;;  %v6810_v16 = vpop.f32.mrb[10].mxu1 }
 0x4de   : > { %v4590_v33 = vpack.c.bf16 %v4569_v46, %v4568_v44  ;;  %vm4478_vm5 = vcmp.ge.f32.partialorder %v4430_v23, 0.0  ;;  %v4510_v62 = vmul.f32 0.2, %v4430_v23  ;;  %v4433_v15 = vadd.f32 %v6810_v16, %v11245_v12  ;;  %v4424_v20 = vpop.f32.mrb[11].mxu1 }
 0x4df   : > { %vm4476_vm6 = vcmp.ge.f32.partialorder %v4422_v28, 0.0  ;;  %v4508_v48 = vmul.f32 0.2, %v4422_v28  ;;  %v4425_v54 = vadd.f32 %v11245_v12, %v4424_v20 }
 0x4e0   : > { %6851 = vmatprep.mubr.bf16.mxu1 %v4590_v33  ;;  %v4542_v42 = vsel %vm4478_vm5, %v4430_v23, %v4510_v62  ;;  %vm4479_vm10 = vcmp.ge.f32.partialorder %v4433_v15, 0.0  ;;  %v4511_v14 = vmul.f32 0.2, %v4433_v15 }
 0x4e1   : > { %6852 = vmatmul.mubr.bf16.gmra.mrb[36].mxu1 %v4591_v5  ;;  %v4540_v27 = vsel %vm4476_vm6, %v4422_v28, %v4508_v48  ;;  %vm4477_vm9 = vcmp.ge.f32.partialorder %v4425_v54, 0.0  ;;  %v4509_v2 = vmul.f32 0.2, %v4425_v54  ;;  %v4574_v49 = vmul.f32 1.4142135, %v4542_v42 }
 0x4e2   : > { %v4543_v4 = vsel %vm4479_vm10, %v4433_v15, %v4511_v14  ;;  %v4572_v13 = vmul.f32 1.4142135, %v4540_v27 }
 0x4e3   : > { %v4575_v3 = vmul.f32 1.4142135, %v4543_v4  ;;  %v4541_v63 = vsel %vm4477_vm9, %v4425_v54, %v4509_v2  ;;  %v6813_v25 = vpop.f32.mrb[12].mxu1 }
 0x4e4   : > { %v4573_v36 = vmul.f32 1.4142135, %v4541_v63  ;;  %v4446_v39 = vadd.f32 %v6813_v25, %v11245_v12  ;;  %v4437_v24 = vpop.f32.mrb[13].mxu1 }
 0x4e5   : > { %v4593_v31 = vpack.c.bf16 %v4575_v3, %v4574_v49  ;;  %v4438_v45 = vadd.f32 %v11245_v12, %v4437_v24  ;;  %v6814_v37 = vpop.f32.mrb[14].mxu1 }
 0x4e6   : > { %v4592_v8 = vpack.c.bf16 %v4573_v36, %v4572_v13  ;;  %vm4482_vm0 = vcmp.ge.f32.partialorder %v4446_v39, 0.0  ;;  %v4514_v53 = vmul.f32 0.2, %v4446_v39  ;;  %v4449_v52 = vadd.f32 %v6814_v37, %v11245_v12  ;;  %v4440_v51 = vpop.f32.mrb[15].mxu1 }
 0x4e7   : > { %vm4480_vm13 = vcmp.ge.f32.partialorder %v4438_v45, 0.0  ;;  %v4512_v7 = vmul.f32 0.2, %v4438_v45  ;;  %v4441_v19 = vadd.f32 %v11245_v12, %v4440_v51 }
 0x4e8   : > { %6855 = vmatprep.mubr.bf16.mxu1 %v4592_v8  ;;  %v4546_v41 = vsel %vm4482_vm0, %v4446_v39, %v4514_v53  ;;  %vm4483_vm12 = vcmp.ge.f32.partialorder %v4449_v52, 0.0  ;;  %v4515_v18 = vmul.f32 0.2, %v4449_v52 }
 0x4e9   : > { %6856 = vmatmul.mubr.bf16.gmra.mrb[40].mxu1 %v4593_v31  ;;  %v4544_v59 = vsel %vm4480_vm13, %v4438_v45, %v4512_v7  ;;  %vm4481_vm15 = vcmp.ge.f32.partialorder %v4441_v19, 0.0  ;;  %v4513_v38 = vmul.f32 0.2, %v4441_v19  ;;  %v4578_v58 = vmul.f32 1.4142135, %v4546_v41 }
 0x4ea   : > { %v4547_v56 = vsel %vm4483_vm12, %v4449_v52, %v4515_v18  ;;  %v4576_v17 = vmul.f32 1.4142135, %v4544_v59 }
 0x4eb   : > { %v4579_v57 = vmul.f32 1.4142135, %v4547_v56  ;;  %v4545_v1 = vsel %vm4481_vm15, %v4441_v19, %v4513_v38  ;;  %v6833_v29 = vpop.f32.mrb[16].mxu1 }
 0x4ec   : > { %v4577_v12 = vmul.f32 1.4142135, %v4545_v1  ;;  %v4708_v0 = vadd.f32 %v6833_v29, %v11354_v30  ;;  %v4699_v47 = vpop.f32.mrb[17].mxu1 }
 0x4ed   : > { %v4595_v11 = vpack.c.bf16 %v4579_v57, %v4578_v58  ;;  %v4700_v50 = vadd.f32 %v11354_v30, %v4699_v47  ;;  %v6834_v21 = vpop.f32.mrb[18].mxu1 }
 0x4ee   : > { %v4594_v61 = vpack.c.bf16 %v4577_v12, %v4576_v17  ;;  %vm4828_vm1 = vcmp.ge.f32.partialorder %v4708_v0, 0.0  ;;  %v4860_v55 = vmul.f32 0.2, %v4708_v0  ;;  %v4711_v43 = vadd.f32 %v6834_v21, %v11354_v30  ;;  %v4702_v6 = vpop.f32.mrb[19].mxu1 }
 0x4ef   : > { %vm4826_vm8 = vcmp.ge.f32.partialorder %v4700_v50, 0.0  ;;  %v4858_v22 = vmul.f32 0.2, %v4700_v50  ;;  %v4703_v26 = vadd.f32 %v11354_v30, %v4702_v6 }
 0x4f0   : > { %6859 = vmatprep.mubr.bf16.mxu1 %v4594_v61  ;;  %v4892_v34 = vsel %vm4828_vm1, %v4708_v0, %v4860_v55  ;;  %vm4829_vm4 = vcmp.ge.f32.partialorder %v4711_v43, 0.0  ;;  %v4861_v35 = vmul.f32 0.2, %v4711_v43 }
 0x4f1   : > { %6860 = vmatmul.mubr.bf16.gmra.mrb[44].mxu1 %v4595_v11  ;;  %v4890_v60 = vsel %vm4826_vm8, %v4700_v50, %v4858_v22  ;;  %vm4827_vm14 = vcmp.ge.f32.partialorder %v4703_v26, 0.0  ;;  %v4859_v32 = vmul.f32 0.2, %v4703_v26  ;;  %v4924_v10 = vmul.f32 1.4142135, %v4892_v34 }
 0x4f2   : > { %v4893_v9 = vsel %vm4829_vm4, %v4711_v43, %v4861_v35  ;;  %v4922_v40 = vmul.f32 1.4142135, %v4890_v60 }
 0x4f3   : > { %v4925_v44 = vmul.f32 1.4142135, %v4893_v9  ;;  %v4891_v46 = vsel %vm4827_vm14, %v4703_v26, %v4859_v32  ;;  %v6837_v23 = vpop.f32.mrb[20].mxu1 }
 0x4f4   : > { %v4923_v5 = vmul.f32 1.4142135, %v4891_v46  ;;  %v4724_v28 = vadd.f32 %v6837_v23, %v11354_v30  ;;  %v4715_v16 = vpop.f32.mrb[21].mxu1 }
 0x4f5   : > { %v4955_v33 = vpack.c.bf16 %v4925_v44, %v4924_v10  ;;  %v4716_v62 = vadd.f32 %v11354_v30, %v4715_v16  ;;  %v6838_v15 = vpop.f32.mrb[22].mxu1 }
 0x4f6   : > { %vm4832_vm2 = vcmp.ge.f32.partialorder %v4724_v28, 0.0  ;;  %v4864_v20 = vmul.f32 0.2, %v4724_v28  ;;  %v4727_v48 = vadd.f32 %v6838_v15, %v11354_v30  ;;  %v4718_v54 = vpop.f32.mrb[23].mxu1  ;;  %v4954_v42 = vpack.c.bf16 %v4923_v5, %v4922_v40  ;;  %v7214_v15 = vld [vmem:[%s7603_s16 + $0x80] sm:$0xff]  }
 0x4f7   : > { %vm4830_vm11 = vcmp.ge.f32.partialorder %v4716_v62, 0.0  ;;  %v4862_v14 = vmul.f32 0.2, %v4716_v62  ;;  %v4719_v27 = vadd.f32 %v11354_v30, %v4718_v54  ;;  %6911 = vmatprep.subr.bf16.mxu1 %v7214_v15  ;;  %v7217_v54 = vld [vmem:[%s7603_s16 + $0x98] sm:$0xff]  }
 0x4f8   : > { %v4896_v2 = vsel %vm4832_vm2, %v4724_v28, %v4864_v20  ;;  %vm4833_vm7 = vcmp.ge.f32.partialorder %v4727_v48, 0.0  ;;  %v4865_v4 = vmul.f32 0.2, %v4727_v48  ;;  %6879 = vmatprep.mubr.bf16.mxu0 %v4954_v42  ;;  %v7215_v20 = vld [vmem:[%s7603_s16 + $0x88] sm:$0xff]   ;;  %6912 = vmatpush3.bf16.msra.mxu1 %v7214_v15  ;;  %v7218_v42 = vld [vmem:[%s7603_s16 + $0xa0] sm:$0xff]  }
 0x4f9   : > { %v4894_v49 = vsel %vm4830_vm11, %v4716_v62, %v4862_v14  ;;  %vm4831_vm3 = vcmp.ge.f32.partialorder %v4719_v27, 0.0  ;;  %v4863_v3 = vmul.f32 0.2, %v4719_v27  ;;  %6880 = vmatmul.mubr.bf16.vlgmr.msra.gmra.mrb[16].mxu0 %v4955_v33  ;;  %v4928_v25 = vmul.f32 1.4142135, %v4896_v2  ;;  %6913 = vmatprep.subr.bf16.mxu1 %v7215_v20  ;;  %v7219_v14 = vld [vmem:[%s7603_s16 + $0xa8] sm:$0xff]  }
 0x4fa   : > { %v4897_v63 = vsel %vm4833_vm7, %v4727_v48, %v4865_v4  ;;  %v4926_v24 = vmul.f32 1.4142135, %v4894_v49  ;;  %v7216_v48 = vld [vmem:[%s7603_s16 + $0x90] sm:$0xff]   ;;  %v7221_v2 = vld [vmem:[%s7603_s16 + $0xb8] sm:$0xff]  }
 0x4fb   : > { %v4929_v13 = vmul.f32 1.4142135, %v4897_v63  ;;  %v4895_v36 = vsel %vm4831_vm3, %v4719_v27, %v4863_v3  ;;  %v6841_v39 = vpop.f32.mrb[24].mxu1  ;;  %v7220_v27 = vld [vmem:[%s7603_s16 + $0xb0] sm:$0xff]  }
 0x4fc   : > { %v4927_v31 = vmul.f32 1.4142135, %v4895_v36  ;;  %v4740_v45 = vadd.f32 %v6841_v39, %v11354_v30  ;;  %v4731_v37 = vpop.f32.mrb[25].mxu1  ;;  %6914 = vmatpush3.bf16.msra.mxu1 %v7215_v20 }
 0x4fd   : > { %v4732_v8 = vadd.f32 %v11354_v30, %v4731_v37  ;;  %v6842_v53 = vpop.f32.mrb[26].mxu1  ;;  %v4957_v52 = vpack.c.bf16 %v4929_v13, %v4928_v25  ;;  %6915 = vmatprep.subr.bf16.mxu1 %v7216_v48 }
 0x4fe   : > { %vm4836_vm5 = vcmp.ge.f32.partialorder %v4740_v45, 0.0  ;;  %v4868_v51 = vmul.f32 0.2, %v4740_v45  ;;  %v4743_v7 = vadd.f32 %v6842_v53, %v11354_v30  ;;  %v4734_v19 = vpop.f32.mrb[27].mxu1  ;;  %v4956_v41 = vpack.c.bf16 %v4927_v31, %v4926_v24 }
 0x4ff   : > { %vm4834_vm6 = vcmp.ge.f32.partialorder %v4732_v8, 0.0  ;;  %v4866_v18 = vmul.f32 0.2, %v4732_v8  ;;  %v4735_v59 = vadd.f32 %v11354_v30, %v4734_v19 }
 0x500   : > { %v4900_v38 = vsel %vm4836_vm5, %v4740_v45, %v4868_v51  ;;  %vm4837_vm10 = vcmp.ge.f32.partialorder %v4743_v7, 0.0  ;;  %v4869_v56 = vmul.f32 0.2, %v4743_v7  ;;  %6883 = vmatprep.mubr.bf16.mxu0 %v4956_v41  ;;  %6916 = vmatpush3.bf16.msra.mxu1 %v7216_v48 }
 0x501   : > { %v4898_v58 = vsel %vm4834_vm6, %v4732_v8, %v4866_v18  ;;  %vm4835_vm9 = vcmp.ge.f32.partialorder %v4735_v59, 0.0  ;;  %v4867_v57 = vmul.f32 0.2, %v4735_v59  ;;  %6884 = vmatmul.mubr.bf16.gmra.mrb[20].mxu0 %v4957_v52  ;;  %v4932_v29 = vmul.f32 1.4142135, %v4900_v38  ;;  %6917 = vmatprep.subr.bf16.mxu1 %v7217_v54 }
 0x502   : > { %v4901_v1 = vsel %vm4837_vm10, %v4743_v7, %v4869_v56  ;;  %v4930_v0 = vmul.f32 1.4142135, %v4898_v58 }
 0x503   : > { %v4933_v17 = vmul.f32 1.4142135, %v4901_v1  ;;  %v4899_v12 = vsel %vm4835_vm9, %v4735_v59, %v4867_v57 }
 0x504   : > { %v4931_v47 = vmul.f32 1.4142135, %v4899_v12  ;;  %6918 = vmatpush3.bf16.msra.mxu1 %v7217_v54 }
 0x505   : > { %v4959_v11 = vpack.c.bf16 %v4933_v17, %v4932_v29  ;;  %6919 = vmatprep.subr.bf16.mxu1 %v7218_v42 }
 0x506   : > { %v4958_v50 = vpack.c.bf16 %v4931_v47, %v4930_v0 }
 0x508   : > { %6887 = vmatprep.mubr.bf16.mxu0 %v4958_v50  ;;  %6920 = vmatpush3.bf16.msra.mxu1 %v7218_v42 }
 0x509   : > { %6888 = vmatmul.mubr.bf16.gmra.mrb[24].mxu0 %v4959_v11  ;;  %6921 = vmatprep.subr.bf16.mxu1 %v7219_v14 }
 0x50c   : > { %6922 = vmatpush3.bf16.msra.mxu1 %v7219_v14 }
 0x50d   : > { %6923 = vmatprep.subr.bf16.mxu1 %v7220_v27 }
 0x510   : > { %6924 = vmatpush3.bf16.msra.mxu1 %v7220_v27 }
 0x511   : > { %6925 = vmatprep.subr.bf16.mxu1 %v7221_v2 }
 0x514   : > { %6926 = vmatpush3.bf16.msra.mxu1 %v7221_v2 }
 0x531   : > { %v6845_v21 = vpop.f32.mrb[28].mxu1 }
 0x532   : > { %v4756_v61 = vadd.f32 %v6845_v21, %v11354_v30  ;;  %v4747_v55 = vpop.f32.mrb[29].mxu1 }
 0x533   : > { %v4748_v43 = vadd.f32 %v11354_v30, %v4747_v55  ;;  %v6846_v6 = vpop.f32.mrb[30].mxu1 }
 0x534   : > { %vm4840_vm0 = vcmp.ge.f32.partialorder %v4756_v61, 0.0  ;;  %v4872_v22 = vmul.f32 0.2, %v4756_v61  ;;  %v4759_v26 = vadd.f32 %v6846_v6, %v11354_v30  ;;  %v4750_v34 = vpop.f32.mrb[31].mxu1 }
 0x535   : > { %vm4838_vm13 = vcmp.ge.f32.partialorder %v4748_v43, 0.0  ;;  %v4870_v35 = vmul.f32 0.2, %v4748_v43  ;;  %v4751_v60 = vadd.f32 %v11354_v30, %v4750_v34 }
 0x536   : > { %v4904_v32 = vsel %vm4840_vm0, %v4756_v61, %v4872_v22  ;;  %vm4841_vm12 = vcmp.ge.f32.partialorder %v4759_v26, 0.0  ;;  %v4873_v9 = vmul.f32 0.2, %v4759_v26 }
 0x537   : > { %v4902_v10 = vsel %vm4838_vm13, %v4748_v43, %v4870_v35  ;;  %vm4839_vm15 = vcmp.ge.f32.partialorder %v4751_v60, 0.0  ;;  %v4871_v44 = vmul.f32 0.2, %v4751_v60  ;;  %v4936_v23 = vmul.f32 1.4142135, %v4904_v32 }
 0x538   : > { %v4905_v46 = vsel %vm4841_vm12, %v4759_v26, %v4873_v9  ;;  %v4934_v28 = vmul.f32 1.4142135, %v4902_v10 }
 0x539   : > { %v4937_v40 = vmul.f32 1.4142135, %v4905_v46  ;;  %v4903_v5 = vsel %vm4839_vm15, %v4751_v60, %v4871_v44 }
 0x53a   : > { %v4935_v16 = vmul.f32 1.4142135, %v4903_v5 }
 0x53b   : > { %v4961_v33 = vpack.c.bf16 %v4937_v40, %v4936_v23 }
 0x53c   : > { %v4960_v62 = vpack.c.bf16 %v4935_v16, %v4934_v28 }
 0x53e   : > { %6891 = vmatprep.mubr.bf16.mxu0 %v4960_v62 }
 0x53f   : > { %6892 = vmatmul.mubr.bf16.gmra.mrb[28].mxu0 %v4961_v33 }
 0x5ab   : > { %v6849_v4 = vpop.f32.mrb[32].mxu1 }
 0x5ac   : > { %v4772_v49 = vadd.f32 %v6849_v4, %v11354_v30  ;;  %v4763_v3 = vpop.f32.mrb[33].mxu1 }
 0x5ad   : > { %v4764_v63 = vadd.f32 %v11354_v30, %v4763_v3  ;;  %v6850_v25 = vpop.f32.mrb[34].mxu1 }
 0x5ae   : > { %vm4844_vm1 = vcmp.ge.f32.partialorder %v4772_v49, 0.0  ;;  %v4876_v13 = vmul.f32 0.2, %v4772_v49  ;;  %v4775_v36 = vadd.f32 %v6850_v25, %v11354_v30  ;;  %v4766_v39 = vpop.f32.mrb[35].mxu1 }
 0x5af   : > { %vm4842_vm8 = vcmp.ge.f32.partialorder %v4764_v63, 0.0  ;;  %v4874_v24 = vmul.f32 0.2, %v4764_v63  ;;  %v4767_v31 = vadd.f32 %v11354_v30, %v4766_v39 }
 0x5b0   : > { %v4908_v45 = vsel %vm4844_vm1, %v4772_v49, %v4876_v13  ;;  %vm4845_vm4 = vcmp.ge.f32.partialorder %v4775_v36, 0.0  ;;  %v4877_v37 = vmul.f32 0.2, %v4775_v36 }
 0x5b1   : > { %v4906_v8 = vsel %vm4842_vm8, %v4764_v63, %v4874_v24  ;;  %vm4843_vm14 = vcmp.ge.f32.partialorder %v4767_v31, 0.0  ;;  %v4875_v53 = vmul.f32 0.2, %v4767_v31  ;;  %v4940_v51 = vmul.f32 1.4142135, %v4908_v45 }
 0x5b2   : > { %v4909_v52 = vsel %vm4845_vm4, %v4775_v36, %v4877_v37  ;;  %v4938_v18 = vmul.f32 1.4142135, %v4906_v8 }
 0x5b3   : > { %v4941_v7 = vmul.f32 1.4142135, %v4909_v52  ;;  %v4907_v19 = vsel %vm4843_vm14, %v4767_v31, %v4875_v53 }
 0x5b4   : > { %v6853_v41 = vpop.f32.mrb[36].mxu1  ;;  %v4939_v59 = vmul.f32 1.4142135, %v4907_v19  ;;  %v11399_v19 = vld [vmem:[%s11596_s5 + $0x1] ss:$0 sm:$0xff] }
 0x5b5   : > { %v4788_v38 = vadd.f32 %v6853_v41, %v11354_v30  ;;  %v4779_v56 = vpop.f32.mrb[37].mxu1  ;;  %v4963_v58 = vpack.c.bf16 %v4941_v7, %v4940_v51 }
 0x5b6   : > { %v4780_v57 = vadd.f32 %v11354_v30, %v4779_v56  ;;  %v6854_v1 = vpop.f32.mrb[38].mxu1  ;;  %v4962_v29 = vpack.c.bf16 %v4939_v59, %v4938_v18 }
 0x5b7   : > { %vm4848_vm2 = vcmp.ge.f32.partialorder %v4788_v38, 0.0  ;;  %v4880_v17 = vmul.f32 0.2, %v4788_v38  ;;  %v4791_v12 = vadd.f32 %v6854_v1, %v11354_v30  ;;  %v4782_v0 = vpop.f32.mrb[39].mxu1 }
 0x5b8   : > { %vm4846_vm11 = vcmp.ge.f32.partialorder %v4780_v57, 0.0  ;;  %v4878_v47 = vmul.f32 0.2, %v4780_v57  ;;  %v4783_v11 = vadd.f32 %v11354_v30, %v4782_v0  ;;  %6895 = vmatprep.mubr.bf16.mxu0 %v4962_v29 }
 0x5b9   : > { %v4912_v50 = vsel %vm4848_vm2, %v4788_v38, %v4880_v17  ;;  %vm4849_vm7 = vcmp.ge.f32.partialorder %v4791_v12, 0.0  ;;  %v4881_v21 = vmul.f32 0.2, %v4791_v12  ;;  %6896 = vmatmul.mubr.bf16.gmra.mrb[32].mxu0 %v4963_v58 }
 0x5ba   : > { %v4910_v61 = vsel %vm4846_vm11, %v4780_v57, %v4878_v47  ;;  %vm4847_vm3 = vcmp.ge.f32.partialorder %v4783_v11, 0.0  ;;  %v4879_v55 = vmul.f32 0.2, %v4783_v11  ;;  %v4944_v6 = vmul.f32 1.4142135, %v4912_v50 }
 0x5bb   : > { %v4913_v43 = vsel %vm4849_vm7, %v4791_v12, %v4881_v21  ;;  %v4942_v35 = vmul.f32 1.4142135, %v4910_v61 }
 0x5bc   : > { %v4945_v22 = vmul.f32 1.4142135, %v4913_v43  ;;  %v4911_v26 = vsel %vm4847_vm3, %v4783_v11, %v4879_v55  ;;  %v6857_v34 = vpop.f32.mrb[40].mxu1 }
 0x5bd   : > { %v4943_v60 = vmul.f32 1.4142135, %v4911_v26  ;;  %v4804_v32 = vadd.f32 %v6857_v34, %v11354_v30  ;;  %v4795_v9 = vpop.f32.mrb[41].mxu1 }
 0x5be   : > { %v4965_v10 = vpack.c.bf16 %v4945_v22, %v4944_v6  ;;  %v4796_v44 = vadd.f32 %v11354_v30, %v4795_v9  ;;  %v6858_v46 = vpop.f32.mrb[42].mxu1 }
 0x5bf   : > { %v4964_v23 = vpack.c.bf16 %v4943_v60, %v4942_v35  ;;  %vm4852_vm5 = vcmp.ge.f32.partialorder %v4804_v32, 0.0  ;;  %v4884_v40 = vmul.f32 0.2, %v4804_v32  ;;  %v4807_v5 = vadd.f32 %v6858_v46, %v11354_v30  ;;  %v4798_v28 = vpop.f32.mrb[43].mxu1 }
 0x5c0   : > { %vm4850_vm6 = vcmp.ge.f32.partialorder %v4796_v44, 0.0  ;;  %v4882_v16 = vmul.f32 0.2, %v4796_v44  ;;  %v4799_v33 = vadd.f32 %v11354_v30, %v4798_v28 }
 0x5c1   : > { %6899 = vmatprep.mubr.bf16.mxu0 %v4964_v23  ;;  %v4916_v62 = vsel %vm4852_vm5, %v4804_v32, %v4884_v40  ;;  %vm4853_vm10 = vcmp.ge.f32.partialorder %v4807_v5, 0.0  ;;  %v4885_v15 = vmul.f32 0.2, %v4807_v5 }
 0x5c2   : > { %6900 = vmatmul.mubr.bf16.gmra.mrb[36].mxu0 %v4965_v10  ;;  %v4914_v20 = vsel %vm4850_vm6, %v4796_v44, %v4882_v16  ;;  %vm4851_vm9 = vcmp.ge.f32.partialorder %v4799_v33, 0.0  ;;  %v4883_v48 = vmul.f32 0.2, %v4799_v33  ;;  %v4948_v42 = vmul.f32 1.4142135, %v4916_v62 }
 0x5c3   : > { %v4917_v54 = vsel %vm4853_vm10, %v4807_v5, %v4885_v15  ;;  %v4946_v4 = vmul.f32 1.4142135, %v4914_v20 }
 0x5c4   : > { %v4949_v14 = vmul.f32 1.4142135, %v4917_v54  ;;  %v4915_v27 = vsel %vm4851_vm9, %v4799_v33, %v4883_v48  ;;  %v6861_v2 = vpop.f32.mrb[44].mxu1 }
 0x5c5   : > { %v4947_v49 = vmul.f32 1.4142135, %v4915_v27  ;;  %v4820_v3 = vadd.f32 %v6861_v2, %v11354_v30  ;;  %v4811_v63 = vpop.f32.mrb[45].mxu1 }
 0x5c6   : > { %v4967_v25 = vpack.c.bf16 %v4949_v14, %v4948_v42  ;;  %v4812_v13 = vadd.f32 %v11354_v30, %v4811_v63  ;;  %v6862_v36 = vpop.f32.mrb[46].mxu1 }
 0x5c7   : > { %v4966_v39 = vpack.c.bf16 %v4947_v49, %v4946_v4  ;;  %vm4856_vm0 = vcmp.ge.f32.partialorder %v4820_v3, 0.0  ;;  %v4888_v24 = vmul.f32 0.2, %v4820_v3  ;;  %v4823_v31 = vadd.f32 %v6862_v36, %v11354_v30  ;;  %v4814_v45 = vpop.f32.mrb[47].mxu1 }
 0x5c8   : > { %vm4854_vm13 = vcmp.ge.f32.partialorder %v4812_v13, 0.0  ;;  %v4886_v37 = vmul.f32 0.2, %v4812_v13  ;;  %v4815_v8 = vadd.f32 %v11354_v30, %v4814_v45 }
 0x5c9   : > { %6903 = vmatprep.mubr.bf16.mxu0 %v4966_v39  ;;  %v4920_v53 = vsel %vm4856_vm0, %v4820_v3, %v4888_v24  ;;  %vm4857_vm12 = vcmp.ge.f32.partialorder %v4823_v31, 0.0  ;;  %v4889_v52 = vmul.f32 0.2, %v4823_v31 }
 0x5ca   : > { %6904 = vmatmul.mubr.bf16.gmra.mrb[40].mxu0 %v4967_v25  ;;  %v4918_v51 = vsel %vm4854_vm13, %v4812_v13, %v4886_v37  ;;  %vm4855_vm15 = vcmp.ge.f32.partialorder %v4815_v8, 0.0  ;;  %v4887_v7 = vmul.f32 0.2, %v4815_v8  ;;  %v4952_v18 = vmul.f32 1.4142135, %v4920_v53 }
 0x5cb   : > { %v4921_v41 = vsel %vm4857_vm12, %v4823_v31, %v4889_v52  ;;  %v4950_v58 = vmul.f32 1.4142135, %v4918_v51 }
 0x5cc   : > { %v4953_v59 = vmul.f32 1.4142135, %v4921_v41  ;;  %v4919_v38 = vsel %vm4855_vm15, %v4815_v8, %v4887_v7  ;;  %v6881_v56 = vpop.f32.mrb[16].mxu0 }
 0x5cd   : > { %v4951_v30 = vmul.f32 1.4142135, %v4919_v38  ;;  %v5083_v57 = vadd.f32 %v6881_v56, %v11399_v19  ;;  %v5074_v1 = vpop.f32.mrb[17].mxu0 }
 0x5ce   : > { %v4969_v29 = vpack.c.bf16 %v4953_v59, %v4952_v18  ;;  %v5075_v17 = vadd.f32 %v11399_v19, %v5074_v1  ;;  %v6882_v12 = vpop.f32.mrb[18].mxu0 }
 0x5cf   : > { %v4968_v0 = vpack.c.bf16 %v4951_v30, %v4950_v58  ;;  %vm5203_vm1 = vcmp.ge.f32.partialorder %v5083_v57, 0.0  ;;  %v5235_v47 = vmul.f32 0.2, %v5083_v57  ;;  %v5086_v11 = vadd.f32 %v6882_v12, %v11399_v19  ;;  %v5077_v50 = vpop.f32.mrb[19].mxu0 }
 0x5d0   : > { %vm5201_vm8 = vcmp.ge.f32.partialorder %v5075_v17, 0.0  ;;  %v5233_v21 = vmul.f32 0.2, %v5075_v17  ;;  %v5078_v61 = vadd.f32 %v11399_v19, %v5077_v50 }
 0x5d1   : > { %6907 = vmatprep.mubr.bf16.mxu0 %v4968_v0  ;;  %v5267_v55 = vsel %vm5203_vm1, %v5083_v57, %v5235_v47  ;;  %vm5204_vm4 = vcmp.ge.f32.partialorder %v5086_v11, 0.0  ;;  %v5236_v43 = vmul.f32 0.2, %v5086_v11 }
 0x5d2   : > { %6908 = vmatmul.mubr.bf16.gmra.mrb[44].mxu0 %v4969_v29  ;;  %v5265_v6 = vsel %vm5201_vm8, %v5075_v17, %v5233_v21  ;;  %vm5202_vm14 = vcmp.ge.f32.partialorder %v5078_v61, 0.0  ;;  %v5234_v22 = vmul.f32 0.2, %v5078_v61  ;;  %v5299_v34 = vmul.f32 1.4142135, %v5267_v55 }
 0x5d3   : > { %v5268_v26 = vsel %vm5204_vm4, %v5086_v11, %v5236_v43  ;;  %v5297_v9 = vmul.f32 1.4142135, %v5265_v6 }
 0x5d4   : > { %v5300_v35 = vmul.f32 1.4142135, %v5268_v26  ;;  %v5266_v60 = vsel %vm5202_vm14, %v5078_v61, %v5234_v22  ;;  %v6885_v32 = vpop.f32.mrb[20].mxu0 }
 0x5d5   : > { %v5298_v10 = vmul.f32 1.4142135, %v5266_v60  ;;  %v5099_v44 = vadd.f32 %v6885_v32, %v11399_v19  ;;  %v5090_v46 = vpop.f32.mrb[21].mxu0 }
 0x5d6   : > { %v5330_v23 = vpack.c.bf16 %v5300_v35, %v5299_v34  ;;  %v5091_v40 = vadd.f32 %v11399_v19, %v5090_v46  ;;  %v6886_v5 = vpop.f32.mrb[22].mxu0 }
 0x5d7   : > { %vm5207_vm2 = vcmp.ge.f32.partialorder %v5099_v44, 0.0  ;;  %v5239_v28 = vmul.f32 0.2, %v5099_v44  ;;  %v5102_v16 = vadd.f32 %v6886_v5, %v11399_v19  ;;  %v5093_v33 = vpop.f32.mrb[23].mxu0  ;;  %v5329_v62 = vpack.c.bf16 %v5298_v10, %v5297_v9  ;;  %v7222_v5 = vld [vmem:[%s394_s15] sm:$0xff]  }
 0x5d8   : > { %vm5205_vm11 = vcmp.ge.f32.partialorder %v5091_v40, 0.0  ;;  %v5237_v15 = vmul.f32 0.2, %v5091_v40  ;;  %v5094_v20 = vadd.f32 %v11399_v19, %v5093_v33  ;;  %6959 = vmatprep.subr.bf16.mxu0 %v7222_v5  ;;  %v7225_v33 = vld [vmem:[%s394_s15 + $0x18] sm:$0xff]  }
 0x5d9   : > { %v5271_v48 = vsel %vm5207_vm2, %v5099_v44, %v5239_v28  ;;  %vm5208_vm7 = vcmp.ge.f32.partialorder %v5102_v16, 0.0  ;;  %v5240_v54 = vmul.f32 0.2, %v5102_v16  ;;  %6927 = vmatprep.mubr.bf16.mxu1 %v5329_v62  ;;  %v7223_v28 = vld [vmem:[%s394_s15 + $0x8] sm:$0xff]   ;;  %6960 = vmatpush3.bf16.msra.mxu0 %v7222_v5  ;;  %v7226_v62 = vld [vmem:[%s394_s15 + $0x20] sm:$0xff]  }
 0x5da   : > { %v5269_v42 = vsel %vm5205_vm11, %v5091_v40, %v5237_v15  ;;  %vm5206_vm3 = vcmp.ge.f32.partialorder %v5094_v20, 0.0  ;;  %v5238_v14 = vmul.f32 0.2, %v5094_v20  ;;  %6928 = vmatmul.mubr.bf16.vlgmr.msra.gmra.mrb[48].mxu1 %v5330_v23  ;;  %v5303_v2 = vmul.f32 1.4142135, %v5271_v48  ;;  %6961 = vmatprep.subr.bf16.mxu0 %v7223_v28  ;;  %v7227_v15 = vld [vmem:[%s394_s15 + $0x28] sm:$0xff]  }
 0x5db   : > { %v5272_v27 = vsel %vm5208_vm7, %v5102_v16, %v5240_v54  ;;  %v5301_v63 = vmul.f32 1.4142135, %v5269_v42  ;;  %v7224_v16 = vld [vmem:[%s394_s15 + $0x10] sm:$0xff]   ;;  %v7229_v48 = vld [vmem:[%s394_s15 + $0x38] sm:$0xff]  }
 0x5dc   : > { %v5304_v4 = vmul.f32 1.4142135, %v5272_v27  ;;  %v5270_v49 = vsel %vm5206_vm3, %v5094_v20, %v5238_v14  ;;  %v6889_v3 = vpop.f32.mrb[24].mxu0  ;;  %v7228_v20 = vld [vmem:[%s394_s15 + $0x30] sm:$0xff]  }
 0x5dd   : > { %v5302_v25 = vmul.f32 1.4142135, %v5270_v49  ;;  %v5115_v13 = vadd.f32 %v6889_v3, %v11399_v19  ;;  %v5106_v36 = vpop.f32.mrb[25].mxu0  ;;  %6962 = vmatpush3.bf16.msra.mxu0 %v7223_v28 }
 0x5de   : > { %v5107_v39 = vadd.f32 %v11399_v19, %v5106_v36  ;;  %v6890_v24 = vpop.f32.mrb[26].mxu0  ;;  %v5332_v31 = vpack.c.bf16 %v5304_v4, %v5303_v2  ;;  %6963 = vmatprep.subr.bf16.mxu0 %v7224_v16 }
 0x5df   : > { %vm5211_vm5 = vcmp.ge.f32.partialorder %v5115_v13, 0.0  ;;  %v5243_v45 = vmul.f32 0.2, %v5115_v13  ;;  %v5118_v37 = vadd.f32 %v6890_v24, %v11399_v19  ;;  %v5109_v8 = vpop.f32.mrb[27].mxu0  ;;  %v5331_v53 = vpack.c.bf16 %v5302_v25, %v5301_v63 }
 0x5e0   : > { %vm5209_vm6 = vcmp.ge.f32.partialorder %v5107_v39, 0.0  ;;  %v5241_v52 = vmul.f32 0.2, %v5107_v39  ;;  %v5110_v51 = vadd.f32 %v11399_v19, %v5109_v8 }
 0x5e1   : > { %v5275_v7 = vsel %vm5211_vm5, %v5115_v13, %v5243_v45  ;;  %vm5212_vm10 = vcmp.ge.f32.partialorder %v5118_v37, 0.0  ;;  %v5244_v41 = vmul.f32 0.2, %v5118_v37  ;;  %6931 = vmatprep.mubr.bf16.mxu1 %v5331_v53  ;;  %6964 = vmatpush3.bf16.msra.mxu0 %v7224_v16 }
 0x5e2   : > { %v5273_v18 = vsel %vm5209_vm6, %v5107_v39, %v5241_v52  ;;  %vm5210_vm9 = vcmp.ge.f32.partialorder %v5110_v51, 0.0  ;;  %v5242_v59 = vmul.f32 0.2, %v5110_v51  ;;  %6932 = vmatmul.mubr.bf16.gmra.mrb[52].mxu1 %v5332_v31  ;;  %v5307_v56 = vmul.f32 1.4142135, %v5275_v7  ;;  %6965 = vmatprep.subr.bf16.mxu0 %v7225_v33 }
 0x5e3   : > { %v5276_v38 = vsel %vm5212_vm10, %v5118_v37, %v5244_v41  ;;  %v5305_v57 = vmul.f32 1.4142135, %v5273_v18 }
 0x5e4   : > { %v5308_v58 = vmul.f32 1.4142135, %v5276_v38  ;;  %v5274_v30 = vsel %vm5210_vm9, %v5110_v51, %v5242_v59 }
 0x5e5   : > { %v5306_v1 = vmul.f32 1.4142135, %v5274_v30  ;;  %6966 = vmatpush3.bf16.msra.mxu0 %v7225_v33 }
 0x5e6   : > { %v5334_v29 = vpack.c.bf16 %v5308_v58, %v5307_v56  ;;  %6967 = vmatprep.subr.bf16.mxu0 %v7226_v62 }
 0x5e7   : > { %v5333_v17 = vpack.c.bf16 %v5306_v1, %v5305_v57 }
 0x5e9   : > { %6935 = vmatprep.mubr.bf16.mxu1 %v5333_v17  ;;  %6968 = vmatpush3.bf16.msra.mxu0 %v7226_v62 }
 0x5ea   : > { %6936 = vmatmul.mubr.bf16.gmra.mrb[56].mxu1 %v5334_v29  ;;  %6969 = vmatprep.subr.bf16.mxu0 %v7227_v15 }
 0x5ed   : > { %6970 = vmatpush3.bf16.msra.mxu0 %v7227_v15 }
 0x5ee   : > { %6971 = vmatprep.subr.bf16.mxu0 %v7228_v20 }
 0x5f1   : > { %6972 = vmatpush3.bf16.msra.mxu0 %v7228_v20 }
 0x5f2   : > { %6973 = vmatprep.subr.bf16.mxu0 %v7229_v48 }
 0x5f5   : > { %6974 = vmatpush3.bf16.msra.mxu0 %v7229_v48 }
 0x612   : > { %v6893_v12 = vpop.f32.mrb[28].mxu0 }
 0x613   : > { %v5131_v0 = vadd.f32 %v6893_v12, %v11399_v19  ;;  %v5122_v47 = vpop.f32.mrb[29].mxu0 }
 0x614   : > { %v5123_v11 = vadd.f32 %v11399_v19, %v5122_v47  ;;  %v6894_v50 = vpop.f32.mrb[30].mxu0 }
 0x615   : > { %vm5215_vm0 = vcmp.ge.f32.partialorder %v5131_v0, 0.0  ;;  %v5247_v21 = vmul.f32 0.2, %v5131_v0  ;;  %v5134_v61 = vadd.f32 %v6894_v50, %v11399_v19  ;;  %v5125_v55 = vpop.f32.mrb[31].mxu0 }
 0x616   : > { %vm5213_vm13 = vcmp.ge.f32.partialorder %v5123_v11, 0.0  ;;  %v5245_v43 = vmul.f32 0.2, %v5123_v11  ;;  %v5126_v6 = vadd.f32 %v11399_v19, %v5125_v55 }
 0x617   : > { %v5279_v22 = vsel %vm5215_vm0, %v5131_v0, %v5247_v21  ;;  %vm5216_vm12 = vcmp.ge.f32.partialorder %v5134_v61, 0.0  ;;  %v5248_v26 = vmul.f32 0.2, %v5134_v61 }
 0x618   : > { %v5277_v34 = vsel %vm5213_vm13, %v5123_v11, %v5245_v43  ;;  %vm5214_vm15 = vcmp.ge.f32.partialorder %v5126_v6, 0.0  ;;  %v5246_v35 = vmul.f32 0.2, %v5126_v6  ;;  %v5311_v32 = vmul.f32 1.4142135, %v5279_v22 }
 0x619   : > { %v5280_v60 = vsel %vm5216_vm12, %v5134_v61, %v5248_v26  ;;  %v5309_v44 = vmul.f32 1.4142135, %v5277_v34 }
 0x61a   : > { %v5312_v9 = vmul.f32 1.4142135, %v5280_v60  ;;  %v5278_v10 = vsel %vm5214_vm15, %v5126_v6, %v5246_v35 }
 0x61b   : > { %v5310_v46 = vmul.f32 1.4142135, %v5278_v10 }
 0x61c   : > { %v5336_v23 = vpack.c.bf16 %v5312_v9, %v5311_v32 }
 0x61d   : > { %v5335_v40 = vpack.c.bf16 %v5310_v46, %v5309_v44 }
 0x61f   : > { %6939 = vmatprep.mubr.bf16.mxu1 %v5335_v40 }
 0x620   : > { %6940 = vmatmul.mubr.bf16.gmra.mrb[60].mxu1 %v5336_v23 }
 0x68c   : > { %v6897_v54 = vpop.f32.mrb[32].mxu0 }
 0x68d   : > { %v5147_v42 = vadd.f32 %v6897_v54, %v11399_v19  ;;  %v5138_v14 = vpop.f32.mrb[33].mxu0 }
 0x68e   : > { %v5139_v27 = vadd.f32 %v11399_v19, %v5138_v14  ;;  %v6898_v2 = vpop.f32.mrb[34].mxu0 }
 0x68f   : > { %vm5219_vm1 = vcmp.ge.f32.partialorder %v5147_v42, 0.0  ;;  %v5251_v4 = vmul.f32 0.2, %v5147_v42  ;;  %v5150_v49 = vadd.f32 %v6898_v2, %v11399_v19  ;;  %v5141_v3 = vpop.f32.mrb[35].mxu0 }
 0x690   : > { %vm5217_vm8 = vcmp.ge.f32.partialorder %v5139_v27, 0.0  ;;  %v5249_v63 = vmul.f32 0.2, %v5139_v27  ;;  %v5142_v25 = vadd.f32 %v11399_v19, %v5141_v3 }
 0x691   : > { %v5283_v13 = vsel %vm5219_vm1, %v5147_v42, %v5251_v4  ;;  %vm5220_vm4 = vcmp.ge.f32.partialorder %v5150_v49, 0.0  ;;  %v5252_v36 = vmul.f32 0.2, %v5150_v49 }
 0x692   : > { %v5281_v39 = vsel %vm5217_vm8, %v5139_v27, %v5249_v63  ;;  %vm5218_vm14 = vcmp.ge.f32.partialorder %v5142_v25, 0.0  ;;  %v5250_v24 = vmul.f32 0.2, %v5142_v25  ;;  %v5315_v45 = vmul.f32 1.4142135, %v5283_v13 }
 0x693   : > { %v5284_v31 = vsel %vm5220_vm4, %v5150_v49, %v5252_v36  ;;  %v5313_v52 = vmul.f32 1.4142135, %v5281_v39 }
 0x694   : > { %v5316_v37 = vmul.f32 1.4142135, %v5284_v31  ;;  %v5282_v8 = vsel %vm5218_vm14, %v5142_v25, %v5250_v24 }
 0x695   : > { %v6901_v53 = vpop.f32.mrb[36].mxu0  ;;  %v5314_v51 = vmul.f32 1.4142135, %v5282_v8  ;;  %v11440_v8 = vld [vmem:[%s11596_s5 + $0x2] ss:$0 sm:$0xff] }
 0x696   : > { %v5163_v7 = vadd.f32 %v6901_v53, %v11399_v19  ;;  %v5154_v41 = vpop.f32.mrb[37].mxu0  ;;  %v5338_v18 = vpack.c.bf16 %v5316_v37, %v5315_v45 }
 0x697   : > { %v5155_v59 = vadd.f32 %v11399_v19, %v5154_v41  ;;  %v6902_v38 = vpop.f32.mrb[38].mxu0  ;;  %v5337_v56 = vpack.c.bf16 %v5314_v51, %v5313_v52 }
 0x698   : > { %vm5223_vm2 = vcmp.ge.f32.partialorder %v5163_v7, 0.0  ;;  %v5255_v58 = vmul.f32 0.2, %v5163_v7  ;;  %v5166_v30 = vadd.f32 %v6902_v38, %v11399_v19  ;;  %v5157_v57 = vpop.f32.mrb[39].mxu0 }
 0x699   : > { %vm5221_vm11 = vcmp.ge.f32.partialorder %v5155_v59, 0.0  ;;  %v5253_v1 = vmul.f32 0.2, %v5155_v59  ;;  %v5158_v29 = vadd.f32 %v11399_v19, %v5157_v57  ;;  %6943 = vmatprep.mubr.bf16.mxu1 %v5337_v56 }
 0x69a   : > { %v5287_v17 = vsel %vm5223_vm2, %v5163_v7, %v5255_v58  ;;  %vm5224_vm7 = vcmp.ge.f32.partialorder %v5166_v30, 0.0  ;;  %v5256_v12 = vmul.f32 0.2, %v5166_v30  ;;  %6944 = vmatmul.mubr.bf16.gmra.mrb[64].mxu1 %v5338_v18 }
 0x69b   : > { %v5285_v0 = vsel %vm5221_vm11, %v5155_v59, %v5253_v1  ;;  %vm5222_vm3 = vcmp.ge.f32.partialorder %v5158_v29, 0.0  ;;  %v5254_v47 = vmul.f32 0.2, %v5158_v29  ;;  %v5319_v50 = vmul.f32 1.4142135, %v5287_v17 }
 0x69c   : > { %v5288_v11 = vsel %vm5224_vm7, %v5166_v30, %v5256_v12  ;;  %v5317_v43 = vmul.f32 1.4142135, %v5285_v0 }
 0x69d   : > { %v5320_v21 = vmul.f32 1.4142135, %v5288_v11  ;;  %v5286_v61 = vsel %vm5222_vm3, %v5158_v29, %v5254_v47  ;;  %v6905_v55 = vpop.f32.mrb[40].mxu0 }
 0x69e   : > { %v5318_v6 = vmul.f32 1.4142135, %v5286_v61  ;;  %v5179_v22 = vadd.f32 %v6905_v55, %v11399_v19  ;;  %v5170_v26 = vpop.f32.mrb[41].mxu0 }
 0x69f   : > { %v5340_v34 = vpack.c.bf16 %v5320_v21, %v5319_v50  ;;  %v5171_v35 = vadd.f32 %v11399_v19, %v5170_v26  ;;  %v6906_v60 = vpop.f32.mrb[42].mxu0 }
 0x6a0   : > { %v5339_v32 = vpack.c.bf16 %v5318_v6, %v5317_v43  ;;  %vm5227_vm5 = vcmp.ge.f32.partialorder %v5179_v22, 0.0  ;;  %v5259_v9 = vmul.f32 0.2, %v5179_v22  ;;  %v5182_v10 = vadd.f32 %v6906_v60, %v11399_v19  ;;  %v5173_v44 = vpop.f32.mrb[43].mxu0 }
 0x6a1   : > { %vm5225_vm6 = vcmp.ge.f32.partialorder %v5171_v35, 0.0  ;;  %v5257_v46 = vmul.f32 0.2, %v5171_v35  ;;  %v5174_v23 = vadd.f32 %v11399_v19, %v5173_v44 }
 0x6a2   : > { %6947 = vmatprep.mubr.bf16.mxu1 %v5339_v32  ;;  %v5291_v40 = vsel %vm5227_vm5, %v5179_v22, %v5259_v9  ;;  %vm5228_vm10 = vcmp.ge.f32.partialorder %v5182_v10, 0.0  ;;  %v5260_v5 = vmul.f32 0.2, %v5182_v10 }
 0x6a3   : > { %6948 = vmatmul.mubr.bf16.gmra.mrb[68].mxu1 %v5340_v34  ;;  %v5289_v28 = vsel %vm5225_vm6, %v5171_v35, %v5257_v46  ;;  %vm5226_vm9 = vcmp.ge.f32.partialorder %v5174_v23, 0.0  ;;  %v5258_v16 = vmul.f32 0.2, %v5174_v23  ;;  %v5323_v62 = vmul.f32 1.4142135, %v5291_v40 }
 0x6a4   : > { %v5292_v33 = vsel %vm5228_vm10, %v5182_v10, %v5260_v5  ;;  %v5321_v54 = vmul.f32 1.4142135, %v5289_v28 }
 0x6a5   : > { %v5324_v15 = vmul.f32 1.4142135, %v5292_v33  ;;  %v5290_v20 = vsel %vm5226_vm9, %v5174_v23, %v5258_v16  ;;  %v6909_v48 = vpop.f32.mrb[44].mxu0 }
 0x6a6   : > { %v5322_v42 = vmul.f32 1.4142135, %v5290_v20  ;;  %v5195_v14 = vadd.f32 %v6909_v48, %v11399_v19  ;;  %v5186_v27 = vpop.f32.mrb[45].mxu0 }
 0x6a7   : > { %v5342_v2 = vpack.c.bf16 %v5324_v15, %v5323_v62  ;;  %v5187_v4 = vadd.f32 %v11399_v19, %v5186_v27  ;;  %v6910_v49 = vpop.f32.mrb[46].mxu0 }
 0x6a8   : > { %v5341_v3 = vpack.c.bf16 %v5322_v42, %v5321_v54  ;;  %vm5231_vm0 = vcmp.ge.f32.partialorder %v5195_v14, 0.0  ;;  %v5263_v63 = vmul.f32 0.2, %v5195_v14  ;;  %v5198_v25 = vadd.f32 %v6910_v49, %v11399_v19  ;;  %v5189_v13 = vpop.f32.mrb[47].mxu0 }
 0x6a9   : > { %vm5229_vm13 = vcmp.ge.f32.partialorder %v5187_v4, 0.0  ;;  %v5261_v36 = vmul.f32 0.2, %v5187_v4  ;;  %v5190_v39 = vadd.f32 %v11399_v19, %v5189_v13 }
 0x6aa   : > { %6951 = vmatprep.mubr.bf16.mxu1 %v5341_v3  ;;  %v5295_v24 = vsel %vm5231_vm0, %v5195_v14, %v5263_v63  ;;  %vm5232_vm12 = vcmp.ge.f32.partialorder %v5198_v25, 0.0  ;;  %v5264_v31 = vmul.f32 0.2, %v5198_v25 }
 0x6ab   : > { %6952 = vmatmul.mubr.bf16.gmra.mrb[72].mxu1 %v5342_v2  ;;  %v5293_v45 = vsel %vm5229_vm13, %v5187_v4, %v5261_v36  ;;  %vm5230_vm15 = vcmp.ge.f32.partialorder %v5190_v39, 0.0  ;;  %v5262_v37 = vmul.f32 0.2, %v5190_v39  ;;  %v5327_v52 = vmul.f32 1.4142135, %v5295_v24 }
 0x6ac   : > { %v5296_v53 = vsel %vm5232_vm12, %v5198_v25, %v5264_v31  ;;  %v5325_v18 = vmul.f32 1.4142135, %v5293_v45 }
 0x6ad   : > { %v5328_v51 = vmul.f32 1.4142135, %v5296_v53  ;;  %v5294_v7 = vsel %vm5230_vm15, %v5190_v39, %v5262_v37  ;;  %v6929_v41 = vpop.f32.mrb[48].mxu1 }
 0x6ae   : > { %v5326_v19 = vmul.f32 1.4142135, %v5294_v7  ;;  %v5458_v59 = vadd.f32 %v6929_v41, %v11440_v8  ;;  %v5449_v38 = vpop.f32.mrb[49].mxu1 }
 0x6af   : > { %v5344_v56 = vpack.c.bf16 %v5328_v51, %v5327_v52  ;;  %v5450_v58 = vadd.f32 %v11440_v8, %v5449_v38  ;;  %v6930_v30 = vpop.f32.mrb[50].mxu1 }
 0x6b0   : > { %v5343_v57 = vpack.c.bf16 %v5326_v19, %v5325_v18  ;;  %vm5578_vm1 = vcmp.ge.f32.partialorder %v5458_v59, 0.0  ;;  %v5610_v1 = vmul.f32 0.2, %v5458_v59  ;;  %v5461_v29 = vadd.f32 %v6930_v30, %v11440_v8  ;;  %v5452_v17 = vpop.f32.mrb[51].mxu1 }
 0x6b1   : > { %vm5576_vm8 = vcmp.ge.f32.partialorder %v5450_v58, 0.0  ;;  %v5608_v12 = vmul.f32 0.2, %v5450_v58  ;;  %v5453_v0 = vadd.f32 %v11440_v8, %v5452_v17 }
 0x6b2   : > { %6955 = vmatprep.mubr.bf16.mxu1 %v5343_v57  ;;  %v5642_v47 = vsel %vm5578_vm1, %v5458_v59, %v5610_v1  ;;  %vm5579_vm4 = vcmp.ge.f32.partialorder %v5461_v29, 0.0  ;;  %v5611_v11 = vmul.f32 0.2, %v5461_v29 }
 0x6b3   : > { %6956 = vmatmul.mubr.bf16.gmra.mrb[76].mxu1 %v5344_v56  ;;  %v5640_v50 = vsel %vm5576_vm8, %v5450_v58, %v5608_v12  ;;  %vm5577_vm14 = vcmp.ge.f32.partialorder %v5453_v0, 0.0  ;;  %v5609_v21 = vmul.f32 0.2, %v5453_v0  ;;  %v5674_v55 = vmul.f32 1.4142135, %v5642_v47 }
 0x6b4   : > { %v5643_v61 = vsel %vm5579_vm4, %v5461_v29, %v5611_v11  ;;  %v5672_v26 = vmul.f32 1.4142135, %v5640_v50 }
 0x6b5   : > { %v5675_v43 = vmul.f32 1.4142135, %v5643_v61  ;;  %v5641_v6 = vsel %vm5577_vm14, %v5453_v0, %v5609_v21  ;;  %v6933_v22 = vpop.f32.mrb[52].mxu1 }
 0x6b6   : > { %v5673_v34 = vmul.f32 1.4142135, %v5641_v6  ;;  %v5474_v35 = vadd.f32 %v6933_v22, %v11440_v8  ;;  %v5465_v60 = vpop.f32.mrb[53].mxu1 }
 0x6b7   : > { %v5705_v32 = vpack.c.bf16 %v5675_v43, %v5674_v55  ;;  %v5466_v9 = vadd.f32 %v11440_v8, %v5465_v60  ;;  %v6934_v10 = vpop.f32.mrb[54].mxu1 }
 0x6b8   : > { %vm5582_vm2 = vcmp.ge.f32.partialorder %v5474_v35, 0.0  ;;  %v5614_v44 = vmul.f32 0.2, %v5474_v35  ;;  %v5477_v46 = vadd.f32 %v6934_v10, %v11440_v8  ;;  %v5468_v23 = vpop.f32.mrb[55].mxu1  ;;  %v5704_v40 = vpack.c.bf16 %v5673_v34, %v5672_v26 }
 0x6b9   : > { %vm5580_vm11 = vcmp.ge.f32.partialorder %v5466_v9, 0.0  ;;  %v5612_v5 = vmul.f32 0.2, %v5466_v9  ;;  %v5469_v28 = vadd.f32 %v11440_v8, %v5468_v23 }
 0x6ba   : > { %v5646_v16 = vsel %vm5582_vm2, %v5474_v35, %v5614_v44  ;;  %vm5583_vm7 = vcmp.ge.f32.partialorder %v5477_v46, 0.0  ;;  %v5615_v33 = vmul.f32 0.2, %v5477_v46  ;;  %6975 = vmatprep.mubr.bf16.mxu0 %v5704_v40 }
 0x6bb   : > { %v5644_v62 = vsel %vm5580_vm11, %v5466_v9, %v5612_v5  ;;  %vm5581_vm3 = vcmp.ge.f32.partialorder %v5469_v28, 0.0  ;;  %v5613_v15 = vmul.f32 0.2, %v5469_v28  ;;  %6976 = vmatmul.mubr.bf16.vlgmr.msra.gmra.mrb[48].mxu0 %v5705_v32  ;;  %v5678_v48 = vmul.f32 1.4142135, %v5646_v16 }
 0x6bc   : > { %v5647_v20 = vsel %vm5583_vm7, %v5477_v46, %v5615_v33  ;;  %v5676_v27 = vmul.f32 1.4142135, %v5644_v62 }
 0x6bd   : > { %v5679_v54 = vmul.f32 1.4142135, %v5647_v20  ;;  %v5645_v42 = vsel %vm5581_vm3, %v5469_v28, %v5613_v15  ;;  %v6937_v14 = vpop.f32.mrb[56].mxu1 }
 0x6be   : > { %v5677_v2 = vmul.f32 1.4142135, %v5645_v42  ;;  %v5490_v4 = vadd.f32 %v6937_v14, %v11440_v8  ;;  %v5481_v49 = vpop.f32.mrb[57].mxu1 }
 0x6bf   : > { %v5482_v3 = vadd.f32 %v11440_v8, %v5481_v49  ;;  %v6938_v63 = vpop.f32.mrb[58].mxu1  ;;  %v5707_v25 = vpack.c.bf16 %v5679_v54, %v5678_v48 }
 0x6c0   : > { %vm5586_vm5 = vcmp.ge.f32.partialorder %v5490_v4, 0.0  ;;  %v5618_v13 = vmul.f32 0.2, %v5490_v4  ;;  %v5493_v36 = vadd.f32 %v6938_v63, %v11440_v8  ;;  %v5484_v39 = vpop.f32.mrb[59].mxu1  ;;  %v5706_v24 = vpack.c.bf16 %v5677_v2, %v5676_v27 }
 0x6c1   : > { %vm5584_vm6 = vcmp.ge.f32.partialorder %v5482_v3, 0.0  ;;  %v5616_v31 = vmul.f32 0.2, %v5482_v3  ;;  %v5485_v45 = vadd.f32 %v11440_v8, %v5484_v39 }
 0x6c2   : > { %v5650_v37 = vsel %vm5586_vm5, %v5490_v4, %v5618_v13  ;;  %vm5587_vm10 = vcmp.ge.f32.partialorder %v5493_v36, 0.0  ;;  %v5619_v53 = vmul.f32 0.2, %v5493_v36  ;;  %6979 = vmatprep.mubr.bf16.mxu0 %v5706_v24 }
 0x6c3   : > { %v5648_v52 = vsel %vm5584_vm6, %v5482_v3, %v5616_v31  ;;  %vm5585_vm9 = vcmp.ge.f32.partialorder %v5485_v45, 0.0  ;;  %v5617_v51 = vmul.f32 0.2, %v5485_v45  ;;  %6980 = vmatmul.mubr.bf16.gmra.mrb[52].mxu0 %v5707_v25  ;;  %v5682_v41 = vmul.f32 1.4142135, %v5650_v37 }
 0x6c4   : > { %v5651_v7 = vsel %vm5587_vm10, %v5493_v36, %v5619_v53  ;;  %v5680_v59 = vmul.f32 1.4142135, %v5648_v52 }
 0x6c5   : > { %v5683_v18 = vmul.f32 1.4142135, %v5651_v7  ;;  %v5649_v19 = vsel %vm5585_vm9, %v5485_v45, %v5617_v51 }
 0x6c6   : > { %v5681_v38 = vmul.f32 1.4142135, %v5649_v19 }
 0x6c7   : > { %v5709_v56 = vpack.c.bf16 %v5683_v18, %v5682_v41 }
 0x6c8   : > { %v5708_v58 = vpack.c.bf16 %v5681_v38, %v5680_v59 }
 0x6ca   : > { %6983 = vmatprep.mubr.bf16.mxu0 %v5708_v58 }
 0x6cb   : > { %6984 = vmatmul.mubr.bf16.gmra.mrb[56].mxu0 %v5709_v56 }
 0x6f3   : > { %v6941_v30 = vpop.f32.mrb[60].mxu1 }
 0x6f4   : > { %v5506_v57 = vadd.f32 %v6941_v30, %v11440_v8  ;;  %v5497_v1 = vpop.f32.mrb[61].mxu1 }
 0x6f5   : > { %v5498_v29 = vadd.f32 %v11440_v8, %v5497_v1  ;;  %v6942_v17 = vpop.f32.mrb[62].mxu1 }
 0x6f6   : > { %vm5590_vm0 = vcmp.ge.f32.partialorder %v5506_v57, 0.0  ;;  %v5622_v12 = vmul.f32 0.2, %v5506_v57  ;;  %v5509_v0 = vadd.f32 %v6942_v17, %v11440_v8  ;;  %v5500_v47 = vpop.f32.mrb[63].mxu1 }
 0x6f7   : > { %vm5588_vm13 = vcmp.ge.f32.partialorder %v5498_v29, 0.0  ;;  %v5620_v11 = vmul.f32 0.2, %v5498_v29  ;;  %v5501_v50 = vadd.f32 %v11440_v8, %v5500_v47 }
 0x6f8   : > { %v5654_v21 = vsel %vm5590_vm0, %v5506_v57, %v5622_v12  ;;  %vm5591_vm12 = vcmp.ge.f32.partialorder %v5509_v0, 0.0  ;;  %v5623_v61 = vmul.f32 0.2, %v5509_v0 }
 0x6f9   : > { %v5652_v55 = vsel %vm5588_vm13, %v5498_v29, %v5620_v11  ;;  %vm5589_vm15 = vcmp.ge.f32.partialorder %v5501_v50, 0.0  ;;  %v5621_v43 = vmul.f32 0.2, %v5501_v50  ;;  %v5686_v22 = vmul.f32 1.4142135, %v5654_v21 }
 0x6fa   : > { %v5655_v6 = vsel %vm5591_vm12, %v5509_v0, %v5623_v61  ;;  %v5684_v35 = vmul.f32 1.4142135, %v5652_v55 }
 0x6fb   : > { %v5687_v26 = vmul.f32 1.4142135, %v5655_v6  ;;  %v5653_v34 = vsel %vm5589_vm15, %v5501_v50, %v5621_v43 }
 0x6fc   : > { %v5685_v60 = vmul.f32 1.4142135, %v5653_v34 }
 0x6fd   : > { %v5711_v32 = vpack.c.bf16 %v5687_v26, %v5686_v22 }
 0x6fe   : > { %v5710_v9 = vpack.c.bf16 %v5685_v60, %v5684_v35 }
 0x700   : > { %6987 = vmatprep.mubr.bf16.mxu0 %v5710_v9 }
 0x701   : > { %6988 = vmatmul.mubr.bf16.gmra.mrb[60].mxu0 %v5711_v32 }
 0x76d   : > { %v6945_v10 = vpop.f32.mrb[64].mxu1 }
 0x76e   : > { %v5522_v44 = vadd.f32 %v6945_v10, %v11440_v8  ;;  %v5513_v46 = vpop.f32.mrb[65].mxu1 }
 0x76f   : > { %v5514_v23 = vadd.f32 %v11440_v8, %v5513_v46  ;;  %v6946_v40 = vpop.f32.mrb[66].mxu1 }
 0x770   : > { %vm5594_vm1 = vcmp.ge.f32.partialorder %v5522_v44, 0.0  ;;  %v5626_v5 = vmul.f32 0.2, %v5522_v44  ;;  %v5525_v28 = vadd.f32 %v6946_v40, %v11440_v8  ;;  %v5516_v16 = vpop.f32.mrb[67].mxu1 }
 0x771   : > { %vm5592_vm8 = vcmp.ge.f32.partialorder %v5514_v23, 0.0  ;;  %v5624_v33 = vmul.f32 0.2, %v5514_v23  ;;  %v5517_v62 = vadd.f32 %v11440_v8, %v5516_v16 }
 0x772   : > { %v5658_v15 = vsel %vm5594_vm1, %v5522_v44, %v5626_v5  ;;  %vm5595_vm4 = vcmp.ge.f32.partialorder %v5525_v28, 0.0  ;;  %v5627_v20 = vmul.f32 0.2, %v5525_v28  ;;  %vm6208_vm1 = vcmask 261120  }
 0x773   : > { %v5656_v48 = vsel %vm5592_vm8, %v5514_v23, %v5624_v33  ;;  %vm5593_vm14 = vcmp.ge.f32.partialorder %v5517_v62, 0.0  ;;  %v5625_v54 = vmul.f32 0.2, %v5517_v62  ;;  %v5690_v14 = vmul.f32 1.4142135, %v5658_v15 }
 0x774   : > { %v5659_v42 = vsel %vm5595_vm4, %v5525_v28, %v5627_v20  ;;  %v5688_v49 = vmul.f32 1.4142135, %v5656_v48 }
 0x775   : > { %v5691_v27 = vmul.f32 1.4142135, %v5659_v42  ;;  %v5657_v2 = vsel %vm5593_vm14, %v5517_v62, %v5625_v54 }
 0x776   : > { %v6949_v4 = vpop.f32.mrb[68].mxu1  ;;  %v5689_v3 = vmul.f32 1.4142135, %v5657_v2  ;;  %v11477_v2 = vld [vmem:[%s11598_s7] ss:$0 sm:$0xff] }
 0x777   : > { %v5538_v63 = vadd.f32 %v6949_v4, %v11440_v8  ;;  %v5529_v25 = vpop.f32.mrb[69].mxu1  ;;  %v5713_v13 = vpack.c.bf16 %v5691_v27, %v5690_v14 }
 0x778   : > { %v5530_v36 = vadd.f32 %v11440_v8, %v5529_v25  ;;  %v6950_v39 = vpop.f32.mrb[70].mxu1  ;;  %v5712_v24 = vpack.c.bf16 %v5689_v3, %v5688_v49 }
 0x779   : > { %vm5598_vm2 = vcmp.ge.f32.partialorder %v5538_v63, 0.0  ;;  %v5630_v31 = vmul.f32 0.2, %v5538_v63  ;;  %v5541_v45 = vadd.f32 %v6950_v39, %v11440_v8  ;;  %v5532_v37 = vpop.f32.mrb[71].mxu1 }
 0x77a   : > { %vm5596_vm11 = vcmp.ge.f32.partialorder %v5530_v36, 0.0  ;;  %v5628_v53 = vmul.f32 0.2, %v5530_v36  ;;  %v5533_v52 = vadd.f32 %v11440_v8, %v5532_v37  ;;  %6991 = vmatprep.mubr.bf16.mxu0 %v5712_v24 }
 0x77b   : > { %v5662_v51 = vsel %vm5598_vm2, %v5538_v63, %v5630_v31  ;;  %vm5599_vm7 = vcmp.ge.f32.partialorder %v5541_v45, 0.0  ;;  %v5631_v7 = vmul.f32 0.2, %v5541_v45  ;;  %6992 = vmatmul.mubr.bf16.gmra.mrb[64].mxu0 %v5713_v13 }
 0x77c   : > { %v5660_v41 = vsel %vm5596_vm11, %v5530_v36, %v5628_v53  ;;  %vm5597_vm3 = vcmp.ge.f32.partialorder %v5533_v52, 0.0  ;;  %v5629_v18 = vmul.f32 0.2, %v5533_v52  ;;  %v5694_v59 = vmul.f32 1.4142135, %v5662_v51 }
 0x77d   : > { %v5663_v19 = vsel %vm5599_vm7, %v5541_v45, %v5631_v7  ;;  %v5692_v30 = vmul.f32 1.4142135, %v5660_v41 }
 0x77e   : > { %v5695_v38 = vmul.f32 1.4142135, %v5663_v19  ;;  %v5661_v56 = vsel %vm5597_vm3, %v5533_v52, %v5629_v18  ;;  %v6953_v58 = vpop.f32.mrb[72].mxu1 }
 0x77f   : > { %v5693_v57 = vmul.f32 1.4142135, %v5661_v56  ;;  %v5554_v1 = vadd.f32 %v6953_v58, %v11440_v8  ;;  %v5545_v29 = vpop.f32.mrb[73].mxu1 }
 0x780   : > { %v5715_v17 = vpack.c.bf16 %v5695_v38, %v5694_v59  ;;  %v5546_v12 = vadd.f32 %v11440_v8, %v5545_v29  ;;  %v6954_v0 = vpop.f32.mrb[74].mxu1 }
 0x781   : > { %v5714_v47 = vpack.c.bf16 %v5693_v57, %v5692_v30  ;;  %vm5602_vm5 = vcmp.ge.f32.partialorder %v5554_v1, 0.0  ;;  %v5634_v11 = vmul.f32 0.2, %v5554_v1  ;;  %v5557_v50 = vadd.f32 %v6954_v0, %v11440_v8  ;;  %v5548_v21 = vpop.f32.mrb[75].mxu1 }
 0x782   : > { %vm5600_vm6 = vcmp.ge.f32.partialorder %v5546_v12, 0.0  ;;  %v5632_v61 = vmul.f32 0.2, %v5546_v12  ;;  %v5549_v55 = vadd.f32 %v11440_v8, %v5548_v21 }
 0x783   : > { %6995 = vmatprep.mubr.bf16.mxu0 %v5714_v47  ;;  %v5666_v43 = vsel %vm5602_vm5, %v5554_v1, %v5634_v11  ;;  %vm5603_vm10 = vcmp.ge.f32.partialorder %v5557_v50, 0.0  ;;  %v5635_v6 = vmul.f32 0.2, %v5557_v50 }
 0x784   : > { %6996 = vmatmul.mubr.bf16.gmra.mrb[68].mxu0 %v5715_v17  ;;  %v5664_v22 = vsel %vm5600_vm6, %v5546_v12, %v5632_v61  ;;  %vm5601_vm9 = vcmp.ge.f32.partialorder %v5549_v55, 0.0  ;;  %v5633_v26 = vmul.f32 0.2, %v5549_v55  ;;  %v5698_v35 = vmul.f32 1.4142135, %v5666_v43 }
 0x785   : > { %v5667_v34 = vsel %vm5603_vm10, %v5557_v50, %v5635_v6  ;;  %v5696_v10 = vmul.f32 1.4142135, %v5664_v22 }
 0x786   : > { %v5699_v60 = vmul.f32 1.4142135, %v5667_v34  ;;  %v5665_v32 = vsel %vm5601_vm9, %v5549_v55, %v5633_v26  ;;  %v6957_v9 = vpop.f32.mrb[76].mxu1 }
 0x787   : > { %v5697_v44 = vmul.f32 1.4142135, %v5665_v32  ;;  %v5570_v46 = vadd.f32 %v6957_v9, %v11440_v8  ;;  %v5561_v23 = vpop.f32.mrb[77].mxu1 }
 0x788   : > { %v5717_v40 = vpack.c.bf16 %v5699_v60, %v5698_v35  ;;  %v5562_v5 = vadd.f32 %v11440_v8, %v5561_v23  ;;  %v6958_v28 = vpop.f32.mrb[78].mxu1 }
 0x789   : > { %v5716_v16 = vpack.c.bf16 %v5697_v44, %v5696_v10  ;;  %vm5606_vm0 = vcmp.ge.f32.partialorder %v5570_v46, 0.0  ;;  %v5638_v33 = vmul.f32 0.2, %v5570_v46  ;;  %v5573_v62 = vadd.f32 %v6958_v28, %v11440_v8  ;;  %v5564_v15 = vpop.f32.mrb[79].mxu1 }
 0x78a   : > { %vm5604_vm13 = vcmp.ge.f32.partialorder %v5562_v5, 0.0  ;;  %v5636_v20 = vmul.f32 0.2, %v5562_v5  ;;  %v5565_v48 = vadd.f32 %v11440_v8, %v5564_v15 }
 0x78b   : > { %6999 = vmatprep.mubr.bf16.mxu0 %v5716_v16  ;;  %v5670_v54 = vsel %vm5606_vm0, %v5570_v46, %v5638_v33  ;;  %vm5607_vm12 = vcmp.ge.f32.partialorder %v5573_v62, 0.0  ;;  %v5639_v42 = vmul.f32 0.2, %v5573_v62 }
 0x78c   : > { %7000 = vmatmul.mubr.bf16.gmra.mrb[72].mxu0 %v5717_v40  ;;  %v5668_v14 = vsel %vm5604_vm13, %v5562_v5, %v5636_v20  ;;  %vm5605_vm15 = vcmp.ge.f32.partialorder %v5565_v48, 0.0  ;;  %v5637_v27 = vmul.f32 0.2, %v5565_v48  ;;  %v5702_v49 = vmul.f32 1.4142135, %v5670_v54 }
 0x78d   : > { %v5671_v4 = vsel %vm5607_vm12, %v5573_v62, %v5639_v42  ;;  %v5700_v13 = vmul.f32 1.4142135, %v5668_v14 }
 0x78e   : > { %v5703_v3 = vmul.f32 1.4142135, %v5671_v4  ;;  %v5669_v63 = vsel %vm5605_vm15, %v5565_v48, %v5637_v27  ;;  %v6977_v25 = vpop.f32.mrb[48].mxu0 }
 0x78f   : > { %v5701_v8 = vmul.f32 1.4142135, %v5669_v63  ;;  %v5834_v36 = vadd.f32 %v6977_v25, %v11477_v2  ;;  %v5825_v39 = vpop.f32.mrb[49].mxu0 }
 0x790   : > { %v5719_v24 = vpack.c.bf16 %v5703_v3, %v5702_v49  ;;  %v5826_v31 = vadd.f32 %v11477_v2, %v5825_v39  ;;  %v6978_v45 = vpop.f32.mrb[50].mxu0 }
 0x791   : > { %v5718_v37 = vpack.c.bf16 %v5701_v8, %v5700_v13  ;;  %v6595_v53 = vmul.f32 -1.442695, %v5834_v36  ;;  %v5837_v52 = vadd.f32 %v6978_v45, %v11477_v2  ;;  %v5828_v51 = vpop.f32.mrb[51].mxu0 }
 0x792   : > { %v6593_v7 = vmul.f32 -1.442695, %v5826_v31  ;;  %v5829_v41 = vadd.f32 %v11477_v2, %v5828_v51 }
 0x793   : > { %7003 = vmatprep.mubr.bf16.mxu0 %v5718_v37  ;;  %7358 = vpow2.f32 %v6595_v53  ;;  %v6596_v18 = vmul.f32 -1.442695, %v5837_v52 }
 0x794   : > { %7004 = vmatmul.mubr.bf16.gmra.mrb[76].mxu0 %v5719_v24  ;;  %7360 = vpow2.f32 %v6593_v7  ;;  %v6594_v19 = vmul.f32 -1.442695, %v5829_v41 }
 0x795   : > { %7362 = vpow2.f32 %v6596_v18 }
 0x796   : > { %7364 = vpow2.f32 %v6594_v19  ;;  %v6981_v59 = vpop.f32.mrb[52].mxu0 }
 0x797   : > { %v5850_v38 = vadd.f32 %v6981_v59, %v11477_v2  ;;  %v5841_v56 = vpop.f32.mrb[53].mxu0 }
 0x798   : > { %v5842_v58 = vadd.f32 %v11477_v2, %v5841_v56  ;;  %v6982_v30 = vpop.f32.mrb[54].mxu0 }
 0x799   : > { %v6599_v57 = vmul.f32 -1.442695, %v5850_v38  ;;  %v5853_v1 = vadd.f32 %v6982_v30, %v11477_v2  ;;  %v5844_v29 = vpop.f32.mrb[55].mxu0 }
 0x79a   : > { %v6597_v17 = vmul.f32 -1.442695, %v5842_v58  ;;  %v5845_v12 = vadd.f32 %v11477_v2, %v5844_v29 }
 0x79b   : > { %7366 = vpow2.f32 %v6599_v57  ;;  %v6600_v0 = vmul.f32 -1.442695, %v5853_v1 }
 0x79c   : > { %7368 = vpow2.f32 %v6597_v17  ;;  %v6598_v47 = vmul.f32 -1.442695, %v5845_v12 }
 0x79d   : > { %v7359_v11 = vpop.eup %7358  ;;  %7370 = vpow2.f32 %v6600_v0 }
 0x79e   : > { %v7361_v50 = vpop.eup %7360  ;;  %v6050_v21 = vadd.f32 1.0, %v7359_v11  ;;  %7372 = vpow2.f32 %v6598_v47  ;;  %v6985_v61 = vpop.f32.mrb[56].mxu0 }
 0x79f   : > { %v7363_v55 = vpop.eup %7362  ;;  %v6048_v43 = vadd.f32 1.0, %v7361_v50  ;;  %v5866_v6 = vadd.f32 %v6985_v61, %v11477_v2  ;;  %v5857_v22 = vpop.f32.mrb[57].mxu0 }
 0x7a0   : > { %v7365_v26 = vpop.eup %7364  ;;  %7374 = vrcp.f32 %v6050_v21  ;;  %v6051_v34 = vadd.f32 1.0, %v7363_v55  ;;  %v5858_v35 = vadd.f32 %v11477_v2, %v5857_v22  ;;  %v6986_v60 = vpop.f32.mrb[58].mxu0 }
 0x7a1   : > { %7376 = vrcp.f32 %v6048_v43  ;;  %v6049_v32 = vadd.f32 1.0, %v7365_v26  ;;  %v6603_v9 = vmul.f32 -1.442695, %v5866_v6  ;;  %v5869_v10 = vadd.f32 %v6986_v60, %v11477_v2  ;;  %v5860_v44 = vpop.f32.mrb[59].mxu0 }
 0x7a2   : > { %7378 = vrcp.f32 %v6051_v34  ;;  %v6601_v46 = vmul.f32 -1.442695, %v5858_v35  ;;  %v5861_v23 = vadd.f32 %v11477_v2, %v5860_v44 }
 0x7a3   : > { %7380 = vrcp.f32 %v6049_v32  ;;  %v6604_v40 = vmul.f32 -1.442695, %v5869_v10 }
 0x7a4   : > { %7382 = vpow2.f32 %v6603_v9  ;;  %v6602_v5 = vmul.f32 -1.442695, %v5861_v23 }
 0x7a5   : > { %v7367_v28 = vpop.eup %7366  ;;  %7384 = vpow2.f32 %v6601_v46 }
 0x7a6   : > { %v7369_v16 = vpop.eup %7368  ;;  %v6054_v33 = vadd.f32 1.0, %v7367_v28  ;;  %7386 = vpow2.f32 %v6604_v40 }
 0x7a7   : > { %v7371_v62 = vpop.eup %7370  ;;  %v6052_v15 = vadd.f32 1.0, %v7369_v16  ;;  %7388 = vpow2.f32 %v6602_v5 }
 0x7a8   : > { %v7373_v20 = vpop.eup %7372  ;;  %7390 = vrcp.f32 %v6054_v33  ;;  %v6055_v48 = vadd.f32 1.0, %v7371_v62 }
 0x7a9   : > { %7392 = vrcp.f32 %v6052_v15  ;;  %v6053_v54 = vadd.f32 1.0, %v7373_v20 }
 0x7aa   : > { %v7375_v42 = vpop.eup %7374  ;;  %7394 = vrcp.f32 %v6055_v48 }
 0x7ab   : > { %v7377_v14 = vpop.eup %7376  ;;  %v6146_v27 = vmul.f32 1.002, %v7375_v42  ;;  %7396 = vrcp.f32 %v6053_v54 }
 0x7ac   : > { %v7379_v4 = vpop.eup %7378  ;;  %v6144_v49 = vmul.f32 1.002, %v7377_v14 }
 0x7ad   : > { %v7381_v3 = vpop.eup %7380  ;;  %v6627_v63 = vadd.f32 -0.001, %v6146_v27  ;;  %v6147_v25 = vmul.f32 1.002, %v7379_v4 }
 0x7ae   : > { %v7383_v13 = vpop.eup %7382  ;;  %v6625_v8 = vadd.f32 -0.001, %v6144_v49  ;;  %v6145_v36 = vmul.f32 1.002, %v7381_v3 }
 0x7af   : > { %v7385_v39 = vpop.eup %7384  ;;  %6211 = vst.msk [vmem:[%s11496_s22 + $0x10] sm:$0xff] %vm6208_vm1, %v6627_v63  ;;  %v6628_v24 = vadd.f32 -0.001, %v6147_v25  ;;  %v6058_v31 = vadd.f32 1.0, %v7383_v13 }
 0x7b0   : > { %v7387_v45 = vpop.eup %7386  ;;  %6209 = vst.msk [vmem:[%s11496_s22] sm:$0xff] %vm6208_vm1, %v6625_v8  ;;  %v6626_v37 = vadd.f32 -0.001, %v6145_v36  ;;  %v6056_v53 = vadd.f32 1.0, %v7385_v39 }
 0x7b1   : > { %v7389_v52 = vpop.eup %7388  ;;  %6212 = vst.msk [vmem:[%s11496_s22 + $0x18] sm:$0xff] %vm6208_vm1, %v6628_v24  ;;  %7398 = vrcp.f32 %v6058_v31  ;;  %v6059_v51 = vadd.f32 1.0, %v7387_v45 }
 0x7b2   : > { %v7391_v7 = vpop.eup %7390  ;;  %6210 = vst.msk [vmem:[%s11496_s22 + $0x8] sm:$0xff] %vm6208_vm1, %v6626_v37  ;;  %7400 = vrcp.f32 %v6056_v53  ;;  %v6057_v41 = vadd.f32 1.0, %v7389_v52 }
 0x7b3   : > { %v7393_v18 = vpop.eup %7392  ;;  %v6150_v19 = vmul.f32 1.002, %v7391_v7  ;;  %7402 = vrcp.f32 %v6059_v51 }
 0x7b4   : > { %v7395_v59 = vpop.eup %7394  ;;  %v6148_v38 = vmul.f32 1.002, %v7393_v18  ;;  %7404 = vrcp.f32 %v6057_v41 }
 0x7b5   : > { %v7397_v56 = vpop.eup %7396  ;;  %v6631_v58 = vadd.f32 -0.001, %v6150_v19  ;;  %v6151_v30 = vmul.f32 1.002, %v7395_v59 }
 0x7b6   : > { %v6629_v57 = vadd.f32 -0.001, %v6148_v38  ;;  %v6149_v1 = vmul.f32 1.002, %v7397_v56 }
 0x7b7   : > { %6215 = vst.msk [vmem:[%s11496_s22 + $0x30] sm:$0xff] %vm6208_vm1, %v6631_v58  ;;  %v6632_v29 = vadd.f32 -0.001, %v6151_v30 }
 0x7b8   : > { %6213 = vst.msk [vmem:[%s11496_s22 + $0x20] sm:$0xff] %vm6208_vm1, %v6629_v57  ;;  %v6630_v17 = vadd.f32 -0.001, %v6149_v1 }
 0x7b9   : > { %6216 = vst.msk [vmem:[%s11496_s22 + $0x38] sm:$0xff] %vm6208_vm1, %v6632_v29 }
 0x7ba   : > { %6214 = vst.msk [vmem:[%s11496_s22 + $0x28] sm:$0xff] %vm6208_vm1, %v6630_v17 }
 0x7bb   : > { %v7399_v12 = vpop.eup %7398 }
 0x7bc   : > { %v7401_v0 = vpop.eup %7400  ;;  %v6154_v47 = vmul.f32 1.002, %v7399_v12 }
 0x7bd   : > { %v7403_v11 = vpop.eup %7402  ;;  %v6152_v50 = vmul.f32 1.002, %v7401_v0 }
 0x7be   : > { %v7405_v21 = vpop.eup %7404  ;;  %v6635_v61 = vadd.f32 -0.001, %v6154_v47  ;;  %v6155_v55 = vmul.f32 1.002, %v7403_v11 }
 0x7bf   : > { %v6633_v43 = vadd.f32 -0.001, %v6152_v50  ;;  %v6153_v6 = vmul.f32 1.002, %v7405_v21 }
 0x7c0   : > { %6219 = vst.msk [vmem:[%s11496_s22 + $0x50] sm:$0xff] %vm6208_vm1, %v6635_v61  ;;  %v6636_v22 = vadd.f32 -0.001, %v6155_v55 }
 0x7c1   : > { %6217 = vst.msk [vmem:[%s11496_s22 + $0x40] sm:$0xff] %vm6208_vm1, %v6633_v43  ;;  %v6634_v26 = vadd.f32 -0.001, %v6153_v6 }
 0x7c2   : > { %6220 = vst.msk [vmem:[%s11496_s22 + $0x58] sm:$0xff] %vm6208_vm1, %v6636_v22 }
 0x7c3   : > { %6218 = vst.msk [vmem:[%s11496_s22 + $0x48] sm:$0xff] %vm6208_vm1, %v6634_v26 }
 0x7d4   : > { %v6989_v34 = vpop.f32.mrb[60].mxu0 }
 0x7d5   : > { %v5882_v35 = vadd.f32 %v6989_v34, %v11477_v2  ;;  %v5873_v60 = vpop.f32.mrb[61].mxu0 }
 0x7d6   : > { %v5874_v32 = vadd.f32 %v11477_v2, %v5873_v60  ;;  %v6990_v9 = vpop.f32.mrb[62].mxu0 }
 0x7d7   : > { %v6607_v10 = vmul.f32 -1.442695, %v5882_v35  ;;  %v5885_v44 = vadd.f32 %v6990_v9, %v11477_v2  ;;  %v5876_v46 = vpop.f32.mrb[63].mxu0 }
 0x7d8   : > { %v6605_v23 = vmul.f32 -1.442695, %v5874_v32  ;;  %v5877_v40 = vadd.f32 %v11477_v2, %v5876_v46 }
 0x7d9   : > { %7406 = vpow2.f32 %v6607_v10  ;;  %v6608_v5 = vmul.f32 -1.442695, %v5885_v44 }
 0x7da   : > { %7408 = vpow2.f32 %v6605_v23  ;;  %v6606_v28 = vmul.f32 -1.442695, %v5877_v40 }
 0x7db   : > { %7410 = vpow2.f32 %v6608_v5 }
 0x7dc   : > { %7412 = vpow2.f32 %v6606_v28 }
 0x7e3   : > { %v7407_v16 = vpop.eup %7406 }
 0x7e4   : > { %v7409_v33 = vpop.eup %7408  ;;  %v6062_v62 = vadd.f32 1.0, %v7407_v16 }
 0x7e5   : > { %v7411_v15 = vpop.eup %7410  ;;  %v6060_v20 = vadd.f32 1.0, %v7409_v33 }
 0x7e6   : > { %v7413_v48 = vpop.eup %7412  ;;  %7414 = vrcp.f32 %v6062_v62  ;;  %v6063_v54 = vadd.f32 1.0, %v7411_v15 }
 0x7e7   : > { %7416 = vrcp.f32 %v6060_v20  ;;  %v6061_v42 = vadd.f32 1.0, %v7413_v48 }
 0x7e8   : > { %7418 = vrcp.f32 %v6063_v54 }
 0x7e9   : > { %7420 = vrcp.f32 %v6061_v42 }
 0x7f0   : > { %v7415_v14 = vpop.eup %7414 }
 0x7f1   : > { %v7417_v27 = vpop.eup %7416  ;;  %v6158_v4 = vmul.f32 1.002, %v7415_v14 }
 0x7f2   : > { %v7419_v49 = vpop.eup %7418  ;;  %v6156_v3 = vmul.f32 1.002, %v7417_v27 }
 0x7f3   : > { %v7421_v63 = vpop.eup %7420  ;;  %v6639_v25 = vadd.f32 -0.001, %v6158_v4  ;;  %v6159_v13 = vmul.f32 1.002, %v7419_v49 }
 0x7f4   : > { %v6637_v8 = vadd.f32 -0.001, %v6156_v3  ;;  %v6157_v36 = vmul.f32 1.002, %v7421_v63 }
 0x7f5   : > { %6223 = vst.msk [vmem:[%s11496_s22 + $0x70] sm:$0xff] %vm6208_vm1, %v6639_v25  ;;  %v6640_v39 = vadd.f32 -0.001, %v6159_v13 }
 0x7f6   : > { %6221 = vst.msk [vmem:[%s11496_s22 + $0x60] sm:$0xff] %vm6208_vm1, %v6637_v8  ;;  %v6638_v24 = vadd.f32 -0.001, %v6157_v36 }
 0x7f7   : > { %6224 = vst.msk [vmem:[%s11496_s22 + $0x78] sm:$0xff] %vm6208_vm1, %v6640_v39 }
 0x7f8   : > { %6222 = vst.msk [vmem:[%s11496_s22 + $0x68] sm:$0xff] %vm6208_vm1, %v6638_v24 }
 0x84e   : > { %v6993_v31 = vpop.f32.mrb[64].mxu0 }
 0x84f   : > { %v5898_v45 = vadd.f32 %v6993_v31, %v11477_v2  ;;  %v5889_v37 = vpop.f32.mrb[65].mxu0 }
 0x850   : > { %v5890_v53 = vadd.f32 %v11477_v2, %v5889_v37  ;;  %v6994_v52 = vpop.f32.mrb[66].mxu0 }
 0x851   : > { %v6611_v51 = vmul.f32 -1.442695, %v5898_v45  ;;  %v5901_v7 = vadd.f32 %v6994_v52, %v11477_v2  ;;  %v5892_v41 = vpop.f32.mrb[67].mxu0 }
 0x852   : > { %v6609_v18 = vmul.f32 -1.442695, %v5890_v53  ;;  %v5893_v19 = vadd.f32 %v11477_v2, %v5892_v41 }
 0x853   : > { %7422 = vpow2.f32 %v6611_v51  ;;  %v6612_v59 = vmul.f32 -1.442695, %v5901_v7 }
 0x854   : > { %7424 = vpow2.f32 %v6609_v18  ;;  %v6610_v38 = vmul.f32 -1.442695, %v5893_v19 }
 0x855   : > { %7426 = vpow2.f32 %v6612_v59 }
 0x856   : > { %7428 = vpow2.f32 %v6610_v38 }
 0x857   : > { %v6997_v56 = vpop.f32.mrb[68].mxu0 }
 0x858   : > { %v5914_v58 = vadd.f32 %v6997_v56, %v11477_v2  ;;  %v5905_v30 = vpop.f32.mrb[69].mxu0 }
 0x859   : > { %v5906_v57 = vadd.f32 %v11477_v2, %v5905_v30  ;;  %v6998_v1 = vpop.f32.mrb[70].mxu0 }
 0x85a   : > { %v6615_v29 = vmul.f32 -1.442695, %v5914_v58  ;;  %v5917_v17 = vadd.f32 %v6998_v1, %v11477_v2  ;;  %v5908_v12 = vpop.f32.mrb[71].mxu0 }
 0x85b   : > { %v6613_v0 = vmul.f32 -1.442695, %v5906_v57  ;;  %v5909_v47 = vadd.f32 %v11477_v2, %v5908_v12 }
 0x85c   : > { %7430 = vpow2.f32 %v6615_v29  ;;  %v6616_v11 = vmul.f32 -1.442695, %v5917_v17 }
 0x85d   : > { %7432 = vpow2.f32 %v6613_v0  ;;  %v6614_v50 = vmul.f32 -1.442695, %v5909_v47  ;;  %v7423_v21 = vpop.eup %7422 }
 0x85e   : > { %7434 = vpow2.f32 %v6616_v11  ;;  %v7425_v61 = vpop.eup %7424  ;;  %v6066_v55 = vadd.f32 1.0, %v7423_v21 }
 0x85f   : > { %7436 = vpow2.f32 %v6614_v50  ;;  %v7001_v43 = vpop.f32.mrb[72].mxu0  ;;  %v7427_v6 = vpop.eup %7426  ;;  %v6064_v22 = vadd.f32 1.0, %v7425_v61 }
 0x860   : > { %v5930_v26 = vadd.f32 %v7001_v43, %v11477_v2  ;;  %v5921_v34 = vpop.f32.mrb[73].mxu0  ;;  %v7429_v35 = vpop.eup %7428  ;;  %7438 = vrcp.f32 %v6066_v55  ;;  %v6067_v60 = vadd.f32 1.0, %v7427_v6 }
 0x861   : > { %v5922_v32 = vadd.f32 %v11477_v2, %v5921_v34  ;;  %v7002_v9 = vpop.f32.mrb[74].mxu0  ;;  %7440 = vrcp.f32 %v6064_v22  ;;  %v6065_v10 = vadd.f32 1.0, %v7429_v35 }
 0x862   : > { %v6619_v44 = vmul.f32 -1.442695, %v5930_v26  ;;  %v5933_v46 = vadd.f32 %v7002_v9, %v11477_v2  ;;  %v5924_v23 = vpop.f32.mrb[75].mxu0  ;;  %7442 = vrcp.f32 %v6067_v60 }
 0x863   : > { %v6617_v40 = vmul.f32 -1.442695, %v5922_v32  ;;  %v5925_v5 = vadd.f32 %v11477_v2, %v5924_v23  ;;  %7444 = vrcp.f32 %v6065_v10 }
 0x864   : > { %v6620_v28 = vmul.f32 -1.442695, %v5933_v46  ;;  %7446 = vpow2.f32 %v6619_v44 }
 0x865   : > { %v6618_v16 = vmul.f32 -1.442695, %v5925_v5  ;;  %7448 = vpow2.f32 %v6617_v40 }
 0x866   : > { %v7431_v33 = vpop.eup %7430  ;;  %7450 = vpow2.f32 %v6620_v28 }
 0x867   : > { %v7433_v62 = vpop.eup %7432  ;;  %v6070_v15 = vadd.f32 1.0, %v7431_v33  ;;  %v7005_v20 = vpop.f32.mrb[76].mxu0  ;;  %7452 = vpow2.f32 %v6618_v16 }
 0x868   : > { %v7435_v48 = vpop.eup %7434  ;;  %v6068_v54 = vadd.f32 1.0, %v7433_v62  ;;  %v5946_v42 = vadd.f32 %v7005_v20, %v11477_v2  ;;  %v5937_v14 = vpop.f32.mrb[77].mxu0 }
 0x869   : > { %v7437_v27 = vpop.eup %7436  ;;  %7454 = vrcp.f32 %v6070_v15  ;;  %v6071_v4 = vadd.f32 1.0, %v7435_v48  ;;  %v5938_v49 = vadd.f32 %v11477_v2, %v5937_v14  ;;  %v7006_v3 = vpop.f32.mrb[78].mxu0 }
 0x86a   : > { %7456 = vrcp.f32 %v6068_v54  ;;  %v6069_v63 = vadd.f32 1.0, %v7437_v27  ;;  %v6623_v25 = vmul.f32 -1.442695, %v5946_v42  ;;  %v5949_v13 = vadd.f32 %v7006_v3, %v11477_v2  ;;  %v5940_v8 = vpop.f32.mrb[79].mxu0  ;;  %v7439_v36 = vpop.eup %7438 }
 0x86b   : > { %7458 = vrcp.f32 %v6071_v4  ;;  %v6621_v39 = vmul.f32 -1.442695, %v5938_v49  ;;  %v5941_v24 = vadd.f32 %v11477_v2, %v5940_v8  ;;  %v7441_v31 = vpop.eup %7440  ;;  %v6162_v45 = vmul.f32 1.002, %v7439_v36 }
 0x86c   : > { %7460 = vrcp.f32 %v6069_v63  ;;  %v6624_v37 = vmul.f32 -1.442695, %v5949_v13  ;;  %v7443_v53 = vpop.eup %7442  ;;  %v6160_v52 = vmul.f32 1.002, %v7441_v31 }
 0x86d   : > { %7462 = vpow2.f32 %v6623_v25  ;;  %v6622_v51 = vmul.f32 -1.442695, %v5941_v24  ;;  %v7445_v7 = vpop.eup %7444  ;;  %v6643_v41 = vadd.f32 -0.001, %v6162_v45  ;;  %v6163_v18 = vmul.f32 1.002, %v7443_v53 }
 0x86e   : > { %7464 = vpow2.f32 %v6621_v39  ;;  %v7447_v19 = vpop.eup %7446  ;;  %v6641_v59 = vadd.f32 -0.001, %v6160_v52  ;;  %v6161_v38 = vmul.f32 1.002, %v7445_v7 }
 0x86f   : > { %7466 = vpow2.f32 %v6624_v37  ;;  %v7449_v2 = vpop.eup %7448  ;;  %6227 = vst.msk [vmem:[%s11496_s22 + $0x90] sm:$0xff] %vm6208_vm1, %v6643_v41  ;;  %v6644_v56 = vadd.f32 -0.001, %v6163_v18  ;;  %v6074_v58 = vadd.f32 1.0, %v7447_v19 }
 0x870   : > { %7468 = vpow2.f32 %v6622_v51  ;;  %v7451_v30 = vpop.eup %7450  ;;  %6225 = vst.msk [vmem:[%s11496_s22 + $0x80] sm:$0xff] %vm6208_vm1, %v6641_v59  ;;  %v6642_v57 = vadd.f32 -0.001, %v6161_v38  ;;  %v6072_v1 = vadd.f32 1.0, %v7449_v2 }
 0x871   : > { %v7453_v29 = vpop.eup %7452  ;;  %6228 = vst.msk [vmem:[%s11496_s22 + $0x98] sm:$0xff] %vm6208_vm1, %v6644_v56  ;;  %7470 = vrcp.f32 %v6074_v58  ;;  %v6075_v17 = vadd.f32 1.0, %v7451_v30 }
 0x872   : > { %6226 = vst.msk [vmem:[%s11496_s22 + $0x88] sm:$0xff] %vm6208_vm1, %v6642_v57  ;;  %7472 = vrcp.f32 %v6072_v1  ;;  %v6073_v0 = vadd.f32 1.0, %v7453_v29 }
 0x873   : > { %v7455_v12 = vpop.eup %7454  ;;  %7474 = vrcp.f32 %v6075_v17 }
 0x874   : > { %v7457_v47 = vpop.eup %7456  ;;  %v6166_v11 = vmul.f32 1.002, %v7455_v12  ;;  %7476 = vrcp.f32 %v6073_v0 }
 0x875   : > { %v7459_v50 = vpop.eup %7458  ;;  %v6164_v21 = vmul.f32 1.002, %v7457_v47 }
 0x876   : > { %v7461_v61 = vpop.eup %7460  ;;  %v6647_v55 = vadd.f32 -0.001, %v6166_v11  ;;  %v6167_v43 = vmul.f32 1.002, %v7459_v50 }
 0x877   : > { %v7463_v6 = vpop.eup %7462  ;;  %v6645_v22 = vadd.f32 -0.001, %v6164_v21  ;;  %v6165_v26 = vmul.f32 1.002, %v7461_v61 }
 0x878   : > { %v7465_v34 = vpop.eup %7464  ;;  %6231 = vst.msk [vmem:[%s11496_s22 + $0xb0] sm:$0xff] %vm6208_vm1, %v6647_v55  ;;  %v6648_v35 = vadd.f32 -0.001, %v6167_v43  ;;  %v6078_v60 = vadd.f32 1.0, %v7463_v6 }
 0x879   : > { %v7467_v32 = vpop.eup %7466  ;;  %6229 = vst.msk [vmem:[%s11496_s22 + $0xa0] sm:$0xff] %vm6208_vm1, %v6645_v22  ;;  %v6646_v9 = vadd.f32 -0.001, %v6165_v26  ;;  %v6076_v10 = vadd.f32 1.0, %v7465_v34 }
 0x87a   : > { %v7469_v44 = vpop.eup %7468  ;;  %6232 = vst.msk [vmem:[%s11496_s22 + $0xb8] sm:$0xff] %vm6208_vm1, %v6648_v35  ;;  %7478 = vrcp.f32 %v6078_v60  ;;  %v6079_v46 = vadd.f32 1.0, %v7467_v32 }
 0x87b   : > { %6230 = vst.msk [vmem:[%s11496_s22 + $0xa8] sm:$0xff] %vm6208_vm1, %v6646_v9  ;;  %7480 = vrcp.f32 %v6076_v10  ;;  %v6077_v23 = vadd.f32 1.0, %v7469_v44  ;;  %v7471_v40 = vpop.eup %7470 }
 0x87c   : > { %7482 = vrcp.f32 %v6079_v46  ;;  %v7473_v5 = vpop.eup %7472  ;;  %v6170_v28 = vmul.f32 1.002, %v7471_v40 }
 0x87d   : > { %7484 = vrcp.f32 %v6077_v23  ;;  %v7475_v16 = vpop.eup %7474  ;;  %v6168_v33 = vmul.f32 1.002, %v7473_v5 }
 0x87e   : > { %v7477_v62 = vpop.eup %7476  ;;  %v6651_v15 = vadd.f32 -0.001, %v6170_v28  ;;  %v6171_v20 = vmul.f32 1.002, %v7475_v16 }
 0x87f   : > { %v6649_v48 = vadd.f32 -0.001, %v6168_v33  ;;  %v6169_v54 = vmul.f32 1.002, %v7477_v62 }
 0x880   : > { %6235 = vst.msk [vmem:[%s11496_s22 + $0xd0] sm:$0xff] %vm6208_vm1, %v6651_v15  ;;  %v6652_v42 = vadd.f32 -0.001, %v6171_v20 }
 0x881   : > { %6233 = vst.msk [vmem:[%s11496_s22 + $0xc0] sm:$0xff] %vm6208_vm1, %v6649_v48  ;;  %v6650_v14 = vadd.f32 -0.001, %v6169_v54 }
 0x882   : > { %6236 = vst.msk [vmem:[%s11496_s22 + $0xd8] sm:$0xff] %vm6208_vm1, %v6652_v42 }
 0x883   : > { %6234 = vst.msk [vmem:[%s11496_s22 + $0xc8] sm:$0xff] %vm6208_vm1, %v6650_v14 }
 0x884   : > { %v7479_v27 = vpop.eup %7478 }
 0x885   : > { %v7481_v4 = vpop.eup %7480  ;;  %v6174_v49 = vmul.f32 1.002, %v7479_v27 }
 0x886   : > { %v7483_v3 = vpop.eup %7482  ;;  %v6172_v63 = vmul.f32 1.002, %v7481_v4 }
 0x887   : > { %v7485_v25 = vpop.eup %7484  ;;  %v6655_v13 = vadd.f32 -0.001, %v6174_v49  ;;  %v6175_v8 = vmul.f32 1.002, %v7483_v3 }
 0x888   : > { %v6653_v36 = vadd.f32 -0.001, %v6172_v63  ;;  %v6173_v39 = vmul.f32 1.002, %v7485_v25 }
 0x889   : > { %6239 = vst.msk [vmem:[%s11496_s22 + $0xf0] sm:$0xff] %vm6208_vm1, %v6655_v13  ;;  %v6656_v24 = vadd.f32 -0.001, %v6175_v8 }
 0x88a   : > { %6237 = vst.msk [vmem:[%s11496_s22 + $0xe0] sm:$0xff] %vm6208_vm1, %v6653_v36  ;;  %v6654_v31 = vadd.f32 -0.001, %v6173_v39 }
 0x88b   : > { %6240 = vst.msk [vmem:[%s11496_s22 + $0xf8] sm:$0xff] %vm6208_vm1, %v6656_v24 }
 0x88c   : > { %6238 = vst.msk [vmem:[%s11496_s22 + $0xe8] sm:$0xff] %vm6208_vm1, %v6654_v31 }
 0x88d PF: > { %s18_s29 = sadd.s32 1, %s7508_s29   ;;  %s12312_s27 = smov %s7504_s28 }
 0x88e   : > { %p15_p5 = scmp.ge.s32.totalorder %s18_s29, 4   ;;  %s12313_s28 = smov %s12315_s30 }
 0x890   :  { %17 = sbr.rel (!%p15_p5) target bundleno = 2 (0x2), region = 93 }

</bundles_post_ra>
